<compile_context>
chip_gen: v6e
topology: v6e:2x2x1
jax: 0.10.0
libtpu: 0.0.40
codegen_flags: <defaults>
</compile_context>

<pallas_src>
import jax
import jax.numpy as jnp
from jax.experimental import pallas as pl
from jax.experimental.pallas import tpu as pltpu

# ---- model hyper-params (NRTSIImputer: model_dim / inner_dim / n_heads / n_layers) ----
N_FEATURES = 2      # (x, y) per player
TIME_ENC_DIM = 16   # time_enc_dim
MODEL_DIM = 32      # model_dim
INNER_DIM = 64      # inner_dim
N_HEADS = 4         # n_heads
N_LAYERS = 2        # n_layers
HEAD_DIM = MODEL_DIM // N_HEADS

PACKED_ORDER = [
    "w_obs_emb", "w_qe", "b_emb",
    "w_qkv_h", "b_qkv_h", "w_o_h", "vec_d",
    "w_ffn1", "b_ffn1", "w_ffn2",
    "w_out", "b_out",
]


# ----------------------------------------------------------------------------- glue
def _time_encoding(t_idx, gap, dim=TIME_ENC_DIM):
    """Sinusoidal time encoding conditioned on the imputation gap (NRTSI-style).
    Computed once per batched level call (amortised over all players/problems)."""
    t = t_idx.astype(jnp.float32)[..., None]
    half = dim // 2
    freqs = jnp.exp(-jnp.arange(half, dtype=jnp.float32)
                    * (jnp.log(10000.0) / max(half - 1, 1)))
    ang = t * freqs * (1.0 + 0.1 * float(gap))
    return jnp.concatenate([jnp.sin(ang), jnp.cos(ang)], axis=-1)


def init_params(key):
    D, T, F, I = MODEL_DIM, TIME_ENC_DIM, N_FEATURES, INNER_DIM
    L, H, Hd = N_LAYERS, N_HEADS, HEAD_DIM
    ks = jax.random.split(key, 10)

    def dense(k, shape):
        return jax.random.normal(k, shape, jnp.float32) / jnp.sqrt(float(shape[-2]))

    w_ex = dense(ks[0], (F, D))
    w_et = dense(ks[1], (T, D))
    w_qe = dense(ks[2], (T, D))
    wq = dense(ks[3], (L, D, D))
    wk = dense(ks[4], (L, D, D))
    wv = dense(ks[5], (L, D, D))
    wo = dense(ks[6], (L, D, D))
    w1 = dense(ks[7], (L, D, I))
    w2 = dense(ks[8], (L, I, D))
    w_out = dense(ks[9], (D, F))

    zeros_d = jnp.zeros((L, D), jnp.float32)
    ones_d = jnp.ones((L, D), jnp.float32)

    def split_heads_out(w):        # (L, D, D) -> (L, H, D, Hd): output dim split per head
        return w.reshape(L, D, H, Hd).transpose(0, 2, 1, 3)

    # ---- pack the 23 raw tensors into 12 dense slabs (fewer DMA descriptors) ----
    return {
        "w_obs_emb": jnp.concatenate([w_ex, w_et], axis=0),        # (F+T, D)
        "w_qe": w_qe,                                              # (T, D)
        "b_emb": jnp.zeros((2, D), jnp.float32),                   # rows: [b_e; b_qe]
        "w_qkv_h": jnp.stack([split_heads_out(wq),
                              split_heads_out(wk),
                              split_heads_out(wv)], axis=1),       # (L, 3, H, D, Hd)
        "b_qkv_h": jnp.zeros((L, 3, H, 1, Hd), jnp.float32),
        "w_o_h": wo.reshape(L, H, Hd, D),                          # (L, H, Hd, D)
        # rows: [bo, g1, be1, g2, be2, b2]
        "vec_d": jnp.stack([zeros_d, ones_d, zeros_d, ones_d, zeros_d, zeros_d], axis=1),
        "w_ffn1": w1, "b_ffn1": jnp.zeros((L, 1, I), jnp.float32),
        "w_ffn2": w2,
        "w_out": w_out, "b_out": jnp.zeros((1, F), jnp.float32),
    }


# --------------------------------------------------------------------- Pallas kernel
def nrtsi_fused_kernel(obs_in_ref, qry_te_ref, gt_ref,
                       w_obs_emb_ref, w_qe_ref, b_emb_ref,
                       w_qkv_h_ref, b_qkv_h_ref, w_o_h_ref, vec_d_ref,
                       w_ffn1_ref, b_ffn1_ref, w_ffn2_ref,
                       w_out_ref, b_out_ref,
                       out_ref, l1_ref, dist_ref):
    f32 = jnp.float32
    scale = 1.0 / (HEAD_DIM ** 0.5)

    obs_in = obs_in_ref[...]            # (ZB, n_obs, F + T)   [positions || time enc]
    qry_te = qry_te_ref[...]            # (ZB, n_imp, T)

    # embeddings — single fused matmul per stream (Z*n rows folded into the MXU M dim)
    kv = (jnp.einsum("znc,cd->znd", obs_in, w_obs_emb_ref[...],
                     preferred_element_type=f32)
          + b_emb_ref[0:1, :])                                   # (ZB, n_obs, D)
    q = (jnp.einsum("zmt,td->zmd", qry_te, w_qe_ref[...],
                    preferred_element_type=f32)
         + b_emb_ref[1:2, :])                                    # (ZB, n_imp, D)

    def layer_norm(x, g, b):
        mu = jnp.mean(x, axis=-1, keepdims=True)
        var = jnp.mean((x - mu) * (x - mu), axis=-1, keepdims=True)
        return (x - mu) * jax.lax.rsqrt(var + 1e-5) * g + b

    for l in range(N_LAYERS):           # static unroll (N_LAYERS = 2)
        bo = vec_d_ref[l, 0:1, :]
        g1 = vec_d_ref[l, 1:2, :]
        be1 = vec_d_ref[l, 2:3, :]
        g2 = vec_d_ref[l, 3:4, :]
        be2 = vec_d_ref[l, 4:5, :]
        b2 = vec_d_ref[l, 5:6, :]

        # multi-head cross attention: head weights are pre-split on the host, so
        # no in-kernel lane slices / concatenates are needed.
        attn = jnp.zeros_like(q)
        for h in range(N_HEADS):        # static unroll (N_HEADS = 4)
            qh = (jnp.einsum("zmd,de->zme", q, w_qkv_h_ref[l, 0, h],
                             preferred_element_type=f32) + b_qkv_h_ref[l, 0, h])
            kh = (jnp.einsum("znd,de->zne", kv, w_qkv_h_ref[l, 1, h],
                             preferred_element_type=f32) + b_qkv_h_ref[l, 1, h])
            vh = (jnp.einsum("znd,de->zne", kv, w_qkv_h_ref[l, 2, h],
                             preferred_element_type=f32) + b_qkv_h_ref[l, 2, h])

            s = jnp.einsum("zme,zne->zmn", qh, kh,
                           preferred_element_type=f32) * scale
            s = s - jnp.max(s, axis=-1, keepdims=True)
            p = jnp.exp(s)
            p = p * pl.reciprocal(jnp.sum(p, axis=-1, keepdims=True), approx=True)
            ctx = jnp.einsum("zmn,zne->zme", p, vh, preferred_element_type=f32)
            attn = attn + jnp.einsum("zme,ed->zmd", ctx, w_o_h_ref[l, h],
                                     preferred_element_type=f32)
        attn = attn + bo

        q = layer_norm(q + attn, g1, be1)

        ff = (jnp.einsum("zmd,di->zmi", q, w_ffn1_ref[l],
                         preferred_element_type=f32) + b_ffn1_ref[l])
        ff = jnp.maximum(ff, 0.0)
        ff = (jnp.einsum("zmi,id->zmd", ff, w_ffn2_ref[l],
                         preferred_element_type=f32) + b2)

        q = layer_norm(q + ff, g2, be2)

    out = (jnp.einsum("zmd,df->zmf", q, w_out_ref[...],
                      preferred_element_type=f32) + b_out_ref[...])   # (ZB, n_imp, F)
    out_ref[...] = out.astype(out_ref.dtype)

    # ---- fused loss partials (free VPU filler; avoids a 2nd launch + HBM re-read) ----
    d = out - gt_ref[...]                                             # (ZB, n_imp, F)
    abs_sum = jnp.sum(jnp.abs(d), axis=-1, keepdims=True)             # (ZB, n_imp, 1)
    l1_ref[...] = jnp.sum(abs_sum, axis=(0, 1), keepdims=True)        # (1, 1, 1)
    sq = jnp.sum(d * d, axis=-1, keepdims=True)                       # (ZB, n_imp, 1)
    dist_ref[...] = jnp.sum(jnp.sqrt(sq), axis=(0, 1), keepdims=True)  # (1, 1, 1)


# --------------------------------------------------------------------------- wrapper
def _choose_block(Z, target_blocks=2):
    """Largest divisor of Z that still gives >= target_blocks grid steps
    (so the 'parallel' grid axis can be sharded across v7x's two TensorCores)."""
    cands = [d for d in range(1, Z + 1) if Z % d == 0 and Z // d >= target_blocks]
    return max(cands) if cands else Z


def _data_spec(arr, zb):
    zeros = (0,) * (arr.ndim - 1)
    return pl.BlockSpec((zb,) + tuple(arr.shape[1:]), lambda z: (z,) + zeros)


def _resident_spec(arr):
    zeros = (0,) * arr.ndim
    return pl.BlockSpec(tuple(arr.shape), lambda z: zeros)   # same block every step


def nrtsi_forward_level(obs_data, gt_data, obs_idx, nxt_idx, gap, params):
    """One imputation level for ALL (player, batch) problems in a single pallas_call.

    obs_data: (Z, n_obs, F) observed positions, Z = players * batch
    gt_data:  (Z, n_imp, F) ground truth at the frames to impute
    Returns (imputations (Z, n_imp, F), level_loss, pos_dist_sum).
    """
    Z, n_obs, F = obs_data.shape
    n_imp = gt_data.shape[1]

    obs_te = jnp.broadcast_to(_time_encoding(obs_idx, gap)[None, :, :],
                              (Z, n_obs, TIME_ENC_DIM))
    qry_te = jnp.broadcast_to(_time_encoding(nxt_idx, gap)[None, :, :],
                              (Z, n_imp, TIME_ENC_DIM)).astype(jnp.float32)
    obs_in = jnp.concatenate([obs_data.astype(jnp.float32), obs_te], axis=-1)
    gt = gt_data.astype(jnp.float32)

    ZB = _choose_block(Z)
    G = Z // ZB

    param_list = [params[k] for k in PACKED_ORDER]
    in_specs = ([_data_spec(obs_in, ZB), _data_spec(qry_te, ZB), _data_spec(gt, ZB)]
                + [_resident_spec(p) for p in param_list])

    out_shape = (jax.ShapeDtypeStruct((Z, n_imp, F), jnp.float32),
                 jax.ShapeDtypeStruct((G, 1, 1), jnp.float32),
                 jax.ShapeDtypeStruct((G, 1, 1), jnp.float32))
    out_specs = (pl.BlockSpec((ZB, n_imp, F), lambda z: (z, 0, 0)),
                 pl.BlockSpec((1, 1, 1), lambda z: (z, 0, 0)),
                 pl.BlockSpec((1, 1, 1), lambda z: (z, 0, 0)))

    imputations, l1_partial, dist_partial = pl.pallas_call(
        nrtsi_fused_kernel,
        grid=(G,),
        in_specs=in_specs,
        out_specs=out_specs,
        out_shape=out_shape,
        compiler_params=pltpu.CompilerParams(
            dimension_semantics=("parallel",)),        # v7x: shard across both TCs
    )(obs_in, qry_te, gt, *param_list)

    # level loss == average over problems of mean(|imp - gt|); summed partials / count
    # matches the reference's  per-player "loss += mean(...)" / num_levels accounting.
    level_loss = jnp.sum(l1_partial) / float(Z * n_imp * F)
    # TODO(synk): reference computes pos_dist on upscaled (pixel) coordinates via
    # reshape_tensor(..., upscale=True); here it is the raw-coordinate L2 sum.
    pos_dist = jnp.sum(dist_partial)
    return imputations, level_loss, pos_dist


# ------------------------------------------------------------------------------- main
if __name__ == "__main__":
    key = jax.random.PRNGKey(0)
    k_data, k_param = jax.random.split(key)

    # small, forward-consistent shapes: dataset != soccer/basketball -> 6 players
    bs, seq_len, total_players = 2, 8, 6

    data0 = jax.random.normal(
        k_data, (bs, seq_len, total_players * N_FEATURES), jnp.float32)
    input_data = data0.reshape(bs, seq_len, total_players, N_FEATURES)
    target_data = input_data      # data[1] is a clone of data[0] in the reference

    params = init_params(k_param)

    # TODO(synk): the data-dependent scheduling (generate_mask / get_next_to_impute
    # while-loop over imputation levels, per-gap model swapping in eval mode) stays
    # host-side; here one representative level (gap=1) is run, but ALL players are
    # batched into a single fused pallas_call instead of one launch per player.
    gap = 1
    obs_idx = jnp.array([0, 2, 4, 6], dtype=jnp.int32)   # observed frames
    nxt_idx = jnp.array([1, 3, 5, 7], dtype=jnp.int32)   # frames to impute

    # (bs, n, P, F) -> (P*bs, n, F): one independent attention problem per (player, batch)
    Z = total_players * bs
    obs = jnp.transpose(input_data[:, obs_idx], (2, 0, 1, 3)).reshape(
        Z, obs_idx.shape[0], N_FEATURES)
    gt = jnp.transpose(target_data[:, nxt_idx], (2, 0, 1, 3)).reshape(
        Z, nxt_idx.shape[0], N_FEATURES)

    imputations, loss, pos_dist = nrtsi_forward_level(
        obs, gt, obs_idx, nxt_idx, gap, params)

    jax.block_until_ready((imputations, loss, pos_dist))
    assert imputations.shape == (Z, nxt_idx.shape[0], N_FEATURES)
    print("KERNEL_OK")
</pallas_src>

<mosaic_0001>
module attributes {stable_mosaic.version = 11 : i64} {
  func.func @nrtsi_fused_kernel(%arg0: i32, %arg1: memref<6x4x18xf32, #tpu.memory_space<vmem>>, %arg2: memref<6x4x16xf32, #tpu.memory_space<vmem>>, %arg3: memref<6x4x2xf32, #tpu.memory_space<vmem>>, %arg4: memref<18x32xf32, #tpu.memory_space<vmem>>, %arg5: memref<16x32xf32, #tpu.memory_space<vmem>>, %arg6: memref<2x32xf32, #tpu.memory_space<vmem>>, %arg7: memref<2x3x4x32x8xf32, #tpu.memory_space<vmem>>, %arg8: memref<2x3x4x1x8xf32, #tpu.memory_space<vmem>>, %arg9: memref<2x4x8x32xf32, #tpu.memory_space<vmem>>, %arg10: memref<2x6x32xf32, #tpu.memory_space<vmem>>, %arg11: memref<2x32x64xf32, #tpu.memory_space<vmem>>, %arg12: memref<2x1x64xf32, #tpu.memory_space<vmem>>, %arg13: memref<2x64x32xf32, #tpu.memory_space<vmem>>, %arg14: memref<32x2xf32, #tpu.memory_space<vmem>>, %arg15: memref<1x2xf32, #tpu.memory_space<vmem>>, %arg16: memref<6x4x2xf32, #tpu.memory_space<vmem>>, %arg17: memref<1x1x1xf32, #tpu.memory_space<vmem>>, %arg18: memref<1x1x1xf32, #tpu.memory_space<vmem>>) attributes {dimension_semantics = [#tpu.dimension_semantics<parallel>], iteration_bounds = array<i64: 2>, scalar_prefetch = 0 : i64, scratch_operands = 0 : i64, tpu.core_type = #tpu.core_type<tc>, window_params = [{transform_indices = @transform_0, window_bounds = array<i64: 6, 4, 18>}, {transform_indices = @transform_1, window_bounds = array<i64: 6, 4, 16>}, {transform_indices = @transform_2, window_bounds = array<i64: 6, 4, 2>}, {pipeline_mode = #tpu.pipeline_mode<synchronous>, transform_indices = @transform_3, window_bounds = array<i64: 18, 32>}, {pipeline_mode = #tpu.pipeline_mode<synchronous>, transform_indices = @transform_4, window_bounds = array<i64: 16, 32>}, {pipeline_mode = #tpu.pipeline_mode<synchronous>, transform_indices = @transform_5, window_bounds = array<i64: 2, 32>}, {pipeline_mode = #tpu.pipeline_mode<synchronous>, transform_indices = @transform_6, window_bounds = array<i64: 2, 3, 4, 32, 8>}, {pipeline_mode = #tpu.pipeline_mode<synchronous>, transform_indices = @transform_7, window_bounds = array<i64: 2, 3, 4, 1, 8>}, {pipeline_mode = #tpu.pipeline_mode<synchronous>, transform_indices = @transform_8, window_bounds = array<i64: 2, 4, 8, 32>}, {pipeline_mode = #tpu.pipeline_mode<synchronous>, transform_indices = @transform_9, window_bounds = array<i64: 2, 6, 32>}, {pipeline_mode = #tpu.pipeline_mode<synchronous>, transform_indices = @transform_10, window_bounds = array<i64: 2, 32, 64>}, {pipeline_mode = #tpu.pipeline_mode<synchronous>, transform_indices = @transform_11, window_bounds = array<i64: 2, 1, 64>}, {pipeline_mode = #tpu.pipeline_mode<synchronous>, transform_indices = @transform_12, window_bounds = array<i64: 2, 64, 32>}, {pipeline_mode = #tpu.pipeline_mode<synchronous>, transform_indices = @transform_13, window_bounds = array<i64: 32, 2>}, {pipeline_mode = #tpu.pipeline_mode<synchronous>, transform_indices = @transform_14, window_bounds = array<i64: 1, 2>}, {transform_indices = @transform_15, window_bounds = array<i64: 6, 4, 2>}, {transform_indices = @transform_16, window_bounds = array<i64: 1, 1, 1>}, {transform_indices = @transform_17, window_bounds = array<i64: 1, 1, 1>}]} {
    %c0 = arith.constant 0 : index
    %c0_0 = arith.constant 0 : index
    %c0_1 = arith.constant 0 : index
    %0 = vector.load %arg1[%c0, %c0_0, %c0_1] : memref<6x4x18xf32, #tpu.memory_space<vmem>>, vector<6x4x18xf32>
    %c0_2 = arith.constant 0 : index
    %c0_3 = arith.constant 0 : index
    %c0_4 = arith.constant 0 : index
    %1 = vector.load %arg2[%c0_2, %c0_3, %c0_4] : memref<6x4x16xf32, #tpu.memory_space<vmem>>, vector<6x4x16xf32>
    %c0_5 = arith.constant 0 : index
    %c0_6 = arith.constant 0 : index
    %2 = vector.load %arg4[%c0_5, %c0_6] : memref<18x32xf32, #tpu.memory_space<vmem>>, vector<18x32xf32>
    "tpu.trace_start"() <{level = 10 : i32, message = "znc,cd->znd"}> : () -> ()
    %cst = arith.constant dense<0.000000e+00> : vector<6x4x32xf32>
    %3 = tpu.matmul %0, %2, %cst {dimension_numbers = #tpu.dot_dimension_numbers<[2], [0], [0, 1], [1], [0, 0, 0, 1, 1, 1], [], []>} : vector<6x4x18xf32>, vector<18x32xf32>, vector<6x4x32xf32> -> vector<6x4x32xf32>
    "tpu.trace_stop"() : () -> ()
    %c0_7 = arith.constant 0 : index
    %c0_8 = arith.constant 0 : index
    %4 = vector.load %arg6[%c0_7, %c0_8] : memref<2x32xf32, #tpu.memory_space<vmem>>, vector<1x32xf32>
    %5 = vector.shape_cast %4 : vector<1x32xf32> to vector<1x1x32xf32>
    %6 = vector.broadcast %5 : vector<1x1x32xf32> to vector<6x4x32xf32>
    %7 = arith.addf %3, %6 : vector<6x4x32xf32>
    %c0_9 = arith.constant 0 : index
    %c0_10 = arith.constant 0 : index
    %8 = vector.load %arg5[%c0_9, %c0_10] : memref<16x32xf32, #tpu.memory_space<vmem>>, vector<16x32xf32>
    "tpu.trace_start"() <{level = 10 : i32, message = "zmt,td->zmd"}> : () -> ()
    %cst_11 = arith.constant dense<0.000000e+00> : vector<6x4x32xf32>
    %9 = tpu.matmul %1, %8, %cst_11 {dimension_numbers = #tpu.dot_dimension_numbers<[2], [0], [0, 1], [1], [0, 0, 0, 1, 1, 1], [], []>} : vector<6x4x16xf32>, vector<16x32xf32>, vector<6x4x32xf32> -> vector<6x4x32xf32>
    "tpu.trace_stop"() : () -> ()
    %c1 = arith.constant 1 : index
    %c0_12 = arith.constant 0 : index
    %10 = vector.load %arg6[%c1, %c0_12] : memref<2x32xf32, #tpu.memory_space<vmem>>, vector<1x32xf32>
    %11 = vector.shape_cast %10 : vector<1x32xf32> to vector<1x1x32xf32>
    %12 = vector.broadcast %11 : vector<1x1x32xf32> to vector<6x4x32xf32>
    %13 = arith.addf %9, %12 : vector<6x4x32xf32>
    %c0_13 = arith.constant 0 : index
    %c0_14 = arith.constant 0 : index
    %c0_15 = arith.constant 0 : index
    %14 = vector.load %arg10[%c0_13, %c0_14, %c0_15] : memref<2x6x32xf32, #tpu.memory_space<vmem>>, vector<1x1x32xf32>
    %15 = vector.shape_cast %14 : vector<1x1x32xf32> to vector<1x32xf32>
    %c0_16 = arith.constant 0 : index
    %c1_17 = arith.constant 1 : index
    %c0_18 = arith.constant 0 : index
    %16 = vector.load %arg10[%c0_16, %c1_17, %c0_18] : memref<2x6x32xf32, #tpu.memory_space<vmem>>, vector<1x1x32xf32>
    %17 = vector.shape_cast %16 : vector<1x1x32xf32> to vector<1x32xf32>
    %c0_19 = arith.constant 0 : index
    %c2 = arith.constant 2 : index
    %c0_20 = arith.constant 0 : index
    %18 = vector.load %arg10[%c0_19, %c2, %c0_20] : memref<2x6x32xf32, #tpu.memory_space<vmem>>, vector<1x1x32xf32>
    %19 = vector.shape_cast %18 : vector<1x1x32xf32> to vector<1x32xf32>
    %c0_21 = arith.constant 0 : index
    %c3 = arith.constant 3 : index
    %c0_22 = arith.constant 0 : index
    %20 = vector.load %arg10[%c0_21, %c3, %c0_22] : memref<2x6x32xf32, #tpu.memory_space<vmem>>, vector<1x1x32xf32>
    %21 = vector.shape_cast %20 : vector<1x1x32xf32> to vector<1x32xf32>
    %c0_23 = arith.constant 0 : index
    %c4 = arith.constant 4 : index
    %c0_24 = arith.constant 0 : index
    %22 = vector.load %arg10[%c0_23, %c4, %c0_24] : memref<2x6x32xf32, #tpu.memory_space<vmem>>, vector<1x1x32xf32>
    %23 = vector.shape_cast %22 : vector<1x1x32xf32> to vector<1x32xf32>
    %c0_25 = arith.constant 0 : index
    %c5 = arith.constant 5 : index
    %c0_26 = arith.constant 0 : index
    %24 = vector.load %arg10[%c0_25, %c5, %c0_26] : memref<2x6x32xf32, #tpu.memory_space<vmem>>, vector<1x1x32xf32>
    %25 = vector.shape_cast %24 : vector<1x1x32xf32> to vector<1x32xf32>
    %cst_27 = arith.constant 0.000000e+00 : f32
    %26 = vector.broadcast %cst_27 : f32 to vector<6x4x32xf32>
    %c0_28 = arith.constant 0 : index
    %c0_29 = arith.constant 0 : index
    %c0_30 = arith.constant 0 : index
    %c0_31 = arith.constant 0 : index
    %c0_32 = arith.constant 0 : index
    %27 = vector.load %arg7[%c0_28, %c0_29, %c0_30, %c0_31, %c0_32] : memref<2x3x4x32x8xf32, #tpu.memory_space<vmem>>, vector<1x1x1x32x8xf32>
    %28 = vector.shape_cast %27 : vector<1x1x1x32x8xf32> to vector<32x8xf32>
    "tpu.trace_start"() <{level = 10 : i32, message = "zmd,de->zme"}> : () -> ()
    %cst_33 = arith.constant dense<0.000000e+00> : vector<6x4x8xf32>
    %29 = tpu.matmul %13, %28, %cst_33 {dimension_numbers = #tpu.dot_dimension_numbers<[2], [0], [0, 1], [1], [0, 0, 0, 1, 1, 1], [], []>} : vector<6x4x32xf32>, vector<32x8xf32>, vector<6x4x8xf32> -> vector<6x4x8xf32>
    "tpu.trace_stop"() : () -> ()
    %c0_34 = arith.constant 0 : index
    %c0_35 = arith.constant 0 : index
    %c0_36 = arith.constant 0 : index
    %c0_37 = arith.constant 0 : index
    %c0_38 = arith.constant 0 : index
    %30 = vector.load %arg8[%c0_34, %c0_35, %c0_36, %c0_37, %c0_38] : memref<2x3x4x1x8xf32, #tpu.memory_space<vmem>>, vector<1x1x1x1x8xf32>
    %31 = vector.shape_cast %30 : vector<1x1x1x1x8xf32> to vector<1x8xf32>
    %32 = vector.shape_cast %31 : vector<1x8xf32> to vector<1x1x8xf32>
    %33 = vector.broadcast %32 : vector<1x1x8xf32> to vector<6x4x8xf32>
    %34 = arith.addf %29, %33 : vector<6x4x8xf32>
    %c0_39 = arith.constant 0 : index
    %c1_40 = arith.constant 1 : index
    %c0_41 = arith.constant 0 : index
    %c0_42 = arith.constant 0 : index
    %c0_43 = arith.constant 0 : index
    %35 = vector.load %arg7[%c0_39, %c1_40, %c0_41, %c0_42, %c0_43] : memref<2x3x4x32x8xf32, #tpu.memory_space<vmem>>, vector<1x1x1x32x8xf32>
    %36 = vector.shape_cast %35 : vector<1x1x1x32x8xf32> to vector<32x8xf32>
    "tpu.trace_start"() <{level = 10 : i32, message = "znd,de->zne"}> : () -> ()
    %cst_44 = arith.constant dense<0.000000e+00> : vector<6x4x8xf32>
    %37 = tpu.matmul %7, %36, %cst_44 {dimension_numbers = #tpu.dot_dimension_numbers<[2], [0], [0, 1], [1], [0, 0, 0, 1, 1, 1], [], []>} : vector<6x4x32xf32>, vector<32x8xf32>, vector<6x4x8xf32> -> vector<6x4x8xf32>
    "tpu.trace_stop"() : () -> ()
    %c0_45 = arith.constant 0 : index
    %c1_46 = arith.constant 1 : index
    %c0_47 = arith.constant 0 : index
    %c0_48 = arith.constant 0 : index
    %c0_49 = arith.constant 0 : index
    %38 = vector.load %arg8[%c0_45, %c1_46, %c0_47, %c0_48, %c0_49] : memref<2x3x4x1x8xf32, #tpu.memory_space<vmem>>, vector<1x1x1x1x8xf32>
    %39 = vector.shape_cast %38 : vector<1x1x1x1x8xf32> to vector<1x8xf32>
    %40 = vector.shape_cast %39 : vector<1x8xf32> to vector<1x1x8xf32>
    %41 = vector.broadcast %40 : vector<1x1x8xf32> to vector<6x4x8xf32>
    %42 = arith.addf %37, %41 : vector<6x4x8xf32>
    %c0_50 = arith.constant 0 : index
    %c2_51 = arith.constant 2 : index
    %c0_52 = arith.constant 0 : index
    %c0_53 = arith.constant 0 : index
    %c0_54 = arith.constant 0 : index
    %43 = vector.load %arg7[%c0_50, %c2_51, %c0_52, %c0_53, %c0_54] : memref<2x3x4x32x8xf32, #tpu.memory_space<vmem>>, vector<1x1x1x32x8xf32>
    %44 = vector.shape_cast %43 : vector<1x1x1x32x8xf32> to vector<32x8xf32>
    "tpu.trace_start"() <{level = 10 : i32, message = "znd,de->zne"}> : () -> ()
    %cst_55 = arith.constant dense<0.000000e+00> : vector<6x4x8xf32>
    %45 = tpu.matmul %7, %44, %cst_55 {dimension_numbers = #tpu.dot_dimension_numbers<[2], [0], [0, 1], [1], [0, 0, 0, 1, 1, 1], [], []>} : vector<6x4x32xf32>, vector<32x8xf32>, vector<6x4x8xf32> -> vector<6x4x8xf32>
    "tpu.trace_stop"() : () -> ()
    %c0_56 = arith.constant 0 : index
    %c2_57 = arith.constant 2 : index
    %c0_58 = arith.constant 0 : index
    %c0_59 = arith.constant 0 : index
    %c0_60 = arith.constant 0 : index
    %46 = vector.load %arg8[%c0_56, %c2_57, %c0_58, %c0_59, %c0_60] : memref<2x3x4x1x8xf32, #tpu.memory_space<vmem>>, vector<1x1x1x1x8xf32>
    %47 = vector.shape_cast %46 : vector<1x1x1x1x8xf32> to vector<1x8xf32>
    %48 = vector.shape_cast %47 : vector<1x8xf32> to vector<1x1x8xf32>
    %49 = vector.broadcast %48 : vector<1x1x8xf32> to vector<6x4x8xf32>
    %50 = arith.addf %45, %49 : vector<6x4x8xf32>
    "tpu.trace_start"() <{level = 10 : i32, message = "zme,zne->zmn"}> : () -> ()
    %cst_61 = arith.constant dense<0.000000e+00> : vector<6x4x4xf32>
    %51 = tpu.matmul %34, %42, %cst_61 {dimension_numbers = #tpu.dot_dimension_numbers<[2], [2], [1], [1], [0, 0, 0, 1, 1, 1], [0], [0]>} : vector<6x4x8xf32>, vector<6x4x8xf32>, vector<6x4x4xf32> -> vector<6x4x4xf32>
    "tpu.trace_stop"() : () -> ()
    %cst_62 = arith.constant 0.353553385 : f32
    %52 = vector.broadcast %cst_62 : f32 to vector<6x4x4xf32>
    %53 = arith.mulf %51, %52 : vector<6x4x4xf32>
    %cst_63 = arith.constant dense<0xFF800000> : vector<6x4xf32>
    %54 = vector.multi_reduction <maximumf>, %53, %cst_63 [2] : vector<6x4x4xf32> to vector<6x4xf32>
    %55 = vector.shape_cast %54 : vector<6x4xf32> to vector<6x4x1xf32>
    %56 = vector.broadcast %55 : vector<6x4x1xf32> to vector<6x4x4xf32>
    %57 = arith.subf %53, %56 : vector<6x4x4xf32>
    %58 = math.exp %57 : vector<6x4x4xf32>
    %cst_64 = arith.constant dense<0.000000e+00> : vector<6x4xf32>
    %59 = vector.multi_reduction <add>, %58, %cst_64 [2] : vector<6x4x4xf32> to vector<6x4xf32>
    %60 = vector.shape_cast %59 : vector<6x4xf32> to vector<6x4x1xf32>
    %61 = tpu.reciprocal %60 {approx = true} : vector<6x4x1xf32> -> vector<6x4x1xf32>
    %62 = vector.broadcast %61 : vector<6x4x1xf32> to vector<6x4x4xf32>
    %63 = arith.mulf %58, %62 : vector<6x4x4xf32>
    "tpu.trace_start"() <{level = 10 : i32, message = "zmn,zne->zme"}> : () -> ()
    %cst_65 = arith.constant dense<0.000000e+00> : vector<6x4x8xf32>
    %64 = tpu.matmul %63, %50, %cst_65 {dimension_numbers = #tpu.dot_dimension_numbers<[2], [1], [1], [2], [0, 0, 0, 1, 1, 2], [0], [0]>} : vector<6x4x4xf32>, vector<6x4x8xf32>, vector<6x4x8xf32> -> vector<6x4x8xf32>
    "tpu.trace_stop"() : () -> ()
    %c0_66 = arith.constant 0 : index
    %c0_67 = arith.constant 0 : index
    %c0_68 = arith.constant 0 : index
    %c0_69 = arith.constant 0 : index
    %65 = vector.load %arg9[%c0_66, %c0_67, %c0_68, %c0_69] : memref<2x4x8x32xf32, #tpu.memory_space<vmem>>, vector<1x1x8x32xf32>
    %66 = vector.shape_cast %65 : vector<1x1x8x32xf32> to vector<8x32xf32>
    "tpu.trace_start"() <{level = 10 : i32, message = "zme,ed->zmd"}> : () -> ()
    %cst_70 = arith.constant dense<0.000000e+00> : vector<6x4x32xf32>
    %67 = tpu.matmul %64, %66, %cst_70 {dimension_numbers = #tpu.dot_dimension_numbers<[2], [0], [0, 1], [1], [0, 0, 0, 1, 1, 1], [], []>} : vector<6x4x8xf32>, vector<8x32xf32>, vector<6x4x32xf32> -> vector<6x4x32xf32>
    "tpu.trace_stop"() : () -> ()
    %68 = arith.addf %26, %67 : vector<6x4x32xf32>
    %c0_71 = arith.constant 0 : index
    %c0_72 = arith.constant 0 : index
    %c1_73 = arith.constant 1 : index
    %c0_74 = arith.constant 0 : index
    %c0_75 = arith.constant 0 : index
    %69 = vector.load %arg7[%c0_71, %c0_72, %c1_73, %c0_74, %c0_75] : memref<2x3x4x32x8xf32, #tpu.memory_space<vmem>>, vector<1x1x1x32x8xf32>
    %70 = vector.shape_cast %69 : vector<1x1x1x32x8xf32> to vector<32x8xf32>
    "tpu.trace_start"() <{level = 10 : i32, message = "zmd,de->zme"}> : () -> ()
    %cst_76 = arith.constant dense<0.000000e+00> : vector<6x4x8xf32>
    %71 = tpu.matmul %13, %70, %cst_76 {dimension_numbers = #tpu.dot_dimension_numbers<[2], [0], [0, 1], [1], [0, 0, 0, 1, 1, 1], [], []>} : vector<6x4x32xf32>, vector<32x8xf32>, vector<6x4x8xf32> -> vector<6x4x8xf32>
    "tpu.trace_stop"() : () -> ()
    %c0_77 = arith.constant 0 : index
    %c0_78 = arith.constant 0 : index
    %c1_79 = arith.constant 1 : index
    %c0_80 = arith.constant 0 : index
    %c0_81 = arith.constant 0 : index
    %72 = vector.load %arg8[%c0_77, %c0_78, %c1_79, %c0_80, %c0_81] : memref<2x3x4x1x8xf32, #tpu.memory_space<vmem>>, vector<1x1x1x1x8xf32>
    %73 = vector.shape_cast %72 : vector<1x1x1x1x8xf32> to vector<1x8xf32>
    %74 = vector.shape_cast %73 : vector<1x8xf32> to vector<1x1x8xf32>
    %75 = vector.broadcast %74 : vector<1x1x8xf32> to vector<6x4x8xf32>
    %76 = arith.addf %71, %75 : vector<6x4x8xf32>
    %c0_82 = arith.constant 0 : index
    %c1_83 = arith.constant 1 : index
    %c1_84 = arith.constant 1 : index
    %c0_85 = arith.constant 0 : index
    %c0_86 = arith.constant 0 : index
    %77 = vector.load %arg7[%c0_82, %c1_83, %c1_84, %c0_85, %c0_86] : memref<2x3x4x32x8xf32, #tpu.memory_space<vmem>>, vector<1x1x1x32x8xf32>
    %78 = vector.shape_cast %77 : vector<1x1x1x32x8xf32> to vector<32x8xf32>
    "tpu.trace_start"() <{level = 10 : i32, message = "znd,de->zne"}> : () -> ()
    %cst_87 = arith.constant dense<0.000000e+00> : vector<6x4x8xf32>
    %79 = tpu.matmul %7, %78, %cst_87 {dimension_numbers = #tpu.dot_dimension_numbers<[2], [0], [0, 1], [1], [0, 0, 0, 1, 1, 1], [], []>} : vector<6x4x32xf32>, vector<32x8xf32>, vector<6x4x8xf32> -> vector<6x4x8xf32>
    "tpu.trace_stop"() : () -> ()
    %c0_88 = arith.constant 0 : index
    %c1_89 = arith.constant 1 : index
    %c1_90 = arith.constant 1 : index
    %c0_91 = arith.constant 0 : index
    %c0_92 = arith.constant 0 : index
    %80 = vector.load %arg8[%c0_88, %c1_89, %c1_90, %c0_91, %c0_92] : memref<2x3x4x1x8xf32, #tpu.memory_space<vmem>>, vector<1x1x1x1x8xf32>
    %81 = vector.shape_cast %80 : vector<1x1x1x1x8xf32> to vector<1x8xf32>
    %82 = vector.shape_cast %81 : vector<1x8xf32> to vector<1x1x8xf32>
    %83 = vector.broadcast %82 : vector<1x1x8xf32> to vector<6x4x8xf32>
    %84 = arith.addf %79, %83 : vector<6x4x8xf32>
    %c0_93 = arith.constant 0 : index
    %c2_94 = arith.constant 2 : index
    %c1_95 = arith.constant 1 : index
    %c0_96 = arith.constant 0 : index
    %c0_97 = arith.constant 0 : index
    %85 = vector.load %arg7[%c0_93, %c2_94, %c1_95, %c0_96, %c0_97] : memref<2x3x4x32x8xf32, #tpu.memory_space<vmem>>, vector<1x1x1x32x8xf32>
    %86 = vector.shape_cast %85 : vector<1x1x1x32x8xf32> to vector<32x8xf32>
    "tpu.trace_start"() <{level = 10 : i32, message = "znd,de->zne"}> : () -> ()
    %cst_98 = arith.constant dense<0.000000e+00> : vector<6x4x8xf32>
    %87 = tpu.matmul %7, %86, %cst_98 {dimension_numbers = #tpu.dot_dimension_numbers<[2], [0], [0, 1], [1], [0, 0, 0, 1, 1, 1], [], []>} : vector<6x4x32xf32>, vector<32x8xf32>, vector<6x4x8xf32> -> vector<6x4x8xf32>
    "tpu.trace_stop"() : () -> ()
    %c0_99 = arith.constant 0 : index
    %c2_100 = arith.constant 2 : index
    %c1_101 = arith.constant 1 : index
    %c0_102 = arith.constant 0 : index
    %c0_103 = arith.constant 0 : index
    %88 = vector.load %arg8[%c0_99, %c2_100, %c1_101, %c0_102, %c0_103] : memref<2x3x4x1x8xf32, #tpu.memory_space<vmem>>, vector<1x1x1x1x8xf32>
    %89 = vector.shape_cast %88 : vector<1x1x1x1x8xf32> to vector<1x8xf32>
    %90 = vector.shape_cast %89 : vector<1x8xf32> to vector<1x1x8xf32>
    %91 = vector.broadcast %90 : vector<1x1x8xf32> to vector<6x4x8xf32>
    %92 = arith.addf %87, %91 : vector<6x4x8xf32>
    "tpu.trace_start"() <{level = 10 : i32, message = "zme,zne->zmn"}> : () -> ()
    %cst_104 = arith.constant dense<0.000000e+00> : vector<6x4x4xf32>
    %93 = tpu.matmul %76, %84, %cst_104 {dimension_numbers = #tpu.dot_dimension_numbers<[2], [2], [1], [1], [0, 0, 0, 1, 1, 1], [0], [0]>} : vector<6x4x8xf32>, vector<6x4x8xf32>, vector<6x4x4xf32> -> vector<6x4x4xf32>
    "tpu.trace_stop"() : () -> ()
    %cst_105 = arith.constant 0.353553385 : f32
    %94 = vector.broadcast %cst_105 : f32 to vector<6x4x4xf32>
    %95 = arith.mulf %93, %94 : vector<6x4x4xf32>
    %cst_106 = arith.constant dense<0xFF800000> : vector<6x4xf32>
    %96 = vector.multi_reduction <maximumf>, %95, %cst_106 [2] : vector<6x4x4xf32> to vector<6x4xf32>
    %97 = vector.shape_cast %96 : vector<6x4xf32> to vector<6x4x1xf32>
    %98 = vector.broadcast %97 : vector<6x4x1xf32> to vector<6x4x4xf32>
    %99 = arith.subf %95, %98 : vector<6x4x4xf32>
    %100 = math.exp %99 : vector<6x4x4xf32>
    %cst_107 = arith.constant dense<0.000000e+00> : vector<6x4xf32>
    %101 = vector.multi_reduction <add>, %100, %cst_107 [2] : vector<6x4x4xf32> to vector<6x4xf32>
    %102 = vector.shape_cast %101 : vector<6x4xf32> to vector<6x4x1xf32>
    %103 = tpu.reciprocal %102 {approx = true} : vector<6x4x1xf32> -> vector<6x4x1xf32>
    %104 = vector.broadcast %103 : vector<6x4x1xf32> to vector<6x4x4xf32>
    %105 = arith.mulf %100, %104 : vector<6x4x4xf32>
    "tpu.trace_start"() <{level = 10 : i32, message = "zmn,zne->zme"}> : () -> ()
    %cst_108 = arith.constant dense<0.000000e+00> : vector<6x4x8xf32>
    %106 = tpu.matmul %105, %92, %cst_108 {dimension_numbers = #tpu.dot_dimension_numbers<[2], [1], [1], [2], [0, 0, 0, 1, 1, 2], [0], [0]>} : vector<6x4x4xf32>, vector<6x4x8xf32>, vector<6x4x8xf32> -> vector<6x4x8xf32>
    "tpu.trace_stop"() : () -> ()
    %c0_109 = arith.constant 0 : index
    %c1_110 = arith.constant 1 : index
    %c0_111 = arith.constant 0 : index
    %c0_112 = arith.constant 0 : index
    %107 = vector.load %arg9[%c0_109, %c1_110, %c0_111, %c0_112] : memref<2x4x8x32xf32, #tpu.memory_space<vmem>>, vector<1x1x8x32xf32>
    %108 = vector.shape_cast %107 : vector<1x1x8x32xf32> to vector<8x32xf32>
    "tpu.trace_start"() <{level = 10 : i32, message = "zme,ed->zmd"}> : () -> ()
    %cst_113 = arith.constant dense<0.000000e+00> : vector<6x4x32xf32>
    %109 = tpu.matmul %106, %108, %cst_113 {dimension_numbers = #tpu.dot_dimension_numbers<[2], [0], [0, 1], [1], [0, 0, 0, 1, 1, 1], [], []>} : vector<6x4x8xf32>, vector<8x32xf32>, vector<6x4x32xf32> -> vector<6x4x32xf32>
    "tpu.trace_stop"() : () -> ()
    %110 = arith.addf %68, %109 : vector<6x4x32xf32>
    %c0_114 = arith.constant 0 : index
    %c0_115 = arith.constant 0 : index
    %c2_116 = arith.constant 2 : index
    %c0_117 = arith.constant 0 : index
    %c0_118 = arith.constant 0 : index
    %111 = vector.load %arg7[%c0_114, %c0_115, %c2_116, %c0_117, %c0_118] : memref<2x3x4x32x8xf32, #tpu.memory_space<vmem>>, vector<1x1x1x32x8xf32>
    %112 = vector.shape_cast %111 : vector<1x1x1x32x8xf32> to vector<32x8xf32>
    "tpu.trace_start"() <{level = 10 : i32, message = "zmd,de->zme"}> : () -> ()
    %cst_119 = arith.constant dense<0.000000e+00> : vector<6x4x8xf32>
    %113 = tpu.matmul %13, %112, %cst_119 {dimension_numbers = #tpu.dot_dimension_numbers<[2], [0], [0, 1], [1], [0, 0, 0, 1, 1, 1], [], []>} : vector<6x4x32xf32>, vector<32x8xf32>, vector<6x4x8xf32> -> vector<6x4x8xf32>
    "tpu.trace_stop"() : () -> ()
    %c0_120 = arith.constant 0 : index
    %c0_121 = arith.constant 0 : index
    %c2_122 = arith.constant 2 : index
    %c0_123 = arith.constant 0 : index
    %c0_124 = arith.constant 0 : index
    %114 = vector.load %arg8[%c0_120, %c0_121, %c2_122, %c0_123, %c0_124] : memref<2x3x4x1x8xf32, #tpu.memory_space<vmem>>, vector<1x1x1x1x8xf32>
    %115 = vector.shape_cast %114 : vector<1x1x1x1x8xf32> to vector<1x8xf32>
    %116 = vector.shape_cast %115 : vector<1x8xf32> to vector<1x1x8xf32>
    %117 = vector.broadcast %116 : vector<1x1x8xf32> to vector<6x4x8xf32>
    %118 = arith.addf %113, %117 : vector<6x4x8xf32>
    %c0_125 = arith.constant 0 : index
    %c1_126 = arith.constant 1 : index
    %c2_127 = arith.constant 2 : index
    %c0_128 = arith.constant 0 : index
    %c0_129 = arith.constant 0 : index
    %119 = vector.load %arg7[%c0_125, %c1_126, %c2_127, %c0_128, %c0_129] : memref<2x3x4x32x8xf32, #tpu.memory_space<vmem>>, vector<1x1x1x32x8xf32>
    %120 = vector.shape_cast %119 : vector<1x1x1x32x8xf32> to vector<32x8xf32>
    "tpu.trace_start"() <{level = 10 : i32, message = "znd,de->zne"}> : () -> ()
    %cst_130 = arith.constant dense<0.000000e+00> : vector<6x4x8xf32>
    %121 = tpu.matmul %7, %120, %cst_130 {dimension_numbers = #tpu.dot_dimension_numbers<[2], [0], [0, 1], [1], [0, 0, 0, 1, 1, 1], [], []>} : vector<6x4x32xf32>, vector<32x8xf32>, vector<6x4x8xf32> -> vector<6x4x8xf32>
    "tpu.trace_stop"() : () -> ()
    %c0_131 = arith.constant 0 : index
    %c1_132 = arith.constant 1 : index
    %c2_133 = arith.constant 2 : index
    %c0_134 = arith.constant 0 : index
    %c0_135 = arith.constant 0 : index
    %122 = vector.load %arg8[%c0_131, %c1_132, %c2_133, %c0_134, %c0_135] : memref<2x3x4x1x8xf32, #tpu.memory_space<vmem>>, vector<1x1x1x1x8xf32>
    %123 = vector.shape_cast %122 : vector<1x1x1x1x8xf32> to vector<1x8xf32>
    %124 = vector.shape_cast %123 : vector<1x8xf32> to vector<1x1x8xf32>
    %125 = vector.broadcast %124 : vector<1x1x8xf32> to vector<6x4x8xf32>
    %126 = arith.addf %121, %125 : vector<6x4x8xf32>
    %c0_136 = arith.constant 0 : index
    %c2_137 = arith.constant 2 : index
    %c2_138 = arith.constant 2 : index
    %c0_139 = arith.constant 0 : index
    %c0_140 = arith.constant 0 : index
    %127 = vector.load %arg7[%c0_136, %c2_137, %c2_138, %c0_139, %c0_140] : memref<2x3x4x32x8xf32, #tpu.memory_space<vmem>>, vector<1x1x1x32x8xf32>
    %128 = vector.shape_cast %127 : vector<1x1x1x32x8xf32> to vector<32x8xf32>
    "tpu.trace_start"() <{level = 10 : i32, message = "znd,de->zne"}> : () -> ()
    %cst_141 = arith.constant dense<0.000000e+00> : vector<6x4x8xf32>
    %129 = tpu.matmul %7, %128, %cst_141 {dimension_numbers = #tpu.dot_dimension_numbers<[2], [0], [0, 1], [1], [0, 0, 0, 1, 1, 1], [], []>} : vector<6x4x32xf32>, vector<32x8xf32>, vector<6x4x8xf32> -> vector<6x4x8xf32>
    "tpu.trace_stop"() : () -> ()
    %c0_142 = arith.constant 0 : index
    %c2_143 = arith.constant 2 : index
    %c2_144 = arith.constant 2 : index
    %c0_145 = arith.constant 0 : index
    %c0_146 = arith.constant 0 : index
    %130 = vector.load %arg8[%c0_142, %c2_143, %c2_144, %c0_145, %c0_146] : memref<2x3x4x1x8xf32, #tpu.memory_space<vmem>>, vector<1x1x1x1x8xf32>
    %131 = vector.shape_cast %130 : vector<1x1x1x1x8xf32> to vector<1x8xf32>
    %132 = vector.shape_cast %131 : vector<1x8xf32> to vector<1x1x8xf32>
    %133 = vector.broadcast %132 : vector<1x1x8xf32> to vector<6x4x8xf32>
    %134 = arith.addf %129, %133 : vector<6x4x8xf32>
    "tpu.trace_start"() <{level = 10 : i32, message = "zme,zne->zmn"}> : () -> ()
    %cst_147 = arith.constant dense<0.000000e+00> : vector<6x4x4xf32>
    %135 = tpu.matmul %118, %126, %cst_147 {dimension_numbers = #tpu.dot_dimension_numbers<[2], [2], [1], [1], [0, 0, 0, 1, 1, 1], [0], [0]>} : vector<6x4x8xf32>, vector<6x4x8xf32>, vector<6x4x4xf32> -> vector<6x4x4xf32>
    "tpu.trace_stop"() : () -> ()
    %cst_148 = arith.constant 0.353553385 : f32
    %136 = vector.broadcast %cst_148 : f32 to vector<6x4x4xf32>
    %137 = arith.mulf %135, %136 : vector<6x4x4xf32>
    %cst_149 = arith.constant dense<0xFF800000> : vector<6x4xf32>
    %138 = vector.multi_reduction <maximumf>, %137, %cst_149 [2] : vector<6x4x4xf32> to vector<6x4xf32>
    %139 = vector.shape_cast %138 : vector<6x4xf32> to vector<6x4x1xf32>
    %140 = vector.broadcast %139 : vector<6x4x1xf32> to vector<6x4x4xf32>
    %141 = arith.subf %137, %140 : vector<6x4x4xf32>
    %142 = math.exp %141 : vector<6x4x4xf32>
    %cst_150 = arith.constant dense<0.000000e+00> : vector<6x4xf32>
    %143 = vector.multi_reduction <add>, %142, %cst_150 [2] : vector<6x4x4xf32> to vector<6x4xf32>
    %144 = vector.shape_cast %143 : vector<6x4xf32> to vector<6x4x1xf32>
    %145 = tpu.reciprocal %144 {approx = true} : vector<6x4x1xf32> -> vector<6x4x1xf32>
    %146 = vector.broadcast %145 : vector<6x4x1xf32> to vector<6x4x4xf32>
    %147 = arith.mulf %142, %146 : vector<6x4x4xf32>
    "tpu.trace_start"() <{level = 10 : i32, message = "zmn,zne->zme"}> : () -> ()
    %cst_151 = arith.constant dense<0.000000e+00> : vector<6x4x8xf32>
    %148 = tpu.matmul %147, %134, %cst_151 {dimension_numbers = #tpu.dot_dimension_numbers<[2], [1], [1], [2], [0, 0, 0, 1, 1, 2], [0], [0]>} : vector<6x4x4xf32>, vector<6x4x8xf32>, vector<6x4x8xf32> -> vector<6x4x8xf32>
    "tpu.trace_stop"() : () -> ()
    %c0_152 = arith.constant 0 : index
    %c2_153 = arith.constant 2 : index
    %c0_154 = arith.constant 0 : index
    %c0_155 = arith.constant 0 : index
    %149 = vector.load %arg9[%c0_152, %c2_153, %c0_154, %c0_155] : memref<2x4x8x32xf32, #tpu.memory_space<vmem>>, vector<1x1x8x32xf32>
    %150 = vector.shape_cast %149 : vector<1x1x8x32xf32> to vector<8x32xf32>
    "tpu.trace_start"() <{level = 10 : i32, message = "zme,ed->zmd"}> : () -> ()
    %cst_156 = arith.constant dense<0.000000e+00> : vector<6x4x32xf32>
    %151 = tpu.matmul %148, %150, %cst_156 {dimension_numbers = #tpu.dot_dimension_numbers<[2], [0], [0, 1], [1], [0, 0, 0, 1, 1, 1], [], []>} : vector<6x4x8xf32>, vector<8x32xf32>, vector<6x4x32xf32> -> vector<6x4x32xf32>
    "tpu.trace_stop"() : () -> ()
    %152 = arith.addf %110, %151 : vector<6x4x32xf32>
    %c0_157 = arith.constant 0 : index
    %c0_158 = arith.constant 0 : index
    %c3_159 = arith.constant 3 : index
    %c0_160 = arith.constant 0 : index
    %c0_161 = arith.constant 0 : index
    %153 = vector.load %arg7[%c0_157, %c0_158, %c3_159, %c0_160, %c0_161] : memref<2x3x4x32x8xf32, #tpu.memory_space<vmem>>, vector<1x1x1x32x8xf32>
    %154 = vector.shape_cast %153 : vector<1x1x1x32x8xf32> to vector<32x8xf32>
    "tpu.trace_start"() <{level = 10 : i32, message = "zmd,de->zme"}> : () -> ()
    %cst_162 = arith.constant dense<0.000000e+00> : vector<6x4x8xf32>
    %155 = tpu.matmul %13, %154, %cst_162 {dimension_numbers = #tpu.dot_dimension_numbers<[2], [0], [0, 1], [1], [0, 0, 0, 1, 1, 1], [], []>} : vector<6x4x32xf32>, vector<32x8xf32>, vector<6x4x8xf32> -> vector<6x4x8xf32>
    "tpu.trace_stop"() : () -> ()
    %c0_163 = arith.constant 0 : index
    %c0_164 = arith.constant 0 : index
    %c3_165 = arith.constant 3 : index
    %c0_166 = arith.constant 0 : index
    %c0_167 = arith.constant 0 : index
    %156 = vector.load %arg8[%c0_163, %c0_164, %c3_165, %c0_166, %c0_167] : memref<2x3x4x1x8xf32, #tpu.memory_space<vmem>>, vector<1x1x1x1x8xf32>
    %157 = vector.shape_cast %156 : vector<1x1x1x1x8xf32> to vector<1x8xf32>
    %158 = vector.shape_cast %157 : vector<1x8xf32> to vector<1x1x8xf32>
    %159 = vector.broadcast %158 : vector<1x1x8xf32> to vector<6x4x8xf32>
    %160 = arith.addf %155, %159 : vector<6x4x8xf32>
    %c0_168 = arith.constant 0 : index
    %c1_169 = arith.constant 1 : index
    %c3_170 = arith.constant 3 : index
    %c0_171 = arith.constant 0 : index
    %c0_172 = arith.constant 0 : index
    %161 = vector.load %arg7[%c0_168, %c1_169, %c3_170, %c0_171, %c0_172] : memref<2x3x4x32x8xf32, #tpu.memory_space<vmem>>, vector<1x1x1x32x8xf32>
    %162 = vector.shape_cast %161 : vector<1x1x1x32x8xf32> to vector<32x8xf32>
    "tpu.trace_start"() <{level = 10 : i32, message = "znd,de->zne"}> : () -> ()
    %cst_173 = arith.constant dense<0.000000e+00> : vector<6x4x8xf32>
    %163 = tpu.matmul %7, %162, %cst_173 {dimension_numbers = #tpu.dot_dimension_numbers<[2], [0], [0, 1], [1], [0, 0, 0, 1, 1, 1], [], []>} : vector<6x4x32xf32>, vector<32x8xf32>, vector<6x4x8xf32> -> vector<6x4x8xf32>
    "tpu.trace_stop"() : () -> ()
    %c0_174 = arith.constant 0 : index
    %c1_175 = arith.constant 1 : index
    %c3_176 = arith.constant 3 : index
    %c0_177 = arith.constant 0 : index
    %c0_178 = arith.constant 0 : index
    %164 = vector.load %arg8[%c0_174, %c1_175, %c3_176, %c0_177, %c0_178] : memref<2x3x4x1x8xf32, #tpu.memory_space<vmem>>, vector<1x1x1x1x8xf32>
    %165 = vector.shape_cast %164 : vector<1x1x1x1x8xf32> to vector<1x8xf32>
    %166 = vector.shape_cast %165 : vector<1x8xf32> to vector<1x1x8xf32>
    %167 = vector.broadcast %166 : vector<1x1x8xf32> to vector<6x4x8xf32>
    %168 = arith.addf %163, %167 : vector<6x4x8xf32>
    %c0_179 = arith.constant 0 : index
    %c2_180 = arith.constant 2 : index
    %c3_181 = arith.constant 3 : index
    %c0_182 = arith.constant 0 : index
    %c0_183 = arith.constant 0 : index
    %169 = vector.load %arg7[%c0_179, %c2_180, %c3_181, %c0_182, %c0_183] : memref<2x3x4x32x8xf32, #tpu.memory_space<vmem>>, vector<1x1x1x32x8xf32>
    %170 = vector.shape_cast %169 : vector<1x1x1x32x8xf32> to vector<32x8xf32>
    "tpu.trace_start"() <{level = 10 : i32, message = "znd,de->zne"}> : () -> ()
    %cst_184 = arith.constant dense<0.000000e+00> : vector<6x4x8xf32>
    %171 = tpu.matmul %7, %170, %cst_184 {dimension_numbers = #tpu.dot_dimension_numbers<[2], [0], [0, 1], [1], [0, 0, 0, 1, 1, 1], [], []>} : vector<6x4x32xf32>, vector<32x8xf32>, vector<6x4x8xf32> -> vector<6x4x8xf32>
    "tpu.trace_stop"() : () -> ()
    %c0_185 = arith.constant 0 : index
    %c2_186 = arith.constant 2 : index
    %c3_187 = arith.constant 3 : index
    %c0_188 = arith.constant 0 : index
    %c0_189 = arith.constant 0 : index
    %172 = vector.load %arg8[%c0_185, %c2_186, %c3_187, %c0_188, %c0_189] : memref<2x3x4x1x8xf32, #tpu.memory_space<vmem>>, vector<1x1x1x1x8xf32>
    %173 = vector.shape_cast %172 : vector<1x1x1x1x8xf32> to vector<1x8xf32>
    %174 = vector.shape_cast %173 : vector<1x8xf32> to vector<1x1x8xf32>
    %175 = vector.broadcast %174 : vector<1x1x8xf32> to vector<6x4x8xf32>
    %176 = arith.addf %171, %175 : vector<6x4x8xf32>
    "tpu.trace_start"() <{level = 10 : i32, message = "zme,zne->zmn"}> : () -> ()
    %cst_190 = arith.constant dense<0.000000e+00> : vector<6x4x4xf32>
    %177 = tpu.matmul %160, %168, %cst_190 {dimension_numbers = #tpu.dot_dimension_numbers<[2], [2], [1], [1], [0, 0, 0, 1, 1, 1], [0], [0]>} : vector<6x4x8xf32>, vector<6x4x8xf32>, vector<6x4x4xf32> -> vector<6x4x4xf32>
    "tpu.trace_stop"() : () -> ()
    %cst_191 = arith.constant 0.353553385 : f32
    %178 = vector.broadcast %cst_191 : f32 to vector<6x4x4xf32>
    %179 = arith.mulf %177, %178 : vector<6x4x4xf32>
    %cst_192 = arith.constant dense<0xFF800000> : vector<6x4xf32>
    %180 = vector.multi_reduction <maximumf>, %179, %cst_192 [2] : vector<6x4x4xf32> to vector<6x4xf32>
    %181 = vector.shape_cast %180 : vector<6x4xf32> to vector<6x4x1xf32>
    %182 = vector.broadcast %181 : vector<6x4x1xf32> to vector<6x4x4xf32>
    %183 = arith.subf %179, %182 : vector<6x4x4xf32>
    %184 = math.exp %183 : vector<6x4x4xf32>
    %cst_193 = arith.constant dense<0.000000e+00> : vector<6x4xf32>
    %185 = vector.multi_reduction <add>, %184, %cst_193 [2] : vector<6x4x4xf32> to vector<6x4xf32>
    %186 = vector.shape_cast %185 : vector<6x4xf32> to vector<6x4x1xf32>
    %187 = tpu.reciprocal %186 {approx = true} : vector<6x4x1xf32> -> vector<6x4x1xf32>
    %188 = vector.broadcast %187 : vector<6x4x1xf32> to vector<6x4x4xf32>
    %189 = arith.mulf %184, %188 : vector<6x4x4xf32>
    "tpu.trace_start"() <{level = 10 : i32, message = "zmn,zne->zme"}> : () -> ()
    %cst_194 = arith.constant dense<0.000000e+00> : vector<6x4x8xf32>
    %190 = tpu.matmul %189, %176, %cst_194 {dimension_numbers = #tpu.dot_dimension_numbers<[2], [1], [1], [2], [0, 0, 0, 1, 1, 2], [0], [0]>} : vector<6x4x4xf32>, vector<6x4x8xf32>, vector<6x4x8xf32> -> vector<6x4x8xf32>
    "tpu.trace_stop"() : () -> ()
    %c0_195 = arith.constant 0 : index
    %c3_196 = arith.constant 3 : index
    %c0_197 = arith.constant 0 : index
    %c0_198 = arith.constant 0 : index
    %191 = vector.load %arg9[%c0_195, %c3_196, %c0_197, %c0_198] : memref<2x4x8x32xf32, #tpu.memory_space<vmem>>, vector<1x1x8x32xf32>
    %192 = vector.shape_cast %191 : vector<1x1x8x32xf32> to vector<8x32xf32>
    "tpu.trace_start"() <{level = 10 : i32, message = "zme,ed->zmd"}> : () -> ()
    %cst_199 = arith.constant dense<0.000000e+00> : vector<6x4x32xf32>
    %193 = tpu.matmul %190, %192, %cst_199 {dimension_numbers = #tpu.dot_dimension_numbers<[2], [0], [0, 1], [1], [0, 0, 0, 1, 1, 1], [], []>} : vector<6x4x8xf32>, vector<8x32xf32>, vector<6x4x32xf32> -> vector<6x4x32xf32>
    "tpu.trace_stop"() : () -> ()
    %194 = arith.addf %152, %193 : vector<6x4x32xf32>
    %195 = vector.shape_cast %15 : vector<1x32xf32> to vector<1x1x32xf32>
    %196 = vector.broadcast %195 : vector<1x1x32xf32> to vector<6x4x32xf32>
    %197 = arith.addf %194, %196 : vector<6x4x32xf32>
    %198 = arith.addf %13, %197 : vector<6x4x32xf32>
    %cst_200 = arith.constant dense<0.000000e+00> : vector<6x4xf32>
    %199 = vector.multi_reduction <add>, %198, %cst_200 [2] : vector<6x4x32xf32> to vector<6x4xf32>
    %200 = vector.shape_cast %199 : vector<6x4xf32> to vector<6x4x1xf32>
    %cst_201 = arith.constant 3.200000e+01 : f32
    %201 = vector.broadcast %cst_201 : f32 to vector<6x4x1xf32>
    %202 = arith.divf %200, %201 : vector<6x4x1xf32>
    %203 = vector.broadcast %202 : vector<6x4x1xf32> to vector<6x4x32xf32>
    %204 = arith.subf %198, %203 : vector<6x4x32xf32>
    %205 = vector.broadcast %202 : vector<6x4x1xf32> to vector<6x4x32xf32>
    %206 = arith.subf %198, %205 : vector<6x4x32xf32>
    %207 = arith.mulf %204, %206 : vector<6x4x32xf32>
    %cst_202 = arith.constant dense<0.000000e+00> : vector<6x4xf32>
    %208 = vector.multi_reduction <add>, %207, %cst_202 [2] : vector<6x4x32xf32> to vector<6x4xf32>
    %209 = vector.shape_cast %208 : vector<6x4xf32> to vector<6x4x1xf32>
    %cst_203 = arith.constant 3.200000e+01 : f32
    %210 = vector.broadcast %cst_203 : f32 to vector<6x4x1xf32>
    %211 = arith.divf %209, %210 : vector<6x4x1xf32>
    %212 = vector.broadcast %202 : vector<6x4x1xf32> to vector<6x4x32xf32>
    %213 = arith.subf %198, %212 : vector<6x4x32xf32>
    %cst_204 = arith.constant 9.99999974E-6 : f32
    %214 = vector.broadcast %cst_204 : f32 to vector<6x4x1xf32>
    %215 = arith.addf %211, %214 : vector<6x4x1xf32>
    %216 = math.rsqrt %215 : vector<6x4x1xf32>
    %217 = vector.broadcast %216 : vector<6x4x1xf32> to vector<6x4x32xf32>
    %218 = arith.mulf %213, %217 : vector<6x4x32xf32>
    %219 = vector.shape_cast %17 : vector<1x32xf32> to vector<1x1x32xf32>
    %220 = vector.broadcast %219 : vector<1x1x32xf32> to vector<6x4x32xf32>
    %221 = arith.mulf %218, %220 : vector<6x4x32xf32>
    %222 = vector.shape_cast %19 : vector<1x32xf32> to vector<1x1x32xf32>
    %223 = vector.broadcast %222 : vector<1x1x32xf32> to vector<6x4x32xf32>
    %224 = arith.addf %221, %223 : vector<6x4x32xf32>
    %c0_205 = arith.constant 0 : index
    %c0_206 = arith.constant 0 : index
    %c0_207 = arith.constant 0 : index
    %225 = vector.load %arg11[%c0_205, %c0_206, %c0_207] : memref<2x32x64xf32, #tpu.memory_space<vmem>>, vector<1x32x64xf32>
    %226 = vector.shape_cast %225 : vector<1x32x64xf32> to vector<32x64xf32>
    "tpu.trace_start"() <{level = 10 : i32, message = "zmd,di->zmi"}> : () -> ()
    %cst_208 = arith.constant dense<0.000000e+00> : vector<6x4x64xf32>
    %227 = tpu.matmul %224, %226, %cst_208 {dimension_numbers = #tpu.dot_dimension_numbers<[2], [0], [0, 1], [1], [0, 0, 0, 1, 1, 1], [], []>} : vector<6x4x32xf32>, vector<32x64xf32>, vector<6x4x64xf32> -> vector<6x4x64xf32>
    "tpu.trace_stop"() : () -> ()
    %c0_209 = arith.constant 0 : index
    %c0_210 = arith.constant 0 : index
    %c0_211 = arith.constant 0 : index
    %228 = vector.load %arg12[%c0_209, %c0_210, %c0_211] : memref<2x1x64xf32, #tpu.memory_space<vmem>>, vector<1x1x64xf32>
    %229 = vector.shape_cast %228 : vector<1x1x64xf32> to vector<1x64xf32>
    %230 = vector.shape_cast %229 : vector<1x64xf32> to vector<1x1x64xf32>
    %231 = vector.broadcast %230 : vector<1x1x64xf32> to vector<6x4x64xf32>
    %232 = arith.addf %227, %231 : vector<6x4x64xf32>
    %cst_212 = arith.constant 0.000000e+00 : f32
    %233 = vector.broadcast %cst_212 : f32 to vector<6x4x64xf32>
    %234 = arith.maximumf %232, %233 : vector<6x4x64xf32>
    %c0_213 = arith.constant 0 : index
    %c0_214 = arith.constant 0 : index
    %c0_215 = arith.constant 0 : index
    %235 = vector.load %arg13[%c0_213, %c0_214, %c0_215] : memref<2x64x32xf32, #tpu.memory_space<vmem>>, vector<1x64x32xf32>
    %236 = vector.shape_cast %235 : vector<1x64x32xf32> to vector<64x32xf32>
    "tpu.trace_start"() <{level = 10 : i32, message = "zmi,id->zmd"}> : () -> ()
    %cst_216 = arith.constant dense<0.000000e+00> : vector<6x4x32xf32>
    %237 = tpu.matmul %234, %236, %cst_216 {dimension_numbers = #tpu.dot_dimension_numbers<[2], [0], [0, 1], [1], [0, 0, 0, 1, 1, 1], [], []>} : vector<6x4x64xf32>, vector<64x32xf32>, vector<6x4x32xf32> -> vector<6x4x32xf32>
    "tpu.trace_stop"() : () -> ()
    %238 = vector.shape_cast %25 : vector<1x32xf32> to vector<1x1x32xf32>
    %239 = vector.broadcast %238 : vector<1x1x32xf32> to vector<6x4x32xf32>
    %240 = arith.addf %237, %239 : vector<6x4x32xf32>
    %241 = arith.addf %224, %240 : vector<6x4x32xf32>
    %cst_217 = arith.constant dense<0.000000e+00> : vector<6x4xf32>
    %242 = vector.multi_reduction <add>, %241, %cst_217 [2] : vector<6x4x32xf32> to vector<6x4xf32>
    %243 = vector.shape_cast %242 : vector<6x4xf32> to vector<6x4x1xf32>
    %cst_218 = arith.constant 3.200000e+01 : f32
    %244 = vector.broadcast %cst_218 : f32 to vector<6x4x1xf32>
    %245 = arith.divf %243, %244 : vector<6x4x1xf32>
    %246 = vector.broadcast %245 : vector<6x4x1xf32> to vector<6x4x32xf32>
    %247 = arith.subf %241, %246 : vector<6x4x32xf32>
    %248 = vector.broadcast %245 : vector<6x4x1xf32> to vector<6x4x32xf32>
    %249 = arith.subf %241, %248 : vector<6x4x32xf32>
    %250 = arith.mulf %247, %249 : vector<6x4x32xf32>
    %cst_219 = arith.constant dense<0.000000e+00> : vector<6x4xf32>
    %251 = vector.multi_reduction <add>, %250, %cst_219 [2] : vector<6x4x32xf32> to vector<6x4xf32>
    %252 = vector.shape_cast %251 : vector<6x4xf32> to vector<6x4x1xf32>
    %cst_220 = arith.constant 3.200000e+01 : f32
    %253 = vector.broadcast %cst_220 : f32 to vector<6x4x1xf32>
    %254 = arith.divf %252, %253 : vector<6x4x1xf32>
    %255 = vector.broadcast %245 : vector<6x4x1xf32> to vector<6x4x32xf32>
    %256 = arith.subf %241, %255 : vector<6x4x32xf32>
    %cst_221 = arith.constant 9.99999974E-6 : f32
    %257 = vector.broadcast %cst_221 : f32 to vector<6x4x1xf32>
    %258 = arith.addf %254, %257 : vector<6x4x1xf32>
    %259 = math.rsqrt %258 : vector<6x4x1xf32>
    %260 = vector.broadcast %259 : vector<6x4x1xf32> to vector<6x4x32xf32>
    %261 = arith.mulf %256, %260 : vector<6x4x32xf32>
    %262 = vector.shape_cast %21 : vector<1x32xf32> to vector<1x1x32xf32>
    %263 = vector.broadcast %262 : vector<1x1x32xf32> to vector<6x4x32xf32>
    %264 = arith.mulf %261, %263 : vector<6x4x32xf32>
    %265 = vector.shape_cast %23 : vector<1x32xf32> to vector<1x1x32xf32>
    %266 = vector.broadcast %265 : vector<1x1x32xf32> to vector<6x4x32xf32>
    %267 = arith.addf %264, %266 : vector<6x4x32xf32>
    %c1_222 = arith.constant 1 : index
    %c0_223 = arith.constant 0 : index
    %c0_224 = arith.constant 0 : index
    %268 = vector.load %arg10[%c1_222, %c0_223, %c0_224] : memref<2x6x32xf32, #tpu.memory_space<vmem>>, vector<1x1x32xf32>
    %269 = vector.shape_cast %268 : vector<1x1x32xf32> to vector<1x32xf32>
    %c1_225 = arith.constant 1 : index
    %c1_226 = arith.constant 1 : index
    %c0_227 = arith.constant 0 : index
    %270 = vector.load %arg10[%c1_225, %c1_226, %c0_227] : memref<2x6x32xf32, #tpu.memory_space<vmem>>, vector<1x1x32xf32>
    %271 = vector.shape_cast %270 : vector<1x1x32xf32> to vector<1x32xf32>
    %c1_228 = arith.constant 1 : index
    %c2_229 = arith.constant 2 : index
    %c0_230 = arith.constant 0 : index
    %272 = vector.load %arg10[%c1_228, %c2_229, %c0_230] : memref<2x6x32xf32, #tpu.memory_space<vmem>>, vector<1x1x32xf32>
    %273 = vector.shape_cast %272 : vector<1x1x32xf32> to vector<1x32xf32>
    %c1_231 = arith.constant 1 : index
    %c3_232 = arith.constant 3 : index
    %c0_233 = arith.constant 0 : index
    %274 = vector.load %arg10[%c1_231, %c3_232, %c0_233] : memref<2x6x32xf32, #tpu.memory_space<vmem>>, vector<1x1x32xf32>
    %275 = vector.shape_cast %274 : vector<1x1x32xf32> to vector<1x32xf32>
    %c1_234 = arith.constant 1 : index
    %c4_235 = arith.constant 4 : index
    %c0_236 = arith.constant 0 : index
    %276 = vector.load %arg10[%c1_234, %c4_235, %c0_236] : memref<2x6x32xf32, #tpu.memory_space<vmem>>, vector<1x1x32xf32>
    %277 = vector.shape_cast %276 : vector<1x1x32xf32> to vector<1x32xf32>
    %c1_237 = arith.constant 1 : index
    %c5_238 = arith.constant 5 : index
    %c0_239 = arith.constant 0 : index
    %278 = vector.load %arg10[%c1_237, %c5_238, %c0_239] : memref<2x6x32xf32, #tpu.memory_space<vmem>>, vector<1x1x32xf32>
    %279 = vector.shape_cast %278 : vector<1x1x32xf32> to vector<1x32xf32>
    %cst_240 = arith.constant 0.000000e+00 : f32
    %280 = vector.broadcast %cst_240 : f32 to vector<6x4x32xf32>
    %c1_241 = arith.constant 1 : index
    %c0_242 = arith.constant 0 : index
    %c0_243 = arith.constant 0 : index
    %c0_244 = arith.constant 0 : index
    %c0_245 = arith.constant 0 : index
    %281 = vector.load %arg7[%c1_241, %c0_242, %c0_243, %c0_244, %c0_245] : memref<2x3x4x32x8xf32, #tpu.memory_space<vmem>>, vector<1x1x1x32x8xf32>
    %282 = vector.shape_cast %281 : vector<1x1x1x32x8xf32> to vector<32x8xf32>
    "tpu.trace_start"() <{level = 10 : i32, message = "zmd,de->zme"}> : () -> ()
    %cst_246 = arith.constant dense<0.000000e+00> : vector<6x4x8xf32>
    %283 = tpu.matmul %267, %282, %cst_246 {dimension_numbers = #tpu.dot_dimension_numbers<[2], [0], [0, 1], [1], [0, 0, 0, 1, 1, 1], [], []>} : vector<6x4x32xf32>, vector<32x8xf32>, vector<6x4x8xf32> -> vector<6x4x8xf32>
    "tpu.trace_stop"() : () -> ()
    %c1_247 = arith.constant 1 : index
    %c0_248 = arith.constant 0 : index
    %c0_249 = arith.constant 0 : index
    %c0_250 = arith.constant 0 : index
    %c0_251 = arith.constant 0 : index
    %284 = vector.load %arg8[%c1_247, %c0_248, %c0_249, %c0_250, %c0_251] : memref<2x3x4x1x8xf32, #tpu.memory_space<vmem>>, vector<1x1x1x1x8xf32>
    %285 = vector.shape_cast %284 : vector<1x1x1x1x8xf32> to vector<1x8xf32>
    %286 = vector.shape_cast %285 : vector<1x8xf32> to vector<1x1x8xf32>
    %287 = vector.broadcast %286 : vector<1x1x8xf32> to vector<6x4x8xf32>
    %288 = arith.addf %283, %287 : vector<6x4x8xf32>
    %c1_252 = arith.constant 1 : index
    %c1_253 = arith.constant 1 : index
    %c0_254 = arith.constant 0 : index
    %c0_255 = arith.constant 0 : index
    %c0_256 = arith.constant 0 : index
    %289 = vector.load %arg7[%c1_252, %c1_253, %c0_254, %c0_255, %c0_256] : memref<2x3x4x32x8xf32, #tpu.memory_space<vmem>>, vector<1x1x1x32x8xf32>
    %290 = vector.shape_cast %289 : vector<1x1x1x32x8xf32> to vector<32x8xf32>
    "tpu.trace_start"() <{level = 10 : i32, message = "znd,de->zne"}> : () -> ()
    %cst_257 = arith.constant dense<0.000000e+00> : vector<6x4x8xf32>
    %291 = tpu.matmul %7, %290, %cst_257 {dimension_numbers = #tpu.dot_dimension_numbers<[2], [0], [0, 1], [1], [0, 0, 0, 1, 1, 1], [], []>} : vector<6x4x32xf32>, vector<32x8xf32>, vector<6x4x8xf32> -> vector<6x4x8xf32>
    "tpu.trace_stop"() : () -> ()
    %c1_258 = arith.constant 1 : index
    %c1_259 = arith.constant 1 : index
    %c0_260 = arith.constant 0 : index
    %c0_261 = arith.constant 0 : index
    %c0_262 = arith.constant 0 : index
    %292 = vector.load %arg8[%c1_258, %c1_259, %c0_260, %c0_261, %c0_262] : memref<2x3x4x1x8xf32, #tpu.memory_space<vmem>>, vector<1x1x1x1x8xf32>
    %293 = vector.shape_cast %292 : vector<1x1x1x1x8xf32> to vector<1x8xf32>
    %294 = vector.shape_cast %293 : vector<1x8xf32> to vector<1x1x8xf32>
    %295 = vector.broadcast %294 : vector<1x1x8xf32> to vector<6x4x8xf32>
    %296 = arith.addf %291, %295 : vector<6x4x8xf32>
    %c1_263 = arith.constant 1 : index
    %c2_264 = arith.constant 2 : index
    %c0_265 = arith.constant 0 : index
    %c0_266 = arith.constant 0 : index
    %c0_267 = arith.constant 0 : index
    %297 = vector.load %arg7[%c1_263, %c2_264, %c0_265, %c0_266, %c0_267] : memref<2x3x4x32x8xf32, #tpu.memory_space<vmem>>, vector<1x1x1x32x8xf32>
    %298 = vector.shape_cast %297 : vector<1x1x1x32x8xf32> to vector<32x8xf32>
    "tpu.trace_start"() <{level = 10 : i32, message = "znd,de->zne"}> : () -> ()
    %cst_268 = arith.constant dense<0.000000e+00> : vector<6x4x8xf32>
    %299 = tpu.matmul %7, %298, %cst_268 {dimension_numbers = #tpu.dot_dimension_numbers<[2], [0], [0, 1], [1], [0, 0, 0, 1, 1, 1], [], []>} : vector<6x4x32xf32>, vector<32x8xf32>, vector<6x4x8xf32> -> vector<6x4x8xf32>
    "tpu.trace_stop"() : () -> ()
    %c1_269 = arith.constant 1 : index
    %c2_270 = arith.constant 2 : index
    %c0_271 = arith.constant 0 : index
    %c0_272 = arith.constant 0 : index
    %c0_273 = arith.constant 0 : index
    %300 = vector.load %arg8[%c1_269, %c2_270, %c0_271, %c0_272, %c0_273] : memref<2x3x4x1x8xf32, #tpu.memory_space<vmem>>, vector<1x1x1x1x8xf32>
    %301 = vector.shape_cast %300 : vector<1x1x1x1x8xf32> to vector<1x8xf32>
    %302 = vector.shape_cast %301 : vector<1x8xf32> to vector<1x1x8xf32>
    %303 = vector.broadcast %302 : vector<1x1x8xf32> to vector<6x4x8xf32>
    %304 = arith.addf %299, %303 : vector<6x4x8xf32>
    "tpu.trace_start"() <{level = 10 : i32, message = "zme,zne->zmn"}> : () -> ()
    %cst_274 = arith.constant dense<0.000000e+00> : vector<6x4x4xf32>
    %305 = tpu.matmul %288, %296, %cst_274 {dimension_numbers = #tpu.dot_dimension_numbers<[2], [2], [1], [1], [0, 0, 0, 1, 1, 1], [0], [0]>} : vector<6x4x8xf32>, vector<6x4x8xf32>, vector<6x4x4xf32> -> vector<6x4x4xf32>
    "tpu.trace_stop"() : () -> ()
    %cst_275 = arith.constant 0.353553385 : f32
    %306 = vector.broadcast %cst_275 : f32 to vector<6x4x4xf32>
    %307 = arith.mulf %305, %306 : vector<6x4x4xf32>
    %cst_276 = arith.constant dense<0xFF800000> : vector<6x4xf32>
    %308 = vector.multi_reduction <maximumf>, %307, %cst_276 [2] : vector<6x4x4xf32> to vector<6x4xf32>
    %309 = vector.shape_cast %308 : vector<6x4xf32> to vector<6x4x1xf32>
    %310 = vector.broadcast %309 : vector<6x4x1xf32> to vector<6x4x4xf32>
    %311 = arith.subf %307, %310 : vector<6x4x4xf32>
    %312 = math.exp %311 : vector<6x4x4xf32>
    %cst_277 = arith.constant dense<0.000000e+00> : vector<6x4xf32>
    %313 = vector.multi_reduction <add>, %312, %cst_277 [2] : vector<6x4x4xf32> to vector<6x4xf32>
    %314 = vector.shape_cast %313 : vector<6x4xf32> to vector<6x4x1xf32>
    %315 = tpu.reciprocal %314 {approx = true} : vector<6x4x1xf32> -> vector<6x4x1xf32>
    %316 = vector.broadcast %315 : vector<6x4x1xf32> to vector<6x4x4xf32>
    %317 = arith.mulf %312, %316 : vector<6x4x4xf32>
    "tpu.trace_start"() <{level = 10 : i32, message = "zmn,zne->zme"}> : () -> ()
    %cst_278 = arith.constant dense<0.000000e+00> : vector<6x4x8xf32>
    %318 = tpu.matmul %317, %304, %cst_278 {dimension_numbers = #tpu.dot_dimension_numbers<[2], [1], [1], [2], [0, 0, 0, 1, 1, 2], [0], [0]>} : vector<6x4x4xf32>, vector<6x4x8xf32>, vector<6x4x8xf32> -> vector<6x4x8xf32>
    "tpu.trace_stop"() : () -> ()
    %c1_279 = arith.constant 1 : index
    %c0_280 = arith.constant 0 : index
    %c0_281 = arith.constant 0 : index
    %c0_282 = arith.constant 0 : index
    %319 = vector.load %arg9[%c1_279, %c0_280, %c0_281, %c0_282] : memref<2x4x8x32xf32, #tpu.memory_space<vmem>>, vector<1x1x8x32xf32>
    %320 = vector.shape_cast %319 : vector<1x1x8x32xf32> to vector<8x32xf32>
    "tpu.trace_start"() <{level = 10 : i32, message = "zme,ed->zmd"}> : () -> ()
    %cst_283 = arith.constant dense<0.000000e+00> : vector<6x4x32xf32>
    %321 = tpu.matmul %318, %320, %cst_283 {dimension_numbers = #tpu.dot_dimension_numbers<[2], [0], [0, 1], [1], [0, 0, 0, 1, 1, 1], [], []>} : vector<6x4x8xf32>, vector<8x32xf32>, vector<6x4x32xf32> -> vector<6x4x32xf32>
    "tpu.trace_stop"() : () -> ()
    %322 = arith.addf %280, %321 : vector<6x4x32xf32>
    %c1_284 = arith.constant 1 : index
    %c0_285 = arith.constant 0 : index
    %c1_286 = arith.constant 1 : index
    %c0_287 = arith.constant 0 : index
    %c0_288 = arith.constant 0 : index
    %323 = vector.load %arg7[%c1_284, %c0_285, %c1_286, %c0_287, %c0_288] : memref<2x3x4x32x8xf32, #tpu.memory_space<vmem>>, vector<1x1x1x32x8xf32>
    %324 = vector.shape_cast %323 : vector<1x1x1x32x8xf32> to vector<32x8xf32>
    "tpu.trace_start"() <{level = 10 : i32, message = "zmd,de->zme"}> : () -> ()
    %cst_289 = arith.constant dense<0.000000e+00> : vector<6x4x8xf32>
    %325 = tpu.matmul %267, %324, %cst_289 {dimension_numbers = #tpu.dot_dimension_numbers<[2], [0], [0, 1], [1], [0, 0, 0, 1, 1, 1], [], []>} : vector<6x4x32xf32>, vector<32x8xf32>, vector<6x4x8xf32> -> vector<6x4x8xf32>
    "tpu.trace_stop"() : () -> ()
    %c1_290 = arith.constant 1 : index
    %c0_291 = arith.constant 0 : index
    %c1_292 = arith.constant 1 : index
    %c0_293 = arith.constant 0 : index
    %c0_294 = arith.constant 0 : index
    %326 = vector.load %arg8[%c1_290, %c0_291, %c1_292, %c0_293, %c0_294] : memref<2x3x4x1x8xf32, #tpu.memory_space<vmem>>, vector<1x1x1x1x8xf32>
    %327 = vector.shape_cast %326 : vector<1x1x1x1x8xf32> to vector<1x8xf32>
    %328 = vector.shape_cast %327 : vector<1x8xf32> to vector<1x1x8xf32>
    %329 = vector.broadcast %328 : vector<1x1x8xf32> to vector<6x4x8xf32>
    %330 = arith.addf %325, %329 : vector<6x4x8xf32>
    %c1_295 = arith.constant 1 : index
    %c1_296 = arith.constant 1 : index
    %c1_297 = arith.constant 1 : index
    %c0_298 = arith.constant 0 : index
    %c0_299 = arith.constant 0 : index
    %331 = vector.load %arg7[%c1_295, %c1_296, %c1_297, %c0_298, %c0_299] : memref<2x3x4x32x8xf32, #tpu.memory_space<vmem>>, vector<1x1x1x32x8xf32>
    %332 = vector.shape_cast %331 : vector<1x1x1x32x8xf32> to vector<32x8xf32>
    "tpu.trace_start"() <{level = 10 : i32, message = "znd,de->zne"}> : () -> ()
    %cst_300 = arith.constant dense<0.000000e+00> : vector<6x4x8xf32>
    %333 = tpu.matmul %7, %332, %cst_300 {dimension_numbers = #tpu.dot_dimension_numbers<[2], [0], [0, 1], [1], [0, 0, 0, 1, 1, 1], [], []>} : vector<6x4x32xf32>, vector<32x8xf32>, vector<6x4x8xf32> -> vector<6x4x8xf32>
    "tpu.trace_stop"() : () -> ()
    %c1_301 = arith.constant 1 : index
    %c1_302 = arith.constant 1 : index
    %c1_303 = arith.constant 1 : index
    %c0_304 = arith.constant 0 : index
    %c0_305 = arith.constant 0 : index
    %334 = vector.load %arg8[%c1_301, %c1_302, %c1_303, %c0_304, %c0_305] : memref<2x3x4x1x8xf32, #tpu.memory_space<vmem>>, vector<1x1x1x1x8xf32>
    %335 = vector.shape_cast %334 : vector<1x1x1x1x8xf32> to vector<1x8xf32>
    %336 = vector.shape_cast %335 : vector<1x8xf32> to vector<1x1x8xf32>
    %337 = vector.broadcast %336 : vector<1x1x8xf32> to vector<6x4x8xf32>
    %338 = arith.addf %333, %337 : vector<6x4x8xf32>
    %c1_306 = arith.constant 1 : index
    %c2_307 = arith.constant 2 : index
    %c1_308 = arith.constant 1 : index
    %c0_309 = arith.constant 0 : index
    %c0_310 = arith.constant 0 : index
    %339 = vector.load %arg7[%c1_306, %c2_307, %c1_308, %c0_309, %c0_310] : memref<2x3x4x32x8xf32, #tpu.memory_space<vmem>>, vector<1x1x1x32x8xf32>
    %340 = vector.shape_cast %339 : vector<1x1x1x32x8xf32> to vector<32x8xf32>
    "tpu.trace_start"() <{level = 10 : i32, message = "znd,de->zne"}> : () -> ()
    %cst_311 = arith.constant dense<0.000000e+00> : vector<6x4x8xf32>
    %341 = tpu.matmul %7, %340, %cst_311 {dimension_numbers = #tpu.dot_dimension_numbers<[2], [0], [0, 1], [1], [0, 0, 0, 1, 1, 1], [], []>} : vector<6x4x32xf32>, vector<32x8xf32>, vector<6x4x8xf32> -> vector<6x4x8xf32>
    "tpu.trace_stop"() : () -> ()
    %c1_312 = arith.constant 1 : index
    %c2_313 = arith.constant 2 : index
    %c1_314 = arith.constant 1 : index
    %c0_315 = arith.constant 0 : index
    %c0_316 = arith.constant 0 : index
    %342 = vector.load %arg8[%c1_312, %c2_313, %c1_314, %c0_315, %c0_316] : memref<2x3x4x1x8xf32, #tpu.memory_space<vmem>>, vector<1x1x1x1x8xf32>
    %343 = vector.shape_cast %342 : vector<1x1x1x1x8xf32> to vector<1x8xf32>
    %344 = vector.shape_cast %343 : vector<1x8xf32> to vector<1x1x8xf32>
    %345 = vector.broadcast %344 : vector<1x1x8xf32> to vector<6x4x8xf32>
    %346 = arith.addf %341, %345 : vector<6x4x8xf32>
    "tpu.trace_start"() <{level = 10 : i32, message = "zme,zne->zmn"}> : () -> ()
    %cst_317 = arith.constant dense<0.000000e+00> : vector<6x4x4xf32>
    %347 = tpu.matmul %330, %338, %cst_317 {dimension_numbers = #tpu.dot_dimension_numbers<[2], [2], [1], [1], [0, 0, 0, 1, 1, 1], [0], [0]>} : vector<6x4x8xf32>, vector<6x4x8xf32>, vector<6x4x4xf32> -> vector<6x4x4xf32>
    "tpu.trace_stop"() : () -> ()
    %cst_318 = arith.constant 0.353553385 : f32
    %348 = vector.broadcast %cst_318 : f32 to vector<6x4x4xf32>
    %349 = arith.mulf %347, %348 : vector<6x4x4xf32>
    %cst_319 = arith.constant dense<0xFF800000> : vector<6x4xf32>
    %350 = vector.multi_reduction <maximumf>, %349, %cst_319 [2] : vector<6x4x4xf32> to vector<6x4xf32>
    %351 = vector.shape_cast %350 : vector<6x4xf32> to vector<6x4x1xf32>
    %352 = vector.broadcast %351 : vector<6x4x1xf32> to vector<6x4x4xf32>
    %353 = arith.subf %349, %352 : vector<6x4x4xf32>
    %354 = math.exp %353 : vector<6x4x4xf32>
    %cst_320 = arith.constant dense<0.000000e+00> : vector<6x4xf32>
    %355 = vector.multi_reduction <add>, %354, %cst_320 [2] : vector<6x4x4xf32> to vector<6x4xf32>
    %356 = vector.shape_cast %355 : vector<6x4xf32> to vector<6x4x1xf32>
    %357 = tpu.reciprocal %356 {approx = true} : vector<6x4x1xf32> -> vector<6x4x1xf32>
    %358 = vector.broadcast %357 : vector<6x4x1xf32> to vector<6x4x4xf32>
    %359 = arith.mulf %354, %358 : vector<6x4x4xf32>
    "tpu.trace_start"() <{level = 10 : i32, message = "zmn,zne->zme"}> : () -> ()
    %cst_321 = arith.constant dense<0.000000e+00> : vector<6x4x8xf32>
    %360 = tpu.matmul %359, %346, %cst_321 {dimension_numbers = #tpu.dot_dimension_numbers<[2], [1], [1], [2], [0, 0, 0, 1, 1, 2], [0], [0]>} : vector<6x4x4xf32>, vector<6x4x8xf32>, vector<6x4x8xf32> -> vector<6x4x8xf32>
    "tpu.trace_stop"() : () -> ()
    %c1_322 = arith.constant 1 : index
    %c1_323 = arith.constant 1 : index
    %c0_324 = arith.constant 0 : index
    %c0_325 = arith.constant 0 : index
    %361 = vector.load %arg9[%c1_322, %c1_323, %c0_324, %c0_325] : memref<2x4x8x32xf32, #tpu.memory_space<vmem>>, vector<1x1x8x32xf32>
    %362 = vector.shape_cast %361 : vector<1x1x8x32xf32> to vector<8x32xf32>
    "tpu.trace_start"() <{level = 10 : i32, message = "zme,ed->zmd"}> : () -> ()
    %cst_326 = arith.constant dense<0.000000e+00> : vector<6x4x32xf32>
    %363 = tpu.matmul %360, %362, %cst_326 {dimension_numbers = #tpu.dot_dimension_numbers<[2], [0], [0, 1], [1], [0, 0, 0, 1, 1, 1], [], []>} : vector<6x4x8xf32>, vector<8x32xf32>, vector<6x4x32xf32> -> vector<6x4x32xf32>
    "tpu.trace_stop"() : () -> ()
    %364 = arith.addf %322, %363 : vector<6x4x32xf32>
    %c1_327 = arith.constant 1 : index
    %c0_328 = arith.constant 0 : index
    %c2_329 = arith.constant 2 : index
    %c0_330 = arith.constant 0 : index
    %c0_331 = arith.constant 0 : index
    %365 = vector.load %arg7[%c1_327, %c0_328, %c2_329, %c0_330, %c0_331] : memref<2x3x4x32x8xf32, #tpu.memory_space<vmem>>, vector<1x1x1x32x8xf32>
    %366 = vector.shape_cast %365 : vector<1x1x1x32x8xf32> to vector<32x8xf32>
    "tpu.trace_start"() <{level = 10 : i32, message = "zmd,de->zme"}> : () -> ()
    %cst_332 = arith.constant dense<0.000000e+00> : vector<6x4x8xf32>
    %367 = tpu.matmul %267, %366, %cst_332 {dimension_numbers = #tpu.dot_dimension_numbers<[2], [0], [0, 1], [1], [0, 0, 0, 1, 1, 1], [], []>} : vector<6x4x32xf32>, vector<32x8xf32>, vector<6x4x8xf32> -> vector<6x4x8xf32>
    "tpu.trace_stop"() : () -> ()
    %c1_333 = arith.constant 1 : index
    %c0_334 = arith.constant 0 : index
    %c2_335 = arith.constant 2 : index
    %c0_336 = arith.constant 0 : index
    %c0_337 = arith.constant 0 : index
    %368 = vector.load %arg8[%c1_333, %c0_334, %c2_335, %c0_336, %c0_337] : memref<2x3x4x1x8xf32, #tpu.memory_space<vmem>>, vector<1x1x1x1x8xf32>
    %369 = vector.shape_cast %368 : vector<1x1x1x1x8xf32> to vector<1x8xf32>
    %370 = vector.shape_cast %369 : vector<1x8xf32> to vector<1x1x8xf32>
    %371 = vector.broadcast %370 : vector<1x1x8xf32> to vector<6x4x8xf32>
    %372 = arith.addf %367, %371 : vector<6x4x8xf32>
    %c1_338 = arith.constant 1 : index
    %c1_339 = arith.constant 1 : index
    %c2_340 = arith.constant 2 : index
    %c0_341 = arith.constant 0 : index
    %c0_342 = arith.constant 0 : index
    %373 = vector.load %arg7[%c1_338, %c1_339, %c2_340, %c0_341, %c0_342] : memref<2x3x4x32x8xf32, #tpu.memory_space<vmem>>, vector<1x1x1x32x8xf32>
    %374 = vector.shape_cast %373 : vector<1x1x1x32x8xf32> to vector<32x8xf32>
    "tpu.trace_start"() <{level = 10 : i32, message = "znd,de->zne"}> : () -> ()
    %cst_343 = arith.constant dense<0.000000e+00> : vector<6x4x8xf32>
    %375 = tpu.matmul %7, %374, %cst_343 {dimension_numbers = #tpu.dot_dimension_numbers<[2], [0], [0, 1], [1], [0, 0, 0, 1, 1, 1], [], []>} : vector<6x4x32xf32>, vector<32x8xf32>, vector<6x4x8xf32> -> vector<6x4x8xf32>
    "tpu.trace_stop"() : () -> ()
    %c1_344 = arith.constant 1 : index
    %c1_345 = arith.constant 1 : index
    %c2_346 = arith.constant 2 : index
    %c0_347 = arith.constant 0 : index
    %c0_348 = arith.constant 0 : index
    %376 = vector.load %arg8[%c1_344, %c1_345, %c2_346, %c0_347, %c0_348] : memref<2x3x4x1x8xf32, #tpu.memory_space<vmem>>, vector<1x1x1x1x8xf32>
    %377 = vector.shape_cast %376 : vector<1x1x1x1x8xf32> to vector<1x8xf32>
    %378 = vector.shape_cast %377 : vector<1x8xf32> to vector<1x1x8xf32>
    %379 = vector.broadcast %378 : vector<1x1x8xf32> to vector<6x4x8xf32>
    %380 = arith.addf %375, %379 : vector<6x4x8xf32>
    %c1_349 = arith.constant 1 : index
    %c2_350 = arith.constant 2 : index
    %c2_351 = arith.constant 2 : index
    %c0_352 = arith.constant 0 : index
    %c0_353 = arith.constant 0 : index
    %381 = vector.load %arg7[%c1_349, %c2_350, %c2_351, %c0_352, %c0_353] : memref<2x3x4x32x8xf32, #tpu.memory_space<vmem>>, vector<1x1x1x32x8xf32>
    %382 = vector.shape_cast %381 : vector<1x1x1x32x8xf32> to vector<32x8xf32>
    "tpu.trace_start"() <{level = 10 : i32, message = "znd,de->zne"}> : () -> ()
    %cst_354 = arith.constant dense<0.000000e+00> : vector<6x4x8xf32>
    %383 = tpu.matmul %7, %382, %cst_354 {dimension_numbers = #tpu.dot_dimension_numbers<[2], [0], [0, 1], [1], [0, 0, 0, 1, 1, 1], [], []>} : vector<6x4x32xf32>, vector<32x8xf32>, vector<6x4x8xf32> -> vector<6x4x8xf32>
    "tpu.trace_stop"() : () -> ()
    %c1_355 = arith.constant 1 : index
    %c2_356 = arith.constant 2 : index
    %c2_357 = arith.constant 2 : index
    %c0_358 = arith.constant 0 : index
    %c0_359 = arith.constant 0 : index
    %384 = vector.load %arg8[%c1_355, %c2_356, %c2_357, %c0_358, %c0_359] : memref<2x3x4x1x8xf32, #tpu.memory_space<vmem>>, vector<1x1x1x1x8xf32>
    %385 = vector.shape_cast %384 : vector<1x1x1x1x8xf32> to vector<1x8xf32>
    %386 = vector.shape_cast %385 : vector<1x8xf32> to vector<1x1x8xf32>
    %387 = vector.broadcast %386 : vector<1x1x8xf32> to vector<6x4x8xf32>
    %388 = arith.addf %383, %387 : vector<6x4x8xf32>
    "tpu.trace_start"() <{level = 10 : i32, message = "zme,zne->zmn"}> : () -> ()
    %cst_360 = arith.constant dense<0.000000e+00> : vector<6x4x4xf32>
    %389 = tpu.matmul %372, %380, %cst_360 {dimension_numbers = #tpu.dot_dimension_numbers<[2], [2], [1], [1], [0, 0, 0, 1, 1, 1], [0], [0]>} : vector<6x4x8xf32>, vector<6x4x8xf32>, vector<6x4x4xf32> -> vector<6x4x4xf32>
    "tpu.trace_stop"() : () -> ()
    %cst_361 = arith.constant 0.353553385 : f32
    %390 = vector.broadcast %cst_361 : f32 to vector<6x4x4xf32>
    %391 = arith.mulf %389, %390 : vector<6x4x4xf32>
    %cst_362 = arith.constant dense<0xFF800000> : vector<6x4xf32>
    %392 = vector.multi_reduction <maximumf>, %391, %cst_362 [2] : vector<6x4x4xf32> to vector<6x4xf32>
    %393 = vector.shape_cast %392 : vector<6x4xf32> to vector<6x4x1xf32>
    %394 = vector.broadcast %393 : vector<6x4x1xf32> to vector<6x4x4xf32>
    %395 = arith.subf %391, %394 : vector<6x4x4xf32>
    %396 = math.exp %395 : vector<6x4x4xf32>
    %cst_363 = arith.constant dense<0.000000e+00> : vector<6x4xf32>
    %397 = vector.multi_reduction <add>, %396, %cst_363 [2] : vector<6x4x4xf32> to vector<6x4xf32>
    %398 = vector.shape_cast %397 : vector<6x4xf32> to vector<6x4x1xf32>
    %399 = tpu.reciprocal %398 {approx = true} : vector<6x4x1xf32> -> vector<6x4x1xf32>
    %400 = vector.broadcast %399 : vector<6x4x1xf32> to vector<6x4x4xf32>
    %401 = arith.mulf %396, %400 : vector<6x4x4xf32>
    "tpu.trace_start"() <{level = 10 : i32, message = "zmn,zne->zme"}> : () -> ()
    %cst_364 = arith.constant dense<0.000000e+00> : vector<6x4x8xf32>
    %402 = tpu.matmul %401, %388, %cst_364 {dimension_numbers = #tpu.dot_dimension_numbers<[2], [1], [1], [2], [0, 0, 0, 1, 1, 2], [0], [0]>} : vector<6x4x4xf32>, vector<6x4x8xf32>, vector<6x4x8xf32> -> vector<6x4x8xf32>
    "tpu.trace_stop"() : () -> ()
    %c1_365 = arith.constant 1 : index
    %c2_366 = arith.constant 2 : index
    %c0_367 = arith.constant 0 : index
    %c0_368 = arith.constant 0 : index
    %403 = vector.load %arg9[%c1_365, %c2_366, %c0_367, %c0_368] : memref<2x4x8x32xf32, #tpu.memory_space<vmem>>, vector<1x1x8x32xf32>
    %404 = vector.shape_cast %403 : vector<1x1x8x32xf32> to vector<8x32xf32>
    "tpu.trace_start"() <{level = 10 : i32, message = "zme,ed->zmd"}> : () -> ()
    %cst_369 = arith.constant dense<0.000000e+00> : vector<6x4x32xf32>
    %405 = tpu.matmul %402, %404, %cst_369 {dimension_numbers = #tpu.dot_dimension_numbers<[2], [0], [0, 1], [1], [0, 0, 0, 1, 1, 1], [], []>} : vector<6x4x8xf32>, vector<8x32xf32>, vector<6x4x32xf32> -> vector<6x4x32xf32>
    "tpu.trace_stop"() : () -> ()
    %406 = arith.addf %364, %405 : vector<6x4x32xf32>
    %c1_370 = arith.constant 1 : index
    %c0_371 = arith.constant 0 : index
    %c3_372 = arith.constant 3 : index
    %c0_373 = arith.constant 0 : index
    %c0_374 = arith.constant 0 : index
    %407 = vector.load %arg7[%c1_370, %c0_371, %c3_372, %c0_373, %c0_374] : memref<2x3x4x32x8xf32, #tpu.memory_space<vmem>>, vector<1x1x1x32x8xf32>
    %408 = vector.shape_cast %407 : vector<1x1x1x32x8xf32> to vector<32x8xf32>
    "tpu.trace_start"() <{level = 10 : i32, message = "zmd,de->zme"}> : () -> ()
    %cst_375 = arith.constant dense<0.000000e+00> : vector<6x4x8xf32>
    %409 = tpu.matmul %267, %408, %cst_375 {dimension_numbers = #tpu.dot_dimension_numbers<[2], [0], [0, 1], [1], [0, 0, 0, 1, 1, 1], [], []>} : vector<6x4x32xf32>, vector<32x8xf32>, vector<6x4x8xf32> -> vector<6x4x8xf32>
    "tpu.trace_stop"() : () -> ()
    %c1_376 = arith.constant 1 : index
    %c0_377 = arith.constant 0 : index
    %c3_378 = arith.constant 3 : index
    %c0_379 = arith.constant 0 : index
    %c0_380 = arith.constant 0 : index
    %410 = vector.load %arg8[%c1_376, %c0_377, %c3_378, %c0_379, %c0_380] : memref<2x3x4x1x8xf32, #tpu.memory_space<vmem>>, vector<1x1x1x1x8xf32>
    %411 = vector.shape_cast %410 : vector<1x1x1x1x8xf32> to vector<1x8xf32>
    %412 = vector.shape_cast %411 : vector<1x8xf32> to vector<1x1x8xf32>
    %413 = vector.broadcast %412 : vector<1x1x8xf32> to vector<6x4x8xf32>
    %414 = arith.addf %409, %413 : vector<6x4x8xf32>
    %c1_381 = arith.constant 1 : index
    %c1_382 = arith.constant 1 : index
    %c3_383 = arith.constant 3 : index
    %c0_384 = arith.constant 0 : index
    %c0_385 = arith.constant 0 : index
    %415 = vector.load %arg7[%c1_381, %c1_382, %c3_383, %c0_384, %c0_385] : memref<2x3x4x32x8xf32, #tpu.memory_space<vmem>>, vector<1x1x1x32x8xf32>
    %416 = vector.shape_cast %415 : vector<1x1x1x32x8xf32> to vector<32x8xf32>
    "tpu.trace_start"() <{level = 10 : i32, message = "znd,de->zne"}> : () -> ()
    %cst_386 = arith.constant dense<0.000000e+00> : vector<6x4x8xf32>
    %417 = tpu.matmul %7, %416, %cst_386 {dimension_numbers = #tpu.dot_dimension_numbers<[2], [0], [0, 1], [1], [0, 0, 0, 1, 1, 1], [], []>} : vector<6x4x32xf32>, vector<32x8xf32>, vector<6x4x8xf32> -> vector<6x4x8xf32>
    "tpu.trace_stop"() : () -> ()
    %c1_387 = arith.constant 1 : index
    %c1_388 = arith.constant 1 : index
    %c3_389 = arith.constant 3 : index
    %c0_390 = arith.constant 0 : index
    %c0_391 = arith.constant 0 : index
    %418 = vector.load %arg8[%c1_387, %c1_388, %c3_389, %c0_390, %c0_391] : memref<2x3x4x1x8xf32, #tpu.memory_space<vmem>>, vector<1x1x1x1x8xf32>
    %419 = vector.shape_cast %418 : vector<1x1x1x1x8xf32> to vector<1x8xf32>
    %420 = vector.shape_cast %419 : vector<1x8xf32> to vector<1x1x8xf32>
    %421 = vector.broadcast %420 : vector<1x1x8xf32> to vector<6x4x8xf32>
    %422 = arith.addf %417, %421 : vector<6x4x8xf32>
    %c1_392 = arith.constant 1 : index
    %c2_393 = arith.constant 2 : index
    %c3_394 = arith.constant 3 : index
    %c0_395 = arith.constant 0 : index
    %c0_396 = arith.constant 0 : index
    %423 = vector.load %arg7[%c1_392, %c2_393, %c3_394, %c0_395, %c0_396] : memref<2x3x4x32x8xf32, #tpu.memory_space<vmem>>, vector<1x1x1x32x8xf32>
    %424 = vector.shape_cast %423 : vector<1x1x1x32x8xf32> to vector<32x8xf32>
    "tpu.trace_start"() <{level = 10 : i32, message = "znd,de->zne"}> : () -> ()
    %cst_397 = arith.constant dense<0.000000e+00> : vector<6x4x8xf32>
    %425 = tpu.matmul %7, %424, %cst_397 {dimension_numbers = #tpu.dot_dimension_numbers<[2], [0], [0, 1], [1], [0, 0, 0, 1, 1, 1], [], []>} : vector<6x4x32xf32>, vector<32x8xf32>, vector<6x4x8xf32> -> vector<6x4x8xf32>
    "tpu.trace_stop"() : () -> ()
    %c1_398 = arith.constant 1 : index
    %c2_399 = arith.constant 2 : index
    %c3_400 = arith.constant 3 : index
    %c0_401 = arith.constant 0 : index
    %c0_402 = arith.constant 0 : index
    %426 = vector.load %arg8[%c1_398, %c2_399, %c3_400, %c0_401, %c0_402] : memref<2x3x4x1x8xf32, #tpu.memory_space<vmem>>, vector<1x1x1x1x8xf32>
    %427 = vector.shape_cast %426 : vector<1x1x1x1x8xf32> to vector<1x8xf32>
    %428 = vector.shape_cast %427 : vector<1x8xf32> to vector<1x1x8xf32>
    %429 = vector.broadcast %428 : vector<1x1x8xf32> to vector<6x4x8xf32>
    %430 = arith.addf %425, %429 : vector<6x4x8xf32>
    "tpu.trace_start"() <{level = 10 : i32, message = "zme,zne->zmn"}> : () -> ()
    %cst_403 = arith.constant dense<0.000000e+00> : vector<6x4x4xf32>
    %431 = tpu.matmul %414, %422, %cst_403 {dimension_numbers = #tpu.dot_dimension_numbers<[2], [2], [1], [1], [0, 0, 0, 1, 1, 1], [0], [0]>} : vector<6x4x8xf32>, vector<6x4x8xf32>, vector<6x4x4xf32> -> vector<6x4x4xf32>
    "tpu.trace_stop"() : () -> ()
    %cst_404 = arith.constant 0.353553385 : f32
    %432 = vector.broadcast %cst_404 : f32 to vector<6x4x4xf32>
    %433 = arith.mulf %431, %432 : vector<6x4x4xf32>
    %cst_405 = arith.constant dense<0xFF800000> : vector<6x4xf32>
    %434 = vector.multi_reduction <maximumf>, %433, %cst_405 [2] : vector<6x4x4xf32> to vector<6x4xf32>
    %435 = vector.shape_cast %434 : vector<6x4xf32> to vector<6x4x1xf32>
    %436 = vector.broadcast %435 : vector<6x4x1xf32> to vector<6x4x4xf32>
    %437 = arith.subf %433, %436 : vector<6x4x4xf32>
    %438 = math.exp %437 : vector<6x4x4xf32>
    %cst_406 = arith.constant dense<0.000000e+00> : vector<6x4xf32>
    %439 = vector.multi_reduction <add>, %438, %cst_406 [2] : vector<6x4x4xf32> to vector<6x4xf32>
    %440 = vector.shape_cast %439 : vector<6x4xf32> to vector<6x4x1xf32>
    %441 = tpu.reciprocal %440 {approx = true} : vector<6x4x1xf32> -> vector<6x4x1xf32>
    %442 = vector.broadcast %441 : vector<6x4x1xf32> to vector<6x4x4xf32>
    %443 = arith.mulf %438, %442 : vector<6x4x4xf32>
    "tpu.trace_start"() <{level = 10 : i32, message = "zmn,zne->zme"}> : () -> ()
    %cst_407 = arith.constant dense<0.000000e+00> : vector<6x4x8xf32>
    %444 = tpu.matmul %443, %430, %cst_407 {dimension_numbers = #tpu.dot_dimension_numbers<[2], [1], [1], [2], [0, 0, 0, 1, 1, 2], [0], [0]>} : vector<6x4x4xf32>, vector<6x4x8xf32>, vector<6x4x8xf32> -> vector<6x4x8xf32>
    "tpu.trace_stop"() : () -> ()
    %c1_408 = arith.constant 1 : index
    %c3_409 = arith.constant 3 : index
    %c0_410 = arith.constant 0 : index
    %c0_411 = arith.constant 0 : index
    %445 = vector.load %arg9[%c1_408, %c3_409, %c0_410, %c0_411] : memref<2x4x8x32xf32, #tpu.memory_space<vmem>>, vector<1x1x8x32xf32>
    %446 = vector.shape_cast %445 : vector<1x1x8x32xf32> to vector<8x32xf32>
    "tpu.trace_start"() <{level = 10 : i32, message = "zme,ed->zmd"}> : () -> ()
    %cst_412 = arith.constant dense<0.000000e+00> : vector<6x4x32xf32>
    %447 = tpu.matmul %444, %446, %cst_412 {dimension_numbers = #tpu.dot_dimension_numbers<[2], [0], [0, 1], [1], [0, 0, 0, 1, 1, 1], [], []>} : vector<6x4x8xf32>, vector<8x32xf32>, vector<6x4x32xf32> -> vector<6x4x32xf32>
    "tpu.trace_stop"() : () -> ()
    %448 = arith.addf %406, %447 : vector<6x4x32xf32>
    %449 = vector.shape_cast %269 : vector<1x32xf32> to vector<1x1x32xf32>
    %450 = vector.broadcast %449 : vector<1x1x32xf32> to vector<6x4x32xf32>
    %451 = arith.addf %448, %450 : vector<6x4x32xf32>
    %452 = arith.addf %267, %451 : vector<6x4x32xf32>
    %cst_413 = arith.constant dense<0.000000e+00> : vector<6x4xf32>
    %453 = vector.multi_reduction <add>, %452, %cst_413 [2] : vector<6x4x32xf32> to vector<6x4xf32>
    %454 = vector.shape_cast %453 : vector<6x4xf32> to vector<6x4x1xf32>
    %cst_414 = arith.constant 3.200000e+01 : f32
    %455 = vector.broadcast %cst_414 : f32 to vector<6x4x1xf32>
    %456 = arith.divf %454, %455 : vector<6x4x1xf32>
    %457 = vector.broadcast %456 : vector<6x4x1xf32> to vector<6x4x32xf32>
    %458 = arith.subf %452, %457 : vector<6x4x32xf32>
    %459 = vector.broadcast %456 : vector<6x4x1xf32> to vector<6x4x32xf32>
    %460 = arith.subf %452, %459 : vector<6x4x32xf32>
    %461 = arith.mulf %458, %460 : vector<6x4x32xf32>
    %cst_415 = arith.constant dense<0.000000e+00> : vector<6x4xf32>
    %462 = vector.multi_reduction <add>, %461, %cst_415 [2] : vector<6x4x32xf32> to vector<6x4xf32>
    %463 = vector.shape_cast %462 : vector<6x4xf32> to vector<6x4x1xf32>
    %cst_416 = arith.constant 3.200000e+01 : f32
    %464 = vector.broadcast %cst_416 : f32 to vector<6x4x1xf32>
    %465 = arith.divf %463, %464 : vector<6x4x1xf32>
    %466 = vector.broadcast %456 : vector<6x4x1xf32> to vector<6x4x32xf32>
    %467 = arith.subf %452, %466 : vector<6x4x32xf32>
    %cst_417 = arith.constant 9.99999974E-6 : f32
    %468 = vector.broadcast %cst_417 : f32 to vector<6x4x1xf32>
    %469 = arith.addf %465, %468 : vector<6x4x1xf32>
    %470 = math.rsqrt %469 : vector<6x4x1xf32>
    %471 = vector.broadcast %470 : vector<6x4x1xf32> to vector<6x4x32xf32>
    %472 = arith.mulf %467, %471 : vector<6x4x32xf32>
    %473 = vector.shape_cast %271 : vector<1x32xf32> to vector<1x1x32xf32>
    %474 = vector.broadcast %473 : vector<1x1x32xf32> to vector<6x4x32xf32>
    %475 = arith.mulf %472, %474 : vector<6x4x32xf32>
    %476 = vector.shape_cast %273 : vector<1x32xf32> to vector<1x1x32xf32>
    %477 = vector.broadcast %476 : vector<1x1x32xf32> to vector<6x4x32xf32>
    %478 = arith.addf %475, %477 : vector<6x4x32xf32>
    %c1_418 = arith.constant 1 : index
    %c0_419 = arith.constant 0 : index
    %c0_420 = arith.constant 0 : index
    %479 = vector.load %arg11[%c1_418, %c0_419, %c0_420] : memref<2x32x64xf32, #tpu.memory_space<vmem>>, vector<1x32x64xf32>
    %480 = vector.shape_cast %479 : vector<1x32x64xf32> to vector<32x64xf32>
    "tpu.trace_start"() <{level = 10 : i32, message = "zmd,di->zmi"}> : () -> ()
    %cst_421 = arith.constant dense<0.000000e+00> : vector<6x4x64xf32>
    %481 = tpu.matmul %478, %480, %cst_421 {dimension_numbers = #tpu.dot_dimension_numbers<[2], [0], [0, 1], [1], [0, 0, 0, 1, 1, 1], [], []>} : vector<6x4x32xf32>, vector<32x64xf32>, vector<6x4x64xf32> -> vector<6x4x64xf32>
    "tpu.trace_stop"() : () -> ()
    %c1_422 = arith.constant 1 : index
    %c0_423 = arith.constant 0 : index
    %c0_424 = arith.constant 0 : index
    %482 = vector.load %arg12[%c1_422, %c0_423, %c0_424] : memref<2x1x64xf32, #tpu.memory_space<vmem>>, vector<1x1x64xf32>
    %483 = vector.shape_cast %482 : vector<1x1x64xf32> to vector<1x64xf32>
    %484 = vector.shape_cast %483 : vector<1x64xf32> to vector<1x1x64xf32>
    %485 = vector.broadcast %484 : vector<1x1x64xf32> to vector<6x4x64xf32>
    %486 = arith.addf %481, %485 : vector<6x4x64xf32>
    %cst_425 = arith.constant 0.000000e+00 : f32
    %487 = vector.broadcast %cst_425 : f32 to vector<6x4x64xf32>
    %488 = arith.maximumf %486, %487 : vector<6x4x64xf32>
    %c1_426 = arith.constant 1 : index
    %c0_427 = arith.constant 0 : index
    %c0_428 = arith.constant 0 : index
    %489 = vector.load %arg13[%c1_426, %c0_427, %c0_428] : memref<2x64x32xf32, #tpu.memory_space<vmem>>, vector<1x64x32xf32>
    %490 = vector.shape_cast %489 : vector<1x64x32xf32> to vector<64x32xf32>
    "tpu.trace_start"() <{level = 10 : i32, message = "zmi,id->zmd"}> : () -> ()
    %cst_429 = arith.constant dense<0.000000e+00> : vector<6x4x32xf32>
    %491 = tpu.matmul %488, %490, %cst_429 {dimension_numbers = #tpu.dot_dimension_numbers<[2], [0], [0, 1], [1], [0, 0, 0, 1, 1, 1], [], []>} : vector<6x4x64xf32>, vector<64x32xf32>, vector<6x4x32xf32> -> vector<6x4x32xf32>
    "tpu.trace_stop"() : () -> ()
    %492 = vector.shape_cast %279 : vector<1x32xf32> to vector<1x1x32xf32>
    %493 = vector.broadcast %492 : vector<1x1x32xf32> to vector<6x4x32xf32>
    %494 = arith.addf %491, %493 : vector<6x4x32xf32>
    %495 = arith.addf %478, %494 : vector<6x4x32xf32>
    %cst_430 = arith.constant dense<0.000000e+00> : vector<6x4xf32>
    %496 = vector.multi_reduction <add>, %495, %cst_430 [2] : vector<6x4x32xf32> to vector<6x4xf32>
    %497 = vector.shape_cast %496 : vector<6x4xf32> to vector<6x4x1xf32>
    %cst_431 = arith.constant 3.200000e+01 : f32
    %498 = vector.broadcast %cst_431 : f32 to vector<6x4x1xf32>
    %499 = arith.divf %497, %498 : vector<6x4x1xf32>
    %500 = vector.broadcast %499 : vector<6x4x1xf32> to vector<6x4x32xf32>
    %501 = arith.subf %495, %500 : vector<6x4x32xf32>
    %502 = vector.broadcast %499 : vector<6x4x1xf32> to vector<6x4x32xf32>
    %503 = arith.subf %495, %502 : vector<6x4x32xf32>
    %504 = arith.mulf %501, %503 : vector<6x4x32xf32>
    %cst_432 = arith.constant dense<0.000000e+00> : vector<6x4xf32>
    %505 = vector.multi_reduction <add>, %504, %cst_432 [2] : vector<6x4x32xf32> to vector<6x4xf32>
    %506 = vector.shape_cast %505 : vector<6x4xf32> to vector<6x4x1xf32>
    %cst_433 = arith.constant 3.200000e+01 : f32
    %507 = vector.broadcast %cst_433 : f32 to vector<6x4x1xf32>
    %508 = arith.divf %506, %507 : vector<6x4x1xf32>
    %509 = vector.broadcast %499 : vector<6x4x1xf32> to vector<6x4x32xf32>
    %510 = arith.subf %495, %509 : vector<6x4x32xf32>
    %cst_434 = arith.constant 9.99999974E-6 : f32
    %511 = vector.broadcast %cst_434 : f32 to vector<6x4x1xf32>
    %512 = arith.addf %508, %511 : vector<6x4x1xf32>
    %513 = math.rsqrt %512 : vector<6x4x1xf32>
    %514 = vector.broadcast %513 : vector<6x4x1xf32> to vector<6x4x32xf32>
    %515 = arith.mulf %510, %514 : vector<6x4x32xf32>
    %516 = vector.shape_cast %275 : vector<1x32xf32> to vector<1x1x32xf32>
    %517 = vector.broadcast %516 : vector<1x1x32xf32> to vector<6x4x32xf32>
    %518 = arith.mulf %515, %517 : vector<6x4x32xf32>
    %519 = vector.shape_cast %277 : vector<1x32xf32> to vector<1x1x32xf32>
    %520 = vector.broadcast %519 : vector<1x1x32xf32> to vector<6x4x32xf32>
    %521 = arith.addf %518, %520 : vector<6x4x32xf32>
    %c0_435 = arith.constant 0 : index
    %c0_436 = arith.constant 0 : index
    %522 = vector.load %arg14[%c0_435, %c0_436] : memref<32x2xf32, #tpu.memory_space<vmem>>, vector<32x2xf32>
    "tpu.trace_start"() <{level = 10 : i32, message = "zmd,df->zmf"}> : () -> ()
    %cst_437 = arith.constant dense<0.000000e+00> : vector<6x4x2xf32>
    %523 = tpu.matmul %521, %522, %cst_437 {dimension_numbers = #tpu.dot_dimension_numbers<[2], [0], [0, 1], [1], [0, 0, 0, 1, 1, 1], [], []>} : vector<6x4x32xf32>, vector<32x2xf32>, vector<6x4x2xf32> -> vector<6x4x2xf32>
    "tpu.trace_stop"() : () -> ()
    %c0_438 = arith.constant 0 : index
    %c0_439 = arith.constant 0 : index
    %524 = vector.load %arg15[%c0_438, %c0_439] : memref<1x2xf32, #tpu.memory_space<vmem>>, vector<1x2xf32>
    %525 = vector.shape_cast %524 : vector<1x2xf32> to vector<1x1x2xf32>
    %526 = vector.broadcast %525 : vector<1x1x2xf32> to vector<6x4x2xf32>
    %527 = arith.addf %523, %526 : vector<6x4x2xf32>
    %c0_440 = arith.constant 0 : index
    %c0_441 = arith.constant 0 : index
    %c0_442 = arith.constant 0 : index
    %528 = vector.load %arg16[%c0_440, %c0_441, %c0_442] : memref<6x4x2xf32, #tpu.memory_space<vmem>>, vector<6x4x2xf32>
    tpu.vector_store %arg16[%c0_440, %c0_441, %c0_442], %527 {strides = array<i32>} : memref<6x4x2xf32, #tpu.memory_space<vmem>>, vector<6x4x2xf32>,
    %c0_443 = arith.constant 0 : index
    %c0_444 = arith.constant 0 : index
    %c0_445 = arith.constant 0 : index
    %529 = vector.load %arg3[%c0_443, %c0_444, %c0_445] : memref<6x4x2xf32, #tpu.memory_space<vmem>>, vector<6x4x2xf32>
    %530 = arith.subf %527, %529 : vector<6x4x2xf32>
    %531 = math.absf %530 : vector<6x4x2xf32>
    %cst_446 = arith.constant dense<0.000000e+00> : vector<6x4xf32>
    %532 = vector.multi_reduction <add>, %531, %cst_446 [2] : vector<6x4x2xf32> to vector<6x4xf32>
    %533 = vector.shape_cast %532 : vector<6x4xf32> to vector<6x4x1xf32>
    %cst_447 = arith.constant dense<0.000000e+00> : vector<1xf32>
    %534 = vector.multi_reduction <add>, %533, %cst_447 [0, 1] : vector<6x4x1xf32> to vector<1xf32>
    %535 = vector.shape_cast %534 : vector<1xf32> to vector<1x1x1xf32>
    %c0_448 = arith.constant 0 : index
    %c0_449 = arith.constant 0 : index
    %c0_450 = arith.constant 0 : index
    %536 = vector.load %arg17[%c0_448, %c0_449, %c0_450] : memref<1x1x1xf32, #tpu.memory_space<vmem>>, vector<1x1x1xf32>
    tpu.vector_store %arg17[%c0_448, %c0_449, %c0_450], %535 {strides = array<i32>} : memref<1x1x1xf32, #tpu.memory_space<vmem>>, vector<1x1x1xf32>,
    %537 = arith.mulf %530, %530 : vector<6x4x2xf32>
    %cst_451 = arith.constant dense<0.000000e+00> : vector<6x4xf32>
    %538 = vector.multi_reduction <add>, %537, %cst_451 [2] : vector<6x4x2xf32> to vector<6x4xf32>
    %539 = vector.shape_cast %538 : vector<6x4xf32> to vector<6x4x1xf32>
    %540 = math.sqrt %539 : vector<6x4x1xf32>
    %cst_452 = arith.constant dense<0.000000e+00> : vector<1xf32>
    %541 = vector.multi_reduction <add>, %540, %cst_452 [0, 1] : vector<6x4x1xf32> to vector<1xf32>
    %542 = vector.shape_cast %541 : vector<1xf32> to vector<1x1x1xf32>
    %c0_453 = arith.constant 0 : index
    %c0_454 = arith.constant 0 : index
    %c0_455 = arith.constant 0 : index
    %543 = vector.load %arg18[%c0_453, %c0_454, %c0_455] : memref<1x1x1xf32, #tpu.memory_space<vmem>>, vector<1x1x1xf32>
    tpu.vector_store %arg18[%c0_453, %c0_454, %c0_455], %542 {strides = array<i32>} : memref<1x1x1xf32, #tpu.memory_space<vmem>>, vector<1x1x1xf32>,
    return
  }
  func.func @transform_0(%arg0: i32) -> (i32, i32, i32) {
    %c0_i32 = arith.constant 0 : i32
    %c0_i32_0 = arith.constant 0 : i32
    %c0_i32_1 = arith.constant 0 : i32
    return %arg0, %c0_i32, %c0_i32_0 : i32, i32, i32
  }
  func.func @transform_1(%arg0: i32) -> (i32, i32, i32) {
    %c0_i32 = arith.constant 0 : i32
    %c0_i32_0 = arith.constant 0 : i32
    %c0_i32_1 = arith.constant 0 : i32
    return %arg0, %c0_i32, %c0_i32_0 : i32, i32, i32
  }
  func.func @transform_2(%arg0: i32) -> (i32, i32, i32) {
    %c0_i32 = arith.constant 0 : i32
    %c0_i32_0 = arith.constant 0 : i32
    %c0_i32_1 = arith.constant 0 : i32
    return %arg0, %c0_i32, %c0_i32_0 : i32, i32, i32
  }
  func.func @transform_3(%arg0: i32) -> (i32, i32) {
    %c0_i32 = arith.constant 0 : i32
    %c0_i32_0 = arith.constant 0 : i32
    %c0_i32_1 = arith.constant 0 : i32
    return %c0_i32, %c0_i32_0 : i32, i32
  }
  func.func @transform_4(%arg0: i32) -> (i32, i32) {
    %c0_i32 = arith.constant 0 : i32
    %c0_i32_0 = arith.constant 0 : i32
    %c0_i32_1 = arith.constant 0 : i32
    return %c0_i32, %c0_i32_0 : i32, i32
  }
  func.func @transform_5(%arg0: i32) -> (i32, i32) {
    %c0_i32 = arith.constant 0 : i32
    %c0_i32_0 = arith.constant 0 : i32
    %c0_i32_1 = arith.constant 0 : i32
    return %c0_i32, %c0_i32_0 : i32, i32
  }
  func.func @transform_6(%arg0: i32) -> (i32, i32, i32, i32, i32) {
    %c0_i32 = arith.constant 0 : i32
    %c0_i32_0 = arith.constant 0 : i32
    %c0_i32_1 = arith.constant 0 : i32
    %c0_i32_2 = arith.constant 0 : i32
    %c0_i32_3 = arith.constant 0 : i32
    %c0_i32_4 = arith.constant 0 : i32
    return %c0_i32, %c0_i32_0, %c0_i32_1, %c0_i32_2, %c0_i32_3 : i32, i32, i32, i32, i32
  }
  func.func @transform_7(%arg0: i32) -> (i32, i32, i32, i32, i32) {
    %c0_i32 = arith.constant 0 : i32
    %c0_i32_0 = arith.constant 0 : i32
    %c0_i32_1 = arith.constant 0 : i32
    %c0_i32_2 = arith.constant 0 : i32
    %c0_i32_3 = arith.constant 0 : i32
    %c0_i32_4 = arith.constant 0 : i32
    return %c0_i32, %c0_i32_0, %c0_i32_1, %c0_i32_2, %c0_i32_3 : i32, i32, i32, i32, i32
  }
  func.func @transform_8(%arg0: i32) -> (i32, i32, i32, i32) {
    %c0_i32 = arith.constant 0 : i32
    %c0_i32_0 = arith.constant 0 : i32
    %c0_i32_1 = arith.constant 0 : i32
    %c0_i32_2 = arith.constant 0 : i32
    %c0_i32_3 = arith.constant 0 : i32
    return %c0_i32, %c0_i32_0, %c0_i32_1, %c0_i32_2 : i32, i32, i32, i32
  }
  func.func @transform_9(%arg0: i32) -> (i32, i32, i32) {
    %c0_i32 = arith.constant 0 : i32
    %c0_i32_0 = arith.constant 0 : i32
    %c0_i32_1 = arith.constant 0 : i32
    %c0_i32_2 = arith.constant 0 : i32
    return %c0_i32, %c0_i32_0, %c0_i32_1 : i32, i32, i32
  }
  func.func @transform_10(%arg0: i32) -> (i32, i32, i32) {
    %c0_i32 = arith.constant 0 : i32
    %c0_i32_0 = arith.constant 0 : i32
    %c0_i32_1 = arith.constant 0 : i32
    %c0_i32_2 = arith.constant 0 : i32
    return %c0_i32, %c0_i32_0, %c0_i32_1 : i32, i32, i32
  }
  func.func @transform_11(%arg0: i32) -> (i32, i32, i32) {
    %c0_i32 = arith.constant 0 : i32
    %c0_i32_0 = arith.constant 0 : i32
    %c0_i32_1 = arith.constant 0 : i32
    %c0_i32_2 = arith.constant 0 : i32
    return %c0_i32, %c0_i32_0, %c0_i32_1 : i32, i32, i32
  }
  func.func @transform_12(%arg0: i32) -> (i32, i32, i32) {
    %c0_i32 = arith.constant 0 : i32
    %c0_i32_0 = arith.constant 0 : i32
    %c0_i32_1 = arith.constant 0 : i32
    %c0_i32_2 = arith.constant 0 : i32
    return %c0_i32, %c0_i32_0, %c0_i32_1 : i32, i32, i32
  }
  func.func @transform_13(%arg0: i32) -> (i32, i32) {
    %c0_i32 = arith.constant 0 : i32
    %c0_i32_0 = arith.constant 0 : i32
    %c0_i32_1 = arith.constant 0 : i32
    return %c0_i32, %c0_i32_0 : i32, i32
  }
  func.func @transform_14(%arg0: i32) -> (i32, i32) {
    %c0_i32 = arith.constant 0 : i32
    %c0_i32_0 = arith.constant 0 : i32
    %c0_i32_1 = arith.constant 0 : i32
    return %c0_i32, %c0_i32_0 : i32, i32
  }
  func.func @transform_15(%arg0: i32) -> (i32, i32, i32) {
    %c0_i32 = arith.constant 0 : i32
    %c0_i32_0 = arith.constant 0 : i32
    %c0_i32_1 = arith.constant 0 : i32
    return %arg0, %c0_i32, %c0_i32_0 : i32, i32, i32
  }
  func.func @transform_16(%arg0: i32) -> (i32, i32, i32) {
    %c0_i32 = arith.constant 0 : i32
    %c0_i32_0 = arith.constant 0 : i32
    %c0_i32_1 = arith.constant 0 : i32
    return %arg0, %c0_i32, %c0_i32_0 : i32, i32, i32
  }
  func.func @transform_17(%arg0: i32) -> (i32, i32, i32) {
    %c0_i32 = arith.constant 0 : i32
    %c0_i32_0 = arith.constant 0 : i32
    %c0_i32_1 = arith.constant 0 : i32
    return %arg0, %c0_i32, %c0_i32_0 : i32, i32, i32
  }
}

</mosaic_0001>

<bundles_post_ra>
// kernel: tpu_custom_call.1
= control target key start
LH: loop header
LB: loop body
LE: loop exit
PB: predicated region body
PF: predicated region fallthrough
CT: control target
= control target key end

     0   :  { %s15616_s24 = smov 0   ;;  %s17895_s0 = inlined_call_operand.vmem [shape: f32[12,4,18], index: 0, kind: input, shape index: {}]   ;;  %s17896_s1 = inlined_call_operand.vmem [shape: f32[12,4,16], index: 1, kind: input, shape index: {}]   ;;  %s17897_s2 = inlined_call_operand.vmem [shape: f32[12,4,2], index: 2, kind: input, shape index: {}]   ;;  %s17898_s3 = inlined_call_operand.vmem [shape: f32[18,32], index: 3, kind: input, shape index: {}]   ;;  %s17899_s4 = inlined_call_operand.vmem [shape: f32[16,32], index: 4, kind: input, shape index: {}]   ;;  %s17900_s5 = inlined_call_operand.vmem [shape: f32[2,32], index: 5, kind: input, shape index: {}]   ;;  %s17901_s6 = inlined_call_operand.vmem [shape: f32[2,3,4,32,8], index: 6, kind: input, shape index: {}]   ;;  %s17902_s7 = inlined_call_operand.vmem [shape: f32[2,3,4,1,8], index: 7, kind: input, shape index: {}]   ;;  %s17903_s8 = inlined_call_operand.vmem [shape: f32[2,4,8,32], index: 8, kind: input, shape index: {}]   ;;  %s17904_s9 = inlined_call_operand.vmem [shape: f32[2,6,32], index: 9, kind: input, shape index: {}]   ;;  %s17905_s10 = inlined_call_operand.vmem [shape: f32[2,32,64], index: 10, kind: input, shape index: {}]   ;;  %s17906_s11 = inlined_call_operand.vmem [shape: f32[2,1,64], index: 11, kind: input, shape index: {}]   ;;  %s17907_s12 = inlined_call_operand.vmem [shape: f32[2,64,32], index: 12, kind: input, shape index: {}]   ;;  %s17908_s13 = inlined_call_operand.vmem [shape: f32[32,2], index: 13, kind: input, shape index: {}]   ;;  %s17909_s14 = inlined_call_operand.vmem [shape: f32[1,2], index: 14, kind: input, shape index: {}]   ;;  %s17910_s15 = inlined_call_operand.vmem [shape: f32[12,4,2], index: 15, kind: output, shape index: {0}]   ;;  %s17911_s16 = inlined_call_operand.vmem [shape: f32[2,1,1], index: 16, kind: output, shape index: {1}]   ;;  %s17912_s17 = inlined_call_operand.vmem [shape: f32[2,1,1], index: 17, kind: output, shape index: {2}]  }
   0x1   :  { %17913 = sst [smem:[#allocation2_spill]] %s17895_s0 }
   0x2   :  { %17914 = sst [smem:[#allocation3_spill]] %s17896_s1 }
   0x3 LB: > { %s15622_s25 = sadd.s32 4294967295, %s15522_s24   ;;  %p13198_p0 = scmp.ge.s32.totalorder %s15522_s24, 1  ;;  %s15522_s24 = sphi %s15616_s24, %s28_s24  }
   0x4   : > { %p515_p1 = scmp.lt.s32.totalorder %s15522_s24, 3 }
   0x6   : > { %p516_p2 = pnand %p13198_p0, %p515_p1 }
   0x7   : > { %s583_s18 = smul.u32 (!%p516_p2), 6, %s15622_s25  ;;  %s17915_s27 = sld [smem:[#allocation2_spill]] (!%p516_p2) }
   0x8   : > { %519 = sbr.rel (%p516_p2) target bundleno = 9960 (0x26e8), region = 80  ;;  %s17916_s30 = sld [smem:[#allocation3_spill]] (!%p516_p2) }
   0x9   : > { %p584_p3 = scmp.lt.s32.totalorder (!%p516_p2), %s583_s18, 11  ;;  %p607_p4 = scmp.lt.s32.totalorder (!%p516_p2), %s15622_s25, 1 }
   0xd   : > { %v627_v0 = vld [vmem:[%s17898_s3 + $0x10] sm:$0x3]  ;;  %vm652_vm0 = vcmask 1041408   ;;  %v737_v1 = vld [vmem:[%s17899_s4 + $0x8] sm:$0xff]  ;;  %v15524_v2 = vmov 0.0   ;;  %v736_v4 = vld [vmem:[%s17899_s4] sm:$0xff] }
   0xe   : > { %14143 = vmatprep.subr.mxu0 %v15524_v2  ;;  %14158 = vmatprep.subr.mxu1 %v15524_v2  ;;  %v626_v3 = vld [vmem:[%s17898_s3 + $0x8] sm:$0xff]  ;;  %v625_v5 = vld [vmem:[%s17898_s3] sm:$0xff]  ;;  %vm15525_vm1 = vmmov 0   ;;  %s17918_s18 = smov (!%p584_p3, %s583_s18), 11  ;;  %vm645_vm2 = vcmask 146432   ;;  %v860_v6 = vld [vmem:[%s17901_s6 + $0x18] sm:$0xff] }
   0xf   : > { %14144 = vmatpush3.msk.msra.mxu0 %vm652_vm0, %v627_v0  ;;  %14159 = vmatpush3.msra.mxu1 %v737_v1  ;;  %s15651_s22 = sshll.u32 %s17918_s18, 2  ;;  %vm755_vm3 = vcmask 130048   ;;  %v13219_v8 = vld [vmem:[%s17901_s6 + $0x98] sm:$0xff]  ;;  %v859_v12 = vld [vmem:[%s17901_s6 + $0x10] sm:$0xff]  ;;  %v858_v16 = vld [vmem:[%s17901_s6 + $0x8] sm:$0xff]  ;;  %vm869_vm4 = vcmask 261120  }
  0x10   : > { %14145 = vmatprep.subr.mxu0 %v15524_v2  ;;  %14160 = vmatprep.subr.mxu1 %v15524_v2  ;;  %s587_s28 = scalar_lea.vmem %s17915_s27, %s15651_s22  ;;  %s593_s19 = scalar_lea.vmem %s17916_s30, %s15651_s22  ;;  %v13218_v14 = vld [vmem:[%s17901_s6 + $0x90] sm:$0xff]  ;;  %v13217_v17 = vld [vmem:[%s17901_s6 + $0x88] sm:$0xff]  ;;  %v857_v18 = vld [vmem:[%s17901_s6] sm:$0xff]  ;;  %vm1171_vm5 = vcmask 64512   ;;  %vm1693_vm6 = vcmask 1043456   ;;  %vm1622_vm7 = vcmask 27648  }
  0x11   : > { %14146 = vmatpush3.msra.mxu0 %v626_v3  ;;  %14149 = vmatprep.mubr.msk.f32.mxu0 %vm15525_vm1, %v15524_v2  ;;  %v15258_v7 = vld [vmem:[%s587_s28] sm:$0xff]   ;;  %v15260_v10 = vld [vmem:[%s587_s28 + $0x8] sm:$0xff]   ;;  %v15262_v13 = vld [vmem:[%s587_s28 + $0x10] sm:$0xff]   ;;  %vm1689_vm8 = vcmask 31744   ;;  %vm6381_vm9 = vcmask 257024   ;;  %vm6627_vm10 = vcmask 523264   ;;  %s17811_s1 = scalar_lea.vmem %s17897_s2, %s15651_s22  ;;  %s17817_s21 = scalar_lea.vmem %s17910_s15, %s15651_s22 }
  0x12   : > { %14147 = vmatprep.subr.mxu0 %v15524_v2  ;;  %14161 = vmatpush3.msra.mxu1 %v736_v4  ;;  %v15259_v9 = vld [vmem:[%s593_s19] sm:$0xff]   ;;  %v15261_v11 = vld [vmem:[%s593_s19 + $0x8] sm:$0xff]   ;;  %v15263_v15 = vld [vmem:[%s593_s19 + $0x10] sm:$0xff]   ;;  %vm12918_vm11 = vcmask 11264   ;;  %s17920_s25 = smov (!%p607_p4, %s15622_s25), 1 }
  0x13   : > { %14148 = vmatpush3.msra.mxu0 %v625_v5  ;;  %14162 = vmatprep.mubr.msk.f32.mxu1 %vm15525_vm1, %v15524_v2  ;;  %v13216_v19 = vld [vmem:[%s17901_s6 + $0x80] sm:$0xff]  ;;  %v13228_v29 = vld [vmem:[%s17901_s6 + $0x118] sm:$0xff]  ;;  %v13227_v32 = vld [vmem:[%s17901_s6 + $0x110] sm:$0xff]  ;;  %s609_s26 = scalar_lea.vmem %s17911_s16, %s17920_s25  ;;  %s612_s28 = scalar_lea.vmem %s17912_s17, %s17920_s25 }
  0x14   : > { %14171 = vmatprep.subr.mxu1 %v15524_v2  ;;  %14188 = vmatprep.subr.mxu0 %v15524_v2  ;;  %v13203_v20 = vld [vmem:[%s17900_s5] ss:$0 sm:$0xff]  ;;  %v13208_v21 = vld [vmem:[%s17900_s5 + $0x1] ss:$0 sm:$0xff]  ;;  %v13226_v38 = vld [vmem:[%s17901_s6 + $0x108] sm:$0xff] }
  0x15   : > { %14150 = vmatmul.mubr.msk.f32.vlgmr.msra.gmra.mxu0 %vm645_vm2, %v15258_v7  ;;  %14163 = vmatmul.mubr.msk.f32.vlgmr.msra.gmra.mxu1 %vm755_vm3, %v15259_v9  ;;  %v643_v22 = vcombine.low %v13203_v20, %v13203_v20  ;;  %v753_v23 = vcombine.low %v13208_v21, %v13208_v21  ;;  %v13225_v44 = vld [vmem:[%s17901_s6 + $0x100] sm:$0xff]  ;;  %v13230_v0 = vld [vmem:[%s17902_s7 + $0x8] ss:$0 sm:$0xff] }
  0x16   : > { %14152 = vmatprep.mubr.msk.f32.mxu0 %vm15525_vm1, %v15524_v2  ;;  %14165 = vmatprep.mubr.msk.f32.mxu1 %vm15525_vm1, %v15524_v2  ;;  %v13221_v46 = vld [vmem:[%s17902_s7 + $0x4] ss:$0 sm:$0xff]  ;;  %v13212_v47 = vld [vmem:[%s17902_s7] ss:$0 sm:$0xff]  ;;  %v1083_v9 = vcombine.low %v13230_v0, %v13230_v0 }
  0x17   : > { %14172 = vmatpush3.msra.mxu1 %v860_v6  ;;  %14189 = vmatpush3.msra.mxu0 %v13219_v8  ;;  %v974_v48 = vcombine.low %v13221_v46, %v13221_v46  ;;  %v867_v49 = vcombine.low %v13212_v47, %v13212_v47 }
  0x18   : > { %14173 = vmatprep.subr.mxu1 %v15524_v2  ;;  %14190 = vmatprep.subr.mxu0 %v15524_v2 }
  0x19   : > { %14153 = vmatmul.mubr.msk.f32.gmra.mxu0 %vm645_vm2, %v15260_v10  ;;  %14166 = vmatmul.mubr.msk.f32.gmra.mxu1 %vm755_vm3, %v15261_v11 }
  0x1a   : > { %14155 = vmatprep.mubr.msk.f32.mxu0 %vm15525_vm1, %v15524_v2  ;;  %14168 = vmatprep.mubr.msk.f32.mxu1 %vm15525_vm1, %v15524_v2 }
  0x1b   : > { %14174 = vmatpush3.msra.mxu1 %v859_v12  ;;  %14191 = vmatpush3.msra.mxu0 %v13218_v14 }
  0x1c   : > { %14175 = vmatprep.subr.mxu1 %v15524_v2  ;;  %14192 = vmatprep.subr.mxu0 %v15524_v2 }
  0x1d   : > { %14156 = vmatmul.mubr.msk.f32.gmra.mxu0 %vm645_vm2, %v15262_v13  ;;  %14169 = vmatmul.mubr.msk.f32.gmra.mxu1 %vm755_vm3, %v15263_v15 }
  0x1e   : > { %14196 = vmatprep.mubr.msk.f32.mxu0 %vm15525_vm1, %v15524_v2  ;;  %14179 = vmatprep.mubr.msk.f32.mxu1 %vm15525_vm1, %v15524_v2 }
  0x1f   : > { %14176 = vmatpush3.msra.mxu1 %v858_v16  ;;  %14193 = vmatpush3.msra.mxu0 %v13217_v17 }
  0x20   : > { %14177 = vmatprep.subr.mxu1 %v15524_v2  ;;  %14194 = vmatprep.subr.mxu0 %v15524_v2 }
  0x21   : > { %14178 = vmatpush3.msra.mxu1 %v857_v18  ;;  %14195 = vmatpush3.msra.mxu0 %v13216_v19 }
  0x22   : > { %14205 = vmatprep.subr.mxu1 %v15524_v2  ;;  %14222 = vmatprep.subr.mxu0 %v15524_v2 }
  0xd5   : > { %v722_v24 = vpop.f32.mrf.mxu0  ;;  %v828_v26 = vpop.f32.mrf.mxu1 }
  0xd6   : > { %v15719_v25 = vadd.f32 %v722_v24, %v643_v22  ;;  %v15721_v27 = vadd.f32 %v828_v26, %v753_v23 }
  0xd7   : > { %v14151_v28 = vpop.f32.mrf.mxu0  ;;  %v14164_v30 = vpop.f32.mrf.mxu1 }
  0xd8   : > { %14197 = vmatmul.mubr.msk.f32.vlgmr.msra.gmra.mxu0 %vm869_vm4, %v15719_v25  ;;  %14180 = vmatmul.mubr.msk.f32.vlgmr.msra.gmra.mxu1 %vm869_vm4, %v15721_v27 }
  0xd9   : > { %v727_v31 = vpop.f32.mrf.mxu0  ;;  %14199 = vmatprep.mubr.msk.f32.mxu0 %vm15525_vm1, %v15524_v2  ;;  %v833_v34 = vpop.f32.mrf.mxu1  ;;  %14182 = vmatprep.mubr.msk.f32.mxu1 %vm15525_vm1, %v15524_v2 }
  0xda   : > { %v15735_v33 = vadd.f32 %v727_v31, %v643_v22  ;;  %14206 = vmatpush3.msra.mxu1 %v13228_v29  ;;  %v15739_v35 = vadd.f32 %v833_v34, %v753_v23 }
  0xdb   : > { %v14154_v36 = vpop.f32.mrf.mxu0  ;;  %14207 = vmatprep.subr.mxu1 %v15524_v2  ;;  %v14167_v37 = vpop.f32.mrf.mxu1 }
  0xdc   : > { %14200 = vmatmul.mubr.msk.f32.gmra.mxu0 %vm869_vm4, %v15735_v33  ;;  %14208 = vmatpush3.msra.mxu1 %v13227_v32 }
  0xdd   : > { %14183 = vmatmul.mubr.msk.f32.gmra.mxu1 %vm869_vm4, %v15739_v35  ;;  %v732_v39 = vpop.f32.mrf.mxu0  ;;  %14202 = vmatprep.mubr.msk.f32.mxu0 %vm15525_vm1, %v15524_v2  ;;  %v838_v41 = vpop.f32.mrf.mxu1 }
  0xde   : > { %v15751_v40 = vadd.f32 %v732_v39, %v643_v22  ;;  %14185 = vmatprep.mubr.msk.f32.mxu1 %vm15525_vm1, %v15524_v2  ;;  %14209 = vmatprep.subr.mxu1 %v15524_v2  ;;  %v15756_v42 = vadd.f32 %v838_v41, %v753_v23 }
  0xdf   : > { %v14157_v43 = vpop.f32.mrf.mxu0  ;;  %14210 = vmatpush3.msra.mxu1 %v13226_v38  ;;  %v14170_v45 = vpop.f32.mrf.mxu1 }
  0xe0   : > { %14203 = vmatmul.mubr.msk.f32.gmra.mxu0 %vm869_vm4, %v15751_v40  ;;  %14211 = vmatprep.subr.mxu1 %v15524_v2 }
  0xe1   : > { %14186 = vmatmul.mubr.msk.f32.gmra.mxu1 %vm869_vm4, %v15756_v42  ;;  %14224 = vmatprep.mubr.msk.f32.mxu0 %vm15525_vm1, %v15524_v2 }
  0xe2   : > { %14212 = vmatpush3.msra.mxu1 %v13225_v44  ;;  %14213 = vmatprep.mubr.msk.f32.mxu1 %vm15525_vm1, %v15524_v2 }
  0xe3   : > { %14237 = vmatprep.subr.mxu1 %v15524_v2 }
  0xe5   : > { %14214 = vmatmul.mubr.msk.f32.vlgmr.msra.gmra.mxu1 %vm869_vm4, %v15719_v25 }
  0xe6   : > { %14216 = vmatprep.mubr.msk.f32.mxu1 %vm15525_vm1, %v15524_v2 }
  0xe9   : > { %14217 = vmatmul.mubr.msk.f32.gmra.mxu1 %vm869_vm4, %v15735_v33 }
  0xea   : > { %14219 = vmatprep.mubr.msk.f32.mxu1 %vm15525_vm1, %v15524_v2 }
  0xed   : > { %14220 = vmatmul.mubr.msk.f32.gmra.mxu1 %vm869_vm4, %v15751_v40 }
  0xee   : > { %14239 = vmatprep.mubr.msk.f32.mxu1 %vm15525_vm1, %v15524_v2 }
 0x198   : > { %v1051_v50 = vpop.f32.mrf.mxu0  ;;  %v942_v51 = vpop.f32.mrf.mxu1 }
 0x199   : > { %v1052_v52 = vadd.f32 %v1051_v50, %v974_v48  ;;  %v943_v53 = vadd.f32 %v942_v51, %v867_v49 }
 0x19a   : > { %v14198_v54 = vpop.f32.mrf.mxu0  ;;  %v14181_v55 = vpop.f32.mrf.mxu1 }
 0x19b   : > { %14223 = vmatpush3.xpose.msk.msra.mxu0 %vm1171_vm5, %v1052_v52  ;;  %v1068_v57 = vcombine.high %v1052_v52, %v1052_v52  ;;  %v959_v1 = vcombine.high %v943_v53, %v943_v53 }
 0x19c   : > { %v1056_v56 = vpop.f32.mrf.mxu0  ;;  %14227 = vmatprep.subr.mxu0 %v15524_v2 }
 0x19d   : > { %v947_v58 = vpop.f32.mrf.mxu1  ;;  %v1057_v59 = vadd.f32 %v1056_v56, %v974_v48 }
 0x19e   : > { %v948_v60 = vadd.f32 %v947_v58, %v867_v49  ;;  %v14201_v61 = vpop.f32.mrf.mxu0  ;;  %14225 = vmatmul.mubr.msk.f32.vlgmr.msra.gmra.mxu0 %vm1171_vm5, %v943_v53 }
 0x19f   : > { %v1069_v62 = vcombine.high %v1057_v59, %v1057_v59  ;;  %v14184_v63 = vpop.f32.mrf.mxu1  ;;  %14228 = vmatpush3.xpose.msk.msra.mxu0 %vm1171_vm5, %v1068_v57  ;;  %14229 = vmatprep.mubr.msk.f32.mxu0 %vm15525_vm1, %v15524_v2 }
 0x1a0   : > { %v960_v3 = vcombine.high %v948_v60, %v948_v60  ;;  %v1061_v4 = vpop.f32.mrf.mxu0  ;;  %14232 = vmatprep.subr.mxu0 %v15524_v2 }
 0x1a1   : > { %v952_v5 = vpop.f32.mrf.mxu1  ;;  %v1062_v6 = vadd.f32 %v1061_v4, %v974_v48  ;;  %14238 = vmatpush3.xpose.msk.msra.mxu1 %vm1171_vm5, %v1069_v62 }
 0x1a2   : > { %v953_v7 = vadd.f32 %v952_v5, %v867_v49  ;;  %14230 = vmatmul.mubr.msk.f32.vlgmr.msra.gmra.mxu0 %vm1171_vm5, %v959_v1  ;;  %v14204_v8 = vpop.f32.mrf.mxu0  ;;  %14247 = vmatprep.subr.mxu1 %v15524_v2 }
 0x1a3   : > { %v1070_v10 = vcombine.high %v1062_v6, %v1062_v6  ;;  %v14187_v11 = vpop.f32.mrf.mxu1  ;;  %14233 = vmatpush3.xpose.msk.msra.mxu0 %vm1171_vm5, %v1057_v59  ;;  %14234 = vmatprep.mubr.msk.f32.mxu0 %vm15525_vm1, %v15524_v2 }
 0x1a4   : > { %v961_v12 = vcombine.high %v953_v7, %v953_v7  ;;  %14240 = vmatmul.mubr.msk.f32.vlgmr.msra.gmra.mxu1 %vm1171_vm5, %v960_v3  ;;  %14242 = vmatprep.subr.mxu0 %v15524_v2 }
 0x1a5   : > { %v1151_v13 = vpop.f32.mrf.mxu1  ;;  %14248 = vmatpush3.xpose.msk.msra.mxu1 %vm1171_vm5, %v1070_v10  ;;  %14249 = vmatprep.mubr.msk.f32.mxu1 %vm15525_vm1, %v15524_v2 }
 0x1a6   : > { %v1152_v14 = vadd.f32 %v1151_v13, %v1083_v9  ;;  %14235 = vmatmul.mubr.msk.f32.vlgmr.msra.gmra.mxu0 %vm1171_vm5, %v948_v60  ;;  %14257 = vmatprep.subr.mxu1 %v15524_v2 }
 0x1a7   : > { %v14215_v15 = vpop.f32.mrf.mxu1  ;;  %14243 = vmatpush3.xpose.msk.msra.mxu0 %vm1171_vm5, %v1062_v6  ;;  %14244 = vmatprep.mubr.msk.f32.mxu0 %vm15525_vm1, %v15524_v2 }
 0x1a8   : > { %v1168_v16 = vcombine.high %v1152_v14, %v1152_v14  ;;  %14250 = vmatmul.mubr.msk.f32.vlgmr.msra.gmra.mxu1 %vm1171_vm5, %v961_v12  ;;  %14252 = vmatprep.subr.mxu0 %v15524_v2 }
 0x1a9   : > { %v1156_v17 = vpop.f32.mrf.mxu1  ;;  %14259 = vmatprep.mubr.msk.f32.mxu1 %vm15525_vm1, %v15524_v2 }
 0x1aa   : > { %v15819_v18 = vadd.f32 %v1156_v17, %v1083_v9  ;;  %14258 = vmatpush3.msk.msra.mxu1 %vm1693_vm6, %v1168_v16  ;;  %14245 = vmatmul.mubr.msk.f32.vlgmr.msra.gmra.mxu0 %vm1171_vm5, %v953_v7 }
 0x1ab   : > { %v14218_v19 = vpop.f32.mrf.mxu1  ;;  %14253 = vmatpush3.msk.msra.mxu0 %vm1693_vm6, %v1152_v14  ;;  %14267 = vmatprep.subr.mxu1 %v15524_v2 }
 0x1ac   : > { %14254 = vmatprep.mubr.msk.f32.mxu0 %vm15525_vm1, %v15524_v2  ;;  %14262 = vmatprep.subr.mxu0 %v15524_v2 }
 0x1ad   : > { %v1161_v20 = vpop.f32.mrf.mxu1 }
 0x1ae   : > { %v15828_v21 = vadd.f32 %v1161_v20, %v1083_v9 }
 0x1af   : > { %v14221_v22 = vpop.f32.mrf.mxu1 }
 0x25e   : > { %v1242_v23 = vpop.f32.mrf.mxu0 }
 0x25f   : > { %v1616_v31 = vmul.f32 0.35355338, %v1242_v23 }
 0x260   : > { %v14226_v24 = vpop.f32.mrf.mxu0 }
 0x261   : > { %v1623_v45 = vsel %vm1622_vm7, %v1616_v31, -inf }
 0x262   : > { %v1316_v26 = vpop.f32.mrf.mxu0 }
 0x263   : > { %v1617_v28 = vmul.f32 0.35355338, %v1316_v26 }
 0x264   : > { %v14231_v29 = vpop.f32.mrf.mxu0  ;;  %v1464_v30 = vpop.f32.mrf.mxu1 }
 0x265   : > { %v1619_v32 = vmul.f32 0.35355338, %v1464_v30  ;;  %v1626_v34 = vsel %vm1622_vm7, %v1617_v28, -inf }
 0x266   : > { %v14241_v36 = vpop.f32.mrf.mxu1  ;;  %1627 = vmax.xlane.f32.xlu0 %v1626_v34  ;;  %v1390_v37 = vpop.f32.mrf.mxu0 }
 0x267   : > { %v1618_v38 = vmul.f32 0.35355338, %v1390_v37  ;;  %v1632_v39 = vsel %vm1622_vm7, %v1619_v32, -inf }
 0x268   : > { %1633 = vmax.xlane.f32.xlu1 %v1632_v39  ;;  %v14236_v41 = vpop.f32.mrf.mxu0  ;;  %v1612_v43 = vpop.f32.mrf.mxu1 }
 0x269   : > { %v1621_v44 = vmul.f32 0.35355338, %v1612_v43  ;;  %v1629_v49 = vsel %vm1622_vm7, %v1618_v38, -inf }
 0x26a   : > { %1624 = vmax.xlane.f32.xlu0 %v1623_v45  ;;  %v1538_v46 = vpop.f32.mrf.mxu0  ;;  %v14251_v47 = vpop.f32.mrf.mxu1  ;;  %v13270_v45 = vld [vmem:[%s17901_s6 + $0xb8] sm:$0xff] }
 0x26b   : > { %v1620_v48 = vmul.f32 0.35355338, %v1538_v46  ;;  %v1638_v50 = vsel %vm1622_vm7, %v1621_v44, -inf }
 0x26c   : > { %1630 = vmax.xlane.f32.xlu1 %v1629_v49  ;;  %v14246_v51 = vpop.f32.mrf.mxu0  ;;  %v13268_v49 = vld [vmem:[%s17901_s6 + $0xa8] sm:$0xff] }
 0x26d   : > { %v1635_v52 = vsel %vm1622_vm7, %v1620_v48, -inf  ;;  %v13260_v51 = vld [vmem:[%s17901_s6 + $0x30] sm:$0xff] }
 0x26e   : > { %1639 = vmax.xlane.f32.xlu0 %v1638_v50  ;;  %v13261_v50 = vld [vmem:[%s17901_s6 + $0x38] sm:$0xff] }
 0x270   : > { %1636 = vmax.xlane.f32.xlu1 %v1635_v52  ;;  %v13259_v52 = vld [vmem:[%s17901_s6 + $0x28] sm:$0xff] }
 0x2ef   : > { %v1628_v53 = vpop.xlane.xlu0 %1627 }
 0x2f0   : > { %v1642_v54 = vsub.f32 %v1617_v28, %v1628_v53  ;;  %v13258_v53 = vld [vmem:[%s17901_s6 + $0x20] sm:$0xff] }
 0x2f1   : > { %v1634_v55 = vpop.xlane.xlu1 %1633 }
 0x2f2   : > { %v1649_v56 = vmul.f32 1.442695, %v1642_v54  ;;  %v1644_v57 = vsub.f32 %v1619_v32, %v1634_v55  ;;  %v1169_v32 = vcombine.high %v15819_v18, %v15819_v18  ;;  %v13279_v54 = vld [vmem:[%s17901_s6 + $0x138] sm:$0xff]  ;;  %v13278_v55 = vld [vmem:[%s17901_s6 + $0x130] sm:$0xff] }
 0x2f3   : > { %v1625_v58 = vpop.xlane.xlu0 %1624 }
 0x2f4   : > { %15264 = vpow2.f32 %v1649_v56  ;;  %v1653_v59 = vmul.f32 1.442695, %v1644_v57  ;;  %v1641_v60 = vsub.f32 %v1616_v31, %v1625_v58  ;;  %v13277_v56 = vld [vmem:[%s17901_s6 + $0x128] sm:$0xff]  ;;  %v13276_v57 = vld [vmem:[%s17901_s6 + $0x120] sm:$0xff] }
 0x2f5   : > { %v1631_v61 = vpop.xlane.xlu1 %1630 }
 0x2f6   : > { %15266 = vpow2.f32 %v1653_v59  ;;  %v1647_v62 = vmul.f32 1.442695, %v1641_v60  ;;  %v1643_v63 = vsub.f32 %v1618_v38, %v1631_v61  ;;  %v1170_v38 = vcombine.high %v15828_v21, %v15828_v21 }
 0x2f7   : > { %v1640_v0 = vpop.xlane.xlu0 %1639 }
 0x2f8   : > { %15268 = vpow2.f32 %v1647_v62  ;;  %v1651_v1 = vmul.f32 1.442695, %v1643_v63  ;;  %v1646_v3 = vsub.f32 %v1621_v44, %v1640_v0 }
 0x2f9   : > { %v1637_v4 = vpop.xlane.xlu1 %1636 }
 0x2fa   : > { %15270 = vpow2.f32 %v1651_v1  ;;  %v1657_v5 = vmul.f32 1.442695, %v1646_v3  ;;  %v1645_v6 = vsub.f32 %v1620_v48, %v1637_v4 }
 0x2fc   : > { %15272 = vpow2.f32 %v1657_v5  ;;  %v1655_v7 = vmul.f32 1.442695, %v1645_v6 }
 0x2fe   : > { %15274 = vpow2.f32 %v1655_v7  ;;  %v13272_v7 = vld [vmem:[%s17902_s7 + $0x5] ss:$0 sm:$0xff] }
 0x301   : > { %v15265_v8 = vpop.eup %15264 }
 0x302   : > { %v1662_v9 = vsel %vm1622_vm7, %v15265_v8, 0.0 }
 0x303   : > { %v15267_v10 = vpop.eup %15266  ;;  %1663 = vadd.xlane.f32.xlu0 %v1662_v9 }
 0x304   : > { %v1668_v12 = vsel %vm1622_vm7, %v15267_v10, 0.0 }
 0x305   : > { %v15269_v11 = vpop.eup %15268 }
 0x306   : > { %v1659_v13 = vsel %vm1622_vm7, %v15269_v11, 0.0 }
 0x307   : > { %v15271_v14 = vpop.eup %15270  ;;  %1669 = vadd.xlane.f32.xlu0 %v1668_v12  ;;  %1660 = vadd.xlane.f32.xlu1 %v1659_v13  ;;  %v13263_v12 = vld [vmem:[%s17902_s7 + $0x1] ss:$0 sm:$0xff] }
 0x308   : > { %v1665_v17 = vsel %vm1622_vm7, %v15271_v14, 0.0 }
 0x309   : > { %v15273_v15 = vpop.eup %15272 }
 0x30a   : > { %v1674_v16 = vsel %vm1622_vm7, %v15273_v15, 0.0 }
 0x30b   : > { %v15275_v19 = vpop.eup %15274  ;;  %1675 = vadd.xlane.f32.xlu0 %v1674_v16  ;;  %1666 = vadd.xlane.f32.xlu1 %v1665_v17 }
 0x30c   : > { %v1671_v20 = vsel %vm1622_vm7, %v15275_v19, 0.0 }
 0x30f   : > { %1672 = vadd.xlane.f32.xlu1 %v1671_v20 }
 0x38c   : > { %v1664_v22 = vpop.xlane.xlu0 %1663 }
 0x38d   : > { %15276 = vrcp.f32 %v1664_v22 }
 0x390   : > { %v1670_v23 = vpop.xlane.xlu0 %1669  ;;  %v1661_v24 = vpop.xlane.xlu1 %1660 }
 0x391   : > { %15278 = vrcp.f32 %v1670_v23 }
 0x392   : > { %15280 = vrcp.f32 %v1661_v24 }
 0x394   : > { %v1676_v26 = vpop.xlane.xlu0 %1675  ;;  %v1667_v28 = vpop.xlane.xlu1 %1666 }
 0x395   : > { %15282 = vrcp.f32 %v1676_v26 }
 0x396   : > { %15284 = vrcp.f32 %v1667_v28 }
 0x398   : > { %v1673_v29 = vpop.xlane.xlu1 %1672 }
 0x399   : > { %15286 = vrcp.f32 %v1673_v29 }
 0x39a   : > { %v15277_v30 = vpop.eup %15276 }
 0x39b   : > { %v1684_v31 = vmul.f32 %v15277_v30, %v15265_v8 }
 0x39d   : > { %14260 = vmatmul.mubr.msk.f32.vlgmr.msra.gmra.mxu1 %vm1689_vm8, %v1684_v31 }
 0x39e   : > { %v15279_v34 = vpop.eup %15278  ;;  %14268 = vmatpush3.msk.msra.mxu1 %vm1693_vm6, %v1169_v32  ;;  %14269 = vmatprep.mubr.msk.f32.mxu1 %vm15525_vm1, %v15524_v2 }
 0x39f   : > { %v15281_v36 = vpop.eup %15280  ;;  %14277 = vmatprep.subr.mxu1 %v15524_v2  ;;  %v1686_v37 = vmul.f32 %v15279_v34, %v15267_v10  ;;  %v2254_v10 = vcombine.low %v13272_v7, %v13272_v7 }
 0x3a0   : > { %v1683_v39 = vmul.f32 %v15281_v36, %v15269_v11 }
 0x3a1   : > { %14270 = vmatmul.mubr.msk.f32.vlgmr.msra.gmra.mxu1 %vm1689_vm8, %v1686_v37 }
 0x3a2   : > { %v15283_v41 = vpop.eup %15282  ;;  %14255 = vmatmul.mubr.msk.f32.vlgmr.msra.gmra.mxu0 %vm1689_vm8, %v1683_v39  ;;  %14278 = vmatpush3.msk.msra.mxu1 %vm1693_vm6, %v1170_v38  ;;  %v13281_v38 = vld [vmem:[%s17902_s7 + $0x9] ss:$0 sm:$0xff] }
 0x3a3   : > { %v15285_v43 = vpop.eup %15284  ;;  %14263 = vmatpush3.msk.msra.mxu0 %vm1693_vm6, %v15819_v18  ;;  %14264 = vmatprep.mubr.msk.f32.mxu0 %vm15525_vm1, %v15524_v2  ;;  %v1688_v44 = vmul.f32 %v15283_v41, %v15273_v15  ;;  %v13269_v18 = vld [vmem:[%s17901_s6 + $0xb0] sm:$0xff]  ;;  %v2154_v15 = vcombine.low %v13263_v12, %v13263_v12 }
 0x3a4   : > { %14272 = vmatprep.subr.mxu0 %v15524_v2  ;;  %14279 = vmatprep.mubr.msk.f32.mxu1 %vm15525_vm1, %v15524_v2  ;;  %v1685_v46 = vmul.f32 %v15285_v43, %v15271_v14 }
 0x3a5   : > { %14299 = vmatprep.subr.mxu1 %v15524_v2  ;;  %14280 = vmatmul.mubr.msk.f32.vlgmr.msra.gmra.mxu1 %vm1689_vm8, %v1688_v44 }
 0x3a6   : > { %v15287_v47 = vpop.eup %15286  ;;  %14265 = vmatmul.mubr.msk.f32.vlgmr.msra.gmra.mxu0 %vm1689_vm8, %v1685_v46  ;;  %14300 = vmatpush3.msra.mxu1 %v13270_v45  ;;  %v2354_v45 = vcombine.low %v13281_v38, %v13281_v38 }
 0x3a7   : > { %14273 = vmatpush3.msk.msra.mxu0 %vm1693_vm6, %v15828_v21  ;;  %14301 = vmatprep.subr.mxu1 %v15524_v2  ;;  %v1687_v48 = vmul.f32 %v15287_v47, %v15275_v19  ;;  %v13267_v21 = vld [vmem:[%s17901_s6 + $0xa0] sm:$0xff] }
 0x3a8   : > { %14302 = vmatpush3.msra.mxu1 %v13269_v18  ;;  %14274 = vmatprep.mubr.msk.f32.mxu0 %vm15525_vm1, %v15524_v2 }
 0x3a9   : > { %14282 = vmatprep.subr.mxu0 %v15524_v2  ;;  %14303 = vmatprep.subr.mxu1 %v15524_v2 }
 0x3aa   : > { %14275 = vmatmul.mubr.msk.f32.vlgmr.msra.gmra.mxu0 %vm1689_vm8, %v1687_v48  ;;  %14304 = vmatpush3.msra.mxu1 %v13268_v49 }
 0x3ab   : > { %14283 = vmatpush3.msra.mxu0 %v13261_v50  ;;  %14305 = vmatprep.subr.mxu1 %v15524_v2 }
 0x3ac   : > { %14284 = vmatprep.subr.mxu0 %v15524_v2  ;;  %14306 = vmatpush3.msra.mxu1 %v13267_v21 }
 0x3ad   : > { %14285 = vmatpush3.msra.mxu0 %v13260_v51  ;;  %14307 = vmatprep.mubr.msk.f32.mxu1 %vm15525_vm1, %v15524_v2 }
 0x3ae   : > { %14286 = vmatprep.subr.mxu0 %v15524_v2  ;;  %14308 = vmatmul.mubr.msk.f32.vlgmr.msra.gmra.mxu1 %vm869_vm4, %v15719_v25 }
 0x3af   : > { %14287 = vmatpush3.msra.mxu0 %v13259_v52  ;;  %14290 = vmatprep.mubr.msk.f32.mxu0 %vm15525_vm1, %v15524_v2 }
 0x3b0   : > { %14288 = vmatprep.subr.mxu0 %v15524_v2  ;;  %14310 = vmatprep.mubr.msk.f32.mxu1 %vm15525_vm1, %v15524_v2 }
 0x3b1   : > { %14289 = vmatpush3.msra.mxu0 %v13258_v53  ;;  %14333 = vmatprep.subr.mxu1 %v15524_v2 }
 0x3b2   : > { %14291 = vmatmul.mubr.msk.f32.vlgmr.msra.gmra.mxu0 %vm869_vm4, %v15721_v27  ;;  %14311 = vmatmul.mubr.msk.f32.gmra.mxu1 %vm869_vm4, %v15735_v33 }
 0x3b3   : > { %14293 = vmatprep.mubr.msk.f32.mxu0 %vm15525_vm1, %v15524_v2  ;;  %14313 = vmatprep.mubr.msk.f32.mxu1 %vm15525_vm1, %v15524_v2 }
 0x3b4   : > { %14316 = vmatprep.subr.mxu0 %v15524_v2 }
 0x3b5   : > { %14317 = vmatpush3.msra.mxu0 %v13279_v54 }
 0x3b6   : > { %14294 = vmatmul.mubr.msk.f32.gmra.mxu0 %vm869_vm4, %v15739_v35  ;;  %14314 = vmatmul.mubr.msk.f32.gmra.mxu1 %vm869_vm4, %v15751_v40 }
 0x3b7   : > { %14318 = vmatprep.subr.mxu0 %v15524_v2  ;;  %14296 = vmatprep.mubr.msk.f32.mxu0 %vm15525_vm1, %v15524_v2 }
 0x3b8   : > { %14319 = vmatpush3.msra.mxu0 %v13278_v55  ;;  %14335 = vmatprep.mubr.msk.f32.mxu1 %vm15525_vm1, %v15524_v2 }
 0x3b9   : > { %14320 = vmatprep.subr.mxu0 %v15524_v2 }
 0x3ba   : > { %14297 = vmatmul.mubr.msk.f32.gmra.mxu0 %vm869_vm4, %v15756_v42 }
 0x3bb   : > { %14321 = vmatpush3.msra.mxu0 %v13277_v56  ;;  %14324 = vmatprep.mubr.msk.f32.mxu0 %vm15525_vm1, %v15524_v2 }
 0x3bc   : > { %14322 = vmatprep.subr.mxu0 %v15524_v2 }
 0x3bd   : > { %14323 = vmatpush3.msra.mxu0 %v13276_v57 }
 0x3be   : > { %14325 = vmatmul.mubr.msk.f32.vlgmr.msra.gmra.mxu0 %vm869_vm4, %v15719_v25  ;;  %14348 = vmatprep.subr.mxu0 %v15524_v2 }
 0x3bf   : > { %14327 = vmatprep.mubr.msk.f32.mxu0 %vm15525_vm1, %v15524_v2 }
 0x3c2   : > { %14328 = vmatmul.mubr.msk.f32.gmra.mxu0 %vm869_vm4, %v15735_v33 }
 0x3c3   : > { %14330 = vmatprep.mubr.msk.f32.mxu0 %vm15525_vm1, %v15524_v2 }
 0x3c6   : > { %14331 = vmatmul.mubr.msk.f32.gmra.mxu0 %vm869_vm4, %v15751_v40 }
 0x3c7   : > { %14350 = vmatprep.mubr.msk.f32.mxu0 %vm15525_vm1, %v15524_v2 }
 0x45d   : > { %v15958_v58 = vpop.f32.mrf.mxu1 }
 0x45f   : > { %v14261_v59 = vpop.f32.mrf.mxu1 }
 0x461   : > { %v15960_v60 = vpop.f32.mrf.mxu1 }
 0x462   : > { %v15962_v61 = vpop.f32.mrf.mxu0 }
 0x463   : > { %v3511_v62 = vcombine.low %v15962_v61, %v15958_v58  ;;  %v14271_v63 = vpop.f32.mrf.mxu1  ;;  %v13325_v58 = vld [vmem:[%s17901_s6 + $0xc0] sm:$0xff] }
 0x464   : > { %v14256_v0 = vpop.f32.mrf.mxu0 }
 0x465   : > { %v15966_v1 = vpop.f32.mrf.mxu1 }
 0x466   : > { %v15968_v3 = vpop.f32.mrf.mxu0 }
 0x467   : > { %v3512_v4 = vcombine.low %v15968_v3, %v15960_v60  ;;  %v14281_v5 = vpop.f32.mrf.mxu1  ;;  %v13309_v60 = vld [vmem:[%s17903_s8 + $0x8] sm:$0xff] }
 0x468   : > { %v14266_v6 = vpop.f32.mrf.mxu0 }
 0x46a   : > { %v15975_v8 = vpop.f32.mrf.mxu0 }
 0x46b   : > { %v3513_v9 = vcombine.low %v15975_v8, %v15966_v1 }
 0x46c   : > { %v14276_v11 = vpop.f32.mrf.mxu0 }
 0x46e   : > { %v2322_v13 = vpop.f32.mrf.mxu1 }
 0x46f   : > { %v2323_v14 = vadd.f32 %v2322_v13, %v2254_v10 }
 0x470   : > { %v14309_v16 = vpop.f32.mrf.mxu1 }
 0x471   : > { %14334 = vmatpush3.xpose.msk.msra.mxu1 %vm1171_vm5, %v2323_v14  ;;  %v2339_v23 = vcombine.high %v2323_v14, %v2323_v14 }
 0x472   : > { %v2222_v17 = vpop.f32.mrf.mxu0  ;;  %v2327_v19 = vpop.f32.mrf.mxu1  ;;  %14338 = vmatprep.subr.mxu1 %v15524_v2 }
 0x473   : > { %v2223_v20 = vadd.f32 %v2222_v17, %v2154_v15  ;;  %v2328_v22 = vadd.f32 %v2327_v19, %v2254_v10 }
 0x474   : > { %v14292_v24 = vpop.f32.mrf.mxu0  ;;  %v14312_v26 = vpop.f32.mrf.mxu1 }
 0x475   : > { %v2340_v28 = vcombine.high %v2328_v22, %v2328_v22  ;;  %14336 = vmatmul.mubr.msk.f32.vlgmr.msra.gmra.mxu1 %vm1171_vm5, %v2223_v20  ;;  %v2239_v31 = vcombine.high %v2223_v20, %v2223_v20 }
 0x476   : > { %14339 = vmatpush3.xpose.msk.msra.mxu1 %vm1171_vm5, %v2339_v23  ;;  %v2227_v29 = vpop.f32.mrf.mxu0  ;;  %v2332_v30 = vpop.f32.mrf.mxu1  ;;  %14340 = vmatprep.mubr.msk.f32.mxu1 %vm15525_vm1, %v15524_v2 }
 0x477   : > { %v2228_v32 = vadd.f32 %v2227_v29, %v2154_v15  ;;  %v2333_v34 = vadd.f32 %v2332_v30, %v2254_v10  ;;  %14349 = vmatpush3.xpose.msk.msra.mxu0 %vm1171_vm5, %v2340_v28  ;;  %14343 = vmatprep.subr.mxu1 %v15524_v2 }
 0x478   : > { %v14295_v36 = vpop.f32.mrf.mxu0  ;;  %v14315_v37 = vpop.f32.mrf.mxu1  ;;  %14358 = vmatprep.subr.mxu0 %v15524_v2 }
 0x479   : > { %v2240_v39 = vcombine.high %v2228_v32, %v2228_v32  ;;  %v2341_v41 = vcombine.high %v2333_v34, %v2333_v34  ;;  %14341 = vmatmul.mubr.msk.f32.vlgmr.msra.gmra.mxu1 %vm1171_vm5, %v2239_v31 }
 0x47a   : > { %14344 = vmatpush3.xpose.msk.msra.mxu1 %vm1171_vm5, %v2328_v22  ;;  %v2232_v43 = vpop.f32.mrf.mxu0  ;;  %14345 = vmatprep.mubr.msk.f32.mxu1 %vm15525_vm1, %v15524_v2 }
 0x47b   : > { %v2233_v44 = vadd.f32 %v2232_v43, %v2154_v15  ;;  %14351 = vmatmul.mubr.msk.f32.vlgmr.msra.gmra.mxu0 %vm1171_vm5, %v2240_v39  ;;  %14353 = vmatprep.subr.mxu1 %v15524_v2 }
 0x47c   : > { %14359 = vmatpush3.xpose.msk.msra.mxu0 %vm1171_vm5, %v2341_v41  ;;  %v14298_v46 = vpop.f32.mrf.mxu0  ;;  %14360 = vmatprep.mubr.msk.f32.mxu0 %vm15525_vm1, %v15524_v2 }
 0x47d   : > { %v2241_v18 = vcombine.high %v2233_v44, %v2233_v44  ;;  %14346 = vmatmul.mubr.msk.f32.vlgmr.msra.gmra.mxu1 %vm1171_vm5, %v2228_v32  ;;  %14368 = vmatprep.subr.mxu0 %v15524_v2 }
 0x47e   : > { %14354 = vmatpush3.xpose.msk.msra.mxu1 %vm1171_vm5, %v2333_v34  ;;  %v2422_v47 = vpop.f32.mrf.mxu0  ;;  %14355 = vmatprep.mubr.msk.f32.mxu1 %vm15525_vm1, %v15524_v2 }
 0x47f   : > { %v2423_v48 = vadd.f32 %v2422_v47, %v2354_v45  ;;  %14361 = vmatmul.mubr.msk.f32.vlgmr.msra.gmra.mxu0 %vm1171_vm5, %v2241_v18  ;;  %14363 = vmatprep.subr.mxu1 %v15524_v2 }
 0x480   : > { %v14326_v49 = vpop.f32.mrf.mxu0  ;;  %14370 = vmatprep.mubr.msk.f32.mxu0 %vm15525_vm1, %v15524_v2 }
 0x481   : > { %v2439_v50 = vcombine.high %v2423_v48, %v2423_v48  ;;  %14356 = vmatmul.mubr.msk.f32.vlgmr.msra.gmra.mxu1 %vm1171_vm5, %v2233_v44 }
 0x482   : > { %14364 = vmatpush3.msk.msra.mxu1 %vm1693_vm6, %v2423_v48  ;;  %v2427_v21 = vpop.f32.mrf.mxu0  ;;  %14365 = vmatprep.mubr.msk.f32.mxu1 %vm15525_vm1, %v15524_v2 }
 0x483   : > { %v16016_v51 = vadd.f32 %v2427_v21, %v2354_v45  ;;  %14369 = vmatpush3.msk.msra.mxu0 %vm1693_vm6, %v2439_v50  ;;  %14373 = vmatprep.subr.mxu1 %v15524_v2 }
 0x484   : > { %v14329_v52 = vpop.f32.mrf.mxu0  ;;  %14378 = vmatprep.subr.mxu0 %v15524_v2 }
 0x486   : > { %v2432_v53 = vpop.f32.mrf.mxu0 }
 0x487   : > { %v16021_v54 = vadd.f32 %v2432_v53, %v2354_v45 }
 0x488   : > { %v14332_v55 = vpop.f32.mrf.mxu0 }
 0x535   : > { %v2512_v56 = vpop.f32.mrf.mxu1 }
 0x536   : > { %v2886_v57 = vmul.f32 0.35355338, %v2512_v56 }
 0x537   : > { %v14337_v59 = vpop.f32.mrf.mxu1 }
 0x538   : > { %v2892_v63 = vsel %vm1622_vm7, %v2886_v57, -inf }
 0x539   : > { %2893 = vmax.xlane.f32.xlu0 %v2892_v63  ;;  %v2586_v0 = vpop.f32.mrf.mxu1 }
 0x53a   : > { %v2887_v5 = vmul.f32 0.35355338, %v2586_v0 }
 0x53b   : > { %v14342_v6 = vpop.f32.mrf.mxu1  ;;  %v2734_v7 = vpop.f32.mrf.mxu0 }
 0x53c   : > { %v2889_v10 = vmul.f32 0.35355338, %v2734_v7  ;;  %v2895_v11 = vsel %vm1622_vm7, %v2887_v5, -inf }
 0x53d   : > { %2896 = vmax.xlane.f32.xlu1 %v2895_v11  ;;  %v2660_v12 = vpop.f32.mrf.mxu1  ;;  %v14352_v13 = vpop.f32.mrf.mxu0 }
 0x53e   : > { %v2888_v14 = vmul.f32 0.35355338, %v2660_v12  ;;  %v2901_v20 = vsel %vm1622_vm7, %v2889_v10, -inf }
 0x53f   : > { %v14347_v15 = vpop.f32.mrf.mxu1  ;;  %v2882_v16 = vpop.f32.mrf.mxu0 }
 0x540   : > { %v2891_v17 = vmul.f32 0.35355338, %v2882_v16  ;;  %v2898_v19 = vsel %vm1622_vm7, %v2888_v14, -inf }
 0x541   : > { %2899 = vmax.xlane.f32.xlu0 %v2898_v19  ;;  %v2808_v22 = vpop.f32.mrf.mxu1  ;;  %2902 = vmax.xlane.f32.xlu1 %v2901_v20  ;;  %v14362_v23 = vpop.f32.mrf.mxu0 }
 0x542   : > { %v2890_v24 = vmul.f32 0.35355338, %v2808_v22  ;;  %v2907_v29 = vsel %vm1622_vm7, %v2891_v17, -inf  ;;  %v2440_v22 = vcombine.high %v16016_v51, %v16016_v51 }
 0x543   : > { %v14357_v26 = vpop.f32.mrf.mxu1 }
 0x544   : > { %v2904_v28 = vsel %vm1622_vm7, %v2890_v24, -inf }
 0x545   : > { %2905 = vmax.xlane.f32.xlu0 %v2904_v28  ;;  %2908 = vmax.xlane.f32.xlu1 %v2907_v29  ;;  %v2441_v29 = vcombine.high %v16021_v54, %v16021_v54 }
 0x5c2   : > { %v2894_v30 = vpop.xlane.xlu0 %2893 }
 0x5c3   : > { %v2910_v31 = vsub.f32 %v2886_v57, %v2894_v30 }
 0x5c5   : > { %v2916_v32 = vmul.f32 1.442695, %v2910_v31 }
 0x5c6   : > { %v2897_v34 = vpop.xlane.xlu1 %2896 }
 0x5c7   : > { %15288 = vpow2.f32 %v2916_v32  ;;  %v2911_v36 = vsub.f32 %v2887_v5, %v2897_v34  ;;  %v2141_v34 = vld [vmem:[%s17903_s8] sm:$0xff] }
 0x5c9   : > { %v2918_v37 = vmul.f32 1.442695, %v2911_v36  ;;  %v13327_v36 = vld [vmem:[%s17901_s6 + $0xd0] sm:$0xff] }
 0x5ca   : > { %v2900_v38 = vpop.xlane.xlu0 %2899  ;;  %v2903_v39 = vpop.xlane.xlu1 %2902 }
 0x5cb   : > { %15290 = vpow2.f32 %v2918_v37  ;;  %v2912_v41 = vsub.f32 %v2888_v14, %v2900_v38  ;;  %v2913_v43 = vsub.f32 %v2889_v10, %v2903_v39  ;;  %v13326_v37 = vld [vmem:[%s17901_s6 + $0xc8] sm:$0xff] }
 0x5cd   : > { %v2920_v44 = vmul.f32 1.442695, %v2912_v41  ;;  %v2922_v45 = vmul.f32 1.442695, %v2913_v43 }
 0x5ce   : > { %v2906_v46 = vpop.xlane.xlu0 %2905  ;;  %v2909_v18 = vpop.xlane.xlu1 %2908 }
 0x5cf   : > { %15292 = vpow2.f32 %v2920_v44  ;;  %v2914_v47 = vsub.f32 %v2890_v24, %v2906_v46  ;;  %v2915_v48 = vsub.f32 %v2891_v17, %v2909_v18  ;;  %v13317_v44 = vld [vmem:[%s17901_s6 + $0x48] sm:$0xff]  ;;  %v13316_v18 = vld [vmem:[%s17901_s6 + $0x40] sm:$0xff] }
 0x5d0   : > { %15294 = vpow2.f32 %v2922_v45 }
 0x5d1   : > { %v2924_v49 = vmul.f32 1.442695, %v2914_v47  ;;  %v2926_v50 = vmul.f32 1.442695, %v2915_v48 }
 0x5d3   : > { %15296 = vpow2.f32 %v2924_v49 }
 0x5d4   : > { %v15289_v21 = vpop.eup %15288  ;;  %15298 = vpow2.f32 %v2926_v50 }
 0x5d5   : > { %v2928_v52 = vsel %vm1622_vm7, %v15289_v21, 0.0 }
 0x5d6   : > { %2929 = vadd.xlane.f32.xlu0 %v2928_v52  ;;  %v13337_v52 = vld [vmem:[%s17901_s6 + $0x158] sm:$0xff] }
 0x5d8   : > { %v15291_v53 = vpop.eup %15290 }
 0x5d9   : > { %v2931_v55 = vsel %vm1622_vm7, %v15291_v53, 0.0 }
 0x5da   : > { %2932 = vadd.xlane.f32.xlu1 %v2931_v55  ;;  %v13336_v55 = vld [vmem:[%s17901_s6 + $0x150] sm:$0xff] }
 0x5dc   : > { %v15293_v56 = vpop.eup %15292 }
 0x5dd   : > { %v15295_v57 = vpop.eup %15294  ;;  %v2934_v59 = vsel %vm1622_vm7, %v15293_v56, 0.0 }
 0x5de   : > { %2935 = vadd.xlane.f32.xlu0 %v2934_v59  ;;  %v2937_v63 = vsel %vm1622_vm7, %v15295_v57, 0.0 }
 0x5df   : > { %2938 = vadd.xlane.f32.xlu1 %v2937_v63  ;;  %v13330_v63 = vld [vmem:[%s17902_s7 + $0x6] ss:$0 sm:$0xff] }
 0x5e0   : > { %v15297_v0 = vpop.eup %15296 }
 0x5e1   : > { %v15299_v5 = vpop.eup %15298  ;;  %v2940_v6 = vsel %vm1622_vm7, %v15297_v0, 0.0 }
 0x5e2   : > { %2941 = vadd.xlane.f32.xlu0 %v2940_v6  ;;  %v2943_v7 = vsel %vm1622_vm7, %v15299_v5, 0.0  ;;  %v3721_v6 = vcombine.low %v13330_v63, %v13330_v63 }
 0x5e3   : > { %2944 = vadd.xlane.f32.xlu1 %v2943_v7 }
 0x65f   : > { %v2930_v10 = vpop.xlane.xlu0 %2929 }
 0x660   : > { %15300 = vrcp.f32 %v2930_v10 }
 0x663   : > { %v2933_v11 = vpop.xlane.xlu1 %2932 }
 0x664   : > { %15302 = vrcp.f32 %v2933_v11 }
 0x667   : > { %v2936_v12 = vpop.xlane.xlu0 %2935 }
 0x668   : > { %15304 = vrcp.f32 %v2936_v12  ;;  %v2939_v13 = vpop.xlane.xlu1 %2938 }
 0x669   : > { %15306 = vrcp.f32 %v2939_v13 }
 0x66b   : > { %v2942_v14 = vpop.xlane.xlu0 %2941 }
 0x66c   : > { %15308 = vrcp.f32 %v2942_v14  ;;  %v2945_v15 = vpop.xlane.xlu1 %2944 }
 0x66d   : > { %v15301_v16 = vpop.eup %15300  ;;  %15310 = vrcp.f32 %v2945_v15 }
 0x66e   : > { %v2952_v17 = vmul.f32 %v15301_v16, %v15289_v21 }
 0x670   : > { %14366 = vmatmul.mubr.msk.f32.vlgmr.msra.gmra.mxu1 %vm1689_vm8, %v2952_v17 }
 0x671   : > { %v15303_v19 = vpop.eup %15302  ;;  %14374 = vmatpush3.msk.msra.mxu1 %vm1693_vm6, %v16016_v51  ;;  %14375 = vmatprep.mubr.msk.f32.mxu1 %vm15525_vm1, %v15524_v2 }
 0x672   : > { %v2953_v20 = vmul.f32 %v15303_v19, %v15291_v53  ;;  %14383 = vmatprep.subr.mxu1 %v15524_v2 }
 0x674   : > { %14371 = vmatmul.mubr.msk.f32.vlgmr.msra.gmra.mxu0 %vm1689_vm8, %v2953_v20 }
 0x675   : > { %v15305_v23 = vpop.eup %15304  ;;  %14379 = vmatpush3.msk.msra.mxu0 %vm1693_vm6, %v2440_v22  ;;  %14380 = vmatprep.mubr.msk.f32.mxu0 %vm15525_vm1, %v15524_v2 }
 0x676   : > { %v15307_v24 = vpop.eup %15306  ;;  %14388 = vmatprep.subr.mxu0 %v15524_v2  ;;  %v2954_v26 = vmul.f32 %v15305_v23, %v15293_v56 }
 0x677   : > { %v2955_v28 = vmul.f32 %v15307_v24, %v15295_v57  ;;  %v13335_v57 = vld [vmem:[%s17901_s6 + $0x148] sm:$0xff] }
 0x678   : > { %14376 = vmatmul.mubr.msk.f32.vlgmr.msra.gmra.mxu1 %vm1689_vm8, %v2954_v26 }
 0x679   : > { %v15309_v30 = vpop.eup %15308  ;;  %14381 = vmatmul.mubr.msk.f32.vlgmr.msra.gmra.mxu0 %vm1689_vm8, %v2955_v28  ;;  %14384 = vmatpush3.msk.msra.mxu1 %vm1693_vm6, %v16021_v54  ;;  %v13328_v54 = vld [vmem:[%s17901_s6 + $0xd8] sm:$0xff]  ;;  %v13321_v28 = vld [vmem:[%s17902_s7 + $0x2] ss:$0 sm:$0xff] }
 0x67a   : > { %v15311_v51 = vpop.eup %15310  ;;  %14389 = vmatpush3.msk.msra.mxu0 %vm1693_vm6, %v2441_v29  ;;  %14385 = vmatprep.mubr.msk.f32.mxu1 %vm15525_vm1, %v15524_v2  ;;  %v2956_v31 = vmul.f32 %v15309_v30, %v15297_v0  ;;  %v13334_v0 = vld [vmem:[%s17901_s6 + $0x140] sm:$0xff]  ;;  %v3621_v30 = vcombine.low %v13321_v28, %v13321_v28 }
 0x67b   : > { %14390 = vmatprep.mubr.msk.f32.mxu0 %vm15525_vm1, %v15524_v2  ;;  %v2957_v32 = vmul.f32 %v15311_v51, %v15299_v5  ;;  %14404 = vmatprep.subr.mxu0 %v15524_v2 }
 0x67c   : > { %14386 = vmatmul.mubr.msk.f32.vlgmr.msra.gmra.mxu1 %vm1689_vm8, %v2956_v31  ;;  %14393 = vmatprep.subr.mxu1 %v15524_v2 }
 0x67d   : > { %14391 = vmatmul.mubr.msk.f32.vlgmr.msra.gmra.mxu0 %vm1689_vm8, %v2957_v32  ;;  %14395 = vmatprep.mubr.msk.f32.mxu1 %vm15525_vm1, %v15524_v2 }
 0x67e   : > { %14405 = vmatpush3.msra.mxu0 %v2141_v34  ;;  %14406 = vmatprep.mubr.msk.f32.mxu0 %vm15525_vm1, %v15524_v2 }
 0x67f   : > { %14432 = vmatprep.subr.mxu0 %v15524_v2  ;;  %14394 = vmatpush3.msra.mxu1 %v13309_v60 }
 0x680   : > { %14415 = vmatprep.subr.mxu1 %v15524_v2 }
 0x681   : > { %14407 = vmatmul.mubr.msk.f32.vlgmr.msra.gmra.mxu0 %vm1171_vm5, %v3511_v62 }
 0x682   : > { %14409 = vmatprep.mubr.msk.f32.mxu0 %vm15525_vm1, %v15524_v2  ;;  %14433 = vmatpush3.msra.mxu0 %v13328_v54 }
 0x683   : > { %14434 = vmatprep.subr.mxu0 %v15524_v2 }
 0x684   : > { %14435 = vmatpush3.msra.mxu0 %v13327_v36 }
 0x685   : > { %14410 = vmatmul.mubr.msk.f32.gmra.mxu0 %vm1171_vm5, %v3512_v4  ;;  %14436 = vmatprep.subr.mxu0 %v15524_v2  ;;  %v13319_v4 = vld [vmem:[%s17901_s6 + $0x58] sm:$0xff] }
 0x686   : > { %14412 = vmatprep.mubr.msk.f32.mxu0 %vm15525_vm1, %v15524_v2  ;;  %14437 = vmatpush3.msra.mxu0 %v13326_v37 }
 0x687   : > { %14438 = vmatprep.subr.mxu0 %v15524_v2 }
 0x688   : > { %14439 = vmatpush3.msra.mxu0 %v13325_v58 }
 0x689   : > { %14413 = vmatmul.mubr.msk.f32.gmra.mxu0 %vm1171_vm5, %v3513_v9  ;;  %14466 = vmatprep.subr.mxu0 %v15524_v2  ;;  %v13318_v9 = vld [vmem:[%s17901_s6 + $0x50] sm:$0xff] }
 0x68a   : > { %14440 = vmatprep.mubr.msk.f32.mxu0 %vm15525_vm1, %v15524_v2 }
 0x68d   : > { %14441 = vmatmul.mubr.msk.f32.vlgmr.msra.gmra.mxu0 %vm869_vm4, %v15719_v25 }
 0x68e   : > { %14443 = vmatprep.mubr.msk.f32.mxu0 %vm15525_vm1, %v15524_v2 }
 0x691   : > { %14444 = vmatmul.mubr.msk.f32.gmra.mxu0 %vm869_vm4, %v15735_v33 }
 0x692   : > { %14446 = vmatprep.mubr.msk.f32.mxu0 %vm15525_vm1, %v15524_v2 }
 0x695   : > { %14447 = vmatmul.mubr.msk.f32.gmra.mxu0 %vm869_vm4, %v15751_v40 }
 0x696   : > { %14468 = vmatprep.mubr.msk.f32.mxu0 %vm15525_vm1, %v15524_v2 }
 0x730   : > { %v3029_v61 = vpop.f32.mrf.mxu1 }
 0x732   : > { %v14367_v62 = vpop.f32.mrf.mxu1 }
 0x734   : > { %v3104_v1 = vpop.f32.mrf.mxu0 }
 0x735   : > { %v3416_v3 = vcombine.low %v3029_v61, %v3104_v1  ;;  %v13339_v61 = vld [vmem:[%s17902_s7 + $0xa] ss:$0 sm:$0xff] }
 0x736   : > { %v14372_v8 = vpop.f32.mrf.mxu0 }
 0x737   : > { %14396 = vmatmul.mubr.msk.f32.vlgmr.msra.gmra.mxu1 %vm1171_vm5, %v3416_v3  ;;  %v3821_v8 = vcombine.low %v13339_v61, %v13339_v61 }
 0x738   : > { %v3179_v38 = vpop.f32.mrf.mxu1  ;;  %14398 = vmatprep.mubr.msk.f32.mxu1 %vm15525_vm1, %v15524_v2  ;;  %14416 = vmatpush3.msra.mxu1 %v13319_v4 }
 0x739   : > { %v3254_v39 = vpop.f32.mrf.mxu0  ;;  %14417 = vmatprep.subr.mxu1 %v15524_v2 }
 0x73a   : > { %v3417_v41 = vcombine.low %v3179_v38, %v3254_v39  ;;  %v14377_v43 = vpop.f32.mrf.mxu1  ;;  %14418 = vmatpush3.msra.mxu1 %v13318_v9 }
 0x73b   : > { %v14382_v45 = vpop.f32.mrf.mxu0  ;;  %14419 = vmatprep.subr.mxu1 %v15524_v2 }
 0x73c   : > { %14399 = vmatmul.mubr.msk.f32.gmra.mxu1 %vm1171_vm5, %v3417_v41  ;;  %v3329_v46 = vpop.f32.mrf.mxu1 }
 0x73d   : > { %v3404_v47 = vpop.f32.mrf.mxu0  ;;  %14401 = vmatprep.mubr.msk.f32.mxu1 %vm15525_vm1, %v15524_v2  ;;  %14420 = vmatpush3.msra.mxu1 %v13317_v44 }
 0x73e   : > { %v3418_v48 = vcombine.low %v3329_v46, %v3404_v47  ;;  %v14387_v49 = vpop.f32.mrf.mxu1  ;;  %14421 = vmatprep.subr.mxu1 %v15524_v2 }
 0x73f   : > { %v14392_v50 = vpop.f32.mrf.mxu0  ;;  %14422 = vmatpush3.msra.mxu1 %v13316_v18 }
 0x740   : > { %14402 = vmatmul.mubr.msk.f32.gmra.mxu1 %vm1171_vm5, %v3418_v48  ;;  %14449 = vmatprep.subr.mxu1 %v15524_v2 }
 0x741   : > { %v16144_v21 = vpop.f32.mrf.mxu0  ;;  %14423 = vmatprep.mubr.msk.f32.mxu1 %vm15525_vm1, %v15524_v2 }
 0x743   : > { %v14408_v53 = vpop.f32.mrf.mxu0 }
 0x744   : > { %14424 = vmatmul.mubr.msk.f32.vlgmr.msra.gmra.mxu1 %vm869_vm4, %v15721_v27 }
 0x745   : > { %v16156_v56 = vpop.f32.mrf.mxu0  ;;  %14426 = vmatprep.mubr.msk.f32.mxu1 %vm15525_vm1, %v15524_v2  ;;  %14450 = vmatpush3.msra.mxu1 %v13337_v52 }
 0x746   : > { %14451 = vmatprep.subr.mxu1 %v15524_v2 }
 0x747   : > { %v14411_v59 = vpop.f32.mrf.mxu0  ;;  %14452 = vmatpush3.msra.mxu1 %v13336_v55 }
 0x748   : > { %14427 = vmatmul.mubr.msk.f32.gmra.mxu1 %vm869_vm4, %v15739_v35  ;;  %14453 = vmatprep.subr.mxu1 %v15524_v2 }
 0x749   : > { %v16173_v5 = vpop.f32.mrf.mxu0  ;;  %14429 = vmatprep.mubr.msk.f32.mxu1 %vm15525_vm1, %v15524_v2  ;;  %14454 = vmatpush3.msra.mxu1 %v13335_v57 }
 0x74a   : > { %14455 = vmatprep.subr.mxu1 %v15524_v2 }
 0x74b   : > { %v14414_v7 = vpop.f32.mrf.mxu0  ;;  %14456 = vmatpush3.msra.mxu1 %v13334_v0 }
 0x74c   : > { %14430 = vmatmul.mubr.msk.f32.gmra.mxu1 %vm869_vm4, %v15756_v42  ;;  %14481 = vmatprep.subr.mxu1 %v15524_v2 }
 0x74d   : > { %v3789_v10 = vpop.f32.mrf.mxu0  ;;  %14457 = vmatprep.mubr.msk.f32.mxu1 %vm15525_vm1, %v15524_v2 }
 0x74e   : > { %v3790_v11 = vadd.f32 %v3789_v10, %v3721_v6 }
 0x74f   : > { %v14442_v12 = vpop.f32.mrf.mxu0 }
 0x750   : > { %14458 = vmatmul.mubr.msk.f32.vlgmr.msra.gmra.mxu1 %vm869_vm4, %v15719_v25  ;;  %14467 = vmatpush3.xpose.msk.msra.mxu0 %vm1171_vm5, %v3790_v11  ;;  %v3806_v34 = vcombine.high %v3790_v11, %v3790_v11 }
 0x751   : > { %v3794_v13 = vpop.f32.mrf.mxu0  ;;  %14460 = vmatprep.mubr.msk.f32.mxu1 %vm15525_vm1, %v15524_v2  ;;  %14471 = vmatprep.subr.mxu0 %v15524_v2 }
 0x752   : > { %v3795_v14 = vadd.f32 %v3794_v13, %v3721_v6 }
 0x753   : > { %v14445_v15 = vpop.f32.mrf.mxu0 }
 0x754   : > { %v3807_v16 = vcombine.high %v3795_v14, %v3795_v14  ;;  %14461 = vmatmul.mubr.msk.f32.gmra.mxu1 %vm869_vm4, %v15735_v33 }
 0x755   : > { %v3799_v17 = vpop.f32.mrf.mxu0  ;;  %14463 = vmatprep.mubr.msk.f32.mxu1 %vm15525_vm1, %v15524_v2 }
 0x756   : > { %v3800_v19 = vadd.f32 %v3799_v17, %v3721_v6  ;;  %14482 = vmatpush3.xpose.msk.msra.mxu1 %vm1171_vm5, %v3807_v16 }
 0x757   : > { %v14448_v20 = vpop.f32.mrf.mxu0  ;;  %14491 = vmatprep.subr.mxu1 %v15524_v2 }
 0x758   : > { %14464 = vmatmul.mubr.msk.f32.gmra.mxu1 %vm869_vm4, %v15751_v40  ;;  %v3808_v1 = vcombine.high %v3800_v19, %v3800_v19 }
 0x759   : > { %14483 = vmatprep.mubr.msk.f32.mxu1 %vm15525_vm1, %v15524_v2 }
 0x7f7   : > { %v16199_v22 = vpop.f32.mrf.mxu1 }
 0x7f9   : > { %v14397_v23 = vpop.f32.mrf.mxu1 }
 0x7fc   : > { %v16201_v24 = vpop.f32.mrf.mxu1 }
 0x7fe   : > { %v14400_v26 = vpop.f32.mrf.mxu1 }
 0x800   : > { %v16206_v29 = vpop.f32.mrf.mxu1 }
 0x802   : > { %v14403_v51 = vpop.f32.mrf.mxu1 }
 0x804   : > { %v3689_v31 = vpop.f32.mrf.mxu1 }
 0x805   : > { %v3690_v32 = vadd.f32 %v3689_v31, %v3621_v30 }
 0x806   : > { %v14425_v54 = vpop.f32.mrf.mxu1 }
 0x807   : > { %14469 = vmatmul.mubr.msk.f32.vlgmr.msra.gmra.mxu0 %vm1171_vm5, %v3690_v32  ;;  %v3706_v37 = vcombine.high %v3690_v32, %v3690_v32 }
 0x808   : > { %14472 = vmatpush3.xpose.msk.msra.mxu0 %vm1171_vm5, %v3806_v34  ;;  %v3694_v36 = vpop.f32.mrf.mxu1  ;;  %14473 = vmatprep.mubr.msk.f32.mxu0 %vm15525_vm1, %v15524_v2 }
 0x809   : > { %v3695_v58 = vadd.f32 %v3694_v36, %v3621_v30  ;;  %14476 = vmatprep.subr.mxu0 %v15524_v2 }
 0x80a   : > { %v14428_v60 = vpop.f32.mrf.mxu1 }
 0x80b   : > { %v3707_v62 = vcombine.high %v3695_v58, %v3695_v58  ;;  %14474 = vmatmul.mubr.msk.f32.vlgmr.msra.gmra.mxu0 %vm1171_vm5, %v3706_v37 }
 0x80c   : > { %14477 = vmatpush3.xpose.msk.msra.mxu0 %vm1171_vm5, %v3795_v14  ;;  %v3699_v3 = vpop.f32.mrf.mxu1  ;;  %14478 = vmatprep.mubr.msk.f32.mxu0 %vm15525_vm1, %v15524_v2 }
 0x80d   : > { %v3700_v4 = vadd.f32 %v3699_v3, %v3621_v30  ;;  %14484 = vmatmul.mubr.msk.f32.vlgmr.msra.gmra.mxu1 %vm1171_vm5, %v3707_v62  ;;  %14486 = vmatprep.subr.mxu0 %v15524_v2 }
 0x80e   : > { %14492 = vmatpush3.xpose.msk.msra.mxu1 %vm1171_vm5, %v3808_v1  ;;  %v14431_v9 = vpop.f32.mrf.mxu1  ;;  %14493 = vmatprep.mubr.msk.f32.mxu1 %vm15525_vm1, %v15524_v2 }
 0x80f   : > { %v3708_v38 = vcombine.high %v3700_v4, %v3700_v4  ;;  %14479 = vmatmul.mubr.msk.f32.vlgmr.msra.gmra.mxu0 %vm1171_vm5, %v3695_v58  ;;  %14501 = vmatprep.subr.mxu1 %v15524_v2 }
 0x810   : > { %14487 = vmatpush3.xpose.msk.msra.mxu0 %vm1171_vm5, %v3800_v19  ;;  %v3889_v39 = vpop.f32.mrf.mxu1  ;;  %14488 = vmatprep.mubr.msk.f32.mxu0 %vm15525_vm1, %v15524_v2 }
 0x811   : > { %v3890_v41 = vadd.f32 %v3889_v39, %v3821_v8  ;;  %14494 = vmatmul.mubr.msk.f32.vlgmr.msra.gmra.mxu1 %vm1171_vm5, %v3708_v38  ;;  %14496 = vmatprep.subr.mxu0 %v15524_v2 }
 0x812   : > { %v14459_v43 = vpop.f32.mrf.mxu1  ;;  %14503 = vmatprep.mubr.msk.f32.mxu1 %vm15525_vm1, %v15524_v2 }
 0x813   : > { %v3906_v44 = vcombine.high %v3890_v41, %v3890_v41  ;;  %14489 = vmatmul.mubr.msk.f32.vlgmr.msra.gmra.mxu0 %vm1171_vm5, %v3700_v4 }
 0x814   : > { %14497 = vmatpush3.msk.msra.mxu0 %vm1693_vm6, %v3890_v41  ;;  %v3894_v45 = vpop.f32.mrf.mxu1  ;;  %14498 = vmatprep.mubr.msk.f32.mxu0 %vm15525_vm1, %v15524_v2 }
 0x815   : > { %v16238_v46 = vadd.f32 %v3894_v45, %v3821_v8  ;;  %14502 = vmatpush3.msk.msra.mxu1 %vm1693_vm6, %v3906_v44  ;;  %14506 = vmatprep.subr.mxu0 %v15524_v2 }
 0x816   : > { %v14462_v18 = vpop.f32.mrf.mxu1  ;;  %14511 = vmatprep.subr.mxu1 %v15524_v2 }
 0x818   : > { %v3899_v47 = vpop.f32.mrf.mxu1 }
 0x819   : > { %v16243_v48 = vadd.f32 %v3899_v47, %v3821_v8 }
 0x81a   : > { %v14465_v49 = vpop.f32.mrf.mxu1 }
 0x8c7   : > { %v3979_v50 = vpop.f32.mrf.mxu0 }
 0x8c8   : > { %v4353_v52 = vmul.f32 0.35355338, %v3979_v50 }
 0x8c9   : > { %v14470_v53 = vpop.f32.mrf.mxu0 }
 0x8ca   : > { %v4359_v55 = vsel %vm1622_vm7, %v4353_v52, -inf }
 0x8cb   : > { %4360 = vmax.xlane.f32.xlu0 %v4359_v55  ;;  %v4053_v57 = vpop.f32.mrf.mxu0 }
 0x8cc   : > { %v4354_v59 = vmul.f32 0.35355338, %v4053_v57 }
 0x8cd   : > { %v14475_v63 = vpop.f32.mrf.mxu0  ;;  %v4201_v0 = vpop.f32.mrf.mxu1 }
 0x8ce   : > { %v4356_v6 = vmul.f32 0.35355338, %v4201_v0  ;;  %v4362_v7 = vsel %vm1622_vm7, %v4354_v59, -inf }
 0x8cf   : > { %v14485_v10 = vpop.f32.mrf.mxu1  ;;  %4363 = vmax.xlane.f32.xlu1 %v4362_v7  ;;  %v4127_v11 = vpop.f32.mrf.mxu0 }
 0x8d0   : > { %v4355_v12 = vmul.f32 0.35355338, %v4127_v11  ;;  %v4368_v16 = vsel %vm1622_vm7, %v4356_v6, -inf }
 0x8d1   : > { %v14480_v13 = vpop.f32.mrf.mxu0  ;;  %v4349_v14 = vpop.f32.mrf.mxu1 }
 0x8d2   : > { %v4358_v15 = vmul.f32 0.35355338, %v4349_v14  ;;  %v4365_v17 = vsel %vm1622_vm7, %v4355_v12, -inf }
 0x8d3   : > { %v14495_v19 = vpop.f32.mrf.mxu1  ;;  %4369 = vmax.xlane.f32.xlu1 %v4368_v16  ;;  %4366 = vmax.xlane.f32.xlu0 %v4365_v17  ;;  %v4275_v20 = vpop.f32.mrf.mxu0 }
 0x8d4   : > { %v4357_v23 = vmul.f32 0.35355338, %v4275_v20  ;;  %v4374_v28 = vsel %vm1622_vm7, %v4358_v15, -inf  ;;  %v3908_v20 = vcombine.high %v16243_v48, %v16243_v48 }
 0x8d5   : > { %v14490_v26 = vpop.f32.mrf.mxu0 }
 0x8d6   : > { %v4371_v30 = vsel %vm1622_vm7, %v4357_v23, -inf }
 0x8d7   : > { %4375 = vmax.xlane.f32.xlu1 %v4374_v28  ;;  %4372 = vmax.xlane.f32.xlu0 %v4371_v30  ;;  %v13374_v30 = vld [vmem:[%s17901_s6 + $0x78] sm:$0xff] }
 0x954   : > { %v4361_v51 = vpop.xlane.xlu0 %4360 }
 0x955   : > { %v4377_v31 = vsub.f32 %v4353_v52, %v4361_v51 }
 0x957   : > { %v4383_v32 = vmul.f32 1.442695, %v4377_v31  ;;  %v13372_v31 = vld [vmem:[%s17901_s6 + $0x68] sm:$0xff] }
 0x958   : > { %v4364_v34 = vpop.xlane.xlu1 %4363 }
 0x959   : > { %15312 = vpow2.f32 %v4383_v32  ;;  %v4378_v54 = vsub.f32 %v4354_v59, %v4364_v34  ;;  %v13371_v32 = vld [vmem:[%s17901_s6 + $0x60] sm:$0xff]  ;;  %v13392_v34 = vld [vmem:[%s17901_s6 + $0x178] sm:$0xff] }
 0x95b   : > { %v4385_v36 = vmul.f32 1.442695, %v4378_v54  ;;  %v13391_v54 = vld [vmem:[%s17901_s6 + $0x170] sm:$0xff] }
 0x95c   : > { %v4370_v37 = vpop.xlane.xlu1 %4369  ;;  %v4367_v58 = vpop.xlane.xlu0 %4366 }
 0x95d   : > { %15314 = vpow2.f32 %v4385_v36  ;;  %v4380_v60 = vsub.f32 %v4356_v6, %v4370_v37  ;;  %v4379_v61 = vsub.f32 %v4355_v12, %v4367_v58  ;;  %v13390_v36 = vld [vmem:[%s17901_s6 + $0x168] sm:$0xff]  ;;  %v13389_v37 = vld [vmem:[%s17901_s6 + $0x160] sm:$0xff]  ;;  %v13367_v58 = vld [vmem:[%s17903_s8 + $0x10] sm:$0xff] }
 0x95f   : > { %v4389_v62 = vmul.f32 1.442695, %v4380_v60  ;;  %v4387_v1 = vmul.f32 1.442695, %v4379_v61 }
 0x960   : > { %v4376_v3 = vpop.xlane.xlu1 %4375  ;;  %v4373_v4 = vpop.xlane.xlu0 %4372 }
 0x961   : > { %15316 = vpow2.f32 %v4389_v62  ;;  %v4382_v8 = vsub.f32 %v4358_v15, %v4376_v3  ;;  %v4381_v9 = vsub.f32 %v4357_v23, %v4373_v4  ;;  %v3907_v15 = vcombine.high %v16238_v46, %v16238_v46  ;;  %v13383_v3 = vld [vmem:[%s17901_s6 + $0xf8] sm:$0xff] }
 0x962   : > { %15318 = vpow2.f32 %v4387_v1 }
 0x963   : > { %v4393_v38 = vmul.f32 1.442695, %v4382_v8  ;;  %v4391_v39 = vmul.f32 1.442695, %v4381_v9  ;;  %v13382_v8 = vld [vmem:[%s17901_s6 + $0xf0] sm:$0xff] }
 0x965   : > { %15320 = vpow2.f32 %v4393_v38 }
 0x966   : > { %v15313_v41 = vpop.eup %15312  ;;  %15322 = vpow2.f32 %v4391_v39 }
 0x967   : > { %v4395_v43 = vsel %vm1622_vm7, %v15313_v41, 0.0 }
 0x968   : > { %4396 = vadd.xlane.f32.xlu0 %v4395_v43  ;;  %v13381_v43 = vld [vmem:[%s17901_s6 + $0xe8] sm:$0xff] }
 0x96a   : > { %v15315_v44 = vpop.eup %15314 }
 0x96b   : > { %v4398_v45 = vsel %vm1622_vm7, %v15315_v44, 0.0 }
 0x96c   : > { %4399 = vadd.xlane.f32.xlu1 %v4398_v45 }
 0x96e   : > { %v15317_v18 = vpop.eup %15316 }
 0x96f   : > { %v15319_v47 = vpop.eup %15318  ;;  %v4404_v49 = vsel %vm1622_vm7, %v15317_v18, 0.0 }
 0x970   : > { %4405 = vadd.xlane.f32.xlu1 %v4404_v49  ;;  %v4401_v50 = vsel %vm1622_vm7, %v15319_v47, 0.0 }
 0x971   : > { %4402 = vadd.xlane.f32.xlu0 %v4401_v50 }
 0x972   : > { %v15321_v52 = vpop.eup %15320 }
 0x973   : > { %v15323_v53 = vpop.eup %15322  ;;  %v4410_v55 = vsel %vm1622_vm7, %v15321_v52, 0.0 }
 0x974   : > { %4411 = vadd.xlane.f32.xlu1 %v4410_v55  ;;  %v4407_v57 = vsel %vm1622_vm7, %v15323_v53, 0.0 }
 0x975   : > { %4408 = vadd.xlane.f32.xlu0 %v4407_v57 }
 0x9f1   : > { %v4397_v59 = vpop.xlane.xlu0 %4396 }
 0x9f2   : > { %15324 = vrcp.f32 %v4397_v59 }
 0x9f5   : > { %v4400_v63 = vpop.xlane.xlu1 %4399 }
 0x9f6   : > { %15326 = vrcp.f32 %v4400_v63 }
 0x9f9   : > { %v4406_v0 = vpop.xlane.xlu1 %4405 }
 0x9fa   : > { %15328 = vrcp.f32 %v4406_v0  ;;  %v4403_v6 = vpop.xlane.xlu0 %4402 }
 0x9fb   : > { %15330 = vrcp.f32 %v4403_v6  ;;  %v13394_v6 = vld [vmem:[%s17902_s7 + $0xb] ss:$0 sm:$0xff] }
 0x9fd   : > { %v4412_v7 = vpop.xlane.xlu1 %4411 }
 0x9fe   : > { %15332 = vrcp.f32 %v4412_v7  ;;  %v4409_v10 = vpop.xlane.xlu0 %4408 }
 0x9ff   : > { %v15325_v11 = vpop.eup %15324  ;;  %15334 = vrcp.f32 %v4409_v10 }
 0xa00   : > { %v4419_v12 = vmul.f32 %v15325_v11, %v15313_v41  ;;  %v5199_v11 = vcombine.low %v13394_v6, %v13394_v6 }
 0xa02   : > { %14499 = vmatmul.mubr.msk.f32.vlgmr.msra.gmra.mxu0 %vm1689_vm8, %v4419_v12 }
 0xa03   : > { %v15327_v13 = vpop.eup %15326  ;;  %14507 = vmatpush3.msk.msra.mxu0 %vm1693_vm6, %v16238_v46  ;;  %14508 = vmatprep.mubr.msk.f32.mxu0 %vm15525_vm1, %v15524_v2 }
 0xa04   : > { %v4420_v14 = vmul.f32 %v15327_v13, %v15315_v44  ;;  %14516 = vmatprep.subr.mxu0 %v15524_v2 }
 0xa06   : > { %14504 = vmatmul.mubr.msk.f32.vlgmr.msra.gmra.mxu1 %vm1689_vm8, %v4420_v14 }
 0xa07   : > { %v15329_v16 = vpop.eup %15328  ;;  %14512 = vmatpush3.msk.msra.mxu1 %vm1693_vm6, %v3907_v15  ;;  %14513 = vmatprep.mubr.msk.f32.mxu1 %vm15525_vm1, %v15524_v2 }
 0xa08   : > { %v15331_v17 = vpop.eup %15330  ;;  %14521 = vmatprep.subr.mxu1 %v15524_v2  ;;  %v4422_v19 = vmul.f32 %v15329_v16, %v15317_v18  ;;  %v13380_v18 = vld [vmem:[%s17901_s6 + $0xe0] sm:$0xff] }
 0xa09   : > { %v4421_v23 = vmul.f32 %v15331_v17, %v15319_v47 }
 0xa0a   : > { %14514 = vmatmul.mubr.msk.f32.vlgmr.msra.gmra.mxu1 %vm1689_vm8, %v4422_v19  ;;  %v3587_v19 = vadd.f32 %v16144_v21, %v16199_v22  ;;  %v13385_v22 = vld [vmem:[%s17902_s7 + $0x7] ss:$0 sm:$0xff] }
 0xa0b   : > { %v15333_v26 = vpop.eup %15332  ;;  %14509 = vmatmul.mubr.msk.f32.vlgmr.msra.gmra.mxu0 %vm1689_vm8, %v4421_v23  ;;  %14522 = vmatpush3.msk.msra.mxu1 %vm1693_vm6, %v3908_v20 }
 0xa0c   : > { %v15335_v46 = vpop.eup %15334  ;;  %14517 = vmatpush3.msk.msra.mxu0 %vm1693_vm6, %v16243_v48  ;;  %14518 = vmatprep.mubr.msk.f32.mxu0 %vm15525_vm1, %v15524_v2  ;;  %v4424_v28 = vmul.f32 %v15333_v26, %v15321_v52  ;;  %v13373_v48 = vld [vmem:[%s17901_s6 + $0x70] sm:$0xff]  ;;  %v3603_v23 = vcombine.high %v3587_v19, %v3587_v19 }
 0xa0d   : > { %14523 = vmatprep.mubr.msk.f32.mxu1 %vm15525_vm1, %v15524_v2  ;;  %14537 = vmatprep.subr.mxu1 %v15524_v2  ;;  %v4423_v51 = vmul.f32 %v15335_v46, %v15323_v53 }
 0xa0e   : > { %14524 = vmatmul.mubr.msk.f32.vlgmr.msra.gmra.mxu1 %vm1689_vm8, %v4424_v28  ;;  %14526 = vmatprep.subr.mxu0 %v15524_v2  ;;  %v3592_v28 = vadd.f32 %v16156_v56, %v16201_v24  ;;  %v13376_v24 = vld [vmem:[%s17902_s7 + $0x3] ss:$0 sm:$0xff] }
 0xa0f   : > { %14519 = vmatmul.mubr.msk.f32.vlgmr.msra.gmra.mxu0 %vm1689_vm8, %v4423_v51  ;;  %14538 = vmatpush3.msra.mxu1 %v13374_v30 }
 0xa10   : > { %14539 = vmatprep.subr.mxu1 %v15524_v2  ;;  %14545 = vmatprep.mubr.msk.f32.mxu1 %vm15525_vm1, %v15524_v2 }
 0xa11   : > { %14540 = vmatpush3.msra.mxu1 %v13373_v48  ;;  %14528 = vmatprep.mubr.msk.f32.mxu0 %vm15525_vm1, %v15524_v2 }
 0xa12   : > { %14541 = vmatprep.subr.mxu1 %v15524_v2  ;;  %14527 = vmatpush3.msra.mxu0 %v13367_v58 }
 0xa13   : > { %14542 = vmatpush3.msra.mxu1 %v13372_v31  ;;  %14554 = vmatprep.subr.mxu0 %v15524_v2  ;;  %v3604_v31 = vcombine.high %v3592_v28, %v3592_v28 }
 0xa14   : > { %14543 = vmatprep.subr.mxu1 %v15524_v2 }
 0xa15   : > { %14544 = vmatpush3.msra.mxu1 %v13371_v32  ;;  %v3597_v32 = vadd.f32 %v16173_v5, %v16206_v29  ;;  %v5099_v5 = vcombine.low %v13385_v22, %v13385_v22 }
 0xa16   : > { %14546 = vmatmul.mubr.msk.f32.vlgmr.msra.gmra.mxu1 %vm869_vm4, %v15721_v27  ;;  %14571 = vmatprep.subr.mxu1 %v15524_v2 }
 0xa17   : > { %14548 = vmatprep.mubr.msk.f32.mxu1 %vm15525_vm1, %v15524_v2  ;;  %14572 = vmatpush3.msra.mxu1 %v13392_v34  ;;  %v3605_v56 = vcombine.high %v3597_v32, %v3597_v32 }
 0xa18   : > { %14573 = vmatprep.subr.mxu1 %v15524_v2 }
 0xa19   : > { %14574 = vmatpush3.msra.mxu1 %v13391_v54 }
 0xa1a   : > { %14549 = vmatmul.mubr.msk.f32.gmra.mxu1 %vm869_vm4, %v15739_v35  ;;  %14575 = vmatprep.subr.mxu1 %v15524_v2 }
 0xa1b   : > { %14551 = vmatprep.mubr.msk.f32.mxu1 %vm15525_vm1, %v15524_v2  ;;  %14576 = vmatpush3.msra.mxu1 %v13390_v36 }
 0xa1c   : > { %14577 = vmatprep.subr.mxu1 %v15524_v2 }
 0xa1d   : > { %14578 = vmatpush3.msra.mxu1 %v13389_v37 }
 0xa1e   : > { %14552 = vmatmul.mubr.msk.f32.gmra.mxu1 %vm869_vm4, %v15756_v42  ;;  %14598 = vmatprep.subr.mxu1 %v15524_v2 }
 0xa1f   : > { %14579 = vmatprep.mubr.msk.f32.mxu1 %vm15525_vm1, %v15524_v2 }
 0xa22   : > { %14580 = vmatmul.mubr.msk.f32.vlgmr.msra.gmra.mxu1 %vm869_vm4, %v15719_v25 }
 0xa23   : > { %14582 = vmatprep.mubr.msk.f32.mxu1 %vm15525_vm1, %v15524_v2 }
 0xa26   : > { %14583 = vmatmul.mubr.msk.f32.gmra.mxu1 %vm869_vm4, %v15735_v33 }
 0xa27   : > { %14585 = vmatprep.mubr.msk.f32.mxu1 %vm15525_vm1, %v15524_v2 }
 0xa2a   : > { %14586 = vmatmul.mubr.msk.f32.gmra.mxu1 %vm869_vm4, %v15751_v40 }
 0xa2b   : > { %14600 = vmatprep.mubr.msk.f32.mxu1 %vm15525_vm1, %v15524_v2 }
 0xac2   : > { %v4496_v60 = vpop.f32.mrf.mxu0 }
 0xac4   : > { %v14500_v61 = vpop.f32.mrf.mxu0 }
 0xac6   : > { %v4571_v62 = vpop.f32.mrf.mxu1 }
 0xac7   : > { %v4883_v1 = vcombine.low %v4496_v60, %v4571_v62  ;;  %v4999_v62 = vcombine.low %v13376_v24, %v13376_v24 }
 0xac8   : > { %v14505_v4 = vpop.f32.mrf.mxu1 }
 0xac9   : > { %14529 = vmatmul.mubr.msk.f32.vlgmr.msra.gmra.mxu0 %vm1171_vm5, %v4883_v1 }
 0xaca   : > { %v4721_v9 = vpop.f32.mrf.mxu1  ;;  %14531 = vmatprep.mubr.msk.f32.mxu0 %vm15525_vm1, %v15524_v2  ;;  %14555 = vmatpush3.msra.mxu0 %v13383_v3 }
 0xacb   : > { %v4646_v38 = vpop.f32.mrf.mxu0  ;;  %14556 = vmatprep.subr.mxu0 %v15524_v2 }
 0xacc   : > { %v4884_v39 = vcombine.low %v4646_v38, %v4721_v9  ;;  %v14515_v41 = vpop.f32.mrf.mxu1  ;;  %14557 = vmatpush3.msra.mxu0 %v13382_v8 }
 0xacd   : > { %v14510_v44 = vpop.f32.mrf.mxu0  ;;  %14558 = vmatprep.subr.mxu0 %v15524_v2 }
 0xace   : > { %14532 = vmatmul.mubr.msk.f32.gmra.mxu0 %vm1171_vm5, %v4884_v39  ;;  %v4871_v45 = vpop.f32.mrf.mxu1 }
 0xacf   : > { %v4796_v47 = vpop.f32.mrf.mxu0  ;;  %14534 = vmatprep.mubr.msk.f32.mxu0 %vm15525_vm1, %v15524_v2  ;;  %14559 = vmatpush3.msra.mxu0 %v13381_v43 }
 0xad0   : > { %v4885_v49 = vcombine.low %v4796_v47, %v4871_v45  ;;  %v14525_v50 = vpop.f32.mrf.mxu1  ;;  %14560 = vmatprep.subr.mxu0 %v15524_v2 }
 0xad1   : > { %v14520_v52 = vpop.f32.mrf.mxu0  ;;  %14561 = vmatpush3.msra.mxu0 %v13380_v18 }
 0xad2   : > { %14535 = vmatmul.mubr.msk.f32.gmra.mxu0 %vm1171_vm5, %v4885_v49  ;;  %14588 = vmatprep.subr.mxu0 %v15524_v2 }
 0xad3   : > { %14562 = vmatprep.mubr.msk.f32.mxu0 %vm15525_vm1, %v15524_v2 }
 0xad6   : > { %v5067_v53 = vpop.f32.mrf.mxu1  ;;  %14563 = vmatmul.mubr.msk.f32.vlgmr.msra.gmra.mxu0 %vm869_vm4, %v15719_v25 }
 0xad7   : > { %14565 = vmatprep.mubr.msk.f32.mxu0 %vm15525_vm1, %v15524_v2  ;;  %v5068_v8 = vadd.f32 %v5067_v53, %v4999_v62 }
 0xad8   : > { %v14547_v55 = vpop.f32.mrf.mxu1 }
 0xad9   : > { %v5084_v43 = vcombine.high %v5068_v8, %v5068_v8 }
 0xada   : > { %v5072_v57 = vpop.f32.mrf.mxu1  ;;  %14566 = vmatmul.mubr.msk.f32.gmra.mxu0 %vm869_vm4, %v15735_v33 }
 0xadb   : > { %14568 = vmatprep.mubr.msk.f32.mxu0 %vm15525_vm1, %v15524_v2  ;;  %v5073_v44 = vadd.f32 %v5072_v57, %v4999_v62 }
 0xadc   : > { %v14550_v59 = vpop.f32.mrf.mxu1 }
 0xadd   : > { %v5085_v50 = vcombine.high %v5073_v44, %v5073_v44 }
 0xade   : > { %v16382_v63 = vpop.f32.mrf.mxu1  ;;  %14569 = vmatmul.mubr.msk.f32.gmra.mxu0 %vm869_vm4, %v15751_v40 }
 0xadf   : > { %14590 = vmatprep.mubr.msk.f32.mxu0 %vm15525_vm1, %v15524_v2  ;;  %v5078_v52 = vadd.f32 %v16382_v63, %v4999_v62 }
 0xae0   : > { %v14553_v0 = vpop.f32.mrf.mxu1 }
 0xae1   : > { %v5086_v57 = vcombine.high %v5078_v52, %v5078_v52 }
 0xae2   : > { %v16391_v7 = vpop.f32.mrf.mxu1 }
 0xae3   : > { %v5268_v53 = vadd.f32 %v16391_v7, %v5199_v11 }
 0xae4   : > { %v14581_v10 = vpop.f32.mrf.mxu1 }
 0xae5   : > { %v5284_v59 = vcombine.high %v5268_v53, %v5268_v53 }
 0xae6   : > { %v5272_v12 = vpop.f32.mrf.mxu1 }
 0xae7   : > { %v16393_v13 = vadd.f32 %v5272_v12, %v5199_v11 }
 0xae8   : > { %v14584_v14 = vpop.f32.mrf.mxu1 }
 0xaea   : > { %v5277_v15 = vpop.f32.mrf.mxu1 }
 0xaeb   : > { %v16395_v16 = vadd.f32 %v5277_v15, %v5199_v11 }
 0xaec   : > { %v14587_v17 = vpop.f32.mrf.mxu1 }
 0xb89   : > { %v4958_v20 = vpop.f32.mrf.mxu0 }
 0xb8a   : > { %v4975_v26 = vcombine.high %v4958_v20, %v4958_v20  ;;  %v16399_v46 = vadd.f32 %v4958_v20, %v3587_v19 }
 0xb8b   : > { %v14530_v30 = vpop.f32.mrf.mxu0 }
 0xb8c   : > { %v16403_v51 = vadd.f32 %v4975_v26, %v3603_v23 }
 0xb8e   : > { %v4963_v48 = vpop.f32.mrf.mxu0 }
 0xb8f   : > { %v4976_v34 = vcombine.high %v4963_v48, %v4963_v48  ;;  %v16407_v54 = vadd.f32 %v4963_v48, %v3592_v28 }
 0xb90   : > { %v14533_v21 = vpop.f32.mrf.mxu0 }
 0xb91   : > { %v16412_v36 = vadd.f32 %v4976_v34, %v3604_v31 }
 0xb92   : > { %v4968_v37 = vpop.f32.mrf.mxu0 }
 0xb93   : > { %v4977_v58 = vcombine.high %v4968_v37, %v4968_v37  ;;  %v16417_v60 = vadd.f32 %v4968_v37, %v3597_v32 }
 0xb94   : > { %v14536_v29 = vpop.f32.mrf.mxu0 }
 0xb95   : > { %v16419_v61 = vadd.f32 %v4977_v58, %v3605_v56 }
 0xb96   : > { %v5167_v1 = vpop.f32.mrf.mxu0 }
 0xb97   : > { %v5168_v3 = vadd.f32 %v5167_v1, %v5099_v5 }
 0xb98   : > { %v14564_v4 = vpop.f32.mrf.mxu0 }
 0xb99   : > { %14589 = vmatpush3.xpose.msk.msra.mxu0 %vm1171_vm5, %v5168_v3  ;;  %v5184_v38 = vcombine.high %v5168_v3, %v5168_v3 }
 0xb9a   : > { %v5172_v9 = vpop.f32.mrf.mxu0  ;;  %14593 = vmatprep.subr.mxu0 %v15524_v2 }
 0xb9b   : > { %v5173_v39 = vadd.f32 %v5172_v9, %v5099_v5 }
 0xb9c   : > { %v14567_v41 = vpop.f32.mrf.mxu0  ;;  %14591 = vmatmul.mubr.msk.f32.vlgmr.msra.gmra.mxu0 %vm1171_vm5, %v5068_v8 }
 0xb9d   : > { %14594 = vmatpush3.xpose.msk.msra.mxu0 %vm1171_vm5, %v5184_v38  ;;  %14599 = vmatpush3.xpose.msk.msra.mxu1 %vm1171_vm5, %v5173_v39  ;;  %v5185_v18 = vcombine.high %v5173_v39, %v5173_v39 }
 0xb9e   : > { %v5177_v45 = vpop.f32.mrf.mxu0  ;;  %14595 = vmatprep.mubr.msk.f32.mxu0 %vm15525_vm1, %v15524_v2  ;;  %14603 = vmatprep.subr.mxu0 %v15524_v2 }
 0xb9f   : > { %v5178_v47 = vadd.f32 %v5177_v45, %v5099_v5  ;;  %14608 = vmatprep.subr.mxu1 %v15524_v2 }
 0xba0   : > { %v14570_v49 = vpop.f32.mrf.mxu0  ;;  %14596 = vmatmul.mubr.msk.f32.vlgmr.msra.gmra.mxu0 %vm1171_vm5, %v5084_v43  ;;  %14601 = vmatmul.mubr.msk.f32.vlgmr.msra.gmra.mxu1 %vm1171_vm5, %v5073_v44 }
 0xba1   : > { %14604 = vmatpush3.xpose.msk.msra.mxu0 %vm1171_vm5, %v5185_v18  ;;  %14609 = vmatpush3.xpose.msk.msra.mxu1 %vm1171_vm5, %v5178_v47  ;;  %v5186_v55 = vcombine.high %v5178_v47, %v5178_v47 }
 0xba2   : > { %14605 = vmatprep.mubr.msk.f32.mxu0 %vm15525_vm1, %v15524_v2  ;;  %14610 = vmatprep.mubr.msk.f32.mxu1 %vm15525_vm1, %v15524_v2 }
 0xba3   : > { %14613 = vmatprep.subr.mxu0 %v15524_v2  ;;  %14618 = vmatprep.subr.mxu1 %v15524_v2 }
 0xba4   : > { %14606 = vmatmul.mubr.msk.f32.vlgmr.msra.gmra.mxu0 %vm1171_vm5, %v5085_v50  ;;  %14611 = vmatmul.mubr.msk.f32.vlgmr.msra.gmra.mxu1 %vm1171_vm5, %v5078_v52 }
 0xba5   : > { %14614 = vmatpush3.xpose.msk.msra.mxu0 %vm1171_vm5, %v5186_v55  ;;  %14619 = vmatpush3.msk.msra.mxu1 %vm1693_vm6, %v5268_v53 }
 0xba6   : > { %14615 = vmatprep.mubr.msk.f32.mxu0 %vm15525_vm1, %v15524_v2  ;;  %14623 = vmatprep.subr.mxu0 %v15524_v2 }
 0xba7   : > { %14620 = vmatprep.mubr.msk.f32.mxu1 %vm15525_vm1, %v15524_v2  ;;  %14628 = vmatprep.subr.mxu1 %v15524_v2 }
 0xba8   : > { %14616 = vmatmul.mubr.msk.f32.vlgmr.msra.gmra.mxu0 %vm1171_vm5, %v5086_v57 }
 0xba9   : > { %14624 = vmatpush3.msk.msra.mxu0 %vm1693_vm6, %v5284_v59  ;;  %14625 = vmatprep.mubr.msk.f32.mxu0 %vm15525_vm1, %v15524_v2 }
 0xbaa   : > { %14633 = vmatprep.subr.mxu0 %v15524_v2 }
 0xc5c   : > { %v5357_v63 = vpop.f32.mrf.mxu0 }
 0xc5d   : > { %v5731_v0 = vmul.f32 0.35355338, %v5357_v63 }
 0xc5e   : > { %v14592_v6 = vpop.f32.mrf.mxu0 }
 0xc5f   : > { %v5737_v7 = vsel %vm1622_vm7, %v5731_v0, -inf }
 0xc60   : > { %v5505_v10 = vpop.f32.mrf.mxu1  ;;  %5738 = vmax.xlane.f32.xlu0 %v5737_v7  ;;  %v5431_v11 = vpop.f32.mrf.mxu0 }
 0xc61   : > { %v5733_v12 = vmul.f32 0.35355338, %v5505_v10  ;;  %v5732_v14 = vmul.f32 0.35355338, %v5431_v11 }
 0xc62   : > { %v14597_v15 = vpop.f32.mrf.mxu0  ;;  %v14602_v17 = vpop.f32.mrf.mxu1 }
 0xc63   : > { %v5743_v19 = vsel %vm1622_vm7, %v5733_v12, -inf  ;;  %v5740_v20 = vsel %vm1622_vm7, %v5732_v14, -inf }
 0xc64   : > { %v5653_v23 = vpop.f32.mrf.mxu1  ;;  %5744 = vmax.xlane.f32.xlu0 %v5743_v19  ;;  %5741 = vmax.xlane.f32.xlu1 %v5740_v20  ;;  %v5579_v26 = vpop.f32.mrf.mxu0 }
 0xc65   : > { %v5735_v28 = vmul.f32 0.35355338, %v5653_v23  ;;  %v5734_v30 = vmul.f32 0.35355338, %v5579_v26 }
 0xc66   : > { %v14607_v48 = vpop.f32.mrf.mxu0  ;;  %v14612_v31 = vpop.f32.mrf.mxu1 }
 0xc67   : > { %v5749_v32 = vsel %vm1622_vm7, %v5735_v28, -inf  ;;  %v5746_v34 = vsel %vm1622_vm7, %v5734_v30, -inf  ;;  %v5285_v31 = vcombine.high %v16393_v13, %v16393_v13 }
 0xc68   : > { %5750 = vmax.xlane.f32.xlu0 %v5749_v32  ;;  %5747 = vmax.xlane.f32.xlu1 %v5746_v34  ;;  %v5727_v21 = vpop.f32.mrf.mxu0 }
 0xc69   : > { %v5736_v22 = vmul.f32 0.35355338, %v5727_v21 }
 0xc6a   : > { %v14617_v37 = vpop.f32.mrf.mxu0 }
 0xc6b   : > { %v5752_v56 = vsel %vm1622_vm7, %v5736_v22, -inf }
 0xc6c   : > { %5753 = vmax.xlane.f32.xlu1 %v5752_v56 }
 0xce9   : > { %v5739_v24 = vpop.xlane.xlu0 %5738 }
 0xcea   : > { %v5755_v58 = vsub.f32 %v5731_v0, %v5739_v24 }
 0xcec   : > { %v5761_v5 = vmul.f32 1.442695, %v5755_v58 }
 0xced   : > { %v5745_v29 = vpop.xlane.xlu0 %5744  ;;  %v5742_v62 = vpop.xlane.xlu1 %5741 }
 0xcee   : > { %15336 = vpow2.f32 %v5761_v5  ;;  %v5757_v1 = vsub.f32 %v5733_v12, %v5745_v29  ;;  %v5756_v3 = vsub.f32 %v5732_v14, %v5742_v62 }
 0xcf0   : > { %v5765_v4 = vmul.f32 1.442695, %v5757_v1  ;;  %v5763_v8 = vmul.f32 1.442695, %v5756_v3 }
 0xcf1   : > { %v5751_v9 = vpop.xlane.xlu0 %5750  ;;  %v5748_v38 = vpop.xlane.xlu1 %5747 }
 0xcf2   : > { %15338 = vpow2.f32 %v5765_v4  ;;  %v5759_v39 = vsub.f32 %v5735_v28, %v5751_v9  ;;  %v5758_v41 = vsub.f32 %v5734_v30, %v5748_v38 }
 0xcf3   : > { %15340 = vpow2.f32 %v5763_v8 }
 0xcf4   : > { %v5769_v43 = vmul.f32 1.442695, %v5759_v39  ;;  %v5767_v44 = vmul.f32 1.442695, %v5758_v41 }
 0xcf5   : > { %v5754_v45 = vpop.xlane.xlu1 %5753 }
 0xcf6   : > { %15342 = vpow2.f32 %v5769_v43  ;;  %v5760_v18 = vsub.f32 %v5736_v22, %v5754_v45  ;;  %v5286_v22 = vcombine.high %v16395_v16, %v16395_v16  ;;  %v13426_v45 = vld [vmem:[%s17904_s9] ss:$0 sm:$0xff] }
 0xcf7   : > { %15344 = vpow2.f32 %v5767_v44 }
 0xcf8   : > { %v5771_v47 = vmul.f32 1.442695, %v5760_v18 }
 0xcfa   : > { %15346 = vpow2.f32 %v5771_v47 }
 0xcfb   : > { %v15337_v49 = vpop.eup %15336 }
 0xcfc   : > { %v5773_v50 = vsel %vm1622_vm7, %v15337_v49, 0.0 }
 0xcfd   : > { %5774 = vadd.xlane.f32.xlu0 %v5773_v50 }
 0xcff   : > { %v15339_v52 = vpop.eup %15338 }
 0xd00   : > { %v15341_v53 = vpop.eup %15340  ;;  %v5779_v55 = vsel %vm1622_vm7, %v15339_v52, 0.0 }
 0xd01   : > { %5780 = vadd.xlane.f32.xlu0 %v5779_v55  ;;  %v5776_v57 = vsel %vm1622_vm7, %v15341_v53, 0.0 }
 0xd02   : > { %5777 = vadd.xlane.f32.xlu1 %v5776_v57  ;;  %v845_v57 = vcombine.high %v15721_v27, %v15721_v27 }
 0xd03   : > { %v15343_v59 = vpop.eup %15342 }
 0xd04   : > { %v15345_v63 = vpop.eup %15344  ;;  %v5785_v0 = vsel %vm1622_vm7, %v15343_v59, 0.0 }
 0xd05   : > { %5786 = vadd.xlane.f32.xlu0 %v5785_v0  ;;  %v5782_v6 = vsel %vm1622_vm7, %v15345_v63, 0.0 }
 0xd06   : > { %5783 = vadd.xlane.f32.xlu1 %v5782_v6 }
 0xd07   : > { %v15347_v7 = vpop.eup %15346 }
 0xd08   : > { %v5788_v10 = vsel %vm1622_vm7, %v15347_v7, 0.0 }
 0xd0a   : > { %5789 = vadd.xlane.f32.xlu1 %v5788_v10 }
 0xd86   : > { %v5775_v11 = vpop.xlane.xlu0 %5774 }
 0xd87   : > { %15348 = vrcp.f32 %v5775_v11 }
 0xd8a   : > { %v5781_v12 = vpop.xlane.xlu0 %5780 }
 0xd8b   : > { %15350 = vrcp.f32 %v5781_v12  ;;  %v5778_v14 = vpop.xlane.xlu1 %5777 }
 0xd8c   : > { %15352 = vrcp.f32 %v5778_v14 }
 0xd8e   : > { %v5787_v15 = vpop.xlane.xlu0 %5786 }
 0xd8f   : > { %15354 = vrcp.f32 %v5787_v15  ;;  %v5784_v17 = vpop.xlane.xlu1 %5783 }
 0xd90   : > { %15356 = vrcp.f32 %v5784_v17 }
 0xd93   : > { %v5790_v19 = vpop.xlane.xlu1 %5789 }
 0xd94   : > { %v15349_v20 = vpop.eup %15348  ;;  %15358 = vrcp.f32 %v5790_v19 }
 0xd95   : > { %v5797_v23 = vmul.f32 %v15349_v20, %v15337_v49 }
 0xd97   : > { %14621 = vmatmul.mubr.msk.f32.vlgmr.msra.gmra.mxu1 %vm1689_vm8, %v5797_v23 }
 0xd98   : > { %v15351_v26 = vpop.eup %15350  ;;  %14629 = vmatpush3.msk.msra.mxu1 %vm1693_vm6, %v16393_v13  ;;  %14630 = vmatprep.mubr.msk.f32.mxu1 %vm15525_vm1, %v15524_v2 }
 0xd99   : > { %v15353_v28 = vpop.eup %15352  ;;  %14638 = vmatprep.subr.mxu1 %v15524_v2  ;;  %v5799_v30 = vmul.f32 %v15351_v26, %v15339_v52 }
 0xd9a   : > { %v5798_v48 = vmul.f32 %v15353_v28, %v15341_v53 }
 0xd9b   : > { %14631 = vmatmul.mubr.msk.f32.vlgmr.msra.gmra.mxu1 %vm1689_vm8, %v5799_v30 }
 0xd9c   : > { %v15355_v32 = vpop.eup %15354  ;;  %14626 = vmatmul.mubr.msk.f32.vlgmr.msra.gmra.mxu0 %vm1689_vm8, %v5798_v48  ;;  %14639 = vmatpush3.msk.msra.mxu1 %vm1693_vm6, %v16395_v16  ;;  %v13422_v16 = vld [vmem:[%s17903_s8 + $0x18] sm:$0xff] }
 0xd9d   : > { %v15357_v34 = vpop.eup %15356  ;;  %14634 = vmatpush3.msk.msra.mxu0 %vm1693_vm6, %v5285_v31  ;;  %14635 = vmatprep.mubr.msk.f32.mxu0 %vm15525_vm1, %v15524_v2  ;;  %v5801_v21 = vmul.f32 %v15355_v32, %v15343_v59 }
 0xd9e   : > { %14640 = vmatprep.mubr.msk.f32.mxu1 %vm15525_vm1, %v15524_v2  ;;  %14643 = vmatprep.subr.mxu0 %v15524_v2  ;;  %v5800_v13 = vmul.f32 %v15357_v34, %v15345_v63 }
 0xd9f   : > { %14641 = vmatmul.mubr.msk.f32.vlgmr.msra.gmra.mxu1 %vm1689_vm8, %v5801_v21  ;;  %14648 = vmatprep.subr.mxu1 %v15524_v2 }
 0xda0   : > { %14636 = vmatmul.mubr.msk.f32.vlgmr.msra.gmra.mxu0 %vm1689_vm8, %v5800_v13  ;;  %14650 = vmatprep.mubr.msk.f32.mxu1 %vm15525_vm1, %v15524_v2 }
 0xda1   : > { %v15359_v37 = vpop.eup %15358  ;;  %14644 = vmatpush3.msk.msra.mxu0 %vm1693_vm6, %v5286_v22  ;;  %14645 = vmatprep.mubr.msk.f32.mxu0 %vm15525_vm1, %v15524_v2 }
 0xda2   : > { %v5802_v56 = vmul.f32 %v15359_v37, %v15347_v7  ;;  %14659 = vmatprep.subr.mxu0 %v15524_v2  ;;  %14649 = vmatpush3.msra.mxu1 %v13422_v16 }
 0xda3   : > { %14676 = vmatprep.subr.mxu1 %v15524_v2 }
 0xda4   : > { %14646 = vmatmul.mubr.msk.f32.vlgmr.msra.gmra.mxu0 %vm1689_vm8, %v5802_v56 }
 0xda5   : > { %14667 = vmatprep.mubr.msk.f32.mxu0 %vm15525_vm1, %v15524_v2 }
 0xe57   : > { %v5874_v24 = vpop.f32.mrf.mxu1 }
 0xe59   : > { %v14622_v58 = vpop.f32.mrf.mxu1 }
 0xe5b   : > { %v6024_v5 = vpop.f32.mrf.mxu1 }
 0xe5c   : > { %v5949_v29 = vpop.f32.mrf.mxu0 }
 0xe5d   : > { %v6261_v62 = vcombine.low %v5874_v24, %v5949_v29  ;;  %v14632_v1 = vpop.f32.mrf.mxu1 }
 0xe5e   : > { %v14627_v3 = vpop.f32.mrf.mxu0 }
 0xe5f   : > { %14651 = vmatmul.mubr.msk.f32.vlgmr.msra.gmra.mxu1 %vm1171_vm5, %v6261_v62  ;;  %v6174_v4 = vpop.f32.mrf.mxu1 }
 0xe60   : > { %v6099_v8 = vpop.f32.mrf.mxu0  ;;  %14653 = vmatprep.mubr.msk.f32.mxu1 %vm15525_vm1, %v15524_v2 }
 0xe61   : > { %v6262_v9 = vcombine.low %v6024_v5, %v6099_v8  ;;  %v14642_v38 = vpop.f32.mrf.mxu1 }
 0xe62   : > { %v14637_v39 = vpop.f32.mrf.mxu0 }
 0xe63   : > { %14654 = vmatmul.mubr.msk.f32.gmra.mxu1 %vm1171_vm5, %v6262_v9 }
 0xe64   : > { %v6249_v41 = vpop.f32.mrf.mxu0  ;;  %14656 = vmatprep.mubr.msk.f32.mxu1 %vm15525_vm1, %v15524_v2 }
 0xe65   : > { %v6263_v43 = vcombine.low %v6174_v4, %v6249_v41 }
 0xe66   : > { %v14647_v44 = vpop.f32.mrf.mxu0 }
 0xe67   : > { %14657 = vmatmul.mubr.msk.f32.gmra.mxu1 %vm1171_vm5, %v6263_v43 }
 0xe68   : > { %14692 = vmatprep.mubr.msk.f32.mxu1 %vm15525_vm1, %v15524_v2 }
 0xf1f   : > { %v6336_v18 = vpop.f32.mrf.mxu1 }
 0xf20   : > { %v6353_v47 = vcombine.high %v6336_v18, %v6336_v18  ;;  %v6359_v49 = vadd.f32 %v6336_v18, %v16399_v46 }
 0xf21   : > { %v14652_v50 = vpop.f32.mrf.mxu1 }
 0xf22   : > { %v6360_v52 = vadd.f32 %v6353_v47, %v16403_v51  ;;  %v6369_v53 = vadd.f32 %v13426_v45, %v6359_v49 }
 0xf23   : > { %v6341_v55 = vpop.f32.mrf.mxu1 }
 0xf24   : > { %v6354_v59 = vcombine.high %v6341_v55, %v6341_v55  ;;  %v6361_v63 = vadd.f32 %v6341_v55, %v16407_v54  ;;  %v6375_v0 = vadd.f32 %v6369_v53, %v15721_v27  ;;  %v6370_v6 = vadd.f32 %v13426_v45, %v6360_v52  ;;  %v6484_v55 = vld [vmem:[%s17905_s10 + $0x18] sm:$0xff] }
 0xf25   : > { %v14655_v7 = vpop.f32.mrf.mxu1  ;;  %v846_v27 = vcombine.high %v15739_v35, %v15739_v35  ;;  %14660 = vmatpush3.msra.mxu0 %v6484_v55 }
 0xf26   : > { %v6362_v10 = vadd.f32 %v6354_v59, %v16412_v36  ;;  %v6371_v11 = vadd.f32 %v13426_v45, %v6361_v63  ;;  %v6382_v46 = vsel %vm6381_vm9, %v6375_v0, 0.0  ;;  %v6376_v12 = vadd.f32 %v6370_v6, %v845_v57  ;;  %v6483_v57 = vld [vmem:[%s17905_s10 + $0x10] sm:$0xff]  ;;  %14661 = vmatprep.subr.mxu0 %v15524_v2  ;;  %v6482_v59 = vld [vmem:[%s17905_s10 + $0x8] sm:$0xff]  ;;  %v6481_v63 = vld [vmem:[%s17905_s10] sm:$0xff] }
 0xf27   : > { %6383 = vadd.xlane.f32.xlu0 %v6382_v46  ;;  %v6346_v51 = vpop.f32.mrf.mxu1  ;;  %14662 = vmatpush3.msra.mxu0 %v6483_v57  ;;  %v6609_v6 = vld [vmem:[%s17907_s12 + $0x30] sm:$0xff]  ;;  %v6608_v7 = vld [vmem:[%s17907_s12 + $0x28] sm:$0xff] }
 0xf28   : > { %v6355_v14 = vcombine.high %v6346_v51, %v6346_v51  ;;  %v6363_v15 = vadd.f32 %v6346_v51, %v16417_v60  ;;  %v6385_v17 = vsel %vm6381_vm9, %v6376_v12, 0.0  ;;  %v6377_v19 = vadd.f32 %v6371_v11, %v15739_v35  ;;  %14663 = vmatprep.subr.mxu0 %v15524_v2 }
 0xf29   : > { %6386 = vadd.xlane.f32.xlu1 %v6385_v17  ;;  %v14658_v54 = vpop.f32.mrf.mxu1  ;;  %v6372_v20 = vadd.f32 %v13426_v45, %v6362_v10  ;;  %v847_v60 = vcombine.high %v15756_v42, %v15756_v42  ;;  %14664 = vmatpush3.msra.mxu0 %v6482_v59 }
 0xf2a   : > { %v6364_v36 = vadd.f32 %v6355_v14, %v16419_v61  ;;  %v6373_v23 = vadd.f32 %v13426_v45, %v6363_v15  ;;  %v6388_v26 = vsel %vm6381_vm9, %v6377_v19, 0.0  ;;  %14665 = vmatprep.subr.mxu0 %v15524_v2 }
 0xf2b   : > { %6389 = vadd.xlane.f32.xlu0 %v6388_v26  ;;  %v6378_v28 = vadd.f32 %v6372_v20, %v846_v27  ;;  %14666 = vmatpush3.msra.mxu0 %v6481_v63 }
 0xf2c   : > { %v6379_v30 = vadd.f32 %v6373_v23, %v15756_v42  ;;  %v6374_v48 = vadd.f32 %v13426_v45, %v6364_v36  ;;  %14701 = vmatprep.subr.mxu0 %v15524_v2 }
 0xf2d   : > { %v6391_v31 = vsel %vm6381_vm9, %v6378_v28, 0.0 }
 0xf2e   : > { %6392 = vadd.xlane.f32.xlu1 %v6391_v31  ;;  %v6394_v32 = vsel %vm6381_vm9, %v6379_v30, 0.0  ;;  %v6380_v35 = vadd.f32 %v6374_v48, %v847_v60  ;;  %v13427_v31 = vld [vmem:[%s17904_s9 + $0x1] ss:$0 sm:$0xff] }
 0xf2f   : > { %6395 = vadd.xlane.f32.xlu0 %v6394_v32 }
 0xf30   : > { %v6397_v61 = vsel %vm6381_vm9, %v6380_v35, 0.0 }
 0xf32   : > { %6398 = vadd.xlane.f32.xlu1 %v6397_v61 }
 0xfb0   : > { %v6384_v34 = vpop.xlane.xlu0 %6383 }
 0xfb1   : > { %v6401_v21 = vmul.f32 0.03125, %v6384_v34 }
 0xfb2   : > { %v6387_v13 = vpop.xlane.xlu1 %6386 }
 0xfb3   : > { %v16538_v22 = vsub.f32 %v6375_v0, %v6401_v21  ;;  %v6402_v37 = vmul.f32 0.03125, %v6387_v13  ;;  %v6610_v0 = vld [vmem:[%s17907_s12 + $0x38] sm:$0xff]  ;;  %v13428_v13 = vld [vmem:[%s17904_s9 + $0x2] ss:$0 sm:$0xff] }
 0xfb4   : > { %v6390_v56 = vpop.xlane.xlu0 %6389  ;;  %14677 = vmatpush3.msra.mxu1 %v6610_v0 }
 0xfb5   : > { %v16540_v16 = vsub.f32 %v6376_v12, %v6402_v37  ;;  %v6403_v42 = vmul.f32 0.03125, %v6390_v56  ;;  %v6413_v24 = vmul.f32 %v16538_v22, %v16538_v22  ;;  %14678 = vmatprep.subr.mxu1 %v15524_v2 }
 0xfb6   : > { %14679 = vmatpush3.msra.mxu1 %v6609_v6 }
 0xfb7   : > { %v16544_v58 = vsub.f32 %v6377_v19, %v6403_v42  ;;  %v6393_v5 = vpop.xlane.xlu1 %6392  ;;  %v6419_v29 = vsel %vm6381_vm9, %v6413_v24, 0.0  ;;  %v6414_v62 = vmul.f32 %v16540_v16, %v16540_v16  ;;  %14680 = vmatprep.subr.mxu1 %v15524_v2 }
 0xfb8   : > { %v6404_v1 = vmul.f32 0.03125, %v6393_v5  ;;  %6420 = vadd.xlane.f32.xlu0 %v6419_v29  ;;  %v6396_v3 = vpop.xlane.xlu0 %6395  ;;  %14681 = vmatpush3.msra.mxu1 %v6608_v7 }
 0xfb9   : > { %v6405_v4 = vmul.f32 0.03125, %v6396_v3  ;;  %v6422_v8 = vsel %vm6381_vm9, %v6414_v62, 0.0  ;;  %v6415_v9 = vmul.f32 %v16544_v58, %v16544_v58  ;;  %14682 = vmatprep.subr.mxu1 %v15524_v2 }
 0xfba   : > { %v16552_v38 = vsub.f32 %v6378_v28, %v6404_v1  ;;  %6423 = vadd.xlane.f32.xlu1 %v6422_v8 }
 0xfbb   : > { %v16554_v39 = vsub.f32 %v6379_v30, %v6405_v4  ;;  %v6399_v41 = vpop.xlane.xlu1 %6398  ;;  %v6425_v43 = vsel %vm6381_vm9, %v6415_v9, 0.0 }
 0xfbc   : > { %v6406_v44 = vmul.f32 0.03125, %v6399_v41  ;;  %6426 = vadd.xlane.f32.xlu0 %v6425_v43  ;;  %v6416_v45 = vmul.f32 %v16552_v38, %v16552_v38 }
 0xfbd   : > { %v6417_v18 = vmul.f32 %v16554_v39, %v16554_v39 }
 0xfbe   : > { %v16561_v47 = vsub.f32 %v6380_v35, %v6406_v44  ;;  %v6428_v49 = vsel %vm6381_vm9, %v6416_v45, 0.0 }
 0xfbf   : > { %6429 = vadd.xlane.f32.xlu1 %v6428_v49  ;;  %v6431_v50 = vsel %vm6381_vm9, %v6417_v18, 0.0  ;;  %v6607_v18 = vld [vmem:[%s17907_s12 + $0x20] sm:$0xff]  ;;  %v6605_v49 = vld [vmem:[%s17907_s12 + $0x10] sm:$0xff] }
 0xfc0   : > { %6432 = vadd.xlane.f32.xlu0 %v6431_v50  ;;  %v6418_v52 = vmul.f32 %v16561_v47, %v16561_v47  ;;  %14683 = vmatpush3.msra.mxu1 %v6607_v18  ;;  %v6604_v50 = vld [vmem:[%s17907_s12 + $0x8] sm:$0xff] }
 0xfc1   : > { %14684 = vmatprep.subr.mxu1 %v15524_v2 }
 0xfc2   : > { %v6434_v53 = vsel %vm6381_vm9, %v6418_v52, 0.0  ;;  %v6603_v52 = vld [vmem:[%s17907_s12] sm:$0xff] }
 0xfc3   : > { %6435 = vadd.xlane.f32.xlu1 %v6434_v53  ;;  %v13429_v53 = vld [vmem:[%s17906_s11] ss:$0 sm:$0xff] }
 0xfc4   : > { %v6500_v55 = vcombine.low %v13429_v53, %v13429_v53 }
0x1041   : > { %v6421_v10 = vpop.xlane.xlu0 %6420 }
0x1042   : > { %v6437_v11 = vmul.f32 0.03125, %v6421_v10 }
0x1043   : > { %v6424_v46 = vpop.xlane.xlu1 %6423 }
0x1044   : > { %v6443_v12 = vadd.f32 1e-05, %v6437_v11  ;;  %v6438_v51 = vmul.f32 0.03125, %v6424_v46 }
0x1045   : > { %v6427_v14 = vpop.xlane.xlu0 %6426 }
0x1046   : > { %15360 = vrsqrt.f32 %v6443_v12  ;;  %v6444_v15 = vadd.f32 1e-05, %v6438_v51  ;;  %v6439_v17 = vmul.f32 0.03125, %v6427_v14  ;;  %v13457_v51 = vld [vmem:[%s17901_s6 + $0x218] sm:$0xff] }
0x1048   : > { %15362 = vrsqrt.f32 %v6444_v15  ;;  %v6445_v19 = vadd.f32 1e-05, %v6439_v17  ;;  %v6430_v54 = vpop.xlane.xlu1 %6429  ;;  %v13456_v17 = vld [vmem:[%s17901_s6 + $0x210] sm:$0xff] }
0x1049   : > { %v6440_v27 = vmul.f32 0.03125, %v6430_v54  ;;  %v6433_v20 = vpop.xlane.xlu0 %6432 }
0x104a   : > { %15364 = vrsqrt.f32 %v6445_v19  ;;  %v6441_v36 = vmul.f32 0.03125, %v6433_v20 }
0x104b   : > { %v6446_v23 = vadd.f32 1e-05, %v6440_v27 }
0x104c   : > { %v6447_v26 = vadd.f32 1e-05, %v6441_v36  ;;  %v6436_v28 = vpop.xlane.xlu1 %6435 }
0x104d   : > { %15366 = vrsqrt.f32 %v6446_v23  ;;  %v6442_v30 = vmul.f32 0.03125, %v6436_v28 }
0x104e   : > { %15368 = vrsqrt.f32 %v6447_v26  ;;  %v13455_v26 = vld [vmem:[%s17901_s6 + $0x208] sm:$0xff] }
0x104f   : > { %v6448_v60 = vadd.f32 1e-05, %v6442_v30 }
0x1051   : > { %15370 = vrsqrt.f32 %v6448_v60  ;;  %v13454_v60 = vld [vmem:[%s17901_s6 + $0x200] sm:$0xff] }
0x1053   : > { %v15361_v48 = vpop.eup %15360 }
0x1054   : > { %v6455_v32 = vmul.f32 %v15361_v48, %v16538_v22 }
0x1055   : > { %v15363_v35 = vpop.eup %15362 }
0x1056   : > { %v6456_v61 = vmul.f32 %v15363_v35, %v16540_v16  ;;  %v6465_v34 = vmul.f32 %v13427_v31, %v6455_v32 }
0x1057   : > { %v15365_v21 = vpop.eup %15364 }
0x1058   : > { %v6466_v37 = vmul.f32 %v13427_v31, %v6456_v61  ;;  %v6457_v56 = vmul.f32 %v15365_v21, %v16544_v58  ;;  %v16605_v24 = vadd.f32 %v13428_v13, %v6465_v34 }
0x105a   : > { %v15367_v42 = vpop.eup %15366  ;;  %v16607_v5 = vadd.f32 %v13428_v13, %v6466_v37  ;;  %v6467_v62 = vmul.f32 %v13427_v31, %v6457_v56 }
0x105b   : > { %v15369_v29 = vpop.eup %15368  ;;  %v6458_v22 = vmul.f32 %v15367_v42, %v16552_v38 }
0x105c   : > { %v6497_v16 = vcombine.low %v16605_v24, %v16607_v5  ;;  %v6459_v1 = vmul.f32 %v15369_v29, %v16554_v39  ;;  %v16616_v58 = vadd.f32 %v13428_v13, %v6467_v62 }
0x105d   : > { %v6468_v3 = vmul.f32 %v13427_v31, %v6458_v22 }
0x105e   : > { %v15371_v4 = vpop.eup %15370  ;;  %14668 = vmatmul.mubr.msk.f32.vlgmr.msra.gmra.mxu0 %vm869_vm4, %v6497_v16  ;;  %v6469_v38 = vmul.f32 %v13427_v31, %v6459_v1  ;;  %v13459_v16 = vld [vmem:[%s17902_s7 + $0x10] ss:$0 sm:$0xff] }
0x105f   : > { %14670 = vmatprep.mubr.msk.f32.mxu0 %vm15525_vm1, %v15524_v2  ;;  %v16618_v8 = vadd.f32 %v13428_v13, %v6468_v3  ;;  %v6460_v9 = vmul.f32 %v15371_v4, %v16561_v47  ;;  %v6606_v47 = vld [vmem:[%s17907_s12 + $0x18] sm:$0xff] }
0x1060   : > { %v16624_v39 = vadd.f32 %v13428_v13, %v6469_v38  ;;  %14685 = vmatpush3.msra.mxu1 %v6606_v47 }
0x1061   : > { %v6498_v41 = vcombine.low %v16616_v58, %v16618_v8  ;;  %v6470_v43 = vmul.f32 %v13427_v31, %v6460_v9  ;;  %14686 = vmatprep.subr.mxu1 %v15524_v2  ;;  %v13433_v31 = vld [vmem:[%s17904_s9 + $0x5] ss:$0 sm:$0xff] }
0x1062   : > { %14687 = vmatpush3.msra.mxu1 %v6605_v49  ;;  %v6625_v32 = vcombine.low %v13433_v31, %v13433_v31 }
0x1063   : > { %14671 = vmatmul.mubr.msk.f32.gmra.mxu0 %vm869_vm4, %v6498_v41  ;;  %v16626_v44 = vadd.f32 %v13428_v13, %v6470_v43  ;;  %14688 = vmatprep.subr.mxu1 %v15524_v2 }
0x1064   : > { %14673 = vmatprep.mubr.msk.f32.mxu0 %vm15525_vm1, %v15524_v2  ;;  %14689 = vmatpush3.msra.mxu1 %v6604_v50 }
0x1065   : > { %v6499_v45 = vcombine.low %v16624_v39, %v16626_v44  ;;  %14690 = vmatprep.subr.mxu1 %v15524_v2 }
0x1066   : > { %14691 = vmatpush3.msra.mxu1 %v6603_v52 }
0x1067   : > { %14674 = vmatmul.mubr.msk.f32.gmra.mxu0 %vm869_vm4, %v6499_v45  ;;  %14718 = vmatprep.subr.mxu1 %v15524_v2 }
0x1068   : > { %14709 = vmatprep.mubr.msk.f32.mxu0 %vm15525_vm1, %v15524_v2 }
0x111e   : > { %v6574_v57 = vpop.f32.mrf.mxu0 }
0x111f   : > { %v6575_v59 = vadd.f32 %v6574_v57, %v6500_v55 }
0x1120   : > { %v14669_v63 = vpop.f32.mrf.mxu0 }
0x1121   : > { %v6591_v0 = vcombine.high %v6575_v59, %v6575_v59  ;;  %v6597_v6 = vmax.f32 %v6575_v59, 0.0 }
0x1123   : > { %v6598_v7 = vmax.f32 %v6591_v0, 0.0  ;;  %v6579_v10 = vpop.f32.mrf.mxu0 }
0x1124   : > { %v6580_v11 = vadd.f32 %v6579_v10, %v6500_v55 }
0x1125   : > { %v6621_v46 = vcombine.low %v6597_v6, %v6598_v7  ;;  %v14672_v12 = vpop.f32.mrf.mxu0 }
0x1126   : > { %v6592_v14 = vcombine.high %v6580_v11, %v6580_v11  ;;  %v6599_v19 = vmax.f32 %v6580_v11, 0.0 }
0x1127   : > { %v6584_v15 = vpop.f32.mrf.mxu0  ;;  %14693 = vmatmul.mubr.msk.f32.vlgmr.msra.gmra.mxu1 %vm6627_vm10, %v6621_v46 }
0x1128   : > { %v6600_v54 = vmax.f32 %v6592_v14, 0.0  ;;  %v6585_v27 = vadd.f32 %v6584_v15, %v6500_v55  ;;  %14695 = vmatprep.mubr.msk.f32.mxu1 %vm15525_vm1, %v15524_v2  ;;  %14719 = vmatpush3.msra.mxu1 %v13457_v51 }
0x1129   : > { %v14675_v20 = vpop.f32.mrf.mxu0  ;;  %14720 = vmatprep.subr.mxu1 %v15524_v2 }
0x112a   : > { %v6622_v36 = vcombine.low %v6599_v19, %v6600_v54  ;;  %v6593_v23 = vcombine.high %v6585_v27, %v6585_v27  ;;  %14721 = vmatpush3.msra.mxu1 %v13456_v17  ;;  %v6601_v28 = vmax.f32 %v6585_v27, 0.0 }
0x112b   : > { %14722 = vmatprep.subr.mxu1 %v15524_v2 }
0x112c   : > { %v6602_v30 = vmax.f32 %v6593_v23, 0.0  ;;  %14696 = vmatmul.mubr.msk.f32.gmra.mxu1 %vm6627_vm10, %v6622_v36 }
0x112d   : > { %14698 = vmatprep.mubr.msk.f32.mxu1 %vm15525_vm1, %v15524_v2  ;;  %14723 = vmatpush3.msra.mxu1 %v13455_v26 }
0x112e   : > { %v6623_v48 = vcombine.low %v6601_v28, %v6602_v30  ;;  %14724 = vmatprep.subr.mxu1 %v15524_v2 }
0x112f   : > { %14725 = vmatpush3.msra.mxu1 %v13454_v60 }
0x1130   : > { %14699 = vmatmul.mubr.msk.f32.gmra.mxu1 %vm6627_vm10, %v6623_v48  ;;  %14752 = vmatprep.subr.mxu1 %v15524_v2 }
0x1131   : > { %14726 = vmatprep.mubr.msk.f32.mxu1 %vm15525_vm1, %v15524_v2 }
0x1134   : > { %14727 = vmatmul.mubr.msk.f32.vlgmr.msra.gmra.mxu1 %vm869_vm4, %v15719_v25 }
0x1135   : > { %14729 = vmatprep.mubr.msk.f32.mxu1 %vm15525_vm1, %v15524_v2 }
0x1138   : > { %14730 = vmatmul.mubr.msk.f32.gmra.mxu1 %vm869_vm4, %v15735_v33 }
0x1139   : > { %14732 = vmatprep.mubr.msk.f32.mxu1 %vm15525_vm1, %v15524_v2 }
0x113c   : > { %14733 = vmatmul.mubr.msk.f32.gmra.mxu1 %vm869_vm4, %v15751_v40 }
0x113d   : > { %14754 = vmatprep.mubr.msk.f32.mxu1 %vm15525_vm1, %v15524_v2 }
0x11e7   : > { %v6700_v35 = vpop.f32.mrf.mxu1 }
0x11e8   : > { %v6701_v61 = vadd.f32 %v6700_v35, %v6625_v32 }
0x11e9   : > { %v14694_v34 = vpop.f32.mrf.mxu1 }
0x11ea   : > { %v6717_v21 = vcombine.high %v6701_v61, %v6701_v61  ;;  %v6723_v13 = vadd.f32 %v6701_v61, %v16605_v24 }
0x11ec   : > { %v6705_v37 = vpop.f32.mrf.mxu1  ;;  %v6729_v56 = vsel %vm6381_vm9, %v6723_v13, 0.0  ;;  %v6724_v42 = vadd.f32 %v6717_v21, %v16607_v5  ;;  %v6961_v5 = vcombine.low %v13459_v16, %v13459_v16 }
0x11ed   : > { %v6706_v29 = vadd.f32 %v6705_v37, %v6625_v32  ;;  %6730 = vadd.xlane.f32.xlu0 %v6729_v56  ;;  %v13448_v37 = vld [vmem:[%s17901_s6 + $0x198] sm:$0xff]  ;;  %v13447_v56 = vld [vmem:[%s17901_s6 + $0x190] sm:$0xff] }
0x11ee   : > { %v14697_v22 = vpop.f32.mrf.mxu1  ;;  %v6732_v62 = vsel %vm6381_vm9, %v6724_v42, 0.0  ;;  %14702 = vmatpush3.msra.mxu0 %v13448_v37 }
0x11ef   : > { %v6718_v1 = vcombine.high %v6706_v29, %v6706_v29  ;;  %6733 = vadd.xlane.f32.xlu1 %v6732_v62  ;;  %v6725_v3 = vadd.f32 %v6706_v29, %v16616_v58  ;;  %14703 = vmatprep.subr.mxu0 %v15524_v2  ;;  %v13445_v29 = vld [vmem:[%s17901_s6 + $0x180] sm:$0xff] }
0x11f0   : > { %v6710_v4 = vpop.f32.mrf.mxu1  ;;  %14704 = vmatpush3.msra.mxu0 %v13447_v56 }
0x11f1   : > { %v6711_v24 = vadd.f32 %v6710_v4, %v6625_v32  ;;  %v6735_v9 = vsel %vm6381_vm9, %v6725_v3, 0.0  ;;  %v6726_v38 = vadd.f32 %v6718_v1, %v16618_v8  ;;  %14705 = vmatprep.subr.mxu0 %v15524_v2 }
0x11f2   : > { %6736 = vadd.xlane.f32.xlu0 %v6735_v9  ;;  %v14700_v41 = vpop.f32.mrf.mxu1 }
0x11f3   : > { %v6719_v43 = vcombine.high %v6711_v24, %v6711_v24  ;;  %v6738_v45 = vsel %vm6381_vm9, %v6726_v38, 0.0  ;;  %v6727_v18 = vadd.f32 %v6711_v24, %v16624_v39 }
0x11f4   : > { %6739 = vadd.xlane.f32.xlu1 %v6738_v45  ;;  %v7029_v47 = vpop.f32.mrf.mxu1 }
0x11f5   : > { %v16710_v49 = vadd.f32 %v7029_v47, %v6961_v5  ;;  %v6741_v58 = vsel %vm6381_vm9, %v6727_v18, 0.0  ;;  %v6728_v50 = vadd.f32 %v6719_v43, %v16626_v44 }
0x11f6   : > { %6742 = vadd.xlane.f32.xlu0 %v6741_v58  ;;  %v14728_v52 = vpop.f32.mrf.mxu1 }
0x11f7   : > { %14753 = vmatpush3.xpose.msk.msra.mxu1 %vm1171_vm5, %v16710_v49  ;;  %v6744_v8 = vsel %vm6381_vm9, %v6728_v50, 0.0 }
0x11f8   : > { %6745 = vadd.xlane.f32.xlu1 %v6744_v8  ;;  %v7034_v53 = vpop.f32.mrf.mxu1  ;;  %14762 = vmatprep.subr.mxu1 %v15524_v2 }
0x11f9   : > { %v16718_v39 = vadd.f32 %v7034_v53, %v6961_v5  ;;  %v13437_v53 = vld [vmem:[%s17904_s9 + $0x3] ss:$0 sm:$0xff] }
0x11fa   : > { %v14731_v55 = vpop.f32.mrf.mxu1 }
0x11fc   : > { %v7039_v57 = vpop.f32.mrf.mxu1 }
0x11fd   : > { %v16720_v59 = vadd.f32 %v7039_v57, %v6961_v5 }
0x11fe   : > { %v14734_v63 = vpop.f32.mrf.mxu1 }
0x1276   : > { %v6731_v0 = vpop.xlane.xlu0 %6730 }
0x1277   : > { %v6747_v44 = vmul.f32 0.03125, %v6731_v0 }
0x1278   : > { %v6734_v6 = vpop.xlane.xlu1 %6733 }
0x1279   : > { %v16722_v7 = vsub.f32 %v6723_v13, %v6747_v44  ;;  %v6748_v10 = vmul.f32 0.03125, %v6734_v6  ;;  %v13438_v44 = vld [vmem:[%s17904_s9 + $0x4] ss:$0 sm:$0xff] }
0x127b   : > { %v16724_v11 = vsub.f32 %v6724_v42, %v6748_v10  ;;  %v6737_v46 = vpop.xlane.xlu0 %6736  ;;  %v6759_v12 = vmul.f32 %v16722_v7, %v16722_v7  ;;  %v13446_v42 = vld [vmem:[%s17901_s6 + $0x188] sm:$0xff] }
0x127c   : > { %v6749_v51 = vmul.f32 0.03125, %v6737_v46  ;;  %14706 = vmatpush3.msra.mxu0 %v13446_v42 }
0x127d   : > { %v6740_v14 = vpop.xlane.xlu1 %6739  ;;  %v6765_v15 = vsel %vm6381_vm9, %v6759_v12, 0.0  ;;  %v6760_v17 = vmul.f32 %v16724_v11, %v16724_v11  ;;  %14707 = vmatprep.subr.mxu0 %v15524_v2 }
0x127e   : > { %v16731_v19 = vsub.f32 %v6725_v3, %v6749_v51  ;;  %v6750_v54 = vmul.f32 0.03125, %v6740_v14  ;;  %6766 = vadd.xlane.f32.xlu0 %v6765_v15  ;;  %14708 = vmatpush3.msra.mxu0 %v13445_v29 }
0x127f   : > { %v6743_v27 = vpop.xlane.xlu0 %6742  ;;  %v6768_v20 = vsel %vm6381_vm9, %v6760_v17, 0.0  ;;  %14735 = vmatprep.subr.mxu0 %v15524_v2 }
0x1280   : > { %v16734_v36 = vsub.f32 %v6726_v38, %v6750_v54  ;;  %v6751_v23 = vmul.f32 0.03125, %v6743_v27  ;;  %6769 = vadd.xlane.f32.xlu1 %v6768_v20  ;;  %v6761_v26 = vmul.f32 %v16731_v19, %v16731_v19  ;;  %v13466_v54 = vld [vmem:[%s17901_s6 + $0x298] sm:$0xff] }
0x1281   : > { %v6746_v28 = vpop.xlane.xlu1 %6745 }
0x1282   : > { %v16738_v30 = vsub.f32 %v6727_v18, %v6751_v23  ;;  %v6752_v60 = vmul.f32 0.03125, %v6746_v28  ;;  %v6771_v48 = vsel %vm6381_vm9, %v6761_v26, 0.0  ;;  %v6762_v31 = vmul.f32 %v16734_v36, %v16734_v36 }
0x1283   : > { %6772 = vadd.xlane.f32.xlu0 %v6771_v48 }
0x1284   : > { %v16743_v32 = vsub.f32 %v6728_v50, %v6752_v60  ;;  %v6774_v35 = vsel %vm6381_vm9, %v6762_v31, 0.0  ;;  %v6763_v61 = vmul.f32 %v16738_v30, %v16738_v30  ;;  %v13464_v31 = vld [vmem:[%s17901_s6 + $0x288] sm:$0xff] }
0x1285   : > { %6775 = vadd.xlane.f32.xlu1 %v6774_v35 }
0x1286   : > { %v6777_v34 = vsel %vm6381_vm9, %v6763_v61, 0.0  ;;  %v6764_v21 = vmul.f32 %v16743_v32, %v16743_v32  ;;  %v13463_v61 = vld [vmem:[%s17901_s6 + $0x280] sm:$0xff] }
0x1287   : > { %6778 = vadd.xlane.f32.xlu0 %v6777_v34 }
0x1288   : > { %v6780_v13 = vsel %vm6381_vm9, %v6764_v21, 0.0  ;;  %v7046_v21 = vcombine.high %v16710_v49, %v16710_v49  ;;  %v13450_v49 = vld [vmem:[%s17902_s7 + $0xc] ss:$0 sm:$0xff] }
0x1289   : > { %6781 = vadd.xlane.f32.xlu1 %v6780_v13  ;;  %v6855_v13 = vcombine.low %v13450_v49, %v13450_v49 }
0x1307   : > { %v6767_v22 = vpop.xlane.xlu0 %6766 }
0x1308   : > { %v6783_v62 = vmul.f32 0.03125, %v6767_v22  ;;  %v7047_v22 = vcombine.high %v16718_v39, %v16718_v39 }
0x1309   : > { %v6770_v16 = vpop.xlane.xlu1 %6769 }
0x130a   : > { %v6789_v1 = vadd.f32 1e-05, %v6783_v62  ;;  %v6784_v3 = vmul.f32 0.03125, %v6770_v16 }
0x130c   : > { %15372 = vrsqrt.f32 %v6789_v1  ;;  %v6790_v4 = vadd.f32 1e-05, %v6784_v3  ;;  %v6773_v24 = vpop.xlane.xlu0 %6772 }
0x130d   : > { %v6785_v9 = vmul.f32 0.03125, %v6773_v24 }
0x130e   : > { %15374 = vrsqrt.f32 %v6790_v4  ;;  %v6776_v38 = vpop.xlane.xlu1 %6775  ;;  %v7048_v4 = vcombine.high %v16720_v59, %v16720_v59 }
0x130f   : > { %v6791_v5 = vadd.f32 1e-05, %v6785_v9  ;;  %v6786_v41 = vmul.f32 0.03125, %v6776_v38 }
0x1310   : > { %v6779_v43 = vpop.xlane.xlu0 %6778 }
0x1311   : > { %15376 = vrsqrt.f32 %v6791_v5  ;;  %v6792_v45 = vadd.f32 1e-05, %v6786_v41  ;;  %v6787_v18 = vmul.f32 0.03125, %v6779_v43 }
0x1312   : > { %v6782_v47 = vpop.xlane.xlu1 %6781 }
0x1313   : > { %15378 = vrsqrt.f32 %v6792_v45  ;;  %v6793_v58 = vadd.f32 1e-05, %v6787_v18  ;;  %v6788_v50 = vmul.f32 0.03125, %v6782_v47 }
0x1315   : > { %15380 = vrsqrt.f32 %v6793_v58  ;;  %v6794_v52 = vadd.f32 1e-05, %v6788_v50 }
0x1317   : > { %15382 = vrsqrt.f32 %v6794_v52 }
0x1319   : > { %v15373_v8 = vpop.eup %15372 }
0x131a   : > { %v6801_v55 = vmul.f32 %v15373_v8, %v16722_v7 }
0x131b   : > { %v15375_v57 = vpop.eup %15374 }
0x131c   : > { %v6811_v63 = vmul.f32 %v13437_v53, %v6801_v55  ;;  %v6802_v0 = vmul.f32 %v15375_v57, %v16724_v11 }
0x131e   : > { %v15377_v6 = vpop.eup %15376  ;;  %v6812_v10 = vmul.f32 %v13437_v53, %v6802_v0  ;;  %v16777_v51 = vadd.f32 %v13438_v44, %v6811_v63 }
0x131f   : > { %v6803_v46 = vmul.f32 %v15377_v6, %v16731_v19 }
0x1320   : > { %v15379_v12 = vpop.eup %15378  ;;  %v16779_v14 = vadd.f32 %v13438_v44, %v6812_v10 }
0x1321   : > { %v6804_v15 = vmul.f32 %v15379_v12, %v16734_v36  ;;  %v6813_v7 = vmul.f32 %v13437_v53, %v6803_v46  ;;  %v13465_v36 = vld [vmem:[%s17901_s6 + $0x290] sm:$0xff] }
0x1322   : > { %v15381_v17 = vpop.eup %15380  ;;  %v16784_v11 = vcombine.low %v16777_v51, %v16779_v14 }
0x1323   : > { %v6814_v27 = vmul.f32 %v13437_v53, %v6804_v15  ;;  %v6805_v19 = vmul.f32 %v15381_v17, %v16738_v30  ;;  %v16792_v23 = vadd.f32 %v13438_v44, %v6813_v7 }
0x1324   : > { %v15383_v20 = vpop.eup %15382  ;;  %14710 = vmatmul.mubr.msk.f32.vlgmr.msra.gmra.mxu0 %vm869_vm4, %v16784_v11 }
0x1325   : > { %14712 = vmatprep.mubr.msk.f32.mxu0 %vm15525_vm1, %v15524_v2  ;;  %v16799_v26 = vadd.f32 %v13438_v44, %v6814_v27  ;;  %14736 = vmatpush3.msra.mxu0 %v13466_v54  ;;  %v6806_v28 = vmul.f32 %v15383_v20, %v16743_v32  ;;  %v6815_v60 = vmul.f32 %v13437_v53, %v6805_v19 }
0x1326   : > { %14737 = vmatprep.subr.mxu0 %v15524_v2 }
0x1327   : > { %v16805_v30 = vcombine.low %v16792_v23, %v16799_v26  ;;  %14738 = vmatpush3.msra.mxu0 %v13465_v36  ;;  %v6816_v48 = vmul.f32 %v13437_v53, %v6806_v28  ;;  %v16813_v35 = vadd.f32 %v13438_v44, %v6815_v60 }
0x1328   : > { %14739 = vmatprep.subr.mxu0 %v15524_v2 }
0x1329   : > { %14713 = vmatmul.mubr.msk.f32.gmra.mxu0 %vm869_vm4, %v16805_v30  ;;  %v16815_v32 = vadd.f32 %v13438_v44, %v6816_v48 }
0x132a   : > { %14715 = vmatprep.mubr.msk.f32.mxu0 %vm15525_vm1, %v15524_v2  ;;  %14740 = vmatpush3.msra.mxu0 %v13464_v31 }
0x132b   : > { %v16824_v34 = vcombine.low %v16813_v35, %v16815_v32  ;;  %14741 = vmatprep.subr.mxu0 %v15524_v2 }
0x132c   : > { %14742 = vmatpush3.msra.mxu0 %v13463_v61 }
0x132d   : > { %14716 = vmatmul.mubr.msk.f32.gmra.mxu0 %vm869_vm4, %v16824_v34  ;;  %14757 = vmatprep.subr.mxu0 %v15524_v2 }
0x132e   : > { %14743 = vmatprep.mubr.msk.f32.mxu0 %vm15525_vm1, %v15524_v2 }
0x1331   : > { %14744 = vmatmul.mubr.msk.f32.vlgmr.msra.gmra.mxu0 %vm869_vm4, %v15719_v25 }
0x1332   : > { %14758 = vmatpush3.xpose.msk.msra.mxu0 %vm1171_vm5, %v7046_v21  ;;  %14746 = vmatprep.mubr.msk.f32.mxu0 %vm15525_vm1, %v15524_v2 }
0x1333   : > { %14767 = vmatprep.subr.mxu0 %v15524_v2 }
0x1335   : > { %14747 = vmatmul.mubr.msk.f32.gmra.mxu0 %vm869_vm4, %v15735_v33 }
0x1336   : > { %14749 = vmatprep.mubr.msk.f32.mxu0 %vm15525_vm1, %v15524_v2 }
0x1339   : > { %14750 = vmatmul.mubr.msk.f32.gmra.mxu0 %vm869_vm4, %v15751_v40 }
0x133a   : > { %14759 = vmatprep.mubr.msk.f32.mxu0 %vm15525_vm1, %v15524_v2 }
0x13e4   : > { %v6929_v37 = vpop.f32.mrf.mxu0 }
0x13e5   : > { %v6930_v56 = vadd.f32 %v6929_v37, %v6855_v13 }
0x13e6   : > { %v14711_v42 = vpop.f32.mrf.mxu0 }
0x13e7   : > { %v6946_v29 = vcombine.high %v6930_v56, %v6930_v56  ;;  %14755 = vmatmul.mubr.msk.f32.vlgmr.msra.gmra.mxu1 %vm1171_vm5, %v6930_v56 }
0x13e8   : > { %14763 = vmatpush3.xpose.msk.msra.mxu1 %vm1171_vm5, %v16718_v39  ;;  %14764 = vmatprep.mubr.msk.f32.mxu1 %vm15525_vm1, %v15524_v2  ;;  %v13468_v39 = vld [vmem:[%s17902_s7 + $0x14] ss:$0 sm:$0xff] }
0x13e9   : > { %v6934_v62 = vpop.f32.mrf.mxu0  ;;  %14760 = vmatmul.mubr.msk.f32.vlgmr.msra.gmra.mxu0 %vm1171_vm5, %v6946_v29  ;;  %14772 = vmatprep.subr.mxu1 %v15524_v2  ;;  %v7061_v38 = vcombine.low %v13468_v39, %v13468_v39 }
0x13ea   : > { %v6935_v16 = vadd.f32 %v6934_v62, %v6855_v13  ;;  %14768 = vmatpush3.xpose.msk.msra.mxu0 %vm1171_vm5, %v7047_v22  ;;  %14769 = vmatprep.mubr.msk.f32.mxu0 %vm15525_vm1, %v15524_v2 }
0x13eb   : > { %v14714_v1 = vpop.f32.mrf.mxu0  ;;  %14777 = vmatprep.subr.mxu0 %v15524_v2 }
0x13ec   : > { %v6947_v3 = vcombine.high %v6935_v16, %v6935_v16  ;;  %14765 = vmatmul.mubr.msk.f32.vlgmr.msra.gmra.mxu1 %vm1171_vm5, %v6935_v16 }
0x13ed   : > { %14773 = vmatpush3.xpose.msk.msra.mxu1 %vm1171_vm5, %v16720_v59  ;;  %v6939_v24 = vpop.f32.mrf.mxu0  ;;  %14774 = vmatprep.mubr.msk.f32.mxu1 %vm15525_vm1, %v15524_v2 }
0x13ee   : > { %v6940_v9 = vadd.f32 %v6939_v24, %v6855_v13  ;;  %14770 = vmatmul.mubr.msk.f32.vlgmr.msra.gmra.mxu0 %vm1171_vm5, %v6947_v3  ;;  %14782 = vmatprep.subr.mxu1 %v15524_v2 }
0x13ef   : > { %14778 = vmatpush3.xpose.msk.msra.mxu0 %vm1171_vm5, %v7048_v4  ;;  %v14717_v5 = vpop.f32.mrf.mxu0  ;;  %14779 = vmatprep.mubr.msk.f32.mxu0 %vm15525_vm1, %v15524_v2 }
0x13f0   : > { %v6948_v41 = vcombine.high %v6940_v9, %v6940_v9  ;;  %14775 = vmatmul.mubr.msk.f32.vlgmr.msra.gmra.mxu1 %vm1171_vm5, %v6940_v9  ;;  %14787 = vmatprep.subr.mxu0 %v15524_v2 }
0x13f1   : > { %v7129_v59 = vpop.f32.mrf.mxu0  ;;  %14784 = vmatprep.mubr.msk.f32.mxu1 %vm15525_vm1, %v15524_v2 }
0x13f2   : > { %v7130_v43 = vadd.f32 %v7129_v59, %v7061_v38  ;;  %14780 = vmatmul.mubr.msk.f32.vlgmr.msra.gmra.mxu0 %vm1171_vm5, %v6948_v41 }
0x13f3   : > { %v14745_v45 = vpop.f32.mrf.mxu0  ;;  %14789 = vmatprep.mubr.msk.f32.mxu0 %vm15525_vm1, %v15524_v2 }
0x13f4   : > { %v7146_v18 = vcombine.high %v7130_v43, %v7130_v43  ;;  %14783 = vmatpush3.msk.msra.mxu1 %vm1693_vm6, %v7130_v43 }
0x13f5   : > { %v7134_v47 = vpop.f32.mrf.mxu0  ;;  %14792 = vmatprep.subr.mxu1 %v15524_v2 }
0x13f6   : > { %v16888_v58 = vadd.f32 %v7134_v47, %v7061_v38  ;;  %14788 = vmatpush3.msk.msra.mxu0 %vm1693_vm6, %v7146_v18 }
0x13f7   : > { %v14748_v50 = vpop.f32.mrf.mxu0  ;;  %14797 = vmatprep.subr.mxu0 %v15524_v2 }
0x13f9   : > { %v7139_v52 = vpop.f32.mrf.mxu0 }
0x13fa   : > { %v16892_v8 = vadd.f32 %v7139_v52, %v7061_v38 }
0x13fb   : > { %v14751_v53 = vpop.f32.mrf.mxu0 }
0x14a7   : > { %v7219_v55 = vpop.f32.mrf.mxu1 }
0x14a8   : > { %v7593_v57 = vmul.f32 0.35355338, %v7219_v55 }
0x14a9   : > { %v14756_v63 = vpop.f32.mrf.mxu1  ;;  %v7293_v0 = vpop.f32.mrf.mxu0 }
0x14aa   : > { %v7594_v44 = vmul.f32 0.35355338, %v7293_v0  ;;  %v7599_v6 = vsel %vm1622_vm7, %v7593_v57, -inf }
0x14ab   : > { %7600 = vmax.xlane.f32.xlu1 %v7599_v6  ;;  %v14761_v10 = vpop.f32.mrf.mxu0 }
0x14ac   : > { %v7367_v46 = vpop.f32.mrf.mxu1  ;;  %v7602_v12 = vsel %vm1622_vm7, %v7594_v44, -inf }
0x14ad   : > { %v7595_v15 = vmul.f32 0.35355338, %v7367_v46  ;;  %7603 = vmax.xlane.f32.xlu0 %v7602_v12 }
0x14ae   : > { %v14766_v7 = vpop.f32.mrf.mxu1  ;;  %v7441_v17 = vpop.f32.mrf.mxu0 }
0x14af   : > { %v7596_v54 = vmul.f32 0.35355338, %v7441_v17  ;;  %v7605_v27 = vsel %vm1622_vm7, %v7595_v15, -inf }
0x14b0   : > { %7606 = vmax.xlane.f32.xlu1 %v7605_v27  ;;  %v14771_v19 = vpop.f32.mrf.mxu0  ;;  %v7515_v20 = vpop.f32.mrf.mxu1 }
0x14b1   : > { %v7597_v36 = vmul.f32 0.35355338, %v7515_v20  ;;  %v7608_v28 = vsel %vm1622_vm7, %v7596_v54, -inf  ;;  %v7147_v20 = vcombine.high %v16888_v58, %v16888_v58 }
0x14b2   : > { %v14776_v60 = vpop.f32.mrf.mxu1  ;;  %7609 = vmax.xlane.f32.xlu0 %v7608_v28  ;;  %v7589_v48 = vpop.f32.mrf.mxu0 }
0x14b3   : > { %v7598_v31 = vmul.f32 0.35355338, %v7589_v48  ;;  %v7611_v61 = vsel %vm1622_vm7, %v7597_v36, -inf }
0x14b4   : > { %7612 = vmax.xlane.f32.xlu1 %v7611_v61  ;;  %v14781_v21 = vpop.f32.mrf.mxu0 }
0x14b5   : > { %v7614_v49 = vsel %vm1622_vm7, %v7598_v31, -inf  ;;  %v13500_v21 = vld [vmem:[%s17901_s6 + $0x1b8] sm:$0xff] }
0x14b6   : > { %7615 = vmax.xlane.f32.xlu0 %v7614_v49 }
0x1534   : > { %v7601_v13 = vpop.xlane.xlu1 %7600 }
0x1535   : > { %v7617_v37 = vsub.f32 %v7593_v57, %v7601_v13 }
0x1536   : > { %v7604_v56 = vpop.xlane.xlu0 %7603 }
0x1537   : > { %v7623_v42 = vmul.f32 1.442695, %v7617_v37  ;;  %v7618_v29 = vsub.f32 %v7594_v44, %v7604_v56  ;;  %v13509_v37 = vld [vmem:[%s17901_s6 + $0x238] sm:$0xff]  ;;  %v13498_v56 = vld [vmem:[%s17901_s6 + $0x1a8] sm:$0xff] }
0x1539   : > { %15384 = vpow2.f32 %v7623_v42  ;;  %v7625_v22 = vmul.f32 1.442695, %v7618_v29  ;;  %v7607_v62 = vpop.xlane.xlu1 %7606  ;;  %v13508_v42 = vld [vmem:[%s17901_s6 + $0x230] sm:$0xff]  ;;  %v13497_v29 = vld [vmem:[%s17901_s6 + $0x1a0] sm:$0xff] }
0x153a   : > { %v7619_v16 = vsub.f32 %v7595_v15, %v7607_v62  ;;  %v13506_v62 = vld [vmem:[%s17901_s6 + $0x220] sm:$0xff] }
0x153b   : > { %15386 = vpow2.f32 %v7625_v22  ;;  %v7610_v1 = vpop.xlane.xlu0 %7609  ;;  %v13507_v22 = vld [vmem:[%s17901_s6 + $0x228] sm:$0xff] }
0x153c   : > { %v7627_v39 = vmul.f32 1.442695, %v7619_v16  ;;  %v7620_v3 = vsub.f32 %v7596_v54, %v7610_v1  ;;  %v13518_v16 = vld [vmem:[%s17901_s6 + $0x2b8] sm:$0xff]  ;;  %v13517_v1 = vld [vmem:[%s17901_s6 + $0x2b0] sm:$0xff] }
0x153d   : > { %v7613_v4 = vpop.xlane.xlu1 %7612 }
0x153e   : > { %15388 = vpow2.f32 %v7627_v39  ;;  %v7629_v24 = vmul.f32 1.442695, %v7620_v3  ;;  %v7621_v9 = vsub.f32 %v7597_v36, %v7613_v4  ;;  %v13516_v39 = vld [vmem:[%s17901_s6 + $0x2a8] sm:$0xff]  ;;  %v13515_v3 = vld [vmem:[%s17901_s6 + $0x2a0] sm:$0xff] }
0x153f   : > { %v7616_v38 = vpop.xlane.xlu0 %7615 }
0x1540   : > { %15390 = vpow2.f32 %v7629_v24  ;;  %v7631_v5 = vmul.f32 1.442695, %v7621_v9  ;;  %v7622_v41 = vsub.f32 %v7598_v31, %v7616_v38  ;;  %v7148_v31 = vcombine.high %v16892_v8, %v16892_v8 }
0x1542   : > { %15392 = vpow2.f32 %v7631_v5  ;;  %v7633_v59 = vmul.f32 1.442695, %v7622_v41 }
0x1544   : > { %15394 = vpow2.f32 %v7633_v59 }
0x1546   : > { %v15385_v43 = vpop.eup %15384 }
0x1547   : > { %v7635_v45 = vsel %vm1622_vm7, %v15385_v43, 0.0 }
0x1548   : > { %v15387_v18 = vpop.eup %15386  ;;  %7636 = vadd.xlane.f32.xlu1 %v7635_v45 }
0x1549   : > { %v7638_v47 = vsel %vm1622_vm7, %v15387_v18, 0.0 }
0x154a   : > { %7639 = vadd.xlane.f32.xlu0 %v7638_v47 }
0x154b   : > { %v15389_v50 = vpop.eup %15388 }
0x154c   : > { %v7641_v52 = vsel %vm1622_vm7, %v15389_v50, 0.0 }
0x154d   : > { %v15391_v53 = vpop.eup %15390  ;;  %7642 = vadd.xlane.f32.xlu1 %v7641_v52 }
0x154e   : > { %v7644_v55 = vsel %vm1622_vm7, %v15391_v53, 0.0 }
0x154f   : > { %v15393_v57 = vpop.eup %15392  ;;  %7645 = vadd.xlane.f32.xlu0 %v7644_v55 }
0x1550   : > { %v7647_v63 = vsel %vm1622_vm7, %v15393_v57, 0.0 }
0x1551   : > { %v15395_v0 = vpop.eup %15394  ;;  %7648 = vadd.xlane.f32.xlu1 %v7647_v63  ;;  %v13502_v63 = vld [vmem:[%s17902_s7 + $0xd] ss:$0 sm:$0xff] }
0x1552   : > { %v7650_v44 = vsel %vm1622_vm7, %v15395_v0, 0.0 }
0x1553   : > { %7651 = vadd.xlane.f32.xlu0 %v7650_v44 }
0x15d1   : > { %v7637_v6 = vpop.xlane.xlu1 %7636 }
0x15d2   : > { %15396 = vrcp.f32 %v7637_v6  ;;  %v8129_v6 = vcombine.low %v13502_v63, %v13502_v63 }
0x15d3   : > { %v7640_v10 = vpop.xlane.xlu0 %7639 }
0x15d4   : > { %15398 = vrcp.f32 %v7640_v10 }
0x15d6   : > { %v7643_v46 = vpop.xlane.xlu1 %7642 }
0x15d7   : > { %15400 = vrcp.f32 %v7643_v46 }
0x15d8   : > { %v7646_v12 = vpop.xlane.xlu0 %7645 }
0x15d9   : > { %15402 = vrcp.f32 %v7646_v12 }
0x15da   : > { %v7649_v15 = vpop.xlane.xlu1 %7648 }
0x15db   : > { %15404 = vrcp.f32 %v7649_v15 }
0x15dc   : > { %v7652_v7 = vpop.xlane.xlu0 %7651 }
0x15dd   : > { %15406 = vrcp.f32 %v7652_v7 }
0x15df   : > { %v15397_v17 = vpop.eup %15396 }
0x15e0   : > { %v7659_v54 = vmul.f32 %v15397_v17, %v15385_v43 }
0x15e1   : > { %v15399_v27 = vpop.eup %15398 }
0x15e2   : > { %v7660_v19 = vmul.f32 %v15399_v27, %v15387_v18  ;;  %14785 = vmatmul.mubr.msk.f32.vlgmr.msra.gmra.mxu1 %vm1689_vm8, %v7659_v54 }
0x15e3   : > { %14793 = vmatpush3.msk.msra.mxu1 %vm1693_vm6, %v16888_v58  ;;  %14794 = vmatprep.mubr.msk.f32.mxu1 %vm15525_vm1, %v15524_v2 }
0x15e4   : > { %v15401_v36 = vpop.eup %15400  ;;  %14790 = vmatmul.mubr.msk.f32.vlgmr.msra.gmra.mxu0 %vm1689_vm8, %v7660_v19  ;;  %14802 = vmatprep.subr.mxu1 %v15524_v2  ;;  %v13520_v19 = vld [vmem:[%s17902_s7 + $0x15] ss:$0 sm:$0xff] }
0x15e5   : > { %v7661_v28 = vmul.f32 %v15401_v36, %v15389_v50  ;;  %14798 = vmatpush3.msk.msra.mxu0 %vm1693_vm6, %v7147_v20  ;;  %14799 = vmatprep.mubr.msk.f32.mxu0 %vm15525_vm1, %v15524_v2 }
0x15e6   : > { %v15403_v60 = vpop.eup %15402  ;;  %14807 = vmatprep.subr.mxu0 %v15524_v2 }
0x15e7   : > { %v7662_v48 = vmul.f32 %v15403_v60, %v15391_v53  ;;  %14795 = vmatmul.mubr.msk.f32.vlgmr.msra.gmra.mxu1 %vm1689_vm8, %v7661_v28 }
0x15e8   : > { %v15405_v58 = vpop.eup %15404  ;;  %14803 = vmatpush3.msk.msra.mxu1 %vm1693_vm6, %v16892_v8  ;;  %14804 = vmatprep.mubr.msk.f32.mxu1 %vm15525_vm1, %v15524_v2  ;;  %v13499_v8 = vld [vmem:[%s17901_s6 + $0x1b0] sm:$0xff] }
0x15e9   : > { %v7663_v61 = vmul.f32 %v15405_v58, %v15393_v57  ;;  %14800 = vmatmul.mubr.msk.f32.vlgmr.msra.gmra.mxu0 %vm1689_vm8, %v7662_v48  ;;  %14812 = vmatprep.subr.mxu1 %v15524_v2  ;;  %v13511_v57 = vld [vmem:[%s17902_s7 + $0x11] ss:$0 sm:$0xff] }
0x15ea   : > { %v15407_v49 = vpop.eup %15406  ;;  %14808 = vmatpush3.msk.msra.mxu0 %vm1693_vm6, %v7148_v31  ;;  %14809 = vmatprep.mubr.msk.f32.mxu0 %vm15525_vm1, %v15524_v2  ;;  %v8329_v31 = vcombine.low %v13520_v19, %v13520_v19 }
0x15eb   : > { %v7664_v13 = vmul.f32 %v15407_v49, %v15395_v0  ;;  %14805 = vmatmul.mubr.msk.f32.vlgmr.msra.gmra.mxu1 %vm1689_vm8, %v7663_v61  ;;  %14829 = vmatprep.subr.mxu0 %v15524_v2  ;;  %v8229_v0 = vcombine.low %v13511_v57, %v13511_v57 }
0x15ec   : > { %14813 = vmatpush3.msra.mxu1 %v13500_v21  ;;  %14820 = vmatprep.mubr.msk.f32.mxu1 %vm15525_vm1, %v15524_v2 }
0x15ed   : > { %14814 = vmatprep.subr.mxu1 %v15524_v2  ;;  %14810 = vmatmul.mubr.msk.f32.vlgmr.msra.gmra.mxu0 %vm1689_vm8, %v7664_v13 }
0x15ee   : > { %14815 = vmatpush3.msra.mxu1 %v13499_v8  ;;  %14830 = vmatpush3.msra.mxu0 %v13509_v37 }
0x15ef   : > { %14816 = vmatprep.subr.mxu1 %v15524_v2  ;;  %14831 = vmatprep.subr.mxu0 %v15524_v2 }
0x15f0   : > { %14817 = vmatpush3.msra.mxu1 %v13498_v56  ;;  %14832 = vmatpush3.msra.mxu0 %v13508_v42 }
0x15f1   : > { %14818 = vmatprep.subr.mxu1 %v15524_v2  ;;  %14833 = vmatprep.subr.mxu0 %v15524_v2 }
0x15f2   : > { %14819 = vmatpush3.msra.mxu1 %v13497_v29  ;;  %14834 = vmatpush3.msra.mxu0 %v13507_v22 }
0x15f3   : > { %14821 = vmatmul.mubr.msk.f32.vlgmr.msra.gmra.mxu1 %vm869_vm4, %v16784_v11  ;;  %14835 = vmatprep.subr.mxu0 %v15524_v2 }
0x15f4   : > { %14836 = vmatpush3.msra.mxu0 %v13506_v62  ;;  %14837 = vmatprep.mubr.msk.f32.mxu0 %vm15525_vm1, %v15524_v2 }
0x15f5   : > { %14838 = vmatmul.mubr.msk.f32.vlgmr.msra.gmra.mxu0 %vm869_vm4, %v15719_v25  ;;  %14823 = vmatprep.mubr.msk.f32.mxu1 %vm15525_vm1, %v15524_v2 }
0x15f6   : > { %14846 = vmatprep.subr.mxu1 %v15524_v2  ;;  %14840 = vmatprep.mubr.msk.f32.mxu0 %vm15525_vm1, %v15524_v2 }
0x15f7   : > { %14824 = vmatmul.mubr.msk.f32.gmra.mxu1 %vm869_vm4, %v16805_v30  ;;  %14863 = vmatprep.subr.mxu0 %v15524_v2 }
0x15f8   : > { %14847 = vmatpush3.msra.mxu1 %v13518_v16  ;;  %14826 = vmatprep.mubr.msk.f32.mxu1 %vm15525_vm1, %v15524_v2 }
0x15f9   : > { %14841 = vmatmul.mubr.msk.f32.gmra.mxu0 %vm869_vm4, %v15735_v33  ;;  %14848 = vmatprep.subr.mxu1 %v15524_v2 }
0x15fa   : > { %14849 = vmatpush3.msra.mxu1 %v13517_v1  ;;  %14843 = vmatprep.mubr.msk.f32.mxu0 %vm15525_vm1, %v15524_v2 }
0x15fb   : > { %14827 = vmatmul.mubr.msk.f32.gmra.mxu1 %vm869_vm4, %v16824_v34  ;;  %14850 = vmatprep.subr.mxu1 %v15524_v2 }
0x15fc   : > { %14851 = vmatpush3.msra.mxu1 %v13516_v39  ;;  %14854 = vmatprep.mubr.msk.f32.mxu1 %vm15525_vm1, %v15524_v2 }
0x15fd   : > { %14844 = vmatmul.mubr.msk.f32.gmra.mxu0 %vm869_vm4, %v15751_v40  ;;  %14852 = vmatprep.subr.mxu1 %v15524_v2 }
0x15fe   : > { %14853 = vmatpush3.msra.mxu1 %v13515_v3  ;;  %14865 = vmatprep.mubr.msk.f32.mxu0 %vm15525_vm1, %v15524_v2 }
0x15ff   : > { %14855 = vmatmul.mubr.msk.f32.vlgmr.msra.gmra.mxu1 %vm869_vm4, %v15719_v25  ;;  %14878 = vmatprep.subr.mxu1 %v15524_v2 }
0x1600   : > { %14857 = vmatprep.mubr.msk.f32.mxu1 %vm15525_vm1, %v15524_v2 }
0x1603   : > { %14858 = vmatmul.mubr.msk.f32.gmra.mxu1 %vm869_vm4, %v15735_v33 }
0x1604   : > { %14860 = vmatprep.mubr.msk.f32.mxu1 %vm15525_vm1, %v15524_v2 }
0x1607   : > { %14861 = vmatmul.mubr.msk.f32.gmra.mxu1 %vm869_vm4, %v15751_v40 }
0x1608   : > { %14880 = vmatprep.mubr.msk.f32.mxu1 %vm15525_vm1, %v15524_v2 }
0x16a2   : > { %v17022_v4 = vpop.f32.mrf.mxu1 }
0x16a4   : > { %v14786_v24 = vpop.f32.mrf.mxu1  ;;  %v17024_v9 = vpop.f32.mrf.mxu0 }
0x16a5   : > { %v9486_v38 = vcombine.low %v17022_v4, %v17024_v9  ;;  %v13564_v4 = vld [vmem:[%s17901_s6 + $0x240] sm:$0xff]  ;;  %v13548_v9 = vld [vmem:[%s17903_s8 + $0x28] sm:$0xff] }
0x16a6   : > { %v14791_v5 = vpop.f32.mrf.mxu0 }
0x16a7   : > { %v17028_v41 = vpop.f32.mrf.mxu1 }
0x16a9   : > { %v14796_v59 = vpop.f32.mrf.mxu1  ;;  %v17030_v43 = vpop.f32.mrf.mxu0 }
0x16aa   : > { %v9487_v45 = vcombine.low %v17028_v41, %v17030_v43 }
0x16ab   : > { %v14801_v18 = vpop.f32.mrf.mxu0  ;;  %v17034_v47 = vpop.f32.mrf.mxu1 }
0x16ad   : > { %v14806_v50 = vpop.f32.mrf.mxu1  ;;  %v17036_v52 = vpop.f32.mrf.mxu0 }
0x16ae   : > { %v9488_v53 = vcombine.low %v17034_v47, %v17036_v52  ;;  %v13558_v47 = vld [vmem:[%s17901_s6 + $0x1d8] sm:$0xff] }
0x16af   : > { %v14811_v55 = vpop.f32.mrf.mxu0 }
0x16b3   : > { %v8197_v44 = vpop.f32.mrf.mxu1 }
0x16b4   : > { %v8198_v17 = vadd.f32 %v8197_v44, %v8129_v6 }
0x16b5   : > { %v14822_v10 = vpop.f32.mrf.mxu1  ;;  %v8297_v46 = vpop.f32.mrf.mxu0 }
0x16b6   : > { %v8298_v12 = vadd.f32 %v8297_v46, %v8229_v0  ;;  %v8214_v61 = vcombine.high %v8198_v17, %v8198_v17 }
0x16b7   : > { %v8202_v15 = vpop.f32.mrf.mxu1  ;;  %v14839_v7 = vpop.f32.mrf.mxu0 }
0x16b8   : > { %14864 = vmatpush3.xpose.msk.msra.mxu0 %vm1171_vm5, %v8298_v12  ;;  %v8314_v20 = vcombine.high %v8298_v12, %v8298_v12  ;;  %v8203_v28 = vadd.f32 %v8202_v15, %v8129_v6 }
0x16b9   : > { %v14825_v54 = vpop.f32.mrf.mxu1  ;;  %v8302_v27 = vpop.f32.mrf.mxu0  ;;  %14868 = vmatprep.subr.mxu0 %v15524_v2 }
0x16ba   : > { %v8303_v36 = vadd.f32 %v8302_v27, %v8229_v0  ;;  %v8215_v8 = vcombine.high %v8203_v28, %v8203_v28 }
0x16bb   : > { %v8207_v60 = vpop.f32.mrf.mxu1  ;;  %v14842_v48 = vpop.f32.mrf.mxu0  ;;  %14866 = vmatmul.mubr.msk.f32.vlgmr.msra.gmra.mxu0 %vm1171_vm5, %v8198_v17 }
0x16bc   : > { %v8315_v58 = vcombine.high %v8303_v36, %v8303_v36  ;;  %14869 = vmatpush3.xpose.msk.msra.mxu0 %vm1171_vm5, %v8314_v20  ;;  %14870 = vmatprep.mubr.msk.f32.mxu0 %vm15525_vm1, %v15524_v2  ;;  %v8208_v37 = vadd.f32 %v8207_v60, %v8129_v6 }
0x16bd   : > { %v14828_v21 = vpop.f32.mrf.mxu1  ;;  %v8307_v49 = vpop.f32.mrf.mxu0  ;;  %14873 = vmatprep.subr.mxu0 %v15524_v2 }
0x16be   : > { %v8308_v13 = vadd.f32 %v8307_v49, %v8229_v0  ;;  %14879 = vmatpush3.xpose.msk.msra.mxu1 %vm1171_vm5, %v8315_v58  ;;  %v8216_v16 = vcombine.high %v8208_v37, %v8208_v37 }
0x16bf   : > { %v14845_v56 = vpop.f32.mrf.mxu0  ;;  %v8397_v42 = vpop.f32.mrf.mxu1  ;;  %14871 = vmatmul.mubr.msk.f32.vlgmr.msra.gmra.mxu0 %vm1171_vm5, %v8214_v61  ;;  %14888 = vmatprep.subr.mxu1 %v15524_v2 }
0x16c0   : > { %v8316_v29 = vcombine.high %v8308_v13, %v8308_v13  ;;  %v8398_v22 = vadd.f32 %v8397_v42, %v8329_v31  ;;  %14874 = vmatpush3.xpose.msk.msra.mxu0 %vm1171_vm5, %v8303_v36  ;;  %14875 = vmatprep.mubr.msk.f32.mxu0 %vm15525_vm1, %v15524_v2 }
0x16c1   : > { %v14856_v62 = vpop.f32.mrf.mxu1  ;;  %14881 = vmatmul.mubr.msk.f32.vlgmr.msra.gmra.mxu1 %vm1171_vm5, %v8215_v8  ;;  %14883 = vmatprep.subr.mxu0 %v15524_v2 }
0x16c2   : > { %14889 = vmatpush3.xpose.msk.msra.mxu1 %vm1171_vm5, %v8316_v29  ;;  %14890 = vmatprep.mubr.msk.f32.mxu1 %vm15525_vm1, %v15524_v2  ;;  %v8414_v39 = vcombine.high %v8398_v22, %v8398_v22 }
0x16c3   : > { %v8402_v1 = vpop.f32.mrf.mxu1  ;;  %14876 = vmatmul.mubr.msk.f32.vlgmr.msra.gmra.mxu0 %vm1171_vm5, %v8203_v28  ;;  %14898 = vmatprep.subr.mxu1 %v15524_v2 }
0x16c4   : > { %v17069_v3 = vadd.f32 %v8402_v1, %v8329_v31  ;;  %14884 = vmatpush3.xpose.msk.msra.mxu0 %vm1171_vm5, %v8308_v13  ;;  %14885 = vmatprep.mubr.msk.f32.mxu0 %vm15525_vm1, %v15524_v2 }
0x16c5   : > { %v14859_v24 = vpop.f32.mrf.mxu1  ;;  %14891 = vmatmul.mubr.msk.f32.vlgmr.msra.gmra.mxu1 %vm1171_vm5, %v8216_v16  ;;  %14893 = vmatprep.subr.mxu0 %v15524_v2 }
0x16c6   : > { %14899 = vmatpush3.msk.msra.mxu1 %vm1693_vm6, %v8414_v39  ;;  %14900 = vmatprep.mubr.msk.f32.mxu1 %vm15525_vm1, %v15524_v2 }
0x16c7   : > { %v8407_v5 = vpop.f32.mrf.mxu1  ;;  %14886 = vmatmul.mubr.msk.f32.vlgmr.msra.gmra.mxu0 %vm1171_vm5, %v8208_v37  ;;  %14908 = vmatprep.subr.mxu1 %v15524_v2 }
0x16c8   : > { %v17081_v59 = vadd.f32 %v8407_v5, %v8329_v31  ;;  %14894 = vmatpush3.msk.msra.mxu0 %vm1693_vm6, %v8398_v22  ;;  %14895 = vmatprep.mubr.msk.f32.mxu0 %vm15525_vm1, %v15524_v2 }
0x16c9   : > { %v14862_v18 = vpop.f32.mrf.mxu1  ;;  %14903 = vmatprep.subr.mxu0 %v15524_v2 }
0x177b   : > { %v8487_v50 = vpop.f32.mrf.mxu0 }
0x177c   : > { %v8861_v55 = vmul.f32 0.35355338, %v8487_v50 }
0x177d   : > { %v14867_v57 = vpop.f32.mrf.mxu0 }
0x177e   : > { %v8867_v63 = vsel %vm1622_vm7, %v8861_v55, -inf }
0x177f   : > { %8868 = vmax.xlane.f32.xlu0 %v8867_v63  ;;  %v8561_v0 = vpop.f32.mrf.mxu0 }
0x1780   : > { %v8862_v44 = vmul.f32 0.35355338, %v8561_v0 }
0x1781   : > { %v14872_v6 = vpop.f32.mrf.mxu0  ;;  %v8709_v10 = vpop.f32.mrf.mxu1 }
0x1782   : > { %v8864_v46 = vmul.f32 0.35355338, %v8709_v10  ;;  %v8870_v12 = vsel %vm1622_vm7, %v8862_v44, -inf }
0x1783   : > { %v14882_v15 = vpop.f32.mrf.mxu1  ;;  %8871 = vmax.xlane.f32.xlu1 %v8870_v12  ;;  %v8635_v7 = vpop.f32.mrf.mxu0 }
0x1784   : > { %v8863_v17 = vmul.f32 0.35355338, %v8635_v7  ;;  %v8876_v20 = vsel %vm1622_vm7, %v8864_v46, -inf }
0x1785   : > { %v14877_v54 = vpop.f32.mrf.mxu0  ;;  %v8857_v27 = vpop.f32.mrf.mxu1 }
0x1786   : > { %v8866_v19 = vmul.f32 0.35355338, %v8857_v27  ;;  %v8873_v36 = vsel %vm1622_vm7, %v8863_v17, -inf }
0x1787   : > { %v14892_v28 = vpop.f32.mrf.mxu1  ;;  %8877 = vmax.xlane.f32.xlu1 %v8876_v20  ;;  %8874 = vmax.xlane.f32.xlu0 %v8873_v36  ;;  %v8783_v60 = vpop.f32.mrf.mxu0 }
0x1788   : > { %v8865_v48 = vmul.f32 0.35355338, %v8783_v60  ;;  %v8882_v31 = vsel %vm1622_vm7, %v8866_v19, -inf }
0x1789   : > { %v14887_v58 = vpop.f32.mrf.mxu0 }
0x178a   : > { %v8879_v61 = vsel %vm1622_vm7, %v8865_v48, -inf }
0x178b   : > { %8883 = vmax.xlane.f32.xlu1 %v8882_v31  ;;  %8880 = vmax.xlane.f32.xlu0 %v8879_v61 }
0x1808   : > { %v8869_v21 = vpop.xlane.xlu0 %8868 }
0x1809   : > { %v8885_v49 = vsub.f32 %v8861_v55, %v8869_v21  ;;  %v8415_v21 = vcombine.high %v17069_v3, %v17069_v3 }
0x180b   : > { %v8891_v13 = vmul.f32 1.442695, %v8885_v49 }
0x180c   : > { %v8872_v8 = vpop.xlane.xlu1 %8871 }
0x180d   : > { %15408 = vpow2.f32 %v8891_v13  ;;  %v8886_v37 = vsub.f32 %v8862_v44, %v8872_v8 }
0x180f   : > { %v8893_v56 = vmul.f32 1.442695, %v8886_v37  ;;  %v8416_v37 = vcombine.high %v17081_v59, %v17081_v59 }
0x1810   : > { %v8878_v42 = vpop.xlane.xlu1 %8877  ;;  %v8875_v29 = vpop.xlane.xlu0 %8874 }
0x1811   : > { %15410 = vpow2.f32 %v8893_v56  ;;  %v8888_v22 = vsub.f32 %v8864_v46, %v8878_v42  ;;  %v8887_v62 = vsub.f32 %v8863_v17, %v8875_v29 }
0x1813   : > { %v8897_v16 = vmul.f32 1.442695, %v8888_v22  ;;  %v8895_v1 = vmul.f32 1.442695, %v8887_v62  ;;  %v13496_v22 = vld [vmem:[%s17903_s8 + $0x20] sm:$0xff] }
0x1814   : > { %v8884_v39 = vpop.xlane.xlu1 %8883  ;;  %v8881_v24 = vpop.xlane.xlu0 %8880 }
0x1815   : > { %15412 = vpow2.f32 %v8897_v16  ;;  %v8890_v5 = vsub.f32 %v8866_v19, %v8884_v39  ;;  %v8889_v18 = vsub.f32 %v8865_v48, %v8881_v24  ;;  %v13566_v16 = vld [vmem:[%s17901_s6 + $0x250] sm:$0xff] }
0x1816   : > { %15414 = vpow2.f32 %v8895_v1  ;;  %v13565_v1 = vld [vmem:[%s17901_s6 + $0x248] sm:$0xff] }
0x1817   : > { %v8901_v50 = vmul.f32 1.442695, %v8890_v5  ;;  %v8899_v55 = vmul.f32 1.442695, %v8889_v18 }
0x1819   : > { %15416 = vpow2.f32 %v8901_v50  ;;  %v13556_v50 = vld [vmem:[%s17901_s6 + $0x1c8] sm:$0xff] }
0x181a   : > { %v15409_v57 = vpop.eup %15408  ;;  %15418 = vpow2.f32 %v8899_v55 }
0x181b   : > { %v8903_v63 = vsel %vm1622_vm7, %v15409_v57, 0.0 }
0x181c   : > { %8904 = vadd.xlane.f32.xlu0 %v8903_v63  ;;  %v13555_v63 = vld [vmem:[%s17901_s6 + $0x1c0] sm:$0xff] }
0x181e   : > { %v15411_v0 = vpop.eup %15410 }
0x181f   : > { %v8906_v44 = vsel %vm1622_vm7, %v15411_v0, 0.0 }
0x1820   : > { %8907 = vadd.xlane.f32.xlu1 %v8906_v44 }
0x1822   : > { %v15413_v6 = vpop.eup %15412 }
0x1823   : > { %v15415_v10 = vpop.eup %15414  ;;  %v8912_v46 = vsel %vm1622_vm7, %v15413_v6, 0.0 }
0x1824   : > { %8913 = vadd.xlane.f32.xlu1 %v8912_v46  ;;  %v8909_v12 = vsel %vm1622_vm7, %v15415_v10, 0.0 }
0x1825   : > { %8910 = vadd.xlane.f32.xlu0 %v8909_v12 }
0x1826   : > { %v15417_v15 = vpop.eup %15416 }
0x1827   : > { %v15419_v7 = vpop.eup %15418  ;;  %v8918_v17 = vsel %vm1622_vm7, %v15417_v15, 0.0 }
0x1828   : > { %8919 = vadd.xlane.f32.xlu1 %v8918_v17  ;;  %v8915_v54 = vsel %vm1622_vm7, %v15419_v7, 0.0  ;;  %v13575_v17 = vld [vmem:[%s17901_s6 + $0x2d0] sm:$0xff] }
0x1829   : > { %8916 = vadd.xlane.f32.xlu0 %v8915_v54 }
0x18a5   : > { %v8905_v27 = vpop.xlane.xlu0 %8904 }
0x18a6   : > { %15420 = vrcp.f32 %v8905_v27  ;;  %v13569_v27 = vld [vmem:[%s17902_s7 + $0x12] ss:$0 sm:$0xff] }
0x18a9   : > { %v8908_v19 = vpop.xlane.xlu1 %8907 }
0x18aa   : > { %15422 = vrcp.f32 %v8908_v19  ;;  %v13574_v19 = vld [vmem:[%s17901_s6 + $0x2c8] sm:$0xff] }
0x18ad   : > { %v8914_v20 = vpop.xlane.xlu1 %8913 }
0x18ae   : > { %15424 = vrcp.f32 %v8914_v20  ;;  %v8911_v36 = vpop.xlane.xlu0 %8910 }
0x18af   : > { %15426 = vrcp.f32 %v8911_v36  ;;  %v13573_v36 = vld [vmem:[%s17901_s6 + $0x2c0] sm:$0xff] }
0x18b1   : > { %v8920_v28 = vpop.xlane.xlu1 %8919 }
0x18b2   : > { %15428 = vrcp.f32 %v8920_v28  ;;  %v8917_v60 = vpop.xlane.xlu0 %8916  ;;  %v9696_v28 = vcombine.low %v13569_v27, %v13569_v27 }
0x18b3   : > { %v15421_v48 = vpop.eup %15420  ;;  %15430 = vrcp.f32 %v8917_v60 }
0x18b4   : > { %v8927_v58 = vmul.f32 %v15421_v48, %v15409_v57 }
0x18b6   : > { %14896 = vmatmul.mubr.msk.f32.vlgmr.msra.gmra.mxu0 %vm1689_vm8, %v8927_v58 }
0x18b7   : > { %v15423_v31 = vpop.eup %15422  ;;  %14904 = vmatpush3.msk.msra.mxu0 %vm1693_vm6, %v17069_v3  ;;  %14905 = vmatprep.mubr.msk.f32.mxu0 %vm15525_vm1, %v15524_v2 }
0x18b8   : > { %v8928_v61 = vmul.f32 %v15423_v31, %v15411_v0  ;;  %14913 = vmatprep.subr.mxu0 %v15524_v2 }
0x18ba   : > { %14901 = vmatmul.mubr.msk.f32.vlgmr.msra.gmra.mxu1 %vm1689_vm8, %v8928_v61 }
0x18bb   : > { %v15425_v49 = vpop.eup %15424  ;;  %14909 = vmatpush3.msk.msra.mxu1 %vm1693_vm6, %v8415_v21  ;;  %14910 = vmatprep.mubr.msk.f32.mxu1 %vm15525_vm1, %v15524_v2 }
0x18bc   : > { %v15427_v13 = vpop.eup %15426  ;;  %v8930_v8 = vmul.f32 %v15425_v49, %v15413_v6  ;;  %14918 = vmatprep.subr.mxu1 %v15524_v2 }
0x18bd   : > { %v8929_v56 = vmul.f32 %v15427_v13, %v15415_v10 }
0x18be   : > { %14911 = vmatmul.mubr.msk.f32.vlgmr.msra.gmra.mxu1 %vm1689_vm8, %v8930_v8 }
0x18bf   : > { %v15429_v42 = vpop.eup %15428  ;;  %14906 = vmatmul.mubr.msk.f32.vlgmr.msra.gmra.mxu0 %vm1689_vm8, %v8929_v56  ;;  %14919 = vmatpush3.msk.msra.mxu1 %vm1693_vm6, %v8416_v37 }
0x18c0   : > { %v15431_v3 = vpop.eup %15430  ;;  %v8932_v29 = vmul.f32 %v15429_v42, %v15417_v15  ;;  %14914 = vmatpush3.msk.msra.mxu0 %vm1693_vm6, %v17081_v59  ;;  %14915 = vmatprep.mubr.msk.f32.mxu0 %vm15525_vm1, %v15524_v2  ;;  %v13567_v59 = vld [vmem:[%s17901_s6 + $0x258] sm:$0xff] }
0x18c1   : > { %v8931_v62 = vmul.f32 %v15431_v3, %v15419_v7  ;;  %14920 = vmatprep.mubr.msk.f32.mxu1 %vm15525_vm1, %v15524_v2  ;;  %14934 = vmatprep.subr.mxu1 %v15524_v2  ;;  %v13576_v15 = vld [vmem:[%s17901_s6 + $0x2d8] sm:$0xff] }
0x18c2   : > { %14921 = vmatmul.mubr.msk.f32.vlgmr.msra.gmra.mxu1 %vm1689_vm8, %v8932_v29  ;;  %14923 = vmatprep.subr.mxu0 %v15524_v2 }
0x18c3   : > { %14916 = vmatmul.mubr.msk.f32.vlgmr.msra.gmra.mxu0 %vm1689_vm8, %v8931_v62  ;;  %14935 = vmatpush3.msra.mxu1 %v13496_v22  ;;  %v13560_v62 = vld [vmem:[%s17902_s7 + $0xe] ss:$0 sm:$0xff] }
0x18c4   : > { %14936 = vmatprep.mubr.msk.f32.mxu1 %vm15525_vm1, %v15524_v2  ;;  %14962 = vmatprep.subr.mxu1 %v15524_v2 }
0x18c5   : > { %14925 = vmatprep.mubr.msk.f32.mxu0 %vm15525_vm1, %v15524_v2  ;;  %14924 = vmatpush3.msra.mxu0 %v13548_v9 }
0x18c6   : > { %14937 = vmatmul.mubr.msk.f32.vlgmr.msra.gmra.mxu1 %vm1171_vm5, %v9486_v38  ;;  %14945 = vmatprep.subr.mxu0 %v15524_v2 }
0x18c7   : > { %14939 = vmatprep.mubr.msk.f32.mxu1 %vm15525_vm1, %v15524_v2  ;;  %14963 = vmatpush3.msra.mxu1 %v13567_v59 }
0x18c8   : > { %14964 = vmatprep.subr.mxu1 %v15524_v2 }
0x18c9   : > { %14965 = vmatpush3.msra.mxu1 %v13566_v16  ;;  %v9596_v16 = vcombine.low %v13560_v62, %v13560_v62 }
0x18ca   : > { %14940 = vmatmul.mubr.msk.f32.gmra.mxu1 %vm1171_vm5, %v9487_v45  ;;  %14966 = vmatprep.subr.mxu1 %v15524_v2 }
0x18cb   : > { %14942 = vmatprep.mubr.msk.f32.mxu1 %vm15525_vm1, %v15524_v2  ;;  %14967 = vmatpush3.msra.mxu1 %v13565_v1 }
0x18cc   : > { %14968 = vmatprep.subr.mxu1 %v15524_v2 }
0x18cd   : > { %14969 = vmatpush3.msra.mxu1 %v13564_v4 }
0x18ce   : > { %14943 = vmatmul.mubr.msk.f32.gmra.mxu1 %vm1171_vm5, %v9488_v53  ;;  %14996 = vmatprep.subr.mxu1 %v15524_v2  ;;  %v13557_v53 = vld [vmem:[%s17901_s6 + $0x1d0] sm:$0xff] }
0x18cf   : > { %14970 = vmatprep.mubr.msk.f32.mxu1 %vm15525_vm1, %v15524_v2 }
0x18d2   : > { %14971 = vmatmul.mubr.msk.f32.vlgmr.msra.gmra.mxu1 %vm869_vm4, %v15719_v25 }
0x18d3   : > { %14973 = vmatprep.mubr.msk.f32.mxu1 %vm15525_vm1, %v15524_v2 }
0x18d6   : > { %14974 = vmatmul.mubr.msk.f32.gmra.mxu1 %vm869_vm4, %v15735_v33 }
0x18d7   : > { %14976 = vmatprep.mubr.msk.f32.mxu1 %vm15525_vm1, %v15524_v2 }
0x18da   : > { %14977 = vmatmul.mubr.msk.f32.gmra.mxu1 %vm869_vm4, %v15751_v40 }
0x18db   : > { %14998 = vmatprep.mubr.msk.f32.mxu1 %vm15525_vm1, %v15524_v2 }
0x1976   : > { %v9004_v38 = vpop.f32.mrf.mxu0 }
0x1978   : > { %v14897_v41 = vpop.f32.mrf.mxu0 }
0x197a   : > { %v9079_v43 = vpop.f32.mrf.mxu1 }
0x197b   : > { %v9391_v45 = vcombine.low %v9004_v38, %v9079_v43 }
0x197c   : > { %v14902_v52 = vpop.f32.mrf.mxu1 }
0x197d   : > { %14926 = vmatmul.mubr.msk.f32.vlgmr.msra.gmra.mxu0 %vm1171_vm5, %v9391_v45 }
0x197e   : > { %v9229_v39 = vpop.f32.mrf.mxu1  ;;  %14928 = vmatprep.mubr.msk.f32.mxu0 %vm15525_vm1, %v15524_v2  ;;  %14946 = vmatpush3.msra.mxu0 %v13558_v47 }
0x197f   : > { %v9154_v24 = vpop.f32.mrf.mxu0  ;;  %14947 = vmatprep.subr.mxu0 %v15524_v2 }
0x1980   : > { %v9392_v5 = vcombine.low %v9154_v24, %v9229_v39  ;;  %v14912_v18 = vpop.f32.mrf.mxu1  ;;  %14948 = vmatpush3.msra.mxu0 %v13557_v53  ;;  %v13578_v53 = vld [vmem:[%s17902_s7 + $0x16] ss:$0 sm:$0xff] }
0x1981   : > { %v14907_v55 = vpop.f32.mrf.mxu0  ;;  %14949 = vmatprep.subr.mxu0 %v15524_v2 }
0x1982   : > { %14929 = vmatmul.mubr.msk.f32.gmra.mxu0 %vm1171_vm5, %v9392_v5  ;;  %v9379_v57 = vpop.f32.mrf.mxu1 }
0x1983   : > { %v9304_v0 = vpop.f32.mrf.mxu0  ;;  %14931 = vmatprep.mubr.msk.f32.mxu0 %vm15525_vm1, %v15524_v2  ;;  %14950 = vmatpush3.msra.mxu0 %v13556_v50  ;;  %v9796_v50 = vcombine.low %v13578_v53, %v13578_v53 }
0x1984   : > { %v9393_v44 = vcombine.low %v9304_v0, %v9379_v57  ;;  %v14922_v6 = vpop.f32.mrf.mxu1  ;;  %14951 = vmatprep.subr.mxu0 %v15524_v2 }
0x1985   : > { %v14917_v10 = vpop.f32.mrf.mxu0  ;;  %14952 = vmatpush3.msra.mxu0 %v13555_v63 }
0x1986   : > { %14932 = vmatmul.mubr.msk.f32.gmra.mxu0 %vm1171_vm5, %v9393_v44  ;;  %v17207_v46 = vpop.f32.mrf.mxu1  ;;  %14979 = vmatprep.subr.mxu0 %v15524_v2 }
0x1987   : > { %14953 = vmatprep.mubr.msk.f32.mxu0 %vm15525_vm1, %v15524_v2 }
0x1988   : > { %v14938_v12 = vpop.f32.mrf.mxu1 }
0x198a   : > { %14954 = vmatmul.mubr.msk.f32.vlgmr.msra.gmra.mxu0 %vm869_vm4, %v16784_v11  ;;  %v17217_v7 = vpop.f32.mrf.mxu1 }
0x198b   : > { %14956 = vmatprep.mubr.msk.f32.mxu0 %vm15525_vm1, %v15524_v2  ;;  %14980 = vmatpush3.msra.mxu0 %v13576_v15 }
0x198c   : > { %v14941_v54 = vpop.f32.mrf.mxu1  ;;  %14981 = vmatprep.subr.mxu0 %v15524_v2 }
0x198d   : > { %14982 = vmatpush3.msra.mxu0 %v13575_v17 }
0x198e   : > { %14957 = vmatmul.mubr.msk.f32.gmra.mxu0 %vm869_vm4, %v16805_v30  ;;  %v17233_v20 = vpop.f32.mrf.mxu1  ;;  %14983 = vmatprep.subr.mxu0 %v15524_v2 }
0x198f   : > { %14959 = vmatprep.mubr.msk.f32.mxu0 %vm15525_vm1, %v15524_v2  ;;  %14984 = vmatpush3.msra.mxu0 %v13574_v19 }
0x1990   : > { %v14944_v60 = vpop.f32.mrf.mxu1  ;;  %14985 = vmatprep.subr.mxu0 %v15524_v2 }
0x1991   : > { %14986 = vmatpush3.msra.mxu0 %v13573_v36 }
0x1992   : > { %14960 = vmatmul.mubr.msk.f32.gmra.mxu0 %vm869_vm4, %v16824_v34  ;;  %v9764_v48 = vpop.f32.mrf.mxu1  ;;  %15011 = vmatprep.subr.mxu0 %v15524_v2 }
0x1993   : > { %v9765_v58 = vadd.f32 %v9764_v48, %v9696_v28  ;;  %14987 = vmatprep.mubr.msk.f32.mxu0 %vm15525_vm1, %v15524_v2 }
0x1994   : > { %v14972_v31 = vpop.f32.mrf.mxu1 }
0x1995   : > { %14997 = vmatpush3.xpose.msk.msra.mxu1 %vm1171_vm5, %v9765_v58  ;;  %v9781_v38 = vcombine.high %v9765_v58, %v9765_v58 }
0x1996   : > { %14988 = vmatmul.mubr.msk.f32.vlgmr.msra.gmra.mxu0 %vm869_vm4, %v15719_v25  ;;  %v9769_v61 = vpop.f32.mrf.mxu1  ;;  %15001 = vmatprep.subr.mxu1 %v15524_v2 }
0x1997   : > { %v9770_v21 = vadd.f32 %v9769_v61, %v9696_v28  ;;  %14990 = vmatprep.mubr.msk.f32.mxu0 %vm15525_vm1, %v15524_v2 }
0x1998   : > { %v14975_v49 = vpop.f32.mrf.mxu1 }
0x1999   : > { %v9782_v13 = vcombine.high %v9770_v21, %v9770_v21 }
0x199a   : > { %14991 = vmatmul.mubr.msk.f32.gmra.mxu0 %vm869_vm4, %v15735_v33  ;;  %v9774_v8 = vpop.f32.mrf.mxu1 }
0x199b   : > { %v9775_v37 = vadd.f32 %v9774_v8, %v9696_v28  ;;  %15012 = vmatpush3.xpose.msk.msra.mxu0 %vm1171_vm5, %v9782_v13  ;;  %14993 = vmatprep.mubr.msk.f32.mxu0 %vm15525_vm1, %v15524_v2 }
0x199c   : > { %v14978_v56 = vpop.f32.mrf.mxu1  ;;  %15021 = vmatprep.subr.mxu0 %v15524_v2 }
0x199d   : > { %v9783_v24 = vcombine.high %v9775_v37, %v9775_v37 }
0x199e   : > { %14994 = vmatmul.mubr.msk.f32.gmra.mxu0 %vm869_vm4, %v15751_v40 }
0x199f   : > { %15013 = vmatprep.mubr.msk.f32.mxu0 %vm15525_vm1, %v15524_v2 }
0x1a3d   : > { %v17263_v42 = vpop.f32.mrf.mxu0 }
0x1a3f   : > { %v14927_v3 = vpop.f32.mrf.mxu0 }
0x1a42   : > { %v17265_v29 = vpop.f32.mrf.mxu0 }
0x1a44   : > { %v14930_v22 = vpop.f32.mrf.mxu0 }
0x1a46   : > { %v17270_v59 = vpop.f32.mrf.mxu0 }
0x1a48   : > { %v14933_v1 = vpop.f32.mrf.mxu0 }
0x1a4a   : > { %v9664_v4 = vpop.f32.mrf.mxu0 }
0x1a4b   : > { %v9665_v9 = vadd.f32 %v9664_v4, %v9596_v16 }
0x1a4c   : > { %v14955_v41 = vpop.f32.mrf.mxu0 }
0x1a4d   : > { %14999 = vmatmul.mubr.msk.f32.vlgmr.msra.gmra.mxu1 %vm1171_vm5, %v9665_v9  ;;  %v9681_v45 = vcombine.high %v9665_v9, %v9665_v9 }
0x1a4e   : > { %15002 = vmatpush3.xpose.msk.msra.mxu1 %vm1171_vm5, %v9781_v38  ;;  %v9669_v43 = vpop.f32.mrf.mxu0  ;;  %15003 = vmatprep.mubr.msk.f32.mxu1 %vm15525_vm1, %v15524_v2 }
0x1a4f   : > { %v9670_v47 = vadd.f32 %v9669_v43, %v9596_v16  ;;  %15006 = vmatprep.subr.mxu1 %v15524_v2 }
0x1a50   : > { %v14958_v52 = vpop.f32.mrf.mxu0 }
0x1a51   : > { %v9682_v39 = vcombine.high %v9670_v47, %v9670_v47  ;;  %15004 = vmatmul.mubr.msk.f32.vlgmr.msra.gmra.mxu1 %vm1171_vm5, %v9681_v45 }
0x1a52   : > { %15007 = vmatpush3.xpose.msk.msra.mxu1 %vm1171_vm5, %v9770_v21  ;;  %v9674_v5 = vpop.f32.mrf.mxu0  ;;  %15008 = vmatprep.mubr.msk.f32.mxu1 %vm15525_vm1, %v15524_v2 }
0x1a53   : > { %v9675_v18 = vadd.f32 %v9674_v5, %v9596_v16  ;;  %15014 = vmatmul.mubr.msk.f32.vlgmr.msra.gmra.mxu0 %vm1171_vm5, %v9682_v39  ;;  %15016 = vmatprep.subr.mxu1 %v15524_v2 }
0x1a54   : > { %15022 = vmatpush3.xpose.msk.msra.mxu0 %vm1171_vm5, %v9783_v24  ;;  %v14961_v55 = vpop.f32.mrf.mxu0  ;;  %15023 = vmatprep.mubr.msk.f32.mxu0 %vm15525_vm1, %v15524_v2 }
0x1a55   : > { %v9683_v57 = vcombine.high %v9675_v18, %v9675_v18  ;;  %15009 = vmatmul.mubr.msk.f32.vlgmr.msra.gmra.mxu1 %vm1171_vm5, %v9670_v47  ;;  %15031 = vmatprep.subr.mxu0 %v15524_v2 }
0x1a56   : > { %15017 = vmatpush3.xpose.msk.msra.mxu1 %vm1171_vm5, %v9775_v37  ;;  %v9864_v63 = vpop.f32.mrf.mxu0  ;;  %15018 = vmatprep.mubr.msk.f32.mxu1 %vm15525_vm1, %v15524_v2 }
0x1a57   : > { %v9865_v0 = vadd.f32 %v9864_v63, %v9796_v50  ;;  %15024 = vmatmul.mubr.msk.f32.vlgmr.msra.gmra.mxu0 %vm1171_vm5, %v9683_v57  ;;  %15026 = vmatprep.subr.mxu1 %v15524_v2 }
0x1a58   : > { %v14989_v44 = vpop.f32.mrf.mxu0  ;;  %15033 = vmatprep.mubr.msk.f32.mxu0 %vm15525_vm1, %v15524_v2 }
0x1a59   : > { %v9881_v6 = vcombine.high %v9865_v0, %v9865_v0  ;;  %15019 = vmatmul.mubr.msk.f32.vlgmr.msra.gmra.mxu1 %vm1171_vm5, %v9675_v18 }
0x1a5a   : > { %15027 = vmatpush3.msk.msra.mxu1 %vm1693_vm6, %v9865_v0  ;;  %v9869_v10 = vpop.f32.mrf.mxu0  ;;  %15028 = vmatprep.mubr.msk.f32.mxu1 %vm15525_vm1, %v15524_v2 }
0x1a5b   : > { %v17302_v12 = vadd.f32 %v9869_v10, %v9796_v50  ;;  %15032 = vmatpush3.msk.msra.mxu0 %vm1693_vm6, %v9881_v6  ;;  %15036 = vmatprep.subr.mxu1 %v15524_v2 }
0x1a5c   : > { %v14992_v15 = vpop.f32.mrf.mxu0  ;;  %15041 = vmatprep.subr.mxu0 %v15524_v2 }
0x1a5e   : > { %v9874_v17 = vpop.f32.mrf.mxu0 }
0x1a5f   : > { %v17307_v54 = vadd.f32 %v9874_v17, %v9796_v50 }
0x1a60   : > { %v14995_v27 = vpop.f32.mrf.mxu0 }
0x1b0d   : > { %v9954_v19 = vpop.f32.mrf.mxu1 }
0x1b0e   : > { %v10328_v36 = vmul.f32 0.35355338, %v9954_v19 }
0x1b0f   : > { %v15000_v28 = vpop.f32.mrf.mxu1 }
0x1b10   : > { %v10334_v60 = vsel %vm1622_vm7, %v10328_v36, -inf }
0x1b11   : > { %10335 = vmax.xlane.f32.xlu0 %v10334_v60  ;;  %v10028_v48 = vpop.f32.mrf.mxu1 }
0x1b12   : > { %v10329_v58 = vmul.f32 0.35355338, %v10028_v48 }
0x1b13   : > { %v15005_v31 = vpop.f32.mrf.mxu1  ;;  %v10176_v61 = vpop.f32.mrf.mxu0 }
0x1b14   : > { %v10331_v21 = vmul.f32 0.35355338, %v10176_v61  ;;  %v10337_v49 = vsel %vm1622_vm7, %v10329_v58, -inf }
0x1b15   : > { %10338 = vmax.xlane.f32.xlu1 %v10337_v49  ;;  %v10102_v13 = vpop.f32.mrf.mxu1  ;;  %v15015_v8 = vpop.f32.mrf.mxu0 }
0x1b16   : > { %v10330_v37 = vmul.f32 0.35355338, %v10102_v13  ;;  %v10343_v16 = vsel %vm1622_vm7, %v10331_v21, -inf }
0x1b17   : > { %v15010_v56 = vpop.f32.mrf.mxu1  ;;  %v10324_v3 = vpop.f32.mrf.mxu0 }
0x1b18   : > { %v10333_v22 = vmul.f32 0.35355338, %v10324_v3  ;;  %v10340_v62 = vsel %vm1622_vm7, %v10330_v37, -inf }
0x1b19   : > { %10341 = vmax.xlane.f32.xlu0 %v10340_v62  ;;  %v10250_v1 = vpop.f32.mrf.mxu1  ;;  %10344 = vmax.xlane.f32.xlu1 %v10343_v16  ;;  %v15025_v4 = vpop.f32.mrf.mxu0 }
0x1b1a   : > { %v10332_v9 = vmul.f32 0.35355338, %v10250_v1  ;;  %v10349_v43 = vsel %vm1622_vm7, %v10333_v22, -inf }
0x1b1b   : > { %v15020_v38 = vpop.f32.mrf.mxu1 }
0x1b1c   : > { %v10346_v41 = vsel %vm1622_vm7, %v10332_v9, -inf  ;;  %v9882_v38 = vcombine.high %v17302_v12, %v17302_v12 }
0x1b1d   : > { %10347 = vmax.xlane.f32.xlu0 %v10346_v41  ;;  %10350 = vmax.xlane.f32.xlu1 %v10349_v43 }
0x1b9a   : > { %v10336_v45 = vpop.xlane.xlu0 %10335 }
0x1b9b   : > { %v10352_v47 = vsub.f32 %v10328_v36, %v10336_v45 }
0x1b9d   : > { %v10358_v52 = vmul.f32 1.442695, %v10352_v47 }
0x1b9e   : > { %v10339_v53 = vpop.xlane.xlu1 %10338 }
0x1b9f   : > { %15432 = vpow2.f32 %v10358_v52  ;;  %v10353_v39 = vsub.f32 %v10329_v58, %v10339_v53  ;;  %v9883_v52 = vcombine.high %v17307_v54, %v17307_v54 }
0x1ba1   : > { %v10360_v24 = vmul.f32 1.442695, %v10353_v39 }
0x1ba2   : > { %v10342_v5 = vpop.xlane.xlu0 %10341  ;;  %v10345_v18 = vpop.xlane.xlu1 %10344 }
0x1ba3   : > { %15434 = vpow2.f32 %v10360_v24  ;;  %v10354_v50 = vsub.f32 %v10330_v37, %v10342_v5  ;;  %v10355_v55 = vsub.f32 %v10331_v21, %v10345_v18  ;;  %v13613_v5 = vld [vmem:[%s17901_s6 + $0x1f8] sm:$0xff]  ;;  %v13611_v18 = vld [vmem:[%s17901_s6 + $0x1e8] sm:$0xff] }
0x1ba5   : > { %v10362_v57 = vmul.f32 1.442695, %v10354_v50  ;;  %v10364_v63 = vmul.f32 1.442695, %v10355_v55  ;;  %v13610_v50 = vld [vmem:[%s17901_s6 + $0x1e0] sm:$0xff]  ;;  %v13631_v55 = vld [vmem:[%s17901_s6 + $0x2f8] sm:$0xff] }
0x1ba6   : > { %v10348_v0 = vpop.xlane.xlu0 %10347  ;;  %v10351_v44 = vpop.xlane.xlu1 %10350 }
0x1ba7   : > { %15436 = vpow2.f32 %v10362_v57  ;;  %v10356_v6 = vsub.f32 %v10332_v9, %v10348_v0  ;;  %v10357_v10 = vsub.f32 %v10333_v22, %v10351_v44  ;;  %v13630_v57 = vld [vmem:[%s17901_s6 + $0x2f0] sm:$0xff] }
0x1ba8   : > { %15438 = vpow2.f32 %v10364_v63  ;;  %v13629_v63 = vld [vmem:[%s17901_s6 + $0x2e8] sm:$0xff] }
0x1ba9   : > { %v10366_v15 = vmul.f32 1.442695, %v10356_v6  ;;  %v10368_v17 = vmul.f32 1.442695, %v10357_v10  ;;  %v13622_v10 = vld [vmem:[%s17901_s6 + $0x278] sm:$0xff] }
0x1bab   : > { %15440 = vpow2.f32 %v10366_v15 }
0x1bac   : > { %v15433_v27 = vpop.eup %15432  ;;  %15442 = vpow2.f32 %v10368_v17  ;;  %v13621_v17 = vld [vmem:[%s17901_s6 + $0x270] sm:$0xff] }
0x1bad   : > { %v10370_v19 = vsel %vm1622_vm7, %v15433_v27, 0.0 }
0x1bae   : > { %10371 = vadd.xlane.f32.xlu0 %v10370_v19 }
0x1bb0   : > { %v15435_v36 = vpop.eup %15434 }
0x1bb1   : > { %v10373_v28 = vsel %vm1622_vm7, %v15435_v36, 0.0 }
0x1bb2   : > { %10374 = vadd.xlane.f32.xlu1 %v10373_v28 }
0x1bb4   : > { %v15437_v60 = vpop.eup %15436 }
0x1bb5   : > { %v15439_v48 = vpop.eup %15438  ;;  %v10376_v58 = vsel %vm1622_vm7, %v15437_v60, 0.0 }
0x1bb6   : > { %10377 = vadd.xlane.f32.xlu0 %v10376_v58  ;;  %v10379_v31 = vsel %vm1622_vm7, %v15439_v48, 0.0 }
0x1bb7   : > { %10380 = vadd.xlane.f32.xlu1 %v10379_v31  ;;  %v13619_v31 = vld [vmem:[%s17901_s6 + $0x260] sm:$0xff] }
0x1bb8   : > { %v15441_v61 = vpop.eup %15440 }
0x1bb9   : > { %v15443_v21 = vpop.eup %15442  ;;  %v10382_v49 = vsel %vm1622_vm7, %v15441_v61, 0.0 }
0x1bba   : > { %10383 = vadd.xlane.f32.xlu0 %v10382_v49  ;;  %v10385_v13 = vsel %vm1622_vm7, %v15443_v21, 0.0 }
0x1bbb   : > { %10386 = vadd.xlane.f32.xlu1 %v10385_v13 }
0x1c37   : > { %v10372_v8 = vpop.xlane.xlu0 %10371 }
0x1c38   : > { %15444 = vrcp.f32 %v10372_v8 }
0x1c3b   : > { %v10375_v37 = vpop.xlane.xlu1 %10374 }
0x1c3c   : > { %15446 = vrcp.f32 %v10375_v37 }
0x1c3f   : > { %v10378_v56 = vpop.xlane.xlu0 %10377 }
0x1c40   : > { %15448 = vrcp.f32 %v10378_v56  ;;  %v10381_v3 = vpop.xlane.xlu1 %10380 }
0x1c41   : > { %15450 = vrcp.f32 %v10381_v3 }
0x1c43   : > { %v10384_v22 = vpop.xlane.xlu0 %10383 }
0x1c44   : > { %15452 = vrcp.f32 %v10384_v22  ;;  %v10387_v62 = vpop.xlane.xlu1 %10386 }
0x1c45   : > { %v15445_v16 = vpop.eup %15444  ;;  %15454 = vrcp.f32 %v10387_v62  ;;  %v13633_v62 = vld [vmem:[%s17902_s7 + $0x17] ss:$0 sm:$0xff] }
0x1c46   : > { %v10394_v1 = vmul.f32 %v15445_v16, %v15433_v27 }
0x1c48   : > { %15029 = vmatmul.mubr.msk.f32.vlgmr.msra.gmra.mxu1 %vm1689_vm8, %v10394_v1  ;;  %v11174_v1 = vcombine.low %v13633_v62, %v13633_v62 }
0x1c49   : > { %v15447_v4 = vpop.eup %15446  ;;  %15037 = vmatpush3.msk.msra.mxu1 %vm1693_vm6, %v17302_v12  ;;  %15038 = vmatprep.mubr.msk.f32.mxu1 %vm15525_vm1, %v15524_v2 }
0x1c4a   : > { %v10395_v9 = vmul.f32 %v15447_v4, %v15435_v36  ;;  %15046 = vmatprep.subr.mxu1 %v15524_v2 }
0x1c4c   : > { %15034 = vmatmul.mubr.msk.f32.vlgmr.msra.gmra.mxu0 %vm1689_vm8, %v10395_v9 }
0x1c4d   : > { %v15449_v41 = vpop.eup %15448  ;;  %15042 = vmatpush3.msk.msra.mxu0 %vm1693_vm6, %v9882_v38  ;;  %15043 = vmatprep.mubr.msk.f32.mxu0 %vm15525_vm1, %v15524_v2 }
0x1c4e   : > { %v15451_v43 = vpop.eup %15450  ;;  %v10396_v45 = vmul.f32 %v15449_v41, %v15437_v60  ;;  %15051 = vmatprep.subr.mxu0 %v15524_v2  ;;  %v13620_v60 = vld [vmem:[%s17901_s6 + $0x268] sm:$0xff] }
0x1c4f   : > { %v10397_v47 = vmul.f32 %v15451_v43, %v15439_v48 }
0x1c50   : > { %15039 = vmatmul.mubr.msk.f32.vlgmr.msra.gmra.mxu1 %vm1689_vm8, %v10396_v45  ;;  %v9562_v45 = vadd.f32 %v17207_v46, %v17263_v42  ;;  %v13624_v42 = vld [vmem:[%s17902_s7 + $0x13] ss:$0 sm:$0xff] }
0x1c51   : > { %v15453_v53 = vpop.eup %15452  ;;  %15044 = vmatmul.mubr.msk.f32.vlgmr.msra.gmra.mxu0 %vm1689_vm8, %v10397_v47  ;;  %15047 = vmatpush3.msk.msra.mxu1 %vm1693_vm6, %v17307_v54  ;;  %v13612_v54 = vld [vmem:[%s17901_s6 + $0x1f0] sm:$0xff] }
0x1c52   : > { %v15455_v12 = vpop.eup %15454  ;;  %v10398_v39 = vmul.f32 %v15453_v53, %v15441_v61  ;;  %15052 = vmatpush3.msk.msra.mxu0 %vm1693_vm6, %v9883_v52  ;;  %15048 = vmatprep.mubr.msk.f32.mxu1 %vm15525_vm1, %v15524_v2  ;;  %v9578_v52 = vcombine.high %v9562_v45, %v9562_v45 }
0x1c53   : > { %v10399_v24 = vmul.f32 %v15455_v12, %v15443_v21  ;;  %15053 = vmatprep.mubr.msk.f32.mxu0 %vm15525_vm1, %v15524_v2  ;;  %15067 = vmatprep.subr.mxu0 %v15524_v2 }
0x1c54   : > { %15049 = vmatmul.mubr.msk.f32.vlgmr.msra.gmra.mxu1 %vm1689_vm8, %v10398_v39  ;;  %15056 = vmatprep.subr.mxu1 %v15524_v2  ;;  %v9567_v39 = vadd.f32 %v17217_v7, %v17265_v29  ;;  %v13615_v29 = vld [vmem:[%s17902_s7 + $0xf] ss:$0 sm:$0xff] }
0x1c55   : > { %15054 = vmatmul.mubr.msk.f32.vlgmr.msra.gmra.mxu0 %vm1689_vm8, %v10399_v24  ;;  %15058 = vmatprep.mubr.msk.f32.mxu1 %vm15525_vm1, %v15524_v2 }
0x1c56   : > { %15068 = vmatpush3.msra.mxu0 %v13613_v5  ;;  %15075 = vmatprep.mubr.msk.f32.mxu0 %vm15525_vm1, %v15524_v2 }
0x1c57   : > { %15069 = vmatprep.subr.mxu0 %v15524_v2 }
0x1c58   : > { %15070 = vmatpush3.msra.mxu0 %v13612_v54 }
0x1c59   : > { %15071 = vmatprep.subr.mxu0 %v15524_v2 }
0x1c5a   : > { %15072 = vmatpush3.msra.mxu0 %v13611_v18  ;;  %v9579_v18 = vcombine.high %v9567_v39, %v9567_v39 }
0x1c5b   : > { %15073 = vmatprep.subr.mxu0 %v15524_v2 }
0x1c5c   : > { %15074 = vmatpush3.msra.mxu0 %v13610_v50  ;;  %v9572_v50 = vadd.f32 %v17233_v20, %v17270_v59  ;;  %v11074_v20 = vcombine.low %v13624_v42, %v13624_v42 }
0x1c5d   : > { %15076 = vmatmul.mubr.msk.f32.vlgmr.msra.gmra.mxu0 %vm869_vm4, %v16784_v11  ;;  %15101 = vmatprep.subr.mxu0 %v15524_v2  ;;  %v13628_v11 = vld [vmem:[%s17901_s6 + $0x2e0] sm:$0xff] }
0x1c5e   : > { %15078 = vmatprep.mubr.msk.f32.mxu0 %vm15525_vm1, %v15524_v2  ;;  %15102 = vmatpush3.msra.mxu0 %v13631_v55  ;;  %v9580_v7 = vcombine.high %v9572_v50, %v9572_v50 }
0x1c5f   : > { %15103 = vmatprep.subr.mxu0 %v15524_v2 }
0x1c60   : > { %15104 = vmatpush3.msra.mxu0 %v13630_v57 }
0x1c61   : > { %15079 = vmatmul.mubr.msk.f32.gmra.mxu0 %vm869_vm4, %v16805_v30  ;;  %15105 = vmatprep.subr.mxu0 %v15524_v2  ;;  %v13606_v30 = vld [vmem:[%s17903_s8 + $0x30] sm:$0xff] }
0x1c62   : > { %15081 = vmatprep.mubr.msk.f32.mxu0 %vm15525_vm1, %v15524_v2  ;;  %15106 = vmatpush3.msra.mxu0 %v13629_v63 }
0x1c63   : > { %15107 = vmatprep.subr.mxu0 %v15524_v2  ;;  %15057 = vmatpush3.msra.mxu1 %v13606_v30 }
0x1c64   : > { %15108 = vmatpush3.msra.mxu0 %v13628_v11  ;;  %15084 = vmatprep.subr.mxu1 %v15524_v2 }
0x1c65   : > { %15082 = vmatmul.mubr.msk.f32.gmra.mxu0 %vm869_vm4, %v16824_v34  ;;  %15128 = vmatprep.subr.mxu0 %v15524_v2 }
0x1c66   : > { %15109 = vmatprep.mubr.msk.f32.mxu0 %vm15525_vm1, %v15524_v2 }
0x1c69   : > { %15110 = vmatmul.mubr.msk.f32.vlgmr.msra.gmra.mxu0 %vm869_vm4, %v15719_v25 }
0x1c6a   : > { %15112 = vmatprep.mubr.msk.f32.mxu0 %vm15525_vm1, %v15524_v2 }
0x1c6d   : > { %15113 = vmatmul.mubr.msk.f32.gmra.mxu0 %vm869_vm4, %v15735_v33 }
0x1c6e   : > { %15115 = vmatprep.mubr.msk.f32.mxu0 %vm15525_vm1, %v15524_v2 }
0x1c71   : > { %15116 = vmatmul.mubr.msk.f32.gmra.mxu0 %vm869_vm4, %v15751_v40 }
0x1c72   : > { %15130 = vmatprep.mubr.msk.f32.mxu0 %vm15525_vm1, %v15524_v2 }
0x1d08   : > { %v10471_v34 = vpop.f32.mrf.mxu1 }
0x1d0a   : > { %v15030_v0 = vpop.f32.mrf.mxu1 }
0x1d0c   : > { %v10546_v44 = vpop.f32.mrf.mxu0 }
0x1d0d   : > { %v10858_v6 = vcombine.low %v10471_v34, %v10546_v44  ;;  %v10974_v44 = vcombine.low %v13615_v29, %v13615_v29 }
0x1d0e   : > { %v15035_v15 = vpop.f32.mrf.mxu0 }
0x1d0f   : > { %15059 = vmatmul.mubr.msk.f32.vlgmr.msra.gmra.mxu1 %vm1171_vm5, %v10858_v6 }
0x1d10   : > { %v10621_v27 = vpop.f32.mrf.mxu1  ;;  %15061 = vmatprep.mubr.msk.f32.mxu1 %vm15525_vm1, %v15524_v2  ;;  %15085 = vmatpush3.msra.mxu1 %v13622_v10 }
0x1d11   : > { %v10696_v19 = vpop.f32.mrf.mxu0  ;;  %15086 = vmatprep.subr.mxu1 %v15524_v2 }
0x1d12   : > { %v10859_v36 = vcombine.low %v10621_v27, %v10696_v19  ;;  %v15040_v28 = vpop.f32.mrf.mxu1  ;;  %15087 = vmatpush3.msra.mxu1 %v13621_v17 }
0x1d13   : > { %v15045_v48 = vpop.f32.mrf.mxu0  ;;  %15088 = vmatprep.subr.mxu1 %v15524_v2 }
0x1d14   : > { %15062 = vmatmul.mubr.msk.f32.gmra.mxu1 %vm1171_vm5, %v10859_v36  ;;  %v10771_v58 = vpop.f32.mrf.mxu1 }
0x1d15   : > { %v10846_v61 = vpop.f32.mrf.mxu0  ;;  %15064 = vmatprep.mubr.msk.f32.mxu1 %vm15525_vm1, %v15524_v2  ;;  %15089 = vmatpush3.msra.mxu1 %v13620_v60 }
0x1d16   : > { %v10860_v21 = vcombine.low %v10771_v58, %v10846_v61  ;;  %v15050_v49 = vpop.f32.mrf.mxu1  ;;  %15090 = vmatprep.subr.mxu1 %v15524_v2 }
0x1d17   : > { %v15055_v13 = vpop.f32.mrf.mxu0  ;;  %15091 = vmatpush3.msra.mxu1 %v13619_v31 }
0x1d18   : > { %15065 = vmatmul.mubr.msk.f32.gmra.mxu1 %vm1171_vm5, %v10860_v21  ;;  %15118 = vmatprep.subr.mxu1 %v15524_v2 }
0x1d19   : > { %15092 = vmatprep.mubr.msk.f32.mxu1 %vm15525_vm1, %v15524_v2 }
0x1d1c   : > { %15093 = vmatmul.mubr.msk.f32.vlgmr.msra.gmra.mxu1 %vm869_vm4, %v15719_v25 }
0x1d1d   : > { %v11042_v8 = vpop.f32.mrf.mxu0  ;;  %15095 = vmatprep.mubr.msk.f32.mxu1 %vm15525_vm1, %v15524_v2 }
0x1d1e   : > { %v11043_v17 = vadd.f32 %v11042_v8, %v10974_v44 }
0x1d1f   : > { %v15077_v37 = vpop.f32.mrf.mxu0 }
0x1d20   : > { %15096 = vmatmul.mubr.msk.f32.gmra.mxu1 %vm869_vm4, %v15735_v33  ;;  %v11059_v60 = vcombine.high %v11043_v17, %v11043_v17 }
0x1d21   : > { %v11047_v56 = vpop.f32.mrf.mxu0  ;;  %15098 = vmatprep.mubr.msk.f32.mxu1 %vm15525_vm1, %v15524_v2 }
0x1d22   : > { %v11048_v48 = vadd.f32 %v11047_v56, %v10974_v44 }
0x1d23   : > { %v15080_v3 = vpop.f32.mrf.mxu0 }
0x1d24   : > { %15099 = vmatmul.mubr.msk.f32.gmra.mxu1 %vm869_vm4, %v15751_v40  ;;  %v11060_v49 = vcombine.high %v11048_v48, %v11048_v48 }
0x1d25   : > { %v17448_v22 = vpop.f32.mrf.mxu0  ;;  %15120 = vmatprep.mubr.msk.f32.mxu1 %vm15525_vm1, %v15524_v2 }
0x1d26   : > { %v11053_v13 = vadd.f32 %v17448_v22, %v10974_v44 }
0x1d27   : > { %v15083_v25 = vpop.f32.mrf.mxu0 }
0x1d28   : > { %v11061_v56 = vcombine.high %v11053_v13, %v11053_v13 }
0x1d29   : > { %v17455_v16 = vpop.f32.mrf.mxu0 }
0x1d2a   : > { %v11243_v8 = vadd.f32 %v17455_v16, %v11174_v1 }
0x1d2b   : > { %v15111_v33 = vpop.f32.mrf.mxu0 }
0x1d2c   : > { %v11259_v3 = vcombine.high %v11243_v8, %v11243_v8 }
0x1d2d   : > { %v11247_v4 = vpop.f32.mrf.mxu0 }
0x1d2e   : > { %v17457_v9 = vadd.f32 %v11247_v4, %v11174_v1 }
0x1d2f   : > { %v15114_v38 = vpop.f32.mrf.mxu0 }
0x1d31   : > { %v11252_v41 = vpop.f32.mrf.mxu0 }
0x1d32   : > { %v17459_v40 = vadd.f32 %v11252_v41, %v11174_v1 }
0x1d33   : > { %v15117_v43 = vpop.f32.mrf.mxu0 }
0x1dcf   : > { %v10933_v47 = vpop.f32.mrf.mxu1 }
0x1dd0   : > { %v10950_v53 = vcombine.high %v10933_v47, %v10933_v47  ;;  %v17463_v12 = vadd.f32 %v10933_v47, %v9562_v45 }
0x1dd1   : > { %v15060_v24 = vpop.f32.mrf.mxu1 }
0x1dd2   : > { %v17467_v5 = vadd.f32 %v10950_v53, %v9578_v52 }
0x1dd4   : > { %v10938_v54 = vpop.f32.mrf.mxu1 }
0x1dd5   : > { %v10951_v55 = vcombine.high %v10938_v54, %v10938_v54  ;;  %v17471_v57 = vadd.f32 %v10938_v54, %v9567_v39 }
0x1dd6   : > { %v15063_v46 = vpop.f32.mrf.mxu1 }
0x1dd7   : > { %v17476_v63 = vadd.f32 %v10951_v55, %v9579_v18 }
0x1dd8   : > { %v10943_v11 = vpop.f32.mrf.mxu1 }
0x1dd9   : > { %v10952_v30 = vcombine.high %v10943_v11, %v10943_v11  ;;  %v17481_v34 = vadd.f32 %v10943_v11, %v9572_v50 }
0x1dda   : > { %v15066_v59 = vpop.f32.mrf.mxu1 }
0x1ddb   : > { %v17483_v0 = vadd.f32 %v10952_v30, %v9580_v7 }
0x1ddc   : > { %v11142_v6 = vpop.f32.mrf.mxu1 }
0x1ddd   : > { %v11143_v10 = vadd.f32 %v11142_v6, %v11074_v20 }
0x1dde   : > { %v15094_v15 = vpop.f32.mrf.mxu1 }
0x1ddf   : > { %15119 = vmatpush3.xpose.msk.msra.mxu1 %vm1171_vm5, %v11143_v10  ;;  %v11159_v19 = vcombine.high %v11143_v10, %v11143_v10 }
0x1de0   : > { %v11147_v27 = vpop.f32.mrf.mxu1  ;;  %15123 = vmatprep.subr.mxu1 %v15524_v2 }
0x1de1   : > { %v11148_v36 = vadd.f32 %v11147_v27, %v11074_v20 }
0x1de2   : > { %v15097_v28 = vpop.f32.mrf.mxu1  ;;  %15121 = vmatmul.mubr.msk.f32.vlgmr.msra.gmra.mxu1 %vm1171_vm5, %v11043_v17 }
0x1de3   : > { %15124 = vmatpush3.xpose.msk.msra.mxu1 %vm1171_vm5, %v11159_v19  ;;  %15129 = vmatpush3.xpose.msk.msra.mxu0 %vm1171_vm5, %v11148_v36  ;;  %v11160_v31 = vcombine.high %v11148_v36, %v11148_v36 }
0x1de4   : > { %v11152_v58 = vpop.f32.mrf.mxu1  ;;  %15125 = vmatprep.mubr.msk.f32.mxu1 %vm15525_vm1, %v15524_v2  ;;  %15133 = vmatprep.subr.mxu1 %v15524_v2 }
0x1de5   : > { %v11153_v61 = vadd.f32 %v11152_v58, %v11074_v20  ;;  %15138 = vmatprep.subr.mxu0 %v15524_v2 }
0x1de6   : > { %v15100_v21 = vpop.f32.mrf.mxu1  ;;  %15126 = vmatmul.mubr.msk.f32.vlgmr.msra.gmra.mxu1 %vm1171_vm5, %v11059_v60  ;;  %15131 = vmatmul.mubr.msk.f32.vlgmr.msra.gmra.mxu0 %vm1171_vm5, %v11048_v48 }
0x1de7   : > { %15134 = vmatpush3.xpose.msk.msra.mxu1 %vm1171_vm5, %v11160_v31  ;;  %15139 = vmatpush3.xpose.msk.msra.mxu0 %vm1171_vm5, %v11153_v61  ;;  %v11161_v37 = vcombine.high %v11153_v61, %v11153_v61 }
0x1de8   : > { %15135 = vmatprep.mubr.msk.f32.mxu1 %vm15525_vm1, %v15524_v2  ;;  %15140 = vmatprep.mubr.msk.f32.mxu0 %vm15525_vm1, %v15524_v2 }
0x1de9   : > { %15143 = vmatprep.subr.mxu1 %v15524_v2  ;;  %15148 = vmatprep.subr.mxu0 %v15524_v2 }
0x1dea   : > { %15136 = vmatmul.mubr.msk.f32.vlgmr.msra.gmra.mxu1 %vm1171_vm5, %v11060_v49  ;;  %15141 = vmatmul.mubr.msk.f32.vlgmr.msra.gmra.mxu0 %vm1171_vm5, %v11053_v13 }
0x1deb   : > { %15144 = vmatpush3.xpose.msk.msra.mxu1 %vm1171_vm5, %v11161_v37  ;;  %15149 = vmatpush3.msk.msra.mxu0 %vm1693_vm6, %v11243_v8 }
0x1dec   : > { %15145 = vmatprep.mubr.msk.f32.mxu1 %vm15525_vm1, %v15524_v2  ;;  %15153 = vmatprep.subr.mxu1 %v15524_v2 }
0x1ded   : > { %15150 = vmatprep.mubr.msk.f32.mxu0 %vm15525_vm1, %v15524_v2  ;;  %15158 = vmatprep.subr.mxu0 %v15524_v2 }
0x1dee   : > { %15146 = vmatmul.mubr.msk.f32.vlgmr.msra.gmra.mxu1 %vm1171_vm5, %v11061_v56 }
0x1def   : > { %15154 = vmatpush3.msk.msra.mxu1 %vm1693_vm6, %v11259_v3  ;;  %15155 = vmatprep.mubr.msk.f32.mxu1 %vm15525_vm1, %v15524_v2 }
0x1df0   : > { %15163 = vmatprep.subr.mxu1 %v15524_v2 }
0x1ea2   : > { %v11332_v22 = vpop.f32.mrf.mxu1 }
0x1ea3   : > { %v11706_v25 = vmul.f32 0.35355338, %v11332_v22 }
0x1ea4   : > { %v15122_v62 = vpop.f32.mrf.mxu1 }
0x1ea5   : > { %v11712_v16 = vsel %vm1622_vm7, %v11706_v25, -inf }
0x1ea6   : > { %11713 = vmax.xlane.f32.xlu0 %v11712_v16  ;;  %v11406_v33 = vpop.f32.mrf.mxu1  ;;  %v11480_v1 = vpop.f32.mrf.mxu0 }
0x1ea7   : > { %v11707_v4 = vmul.f32 0.35355338, %v11406_v33  ;;  %v11708_v38 = vmul.f32 0.35355338, %v11480_v1 }
0x1ea8   : > { %v15127_v41 = vpop.f32.mrf.mxu1  ;;  %v15132_v43 = vpop.f32.mrf.mxu0 }
0x1ea9   : > { %v11715_v45 = vsel %vm1622_vm7, %v11707_v4, -inf  ;;  %v11718_v47 = vsel %vm1622_vm7, %v11708_v38, -inf }
0x1eaa   : > { %11716 = vmax.xlane.f32.xlu1 %v11715_v45  ;;  %v11554_v52 = vpop.f32.mrf.mxu1  ;;  %11719 = vmax.xlane.f32.xlu0 %v11718_v47  ;;  %v11628_v53 = vpop.f32.mrf.mxu0 }
0x1eab   : > { %v11709_v39 = vmul.f32 0.35355338, %v11554_v52  ;;  %v11710_v24 = vmul.f32 0.35355338, %v11628_v53 }
0x1eac   : > { %v15137_v54 = vpop.f32.mrf.mxu1  ;;  %v15142_v18 = vpop.f32.mrf.mxu0 }
0x1ead   : > { %v11721_v50 = vsel %vm1622_vm7, %v11709_v39, -inf  ;;  %v11724_v55 = vsel %vm1622_vm7, %v11710_v24, -inf  ;;  %v11260_v54 = vcombine.high %v17457_v9, %v17457_v9 }
0x1eae   : > { %11722 = vmax.xlane.f32.xlu1 %v11721_v50  ;;  %v11702_v46 = vpop.f32.mrf.mxu1  ;;  %11725 = vmax.xlane.f32.xlu0 %v11724_v55 }
0x1eaf   : > { %v11711_v42 = vmul.f32 0.35355338, %v11702_v46 }
0x1eb0   : > { %v15147_v11 = vpop.f32.mrf.mxu1 }
0x1eb1   : > { %v11727_v7 = vsel %vm1622_vm7, %v11711_v42, -inf }
0x1eb2   : > { %11728 = vmax.xlane.f32.xlu1 %v11727_v7 }
0x1f2f   : > { %v11714_v29 = vpop.xlane.xlu0 %11713 }
0x1f30   : > { %v11730_v30 = vsub.f32 %v11706_v25, %v11714_v29 }
0x1f32   : > { %v11736_v20 = vmul.f32 1.442695, %v11730_v30 }
0x1f33   : > { %v11717_v59 = vpop.xlane.xlu1 %11716  ;;  %v11720_v44 = vpop.xlane.xlu0 %11719 }
0x1f34   : > { %15456 = vpow2.f32 %v11736_v20  ;;  %v11731_v6 = vsub.f32 %v11707_v4, %v11717_v59  ;;  %v11732_v10 = vsub.f32 %v11708_v38, %v11720_v44 }
0x1f36   : > { %v11738_v15 = vmul.f32 1.442695, %v11731_v6  ;;  %v11740_v17 = vmul.f32 1.442695, %v11732_v10 }
0x1f37   : > { %v11723_v27 = vpop.xlane.xlu1 %11722  ;;  %v11726_v19 = vpop.xlane.xlu0 %11725 }
0x1f38   : > { %15458 = vpow2.f32 %v11738_v15  ;;  %v11733_v36 = vsub.f32 %v11709_v39, %v11723_v27  ;;  %v11734_v28 = vsub.f32 %v11710_v24, %v11726_v19 }
0x1f39   : > { %15460 = vpow2.f32 %v11740_v17 }
0x1f3a   : > { %v11742_v60 = vmul.f32 1.442695, %v11733_v36  ;;  %v11744_v48 = vmul.f32 1.442695, %v11734_v28 }
0x1f3b   : > { %v11729_v58 = vpop.xlane.xlu1 %11728 }
0x1f3c   : > { %15462 = vpow2.f32 %v11742_v60  ;;  %v11735_v31 = vsub.f32 %v11711_v42, %v11729_v58  ;;  %v11261_v42 = vcombine.high %v17459_v40, %v17459_v40  ;;  %v13665_v58 = vld [vmem:[%s17904_s9 + $0x8] ss:$0 sm:$0xff] }
0x1f3d   : > { %15464 = vpow2.f32 %v11744_v48 }
0x1f3e   : > { %v11746_v61 = vmul.f32 1.442695, %v11735_v31 }
0x1f40   : > { %15466 = vpow2.f32 %v11746_v61 }
0x1f41   : > { %v15457_v21 = vpop.eup %15456 }
0x1f42   : > { %v11748_v49 = vsel %vm1622_vm7, %v15457_v21, 0.0 }
0x1f43   : > { %11749 = vadd.xlane.f32.xlu0 %v11748_v49 }
0x1f45   : > { %v15459_v13 = vpop.eup %15458 }
0x1f46   : > { %v15461_v8 = vpop.eup %15460  ;;  %v11751_v37 = vsel %vm1622_vm7, %v15459_v13, 0.0 }
0x1f47   : > { %11752 = vadd.xlane.f32.xlu1 %v11751_v37  ;;  %v11754_v56 = vsel %vm1622_vm7, %v15461_v8, 0.0 }
0x1f48   : > { %11755 = vadd.xlane.f32.xlu0 %v11754_v56 }
0x1f49   : > { %v15463_v3 = vpop.eup %15462 }
0x1f4a   : > { %v15465_v22 = vpop.eup %15464  ;;  %v11757_v25 = vsel %vm1622_vm7, %v15463_v3, 0.0 }
0x1f4b   : > { %11758 = vadd.xlane.f32.xlu1 %v11757_v25  ;;  %v11760_v62 = vsel %vm1622_vm7, %v15465_v22, 0.0 }
0x1f4c   : > { %11761 = vadd.xlane.f32.xlu0 %v11760_v62 }
0x1f4d   : > { %v15467_v16 = vpop.eup %15466 }
0x1f4e   : > { %v11763_v33 = vsel %vm1622_vm7, %v15467_v16, 0.0 }
0x1f4f   : > { %11764 = vadd.xlane.f32.xlu1 %v11763_v33 }
0x1fcc   : > { %v11750_v1 = vpop.xlane.xlu0 %11749 }
0x1fcd   : > { %15468 = vrcp.f32 %v11750_v1 }
0x1fd0   : > { %v11753_v4 = vpop.xlane.xlu1 %11752 }
0x1fd1   : > { %15470 = vrcp.f32 %v11753_v4  ;;  %v11756_v38 = vpop.xlane.xlu0 %11755 }
0x1fd2   : > { %15472 = vrcp.f32 %v11756_v38 }
0x1fd4   : > { %v11759_v41 = vpop.xlane.xlu1 %11758 }
0x1fd5   : > { %15474 = vrcp.f32 %v11759_v41  ;;  %v11762_v43 = vpop.xlane.xlu0 %11761 }
0x1fd6   : > { %15476 = vrcp.f32 %v11762_v43 }
0x1fd8   : > { %v11765_v45 = vpop.xlane.xlu1 %11764 }
0x1fd9   : > { %15478 = vrcp.f32 %v11765_v45 }
0x1fda   : > { %v15469_v47 = vpop.eup %15468 }
0x1fdb   : > { %v11772_v52 = vmul.f32 %v15469_v47, %v15457_v21 }
0x1fdd   : > { %15151 = vmatmul.mubr.msk.f32.vlgmr.msra.gmra.mxu0 %vm1689_vm8, %v11772_v52 }
0x1fde   : > { %v15471_v53 = vpop.eup %15470  ;;  %15159 = vmatpush3.msk.msra.mxu0 %vm1693_vm6, %v17457_v9  ;;  %15160 = vmatprep.mubr.msk.f32.mxu0 %vm15525_vm1, %v15524_v2 }
0x1fdf   : > { %v15473_v39 = vpop.eup %15472  ;;  %v11773_v24 = vmul.f32 %v15471_v53, %v15459_v13  ;;  %15168 = vmatprep.subr.mxu0 %v15524_v2 }
0x1fe0   : > { %v11774_v18 = vmul.f32 %v15473_v39, %v15461_v8 }
0x1fe1   : > { %15156 = vmatmul.mubr.msk.f32.vlgmr.msra.gmra.mxu1 %vm1689_vm8, %v11773_v24 }
0x1fe2   : > { %v15475_v50 = vpop.eup %15474  ;;  %15161 = vmatmul.mubr.msk.f32.vlgmr.msra.gmra.mxu0 %vm1689_vm8, %v11774_v18  ;;  %15164 = vmatpush3.msk.msra.mxu1 %vm1693_vm6, %v11260_v54 }
0x1fe3   : > { %v15477_v55 = vpop.eup %15476  ;;  %v11775_v46 = vmul.f32 %v15475_v50, %v15463_v3  ;;  %15169 = vmatpush3.msk.msra.mxu0 %vm1693_vm6, %v17459_v40  ;;  %15165 = vmatprep.mubr.msk.f32.mxu1 %vm15525_vm1, %v15524_v2  ;;  %v13661_v40 = vld [vmem:[%s17903_s8 + $0x38] sm:$0xff] }
0x1fe4   : > { %v11776_v9 = vmul.f32 %v15477_v55, %v15465_v22  ;;  %15170 = vmatprep.mubr.msk.f32.mxu0 %vm15525_vm1, %v15524_v2  ;;  %15173 = vmatprep.subr.mxu1 %v15524_v2 }
0x1fe5   : > { %15166 = vmatmul.mubr.msk.f32.vlgmr.msra.gmra.mxu1 %vm1689_vm8, %v11775_v46  ;;  %15178 = vmatprep.subr.mxu0 %v15524_v2 }
0x1fe6   : > { %v15479_v11 = vpop.eup %15478  ;;  %15171 = vmatmul.mubr.msk.f32.vlgmr.msra.gmra.mxu0 %vm1689_vm8, %v11776_v9  ;;  %15174 = vmatpush3.msk.msra.mxu1 %vm1693_vm6, %v11261_v42 }
0x1fe7   : > { %v11777_v7 = vmul.f32 %v15479_v11, %v15467_v16  ;;  %15175 = vmatprep.mubr.msk.f32.mxu1 %vm15525_vm1, %v15524_v2  ;;  %15180 = vmatprep.mubr.msk.f32.mxu0 %vm15525_vm1, %v15524_v2 }
0x1fe8   : > { %15189 = vmatprep.subr.mxu1 %v15524_v2  ;;  %15179 = vmatpush3.msra.mxu0 %v13661_v40 }
0x1fe9   : > { %15176 = vmatmul.mubr.msk.f32.vlgmr.msra.gmra.mxu1 %vm1689_vm8, %v11777_v7  ;;  %15206 = vmatprep.subr.mxu0 %v15524_v2 }
0x1fea   : > { %15197 = vmatprep.mubr.msk.f32.mxu1 %vm15525_vm1, %v15524_v2 }
0x209d   : > { %v11849_v29 = vpop.f32.mrf.mxu0 }
0x209f   : > { %v15152_v30 = vpop.f32.mrf.mxu0 }
0x20a1   : > { %v11924_v20 = vpop.f32.mrf.mxu1 }
0x20a2   : > { %v12236_v59 = vcombine.low %v11849_v29, %v11924_v20  ;;  %v11999_v44 = vpop.f32.mrf.mxu0 }
0x20a3   : > { %v15157_v6 = vpop.f32.mrf.mxu1 }
0x20a4   : > { %v15162_v10 = vpop.f32.mrf.mxu0  ;;  %15181 = vmatmul.mubr.msk.f32.vlgmr.msra.gmra.mxu0 %vm1171_vm5, %v12236_v59 }
0x20a5   : > { %v12074_v15 = vpop.f32.mrf.mxu1  ;;  %15183 = vmatprep.mubr.msk.f32.mxu0 %vm15525_vm1, %v15524_v2 }
0x20a6   : > { %v12237_v17 = vcombine.low %v11999_v44, %v12074_v15  ;;  %v12149_v27 = vpop.f32.mrf.mxu0 }
0x20a7   : > { %v15167_v19 = vpop.f32.mrf.mxu1 }
0x20a8   : > { %v15172_v36 = vpop.f32.mrf.mxu0  ;;  %15184 = vmatmul.mubr.msk.f32.gmra.mxu0 %vm1171_vm5, %v12237_v17 }
0x20a9   : > { %v12224_v28 = vpop.f32.mrf.mxu1  ;;  %15186 = vmatprep.mubr.msk.f32.mxu0 %vm15525_vm1, %v15524_v2 }
0x20aa   : > { %v12238_v60 = vcombine.low %v12149_v27, %v12224_v28 }
0x20ab   : > { %v15177_v48 = vpop.f32.mrf.mxu1 }
0x20ac   : > { %15187 = vmatmul.mubr.msk.f32.gmra.mxu0 %vm1171_vm5, %v12238_v60 }
0x20ad   : > { %15222 = vmatprep.mubr.msk.f32.mxu0 %vm15525_vm1, %v15524_v2 }
0x2164   : > { %v12311_v31 = vpop.f32.mrf.mxu0 }
0x2165   : > { %v12328_v61 = vcombine.high %v12311_v31, %v12311_v31  ;;  %v12334_v21 = vadd.f32 %v12311_v31, %v17463_v12  ;;  %v13671_v31 = vld [vmem:[%s17905_s10 + $0x38] sm:$0xff] }
0x2166   : > { %v15182_v49 = vpop.f32.mrf.mxu0  ;;  %15190 = vmatpush3.msra.mxu1 %v13671_v31 }
0x2167   : > { %v12335_v13 = vadd.f32 %v12328_v61, %v17467_v5  ;;  %v12344_v8 = vadd.f32 %v13665_v58, %v12334_v21  ;;  %15191 = vmatprep.subr.mxu1 %v15524_v2  ;;  %v13670_v61 = vld [vmem:[%s17905_s10 + $0x30] sm:$0xff]  ;;  %v13669_v21 = vld [vmem:[%s17905_s10 + $0x28] sm:$0xff]  ;;  %v13668_v49 = vld [vmem:[%s17905_s10 + $0x20] sm:$0xff] }
0x2168   : > { %v12316_v37 = vpop.f32.mrf.mxu0  ;;  %15192 = vmatpush3.msra.mxu1 %v13670_v61 }
0x2169   : > { %v12329_v56 = vcombine.high %v12316_v37, %v12316_v37  ;;  %v12336_v3 = vadd.f32 %v12316_v37, %v17471_v57  ;;  %v12350_v22 = vadd.f32 %v12344_v8, %v16777_v51  ;;  %v12345_v25 = vadd.f32 %v13665_v58, %v12335_v13  ;;  %15193 = vmatprep.subr.mxu1 %v15524_v2  ;;  %v13684_v13 = vld [vmem:[%s17907_s12 + $0x78] sm:$0xff]  ;;  %v13683_v8 = vld [vmem:[%s17907_s12 + $0x70] sm:$0xff]  ;;  %v13682_v37 = vld [vmem:[%s17907_s12 + $0x68] sm:$0xff] }
0x216a   : > { %v15185_v62 = vpop.f32.mrf.mxu0  ;;  %15194 = vmatpush3.msra.mxu1 %v13669_v21  ;;  %15207 = vmatpush3.msra.mxu0 %v13684_v13 }
0x216b   : > { %v12337_v16 = vadd.f32 %v12329_v56, %v17476_v63  ;;  %v12346_v33 = vadd.f32 %v13665_v58, %v12336_v3  ;;  %v12356_v1 = vsel %vm6381_vm9, %v12350_v22, 0.0  ;;  %v12351_v4 = vadd.f32 %v12345_v25, %v16779_v14  ;;  %15195 = vmatprep.subr.mxu1 %v15524_v2  ;;  %15208 = vmatprep.subr.mxu0 %v15524_v2 }
0x216c   : > { %12357 = vadd.xlane.f32.xlu0 %v12356_v1  ;;  %v12321_v12 = vpop.f32.mrf.mxu0  ;;  %15196 = vmatpush3.msra.mxu1 %v13668_v49 }
0x216d   : > { %v12330_v38 = vcombine.high %v12321_v12, %v12321_v12  ;;  %v12338_v5 = vadd.f32 %v12321_v12, %v17481_v34  ;;  %v12359_v41 = vsel %vm6381_vm9, %v12351_v4, 0.0  ;;  %v12352_v57 = vadd.f32 %v12346_v33, %v16792_v23  ;;  %15231 = vmatprep.subr.mxu1 %v15524_v2  ;;  %15209 = vmatpush3.msra.mxu0 %v13683_v8 }
0x216e   : > { %12360 = vadd.xlane.f32.xlu1 %v12359_v41  ;;  %v15188_v51 = vpop.f32.mrf.mxu0  ;;  %v12347_v43 = vadd.f32 %v13665_v58, %v12337_v16  ;;  %15210 = vmatprep.subr.mxu0 %v15524_v2 }
0x216f   : > { %v12339_v45 = vadd.f32 %v12330_v38, %v17483_v0  ;;  %v12348_v63 = vadd.f32 %v13665_v58, %v12338_v5  ;;  %v12362_v47 = vsel %vm6381_vm9, %v12352_v57, 0.0  ;;  %15211 = vmatpush3.msra.mxu0 %v13682_v37 }
0x2170   : > { %12363 = vadd.xlane.f32.xlu0 %v12362_v47  ;;  %v12353_v14 = vadd.f32 %v12347_v43, %v16799_v26  ;;  %15212 = vmatprep.subr.mxu0 %v15524_v2 }
0x2171   : > { %v12354_v52 = vadd.f32 %v12348_v63, %v16813_v35  ;;  %v12349_v53 = vadd.f32 %v13665_v58, %v12339_v45 }
0x2172   : > { %v12365_v34 = vsel %vm6381_vm9, %v12353_v14, 0.0 }
0x2173   : > { %12366 = vadd.xlane.f32.xlu1 %v12365_v34  ;;  %v12368_v39 = vsel %vm6381_vm9, %v12354_v52, 0.0  ;;  %v12355_v23 = vadd.f32 %v12349_v53, %v16815_v32 }
0x2174   : > { %12369 = vadd.xlane.f32.xlu0 %v12368_v39 }
0x2175   : > { %v12371_v24 = vsel %vm6381_vm9, %v12355_v23, 0.0 }
0x2177   : > { %12372 = vadd.xlane.f32.xlu1 %v12371_v24  ;;  %v13667_v24 = vld [vmem:[%s17904_s9 + $0xa] ss:$0 sm:$0xff] }
0x21f5   : > { %v12358_v0 = vpop.xlane.xlu0 %12357 }
0x21f6   : > { %v12374_v54 = vmul.f32 0.03125, %v12358_v0 }
0x21f7   : > { %v12361_v18 = vpop.xlane.xlu1 %12360 }
0x21f8   : > { %v17599_v50 = vsub.f32 %v12350_v22, %v12374_v54  ;;  %v12375_v26 = vmul.f32 0.03125, %v12361_v18 }
0x21f9   : > { %v12364_v55 = vpop.xlane.xlu0 %12363 }
0x21fa   : > { %v17601_v35 = vsub.f32 %v12351_v4, %v12375_v26  ;;  %v12376_v46 = vmul.f32 0.03125, %v12364_v55  ;;  %v12386_v42 = vmul.f32 %v17599_v50, %v17599_v50 }
0x21fc   : > { %v17605_v9 = vsub.f32 %v12352_v57, %v12376_v46  ;;  %v12367_v32 = vpop.xlane.xlu1 %12366  ;;  %v12392_v11 = vsel %vm6381_vm9, %v12386_v42, 0.0  ;;  %v12387_v7 = vmul.f32 %v17601_v35, %v17601_v35 }
0x21fd   : > { %v12377_v40 = vmul.f32 0.03125, %v12367_v32  ;;  %12393 = vadd.xlane.f32.xlu0 %v12392_v11  ;;  %v12370_v29 = vpop.xlane.xlu0 %12369 }
0x21fe   : > { %v12378_v30 = vmul.f32 0.03125, %v12370_v29  ;;  %v12395_v20 = vsel %vm6381_vm9, %v12387_v7, 0.0  ;;  %v12388_v59 = vmul.f32 %v17605_v9, %v17605_v9 }
0x21ff   : > { %v17613_v44 = vsub.f32 %v12353_v14, %v12377_v40  ;;  %12396 = vadd.xlane.f32.xlu1 %v12395_v20  ;;  %v13666_v14 = vld [vmem:[%s17904_s9 + $0x9] ss:$0 sm:$0xff] }
0x2200   : > { %v17615_v6 = vsub.f32 %v12354_v52, %v12378_v30  ;;  %v12373_v10 = vpop.xlane.xlu1 %12372  ;;  %v12398_v15 = vsel %vm6381_vm9, %v12388_v59, 0.0 }
0x2201   : > { %v12379_v17 = vmul.f32 0.03125, %v12373_v10  ;;  %12399 = vadd.xlane.f32.xlu0 %v12398_v15  ;;  %v12389_v27 = vmul.f32 %v17613_v44, %v17613_v44  ;;  %v13681_v15 = vld [vmem:[%s17907_s12 + $0x60] sm:$0xff] }
0x2202   : > { %v12390_v19 = vmul.f32 %v17615_v6, %v17615_v6  ;;  %15213 = vmatpush3.msra.mxu0 %v13681_v15 }
0x2203   : > { %v17622_v36 = vsub.f32 %v12355_v23, %v12379_v17  ;;  %v12401_v28 = vsel %vm6381_vm9, %v12389_v27, 0.0  ;;  %15214 = vmatprep.subr.mxu0 %v15524_v2  ;;  %v13680_v17 = vld [vmem:[%s17907_s12 + $0x58] sm:$0xff]  ;;  %v13679_v27 = vld [vmem:[%s17907_s12 + $0x50] sm:$0xff] }
0x2204   : > { %12402 = vadd.xlane.f32.xlu1 %v12401_v28  ;;  %v12404_v60 = vsel %vm6381_vm9, %v12390_v19, 0.0  ;;  %15215 = vmatpush3.msra.mxu0 %v13680_v17  ;;  %v13678_v19 = vld [vmem:[%s17907_s12 + $0x48] sm:$0xff]  ;;  %v13673_v28 = vld [vmem:[%s17906_s11 + $0x1] ss:$0 sm:$0xff] }
0x2205   : > { %12405 = vadd.xlane.f32.xlu0 %v12404_v60  ;;  %v12391_v48 = vmul.f32 %v17622_v36, %v17622_v36  ;;  %15216 = vmatprep.subr.mxu0 %v15524_v2  ;;  %v12475_v60 = vcombine.low %v13673_v28, %v13673_v28 }
0x2206   : > { %15217 = vmatpush3.msra.mxu0 %v13679_v27 }
0x2207   : > { %v12407_v58 = vsel %vm6381_vm9, %v12391_v48, 0.0  ;;  %15218 = vmatprep.subr.mxu0 %v15524_v2 }
0x2208   : > { %12408 = vadd.xlane.f32.xlu1 %v12407_v58  ;;  %15219 = vmatpush3.msra.mxu0 %v13678_v19 }
0x2209   : > { %15220 = vmatprep.subr.mxu0 %v15524_v2 }
0x2286   : > { %v12394_v56 = vpop.xlane.xlu0 %12393 }
0x2287   : > { %v12410_v3 = vmul.f32 0.03125, %v12394_v56 }
0x2288   : > { %v12397_v22 = vpop.xlane.xlu1 %12396 }
0x2289   : > { %v12416_v25 = vadd.f32 1e-05, %v12410_v3  ;;  %v12411_v62 = vmul.f32 0.03125, %v12397_v22 }
0x228a   : > { %v12400_v16 = vpop.xlane.xlu0 %12399 }
0x228b   : > { %15480 = vrsqrt.f32 %v12416_v25  ;;  %v12417_v33 = vadd.f32 1e-05, %v12411_v62  ;;  %v12412_v1 = vmul.f32 0.03125, %v12400_v16 }
0x228d   : > { %15482 = vrsqrt.f32 %v12417_v33  ;;  %v12418_v4 = vadd.f32 1e-05, %v12412_v1  ;;  %v12403_v12 = vpop.xlane.xlu1 %12402 }
0x228e   : > { %v12413_v38 = vmul.f32 0.03125, %v12403_v12  ;;  %v12406_v5 = vpop.xlane.xlu0 %12405 }
0x228f   : > { %15484 = vrsqrt.f32 %v12418_v4  ;;  %v12414_v41 = vmul.f32 0.03125, %v12406_v5 }
0x2290   : > { %v12419_v57 = vadd.f32 1e-05, %v12413_v38 }
0x2291   : > { %v12420_v51 = vadd.f32 1e-05, %v12414_v41  ;;  %v12409_v43 = vpop.xlane.xlu1 %12408  ;;  %v13685_v41 = vld [vmem:[%s17904_s9 + $0xd] ss:$0 sm:$0xff] }
0x2292   : > { %15486 = vrsqrt.f32 %v12419_v57  ;;  %v12415_v45 = vmul.f32 0.03125, %v12409_v43  ;;  %v12601_v57 = vcombine.low %v13685_v41, %v13685_v41 }
0x2293   : > { %15488 = vrsqrt.f32 %v12420_v51 }
0x2294   : > { %v12421_v63 = vadd.f32 1e-05, %v12415_v45 }
0x2296   : > { %15490 = vrsqrt.f32 %v12421_v63 }
0x2298   : > { %v15481_v47 = vpop.eup %15480 }
0x2299   : > { %v12428_v52 = vmul.f32 %v15481_v47, %v17599_v50 }
0x229a   : > { %v15483_v53 = vpop.eup %15482 }
0x229b   : > { %v12438_v34 = vmul.f32 %v13666_v14, %v12428_v52  ;;  %v12429_v39 = vmul.f32 %v15483_v53, %v17601_v35 }
0x229c   : > { %v15485_v23 = vpop.eup %15484 }
0x229d   : > { %v12439_v0 = vmul.f32 %v13666_v14, %v12429_v39  ;;  %v12430_v54 = vmul.f32 %v15485_v23, %v17605_v9  ;;  %v17666_v26 = vadd.f32 %v13667_v24, %v12438_v34 }
0x229f   : > { %v15487_v18 = vpop.eup %15486  ;;  %v17668_v55 = vadd.f32 %v13667_v24, %v12439_v0  ;;  %v12440_v42 = vmul.f32 %v13666_v14, %v12430_v54 }
0x22a0   : > { %v15489_v46 = vpop.eup %15488  ;;  %v12431_v50 = vmul.f32 %v15487_v18, %v17613_v44 }
0x22a1   : > { %v12432_v32 = vmul.f32 %v15489_v46, %v17615_v6  ;;  %v12472_v35 = vcombine.low %v17666_v26, %v17668_v55  ;;  %v17678_v40 = vadd.f32 %v13667_v24, %v12440_v42 }
0x22a2   : > { %v12441_v11 = vmul.f32 %v13666_v14, %v12431_v50 }
0x22a3   : > { %v15491_v7 = vpop.eup %15490  ;;  %15198 = vmatmul.mubr.msk.f32.vlgmr.msra.gmra.mxu1 %vm869_vm4, %v12472_v35  ;;  %v12442_v30 = vmul.f32 %v13666_v14, %v12432_v32 }
0x22a4   : > { %v12433_v9 = vmul.f32 %v15491_v7, %v17622_v36  ;;  %15200 = vmatprep.mubr.msk.f32.mxu1 %vm15525_vm1, %v15524_v2  ;;  %v17680_v29 = vadd.f32 %v13667_v24, %v12441_v11  ;;  %v13677_v36 = vld [vmem:[%s17907_s12 + $0x40] sm:$0xff] }
0x22a5   : > { %v17685_v44 = vadd.f32 %v13667_v24, %v12442_v30  ;;  %15221 = vmatpush3.msra.mxu0 %v13677_v36 }
0x22a6   : > { %v12473_v20 = vcombine.low %v17678_v40, %v17680_v29  ;;  %v12443_v59 = vmul.f32 %v13666_v14, %v12433_v9 }
0x22a8   : > { %15201 = vmatmul.mubr.msk.f32.gmra.mxu1 %vm869_vm4, %v12473_v20  ;;  %v17687_v6 = vadd.f32 %v13667_v24, %v12443_v59 }
0x22a9   : > { %15203 = vmatprep.mubr.msk.f32.mxu1 %vm15525_vm1, %v15524_v2 }
0x22aa   : > { %v12474_v10 = vcombine.low %v17685_v44, %v17687_v6 }
0x22ac   : > { %15204 = vmatmul.mubr.msk.f32.gmra.mxu1 %vm869_vm4, %v12474_v10 }
0x22ad   : > { %15239 = vmatprep.mubr.msk.f32.mxu1 %vm15525_vm1, %v15524_v2 }
0x2363   : > { %v12549_v48 = vpop.f32.mrf.mxu1 }
0x2364   : > { %v12550_v58 = vadd.f32 %v12549_v48, %v12475_v60 }
0x2365   : > { %v15199_v31 = vpop.f32.mrf.mxu1 }
0x2366   : > { %v12566_v61 = vcombine.high %v12550_v58, %v12550_v58  ;;  %v12572_v21 = vmax.f32 %v12550_v58, 0.0 }
0x2368   : > { %v12573_v49 = vmax.f32 %v12566_v61, 0.0  ;;  %v12554_v13 = vpop.f32.mrf.mxu1 }
0x2369   : > { %v12555_v8 = vadd.f32 %v12554_v13, %v12475_v60 }
0x236a   : > { %v12597_v37 = vcombine.low %v12572_v21, %v12573_v49  ;;  %v15202_v56 = vpop.f32.mrf.mxu1 }
0x236b   : > { %v12567_v3 = vcombine.high %v12555_v8, %v12555_v8  ;;  %v12574_v25 = vmax.f32 %v12555_v8, 0.0 }
0x236c   : > { %v12559_v22 = vpop.f32.mrf.mxu1  ;;  %15223 = vmatmul.mubr.msk.f32.vlgmr.msra.gmra.mxu0 %vm6627_vm10, %v12597_v37 }
0x236d   : > { %v12575_v62 = vmax.f32 %v12567_v3, 0.0  ;;  %v12560_v16 = vadd.f32 %v12559_v22, %v12475_v60  ;;  %15225 = vmatprep.mubr.msk.f32.mxu0 %vm15525_vm1, %v15524_v2 }
0x236e   : > { %v15205_v33 = vpop.f32.mrf.mxu1 }
0x236f   : > { %v12598_v1 = vcombine.low %v12574_v25, %v12575_v62  ;;  %v12568_v4 = vcombine.high %v12560_v16, %v12560_v16  ;;  %v12576_v12 = vmax.f32 %v12560_v16, 0.0  ;;  %v12805_v16 = vld [vmem:[%s17908_s13 + $0x18] sm:$0xff]  ;;  %v12804_v33 = vld [vmem:[%s17908_s13 + $0x10] sm:$0xff] }
0x2370   : > { %15232 = vmatpush3.msra.mxu1 %v12805_v16 }
0x2371   : > { %v12577_v38 = vmax.f32 %v12568_v4, 0.0  ;;  %15226 = vmatmul.mubr.msk.f32.gmra.mxu0 %vm6627_vm10, %v12598_v1  ;;  %15233 = vmatprep.subr.mxu1 %v15524_v2  ;;  %v12803_v1 = vld [vmem:[%s17908_s13 + $0x8] sm:$0xff]  ;;  %v12802_v4 = vld [vmem:[%s17908_s13] sm:$0xff] }
0x2372   : > { %15228 = vmatprep.mubr.msk.f32.mxu0 %vm15525_vm1, %v15524_v2  ;;  %15234 = vmatpush3.msra.mxu1 %v12804_v33 }
0x2373   : > { %v12599_v5 = vcombine.low %v12576_v12, %v12577_v38  ;;  %15235 = vmatprep.subr.mxu1 %v15524_v2 }
0x2374   : > { %15236 = vmatpush3.msra.mxu1 %v12803_v1 }
0x2375   : > { %15229 = vmatmul.mubr.msk.f32.gmra.mxu0 %vm6627_vm10, %v12599_v5  ;;  %15237 = vmatprep.subr.mxu1 %v15524_v2 }
0x2376   : > { %15238 = vmatpush3.msra.mxu1 %v12802_v4 }
0x242c   : > { %v12675_v51 = vpop.f32.mrf.mxu0 }
0x242d   : > { %v12676_v43 = vadd.f32 %v12675_v51, %v12601_v57 }
0x242e   : > { %v15224_v45 = vpop.f32.mrf.mxu0 }
0x242f   : > { %v12692_v63 = vcombine.high %v12676_v43, %v12676_v43  ;;  %v12698_v47 = vadd.f32 %v12676_v43, %v17666_v26 }
0x2431   : > { %v12680_v14 = vpop.f32.mrf.mxu0  ;;  %v12704_v52 = vsel %vm6381_vm9, %v12698_v47, 0.0  ;;  %v12699_v53 = vadd.f32 %v12692_v63, %v17668_v55 }
0x2432   : > { %v12681_v34 = vadd.f32 %v12680_v14, %v12601_v57  ;;  %12705 = vadd.xlane.f32.xlu0 %v12704_v52 }
0x2433   : > { %v15227_v39 = vpop.f32.mrf.mxu0  ;;  %v12707_v23 = vsel %vm6381_vm9, %v12699_v53, 0.0 }
0x2434   : > { %v12693_v24 = vcombine.high %v12681_v34, %v12681_v34  ;;  %v12700_v0 = vadd.f32 %v12681_v34, %v17678_v40  ;;  %12708 = vadd.xlane.f32.xlu1 %v12707_v23 }
0x2435   : > { %v12685_v54 = vpop.f32.mrf.mxu0 }
0x2436   : > { %v12686_v18 = vadd.f32 %v12685_v54, %v12601_v57  ;;  %v12710_v46 = vsel %vm6381_vm9, %v12700_v0, 0.0  ;;  %v12701_v26 = vadd.f32 %v12693_v24, %v17680_v29 }
0x2437   : > { %12711 = vadd.xlane.f32.xlu0 %v12710_v46  ;;  %v15230_v50 = vpop.f32.mrf.mxu0 }
0x2438   : > { %v12694_v42 = vcombine.high %v12686_v18, %v12686_v18  ;;  %v12702_v55 = vadd.f32 %v12686_v18, %v17685_v44  ;;  %v12713_v32 = vsel %vm6381_vm9, %v12701_v26, 0.0  ;;  %v13689_v18 = vld [vmem:[%s17904_s9 + $0xb] ss:$0 sm:$0xff] }
0x2439   : > { %12714 = vadd.xlane.f32.xlu1 %v12713_v32 }
0x243a   : > { %v12716_v35 = vsel %vm6381_vm9, %v12702_v55, 0.0  ;;  %v12703_v11 = vadd.f32 %v12694_v42, %v17687_v6 }
0x243b   : > { %12717 = vadd.xlane.f32.xlu0 %v12716_v35 }
0x243c   : > { %v12719_v7 = vsel %vm6381_vm9, %v12703_v11, 0.0 }
0x243d   : > { %12720 = vadd.xlane.f32.xlu1 %v12719_v7 }
0x24bb   : > { %v12706_v9 = vpop.xlane.xlu0 %12705 }
0x24bc   : > { %v12722_v40 = vmul.f32 0.03125, %v12706_v9 }
0x24bd   : > { %v12709_v30 = vpop.xlane.xlu1 %12708 }
0x24be   : > { %v17740_v29 = vsub.f32 %v12698_v47, %v12722_v40  ;;  %v12723_v20 = vmul.f32 0.03125, %v12709_v30 }
0x24c0   : > { %v17742_v59 = vsub.f32 %v12699_v53, %v12723_v20  ;;  %v12712_v44 = vpop.xlane.xlu0 %12711  ;;  %v12734_v10 = vmul.f32 %v17740_v29, %v17740_v29 }
0x24c1   : > { %v12724_v15 = vmul.f32 0.03125, %v12712_v44 }
0x24c2   : > { %v12715_v17 = vpop.xlane.xlu1 %12714  ;;  %v12740_v6 = vsel %vm6381_vm9, %v12734_v10, 0.0  ;;  %v12735_v27 = vmul.f32 %v17742_v59, %v17742_v59 }
0x24c3   : > { %v17749_v19 = vsub.f32 %v12700_v0, %v12724_v15  ;;  %v12725_v36 = vmul.f32 0.03125, %v12715_v17  ;;  %12741 = vadd.xlane.f32.xlu0 %v12740_v6 }
0x24c4   : > { %v12718_v28 = vpop.xlane.xlu0 %12717  ;;  %v12743_v60 = vsel %vm6381_vm9, %v12735_v27, 0.0 }
0x24c5   : > { %v17752_v48 = vsub.f32 %v12701_v26, %v12725_v36  ;;  %v12726_v58 = vmul.f32 0.03125, %v12718_v28  ;;  %12744 = vadd.xlane.f32.xlu1 %v12743_v60  ;;  %v12736_v31 = vmul.f32 %v17749_v19, %v17749_v19 }
0x24c6   : > { %v12721_v61 = vpop.xlane.xlu1 %12720 }
0x24c7   : > { %v17756_v21 = vsub.f32 %v12702_v55, %v12726_v58  ;;  %v12727_v49 = vmul.f32 0.03125, %v12721_v61  ;;  %v12746_v13 = vsel %vm6381_vm9, %v12736_v31, 0.0  ;;  %v12737_v8 = vmul.f32 %v17752_v48, %v17752_v48  ;;  %v13690_v55 = vld [vmem:[%s17904_s9 + $0xc] ss:$0 sm:$0xff]  ;;  %v13691_v31 = vld [vmem:[%s17909_s14] ss:$0 sm:$0xff] }
0x24c8   : > { %12747 = vadd.xlane.f32.xlu0 %v12746_v13  ;;  %v12821_v61 = vcombine.low %v13691_v31, %v13691_v31 }
0x24c9   : > { %v17761_v37 = vsub.f32 %v12703_v11, %v12727_v49  ;;  %v12749_v56 = vsel %vm6381_vm9, %v12737_v8, 0.0  ;;  %v12738_v3 = vmul.f32 %v17756_v21, %v17756_v21  ;;  %v12926_v8 = vld [vmem:[%s17811_s1 + $0x4] sm:$0xf] }
0x24ca   : > { %12750 = vadd.xlane.f32.xlu1 %v12749_v56 }
0x24cb   : > { %v12752_v22 = vsel %vm6381_vm9, %v12738_v3, 0.0  ;;  %v12739_v25 = vmul.f32 %v17761_v37, %v17761_v37 }
0x24cc   : > { %12753 = vadd.xlane.f32.xlu0 %v12752_v22  ;;  %v12927_v22 = vld [vmem:[%s17811_s1 + $0x8] sm:$0xf] }
0x24cd   : > { %v12755_v62 = vsel %vm6381_vm9, %v12739_v25, 0.0  ;;  %vm12978_vm9 = vcmask 0  }
0x24ce   : > { %12756 = vadd.xlane.f32.xlu1 %v12755_v62 }
0x254c   : > { %v12742_v12 = vpop.xlane.xlu0 %12741 }
0x254d   : > { %v12758_v38 = vmul.f32 0.03125, %v12742_v12  ;;  %v12928_v12 = vld [vmem:[%s17811_s1 + $0xc] sm:$0xf] }
0x254e   : > { %v12745_v5 = vpop.xlane.xlu1 %12744 }
0x254f   : > { %v12764_v41 = vadd.f32 1e-05, %v12758_v38  ;;  %v12759_v57 = vmul.f32 0.03125, %v12745_v5 }
0x2551   : > { %15492 = vrsqrt.f32 %v12764_v41  ;;  %v12765_v51 = vadd.f32 1e-05, %v12759_v57  ;;  %v12748_v43 = vpop.xlane.xlu0 %12747  ;;  %v12929_v57 = vld [vmem:[%s17811_s1 + $0x10] sm:$0xf] }
0x2552   : > { %v12760_v45 = vmul.f32 0.03125, %v12748_v43 }
0x2553   : > { %15494 = vrsqrt.f32 %v12765_v51  ;;  %v12751_v63 = vpop.xlane.xlu1 %12750 }
0x2554   : > { %v12766_v47 = vadd.f32 1e-05, %v12760_v45  ;;  %v12761_v14 = vmul.f32 0.03125, %v12751_v63 }
0x2555   : > { %v12754_v52 = vpop.xlane.xlu0 %12753 }
0x2556   : > { %15496 = vrsqrt.f32 %v12766_v47  ;;  %v12767_v53 = vadd.f32 1e-05, %v12761_v14  ;;  %v12762_v34 = vmul.f32 0.03125, %v12754_v52  ;;  %v12930_v14 = vld [vmem:[%s17811_s1 + $0x14] sm:$0xf] }
0x2557   : > { %v12757_v39 = vpop.xlane.xlu1 %12756 }
0x2558   : > { %15498 = vrsqrt.f32 %v12767_v53  ;;  %v12768_v23 = vadd.f32 1e-05, %v12762_v34  ;;  %v12763_v24 = vmul.f32 0.03125, %v12757_v39 }
0x255a   : > { %15500 = vrsqrt.f32 %v12768_v23  ;;  %v12769_v0 = vadd.f32 1e-05, %v12763_v24 }
0x255c   : > { %15502 = vrsqrt.f32 %v12769_v0 }
0x255e   : > { %v15493_v54 = vpop.eup %15492 }
0x255f   : > { %v12776_v46 = vmul.f32 %v15493_v54, %v17740_v29 }
0x2560   : > { %v15495_v26 = vpop.eup %15494 }
0x2561   : > { %v12786_v50 = vmul.f32 %v13689_v18, %v12776_v46  ;;  %v12777_v42 = vmul.f32 %v15495_v26, %v17742_v59 }
0x2563   : > { %v15497_v32 = vpop.eup %15496  ;;  %v12787_v35 = vmul.f32 %v13689_v18, %v12777_v42  ;;  %v12796_v9 = vadd.f32 %v13690_v55, %v12786_v50 }
0x2564   : > { %v12778_v11 = vmul.f32 %v15497_v32, %v17749_v19 }
0x2565   : > { %v15499_v7 = vpop.eup %15498  ;;  %v12797_v40 = vadd.f32 %v13690_v55, %v12787_v35 }
0x2566   : > { %v12779_v30 = vmul.f32 %v15499_v7, %v17752_v48  ;;  %v12788_v20 = vmul.f32 %v13689_v18, %v12778_v11 }
0x2567   : > { %v15501_v44 = vpop.eup %15500  ;;  %v12818_v29 = vcombine.low %v12796_v9, %v12797_v40 }
0x2568   : > { %v12780_v10 = vmul.f32 %v15501_v44, %v17756_v21  ;;  %v12789_v15 = vmul.f32 %v13689_v18, %v12779_v30  ;;  %v12798_v6 = vadd.f32 %v13690_v55, %v12788_v20  ;;  %v12925_v21 = vld [vmem:[%s17811_s1] sm:$0xf] }
0x2569   : > { %v15503_v59 = vpop.eup %15502  ;;  %15240 = vmatmul.mubr.msk.f32.vlgmr.msra.gmra.mxu1 %vm869_vm4, %v12818_v29 }
0x256a   : > { %v12781_v17 = vmul.f32 %v15503_v59, %v17761_v37  ;;  %15242 = vmatprep.mubr.msk.f32.mxu1 %vm15525_vm1, %v15524_v2  ;;  %v12799_v27 = vadd.f32 %v13690_v55, %v12789_v15  ;;  %v12790_v19 = vmul.f32 %v13689_v18, %v12780_v10 }
0x256c   : > { %v12819_v36 = vcombine.low %v12798_v6, %v12799_v27  ;;  %v12791_v28 = vmul.f32 %v13689_v18, %v12781_v17  ;;  %v12800_v60 = vadd.f32 %v13690_v55, %v12790_v19 }
0x256e   : > { %15243 = vmatmul.mubr.msk.f32.gmra.mxu1 %vm869_vm4, %v12819_v36  ;;  %v12801_v48 = vadd.f32 %v13690_v55, %v12791_v28 }
0x256f   : > { %15245 = vmatprep.mubr.msk.f32.mxu1 %vm15525_vm1, %v15524_v2 }
0x2570   : > { %v12820_v58 = vcombine.low %v12800_v60, %v12801_v48 }
0x2572   : > { %15246 = vmatmul.mubr.msk.f32.gmra.mxu1 %vm869_vm4, %v12820_v58 }
0x2629   : > { %v12895_v2 = vpop.f32.mrf.mxu1 }
0x262a   : > { %v12896_v49 = vadd.f32 %v12895_v2, %v12821_v61 }
0x262b   : > { %v15241_v13 = vpop.f32.mrf.mxu1 }
0x262c   : > { %v12912_v37 = vcombine.high %v12896_v49, %v12896_v49  ;;  %12919 = vst.msk [vmem:[%s17817_s21] sm:$0xf] %vm12918_vm11, %v12896_v49  ;;  %v12931_v56 = vsub.f32 %v12896_v49, %v12925_v21 }
0x262e   : > { %12920 = vst.msk [vmem:[%s17817_s21 + $0x4] sm:$0xf] %vm12918_vm11, %v12912_v37  ;;  %v12900_v3 = vpop.f32.mrf.mxu1  ;;  %v12980_v25 = vmul.f32 %v12931_v56, %v12931_v56  ;;  %v12932_v62 = vsub.f32 %v12912_v37, %v12926_v8  ;;  %v12937_v46 = vand.u32 2147483647, %v12931_v56 }
0x262f   : > { %v12901_v16 = vadd.f32 %v12900_v3, %v12821_v61 }
0x2630   : > { %v15244_v33 = vpop.f32.mrf.mxu1  ;;  %v12986_v1 = vsel %vm12918_vm11, %v12980_v25, 0.0  ;;  %v12981_v4 = vmul.f32 %v12932_v62, %v12932_v62  ;;  %v12938_v50 = vand.u32 2147483647, %v12932_v62  ;;  %v12943_v42 = vsel %vm12918_vm11, %v12937_v46, 0.0 }
0x2631   : > { %v12913_v38 = vcombine.high %v12901_v16, %v12901_v16  ;;  %12921 = vst.msk [vmem:[%s17817_s21 + $0x8] sm:$0xf] %vm12918_vm11, %v12901_v16  ;;  %v12933_v5 = vsub.f32 %v12901_v16, %v12927_v22  ;;  %12987 = vadd.xlane.f32.xlu0 %v12986_v1 }
0x2632   : > { %v12905_v41 = vpop.f32.mrf.mxu1  ;;  %v12989_v51 = vsel %vm12918_vm11, %v12981_v4, 0.0  ;;  %v12946_v32 = vsel %vm12918_vm11, %v12938_v50, 0.0 }
0x2633   : > { %12922 = vst.msk [vmem:[%s17817_s21 + $0xc] sm:$0xf] %vm12918_vm11, %v12913_v38  ;;  %v12906_v43 = vadd.f32 %v12905_v41, %v12821_v61  ;;  %12990 = vadd.xlane.f32.xlu1 %v12989_v51  ;;  %v12982_v45 = vmul.f32 %v12933_v5, %v12933_v5  ;;  %v12934_v63 = vsub.f32 %v12913_v38, %v12928_v12  ;;  %v12939_v55 = vand.u32 2147483647, %v12933_v5 }
0x2634   : > { %v15247_v47 = vpop.f32.mrf.mxu1 }
0x2635   : > { %v12914_v52 = vcombine.high %v12906_v43, %v12906_v43  ;;  %12923 = vst.msk [vmem:[%s17817_s21 + $0x10] sm:$0xf] %vm12918_vm11, %v12906_v43  ;;  %v12935_v53 = vsub.f32 %v12906_v43, %v12929_v57  ;;  %v12992_v34 = vsel %vm12918_vm11, %v12982_v45, 0.0  ;;  %v12983_v39 = vmul.f32 %v12934_v63, %v12934_v63 }
0x2636   : > { %12993 = vadd.xlane.f32.xlu0 %v12992_v34  ;;  %v12940_v35 = vand.u32 2147483647, %v12934_v63  ;;  %v12949_v11 = vsel %vm12918_vm11, %v12939_v55, 0.0 }
0x2637   : > { %12924 = vst.msk [vmem:[%s17817_s21 + $0x14] sm:$0xf] %vm12918_vm11, %v12914_v52  ;;  %v12995_v23 = vsel %vm12918_vm11, %v12983_v39, 0.0  ;;  %v12984_v24 = vmul.f32 %v12935_v53, %v12935_v53  ;;  %v12936_v0 = vsub.f32 %v12914_v52, %v12930_v14  ;;  %v12941_v7 = vand.u32 2147483647, %v12935_v53 }
0x2638   : > { %12996 = vadd.xlane.f32.xlu1 %v12995_v23  ;;  %v12952_v9 = vsel %vm12918_vm11, %v12940_v35, 0.0 }
0x2639   : > { %v12998_v54 = vsel %vm12918_vm11, %v12984_v24, 0.0  ;;  %v12985_v18 = vmul.f32 %v12936_v0, %v12936_v0  ;;  %v12942_v40 = vand.u32 2147483647, %v12936_v0  ;;  %v12955_v30 = vsel %vm12918_vm11, %v12941_v7, 0.0 }
0x263a   : > { %12999 = vadd.xlane.f32.xlu0 %v12998_v54 }
0x263b   : > { %v13001_v26 = vsel %vm12918_vm11, %v12985_v18, 0.0  ;;  %v12958_v20 = vsel %vm12918_vm11, %v12942_v40, 0.0 }
0x263c   : > { %13002 = vadd.xlane.f32.xlu1 %v13001_v26 }
0x263e   : > { %12944 = vadd.xlane.f32.xlu0 %v12943_v42 }
0x2640   : > { %12947 = vadd.xlane.f32.xlu1 %v12946_v32 }
0x2642   : > { %12950 = vadd.xlane.f32.xlu0 %v12949_v11 }
0x2644   : > { %12953 = vadd.xlane.f32.xlu1 %v12952_v9 }
0x2646   : > { %12956 = vadd.xlane.f32.xlu0 %v12955_v30 }
0x2648   : > { %12959 = vadd.xlane.f32.xlu1 %v12958_v20 }
0x26ba   : > { %v12988_v44 = vpop.xlane.xlu0 %12987 }
0x26bb   : > { %15504 = vrsqrt.f32 %v12988_v44  ;;  %vm13006_vm12 = vcmp.eq.f32.partialorder %v12988_v44, inf  ;;  %vm13008_vm13 = vcmp.eq.f32.partialorder %v12988_v44, 0.0  ;;  %v13009_v36 = vand.u32 2147483648, %v12988_v44 }
0x26bc   : > { %v12991_v29 = vpop.xlane.xlu1 %12990 }
0x26bd   : > { %15506 = vrsqrt.f32 %v12991_v29  ;;  %vm13013_vm14 = vcmp.eq.f32.partialorder %v12991_v29, inf  ;;  %vm13015_vm15 = vcmp.eq.f32.partialorder %v12991_v29, 0.0  ;;  %v13016_v2 = vand.u32 2147483648, %v12991_v29 }
0x26bf   : > { %v12994_v10 = vpop.xlane.xlu0 %12993 }
0x26c0   : > { %15508 = vrsqrt.f32 %v12994_v10  ;;  %vm13020_vm0 = vcmp.eq.f32.partialorder %v12994_v10, inf  ;;  %vm13022_vm1 = vcmp.eq.f32.partialorder %v12994_v10, 0.0  ;;  %v13023_v3 = vand.u32 2147483648, %v12994_v10 }
0x26c1   : > { %v12997_v15 = vpop.xlane.xlu1 %12996 }
0x26c2   : > { %15510 = vrsqrt.f32 %v12997_v15  ;;  %vm13027_vm2 = vcmp.eq.f32.partialorder %v12997_v15, inf  ;;  %vm13029_vm3 = vcmp.eq.f32.partialorder %v12997_v15, 0.0  ;;  %v13030_v38 = vand.u32 2147483648, %v12997_v15 }
0x26c3   : > { %v17849_v59 = vpop.xlane.xlu0 %12999 }
0x26c4   : > { %15512 = vrsqrt.f32 %v17849_v59  ;;  %vm13034_vm4 = vcmp.eq.f32.partialorder %v17849_v59, inf  ;;  %vm13036_vm5 = vcmp.eq.f32.partialorder %v17849_v59, 0.0  ;;  %v13037_v18 = vand.u32 2147483648, %v17849_v59 }
0x26c5   : > { %v17852_v17 = vpop.xlane.xlu1 %13002 }
0x26c6   : > { %15514 = vrsqrt.f32 %v17852_v17  ;;  %vm13041_vm7 = vcmp.eq.f32.partialorder %v17852_v17, inf  ;;  %v13044_v35 = vand.u32 2147483648, %v17852_v17  ;;  %vm13043_vm8 = vcmp.eq.f32.partialorder %v17852_v17, 0.0 }
0x26c7   : > { %v12945_v6 = vpop.xlane.xlu0 %12944 }
0x26c8   : > { %v15505_v27 = vpop.eup %15504  ;;  %v12961_v48 = vsel %vm1693_vm6, %v12945_v6, 0.0 }
0x26c9   : > { %v13005_v19 = vmul.f32 %v15505_v27, %v12988_v44  ;;  %v12948_v28 = vpop.xlane.xlu1 %12947 }
0x26ca   : > { %v15507_v60 = vpop.eup %15506  ;;  %v12962_v58 = vsel %vm1693_vm6, %v12948_v28, 0.0 }
0x26cb   : > { %v13007_v31 = vsel %vm13006_vm12, %v12988_v44, %v13005_v19  ;;  %v13012_v61 = vmul.f32 %v15507_v60, %v12991_v29  ;;  %v12963_v21 = vadd.f32 %v12962_v58, %v12961_v48  ;;  %v12951_v49 = vpop.xlane.xlu0 %12950 }
0x26cc   : > { %v13010_v13 = vsel %vm13008_vm13, %v13009_v36, %v13007_v31  ;;  %v12964_v8 = vsel %vm1693_vm6, %v12951_v49, 0.0 }
0x26cd   : > { %v15509_v37 = vpop.eup %15508  ;;  %v13014_v56 = vsel %vm13013_vm14, %v12991_v29, %v13012_v61  ;;  %v12965_v22 = vadd.f32 %v12964_v8, %v12963_v21  ;;  %v12954_v25 = vpop.xlane.xlu1 %12953  ;;  %v13046_v4 = vsel %vm1693_vm6, %v13010_v13, 0.0 }
0x26ce   : > { %v13017_v62 = vsel %vm13015_vm15, %v13016_v2, %v13014_v56  ;;  %v13019_v16 = vmul.f32 %v15509_v37, %v12994_v10  ;;  %v12966_v33 = vsel %vm1693_vm6, %v12954_v25, 0.0 }
0x26cf   : > { %v15511_v1 = vpop.eup %15510  ;;  %v13047_v12 = vsel %vm1693_vm6, %v13017_v62, 0.0  ;;  %v12967_v5 = vadd.f32 %v12966_v33, %v12965_v22  ;;  %v12957_v41 = vpop.xlane.xlu0 %12956 }
0x26d0   : > { %v13048_v57 = vadd.f32 %v13047_v12, %v13046_v4  ;;  %v13021_v51 = vsel %vm13020_vm0, %v12994_v10, %v13019_v16  ;;  %v13026_v43 = vmul.f32 %v15511_v1, %v12997_v15  ;;  %v12968_v45 = vsel %vm1693_vm6, %v12957_v41, 0.0 }
0x26d1   : > { %v15513_v63 = vpop.eup %15512  ;;  %v13024_v47 = vsel %vm13022_vm1, %v13023_v3, %v13021_v51  ;;  %v12969_v14 = vadd.f32 %v12968_v45, %v12967_v5  ;;  %v12960_v52 = vpop.xlane.xlu1 %12959 }
0x26d2   : > { %v13049_v53 = vsel %vm1693_vm6, %v13024_v47, 0.0  ;;  %v13028_v34 = vsel %vm13027_vm2, %v12997_v15, %v13026_v43  ;;  %v13033_v39 = vmul.f32 %v15513_v63, %v17849_v59  ;;  %v12970_v23 = vsel %vm1693_vm6, %v12960_v52, 0.0 }
0x26d3   : > { %v15515_v24 = vpop.eup %15514  ;;  %v13050_v0 = vadd.f32 %v13049_v53, %v13048_v57  ;;  %v13031_v54 = vsel %vm13029_vm3, %v13030_v38, %v13028_v34  ;;  %v12971_v46 = vadd.f32 %v12970_v23, %v12969_v14 }
0x26d4   : > { %v13051_v26 = vsel %vm1693_vm6, %v13031_v54, 0.0  ;;  %v13035_v50 = vsel %vm13034_vm4, %v17849_v59, %v13033_v39  ;;  %v13040_v42 = vmul.f32 %v15515_v24, %v17852_v17 }
0x26d5   : > { %v13052_v55 = vadd.f32 %v13051_v26, %v13050_v0  ;;  %v13038_v32 = vsel %vm13036_vm5, %v13037_v18, %v13035_v50  ;;  %v12972_v11 = vrot.slane %v12971_v46, 4 }
0x26d6   : > { %v13053_v7 = vsel %vm1693_vm6, %v13038_v32, 0.0  ;;  %v13042_v9 = vsel %vm13041_vm7, %v17852_v17, %v13040_v42 }
0x26d7   : > { %v13054_v40 = vadd.f32 %v13053_v7, %v13052_v55  ;;  %v13045_v30 = vsel %vm13043_vm8, %v13044_v35, %v13042_v9  ;;  %v12973_v20 = vadd.f32 %v12972_v11, %v12971_v46 }
0x26d8   : > { %v13055_v44 = vsel %vm1693_vm6, %v13045_v30, 0.0 }
0x26d9   : > { %v13056_v29 = vadd.f32 %v13055_v44, %v13054_v40  ;;  %v12974_v10 = vrot.slane %v12973_v20, 2 }
0x26db   : > { %v13057_v15 = vrot.slane %v13056_v29, 4  ;;  %v12975_v59 = vadd.f32 %v12974_v10, %v12973_v20 }
0x26dd   : > { %v13058_v6 = vadd.f32 %v13057_v15, %v13056_v29  ;;  %v12976_v27 = vrot.slane %v12975_v59, 1 }
0x26df   : > { %v13059_v19 = vrot.slane %v13058_v6, 2  ;;  %v12977_v17 = vadd.f32 %v12976_v27, %v12975_v59 }
0x26e1   : > { %v13060_v36 = vadd.f32 %v13059_v19, %v13058_v6  ;;  %12979 = vst.msk [vmem:[%s609_s26] sm:$0x1] %vm12978_vm9, %v12977_v17 }
0x26e3   : > { %v13061_v28 = vrot.slane %v13060_v36, 1 }
0x26e5   : > { %v13062_v60 = vadd.f32 %v13061_v28, %v13060_v36 }
0x26e7   : > { %13063 = vst.msk [vmem:[%s612_s28] sm:$0x1] %vm12978_vm9, %v13062_v60 }
0x26e8 PF: > { %s28_s24 = sadd.s32 1, %s15522_s24  }
0x26e9   : > { %p25_p5 = scmp.ge.s32.totalorder %s28_s24, 4  }
0x26eb   :  { %27 = sbr.rel (!%p25_p5) target bundleno = 3 (0x3), region = 197 }

</bundles_post_ra>
